<compile_context>
chip_gen: v6e
topology: v6e:2x2x1
jax: 0.10.0
libtpu: 0.0.40
codegen_flags: <defaults>
</compile_context>

<pallas_src>
import jax
import jax.numpy as jnp
from jax.experimental import pallas as pl
from jax.experimental.pallas import tpu as pltpu

# ----------------------------------------------------------------------------
# Small synthetic configuration implied by LocalMemoryDecoder.forward
# ----------------------------------------------------------------------------
B   = 2    # batch_size
T   = 6    # max_target_length
HID = 32   # hidden_dim == embedding_dim (required by attend_vocab matmul)
EMB = HID
ND  = 3    # number of domains
V   = 64   # vocab size (lang.n_words)
LH  = 8    # rows of the attention table H
LS  = 10   # story length (story_size[1]) == external-knowledge memory slots
OC  = HID  # CNNClassifier output channels (== hidden_dim in the module init)
SOS = 2

F32  = jnp.float32
BF16 = jnp.bfloat16
K    = ND + 1          # global GRU + ND local GRUs
H3   = 3 * HID


# ----------------------------------------------------------------------------
# Fused decoder kernel: whole T-step recurrence + CNN domain classifier
# ----------------------------------------------------------------------------
def decoder_kernel(
        embed_q_ref, enc_ref,
        WpT_ref, bp_ref,
        WihT_ref, bih_ref, Whh_ref, bhh_ref,
        Wsc_ref, bsc_ref,
        Wm1aT_ref, Wm1bT_ref, bm1_ref, Wm2T_ref, bm2_ref,
        Wa1hT_ref, Wa1qT_ref, Wa2T_ref, Wa3_ref, ba3_ref,
        Wp2aT_ref, Wp2bT_ref, bp2_ref,
        CwT_ref, Htab_ref, extmem_ref, gptr_ref,
        Wc2T_ref, bc2_ref, Wc3T_ref, bc3_ref, WlinT_ref,
        vocab_ref, ptr_ref, scores_ref, label_ref):
    Tn, Bc, _ = embed_q_ref.shape
    Hd = HID

    def mxu(a, wt):  # a @ W.T with pre-transposed bf16 weight, f32 accumulate
        return jnp.dot(a.astype(BF16), wt, preferred_element_type=F32)

    # hoisted loads of everything reused every step
    WihT = WihT_ref[...]; bih = bih_ref[...]
    Whh  = Whh_ref[...];  bhh = bhh_ref[...]
    Wsc  = Wsc_ref[...];  bsc = bsc_ref[...]
    Wm1aT = Wm1aT_ref[...]; Wm1bT = Wm1bT_ref[...]; bm1 = bm1_ref[...]
    Wm2T  = Wm2T_ref[...];  bm2  = bm2_ref[...]
    Wa1hT = Wa1hT_ref[...]; Wa1qT = Wa1qT_ref[...]; Wa2T = Wa2T_ref[...]
    wa3   = Wa3_ref[...];   ba3  = ba3_ref[...]
    Wp2aT = Wp2aT_ref[...]; Wp2bT = Wp2bT_ref[...]; bp2 = bp2_ref[...]
    CwT   = CwT_ref[...]
    Htab  = Htab_ref[...]                    # (B, LH, H)
    extm  = extmem_ref[...]                  # (B, LS, H)
    gptr  = gptr_ref[...]                    # (B, LS)
    lh    = Htab.shape[1]

    # hidden = relu(projector(encode_hidden)); local hiddens are copies of it
    h0 = jax.nn.relu(mxu(enc_ref[...], WpT_ref[...]) + bp_ref[...])   # (B, H)
    h_all = jnp.broadcast_to(h0[None], (K, Bc, Hd))                   # (K, B, H)

    gh_steps = []
    # T is small and static -> fully unrolled; outputs stay in VMEM until the end.
    for t in range(Tn):
        x = embed_q_ref[t]                                            # (B, E)

        # ---- fused global + per-domain local GRU cells ---------------------
        gi  = mxu(x, WihT) + bih                                      # (B, K*3H)
        ghl = jnp.einsum('kbh,kgh->kbg', h_all.astype(BF16), Whh,
                         preferred_element_type=F32) + bhh            # (K, B, 3H)
        h_new = []
        for k in range(K):
            gik = gi[:, k * H3:(k + 1) * H3]
            ghk = ghl[k]
            r = jax.nn.sigmoid(gik[:, :Hd] + ghk[:, :Hd])
            z = jax.nn.sigmoid(gik[:, Hd:2 * Hd] + ghk[:, Hd:2 * Hd])
            n = jnp.tanh(gik[:, 2 * Hd:] + r * ghk[:, 2 * Hd:])
            h_new.append((1.0 - z) * n + z * h_all[k])
        h_all = jnp.stack(h_new, axis=0)                              # (K, B, H)
        hg = h_new[0]                                                 # global hidden
        hl = h_all[1:]                                                # (ND, B, H) locals
        gh_steps.append(hg)

        # ---- MLPSelfAttention over domains (mask is all-ones) --------------
        # scorer flattening in torch is h*ND + d (stack(dim=-1) makes d fastest),
        # Wsc was re-laid-out on the host as Wsc[d, o, h] == W_scorer[o, h*ND + d].
        s_d = jnp.einsum('dbh,doh->dbo', hl.astype(BF16), Wsc,
                         preferred_element_type=F32)                  # (ND, B, ND)
        scores_raw = jnp.sum(s_d, axis=0) + bsc                       # (B, ND)
        sc = jax.nn.softmax(scores_raw, axis=-1)
        h_local = sc[:, 0:1] * h_new[1]
        for d in range(1, ND):
            h_local = h_local + sc[:, d:d + 1] * h_new[1 + d]
        scores_ref[t] = scores_raw                                    # pre-softmax

        # ---- query_vector = MLP(cat(global, local))  (concat split) --------
        q1 = mxu(hg, Wm1aT) + mxu(h_local, Wm1bT) + bm1               # (B, 2H)
        q1 = jnp.where(q1 >= 0, q1, 0.1 * q1)                         # LeakyReLU(0.1)
        qv = mxu(q1, Wm2T) + bm2                                      # (B, H)

        # ---- get_p_vocab: attn_table over the LH table rows (batched) ------
        p_h = mxu(Htab.reshape(Bc * lh, Hd), Wa1hT)                   # (B*LH, H)
        p_q = mxu(qv, Wa1qT)                                          # (B, H)
        a1 = jnp.tanh(p_h.reshape(Bc, lh, Hd) + p_q[:, None, :])      # (B, LH, H)
        a2 = jnp.tanh(mxu(a1.reshape(Bc * lh, Hd), Wa2T))             # (B*LH, H)
        logits = jnp.sum(a2.reshape(Bc, lh, Hd) * wa3[None], axis=-1) + ba3
        cond = jax.nn.softmax(logits, axis=-1)                        # (B, LH)
        hidden_ = jnp.sum(cond[:, :, None] * Htab, axis=1)            # (B, H)
        context = jnp.tanh(mxu(qv, Wp2aT) + mxu(hidden_, Wp2bT) + bp2)
        vocab_ref[t] = mxu(context, CwT)                              # p_vocab (B, V)

        # TODO(synk): extKnow is an externally supplied module in the reference
        # forward; stand-in: single-hop memory attention gated by global_pointer.
        ptr_ref[t] = jnp.sum(extm * context[:, None, :], axis=-1) * gptr   # (B, LS)

    # ---- GradientReversal (identity fwd) + CNNClassifier, fused -------------
    # classifier input = cat(global_hiddens).transpose(0,1) -> (B, T, H); the
    # PyTorch Conv2d kernels (f, H) span the full width, so conv == im2col matmul.
    gh_bth = jnp.stack(gh_steps, axis=1)                              # (B, T, H)
    feats = []
    for WcT_ref, bc_ref, f in ((Wc2T_ref, bc2_ref, 2), (Wc3T_ref, bc3_ref, 3)):
        L = Tn - f + 1
        win = jnp.concatenate([gh_bth[:, i:i + L, :] for i in range(f)], axis=-1)
        conv = jax.nn.relu(mxu(win.reshape(Bc * L, f * Hd), WcT_ref[...])
                           + bc_ref[...])                             # (B*L, OC)
        feats.append(jnp.max(conv.reshape(Bc, L, -1), axis=1))        # max_pool1d over T
    feat = jnp.concatenate(feats, axis=-1)                            # (B, 2*OC)
    y = mxu(feat, WlinT_ref[...])                                     # Linear (no bias)
    y = jnp.where(y >= 0, y, 0.1 * y)                                 # LeakyReLU(0.1)
    label_ref[...] = jax.nn.sigmoid(y)                                # Sigmoid


def decoder_forward(kp, embed_q, encode_hidden, Htab, ext_mem, global_pointer):
    vmem = pl.BlockSpec(memory_space=pltpu.MemorySpace.VMEM)
    args = (embed_q, encode_hidden,
            kp["WpT"], kp["bp"],
            kp["WihT"], kp["bih"], kp["Whh"], kp["bhh"],
            kp["Wsc"], kp["bsc"],
            kp["Wm1aT"], kp["Wm1bT"], kp["bm1"], kp["Wm2T"], kp["bm2"],
            kp["Wa1hT"], kp["Wa1qT"], kp["Wa2T"], kp["Wa3"], kp["ba3"],
            kp["Wp2aT"], kp["Wp2bT"], kp["bp2"],
            kp["CwT"], Htab, ext_mem, global_pointer,
            kp["Wc2T"], kp["bc2"], kp["Wc3T"], kp["bc3"], kp["WlinT"])
    out_shape = (
        jax.ShapeDtypeStruct((T, B, V), F32),    # all_decoder_outputs_vocab
        jax.ShapeDtypeStruct((T, B, LS), F32),   # all_decoder_outputs_ptr
        jax.ShapeDtypeStruct((T, B, ND), F32),   # scores (pre-transpose)
        jax.ShapeDtypeStruct((B, ND), F32),      # label
    )
    return pl.pallas_call(
        decoder_kernel,
        out_shape=out_shape,
        in_specs=[vmem] * len(args),
        out_specs=(vmem, vmem, vmem, vmem),
    )(*args)


# ----------------------------------------------------------------------------
# Parameters (PyTorch-layout raw params) and kernel-layout preparation
# ----------------------------------------------------------------------------
def make_params(key):
    keys = iter(jax.random.split(key, 40))

    def nrm(shape):
        return jax.random.normal(next(keys), shape, F32) * 0.1

    p = {}
    p["C"] = nrm((V, EMB))                                  # shared_emb.weight
    p["domain_emb"] = nrm((ND, EMB))
    p["Wp"]  = nrm((HID, 2 * HID)); p["bp"]  = nrm((HID,))  # projector
    p["Wp2"] = nrm((HID, 2 * HID)); p["bp2"] = nrm((HID,))  # projector2
    # sketch_rnn_global (PyTorch GRU layout: rows = [r; z; n])
    p["Wih_g"] = nrm((3 * HID, EMB)); p["Whh_g"] = nrm((3 * HID, HID))
    p["bih_g"] = nrm((3 * HID,));     p["bhh_g"] = nrm((3 * HID,))
    # sketch_rnn_local_{0..ND-1}
    p["Wih_l"] = nrm((ND, 3 * HID, EMB)); p["Whh_l"] = nrm((ND, 3 * HID, HID))
    p["bih_l"] = nrm((ND, 3 * HID));      p["bhh_l"] = nrm((ND, 3 * HID))
    # mix_attention.scorer: Linear(ND*HID, ND)
    p["Wsc"] = nrm((ND, ND * HID)); p["bsc"] = nrm((ND,))
    # MLP: Linear(2H,2H) -> LeakyReLU(0.1) -> Linear(2H,H)
    p["Wm1"] = nrm((2 * HID, 2 * HID)); p["bm1"] = nrm((2 * HID,))
    p["Wm2"] = nrm((HID, 2 * HID));     p["bm2"] = nrm((HID,))
    # attn_table: Linear(2H,H,no bias), Tanh, Linear(H,H,no bias), Tanh, Linear(H,1)
    p["Wa1"] = nrm((HID, 2 * HID)); p["Wa2"] = nrm((HID, HID))
    p["Wa3"] = nrm((1, HID));       p["ba3"] = nrm((1,))
    # CNNClassifier: Conv2d(1, OC, (f, HID)) for f in (2, 3); Linear(2*OC, ND, no bias)
    p["Wc2"] = nrm((OC, 2, HID)); p["bc2"] = nrm((OC,))
    p["Wc3"] = nrm((OC, 3, HID)); p["bc3"] = nrm((OC,))
    p["Wlin"] = nrm((ND, 2 * OC))
    return p


def prepare_kernel_params(p):
    """Fuse / split / pre-transpose / bf16-cast weights into the kernel layout."""
    H = HID
    bf = lambda a: a.astype(BF16)
    row = lambda a: a.reshape(1, -1).astype(F32)     # bias as (1, X) f32

    # fused GRU stacks: [global, local_0, ..., local_{ND-1}]
    Wih_all = jnp.concatenate([p["Wih_g"]] + [p["Wih_l"][d] for d in range(ND)], 0)
    bih_all = jnp.concatenate([p["bih_g"]] + [p["bih_l"][d] for d in range(ND)], 0)
    Whh_all = jnp.stack([p["Whh_g"]] + [p["Whh_l"][d] for d in range(ND)], 0)
    bhh_all = jnp.stack([p["bhh_g"]] + [p["bhh_l"][d] for d in range(ND)], 0)

    # scorer column order is h*ND + d (torch.stack(..., dim=-1) makes d fastest)
    Wsc_r = jnp.transpose(p["Wsc"].reshape(ND, H, ND), (2, 0, 1))    # (d, o, h)

    return dict(
        WpT=bf(p["Wp"].T), bp=row(p["bp"]),
        WihT=bf(Wih_all.T), bih=row(bih_all),
        Whh=bf(Whh_all), bhh=bhh_all.reshape(K, 1, H3).astype(F32),
        Wsc=bf(Wsc_r), bsc=row(p["bsc"]),
        Wm1aT=bf(p["Wm1"][:, :H].T), Wm1bT=bf(p["Wm1"][:, H:].T), bm1=row(p["bm1"]),
        Wm2T=bf(p["Wm2"].T), bm2=row(p["bm2"]),
        Wa1hT=bf(p["Wa1"][:, :H].T), Wa1qT=bf(p["Wa1"][:, H:].T),
        Wa2T=bf(p["Wa2"].T), Wa3=p["Wa3"].astype(F32),
        ba3=p["ba3"].reshape(1, 1).astype(F32),
        Wp2aT=bf(p["Wp2"][:, :H].T), Wp2bT=bf(p["Wp2"][:, H:].T), bp2=row(p["bp2"]),
        CwT=bf(p["C"].T),
        Wc2T=bf(p["Wc2"].reshape(OC, -1).T), bc2=row(p["bc2"]),
        Wc3T=bf(p["Wc3"].reshape(OC, -1).T), bc3=row(p["bc3"]),
        WlinT=bf(p["Wlin"].T),
    )


# ----------------------------------------------------------------------------
# Full forward (teacher forcing, eval mode, get_decoded_words=False)
# ----------------------------------------------------------------------------
@jax.jit
def _forward_core(p, encode_hidden, Htab, ext_mem, global_pointer,
                  target_batches, domains):
    kp = prepare_kernel_params(p)
    # decoder input: t=0 -> domain_emb(domains) + C(SOS); t>0 -> C(target[:, t-1])
    dec0 = p["domain_emb"][domains] + p["C"][SOS]                       # (B, E)
    teach = p["C"][target_batches[:, :-1]]                              # (B, T-1, E)
    embed_q = jnp.concatenate([dec0[None], jnp.transpose(teach, (1, 0, 2))], axis=0)

    vocab, ptr, scores_tbd, label = decoder_forward(
        kp, embed_q, encode_hidden, Htab, ext_mem, global_pointer)
    scores = jnp.transpose(scores_tbd, (1, 0, 2))                       # (B, T, ND)
    return vocab, ptr, label, scores


def local_memory_decoder_forward(p, encode_hidden, Htab, ext_mem, global_pointer,
                                 target_batches, domains):
    vocab, ptr, label, scores = _forward_core(
        p, encode_hidden, Htab, ext_mem, global_pointer, target_batches, domains)
    decoded_fine, decoded_coarse = [], []   # get_decoded_words=False (string decode skipped)
    return vocab, ptr, decoded_fine, decoded_coarse, label, scores


if __name__ == "__main__":
    key = jax.random.PRNGKey(0)
    kp_, k1, k2, k3, k4, k5 = jax.random.split(key, 6)
    params = make_params(kp_)

    encode_hidden  = jax.random.normal(k1, (B, 2 * HID), F32)
    Htab           = jax.random.normal(k2, (B, LH, HID), F32)
    ext_mem        = jax.random.normal(k3, (B, LS, HID), F32)
    global_pointer = jax.nn.sigmoid(jax.random.normal(k4, (B, LS), F32))
    target_batches = jax.random.randint(k5, (B, T), 0, V)
    domains        = jnp.arange(B, dtype=jnp.int32) % ND

    vocab, ptr, dec_f, dec_c, label, scores = local_memory_decoder_forward(
        params, encode_hidden, Htab, ext_mem, global_pointer, target_batches, domains)
    jax.block_until_ready((vocab, ptr, label, scores))

    assert vocab.shape == (T, B, V)
    assert ptr.shape == (T, B, LS)
    assert label.shape == (B, ND)
    assert scores.shape == (B, T, ND)
    print("KERNEL_OK")
</pallas_src>

<mosaic_0001>
module attributes {stable_mosaic.version = 11 : i64} {
  func.func @decoder_kernel(%arg0: memref<6x2x32xf32, #tpu.memory_space<vmem>>, %arg1: memref<2x64xf32, #tpu.memory_space<vmem>>, %arg2: memref<64x32xbf16, #tpu.memory_space<vmem>>, %arg3: memref<1x32xf32, #tpu.memory_space<vmem>>, %arg4: memref<32x384xbf16, #tpu.memory_space<vmem>>, %arg5: memref<1x384xf32, #tpu.memory_space<vmem>>, %arg6: memref<4x96x32xbf16, #tpu.memory_space<vmem>>, %arg7: memref<4x1x96xf32, #tpu.memory_space<vmem>>, %arg8: memref<3x3x32xbf16, #tpu.memory_space<vmem>>, %arg9: memref<1x3xf32, #tpu.memory_space<vmem>>, %arg10: memref<32x64xbf16, #tpu.memory_space<vmem>>, %arg11: memref<32x64xbf16, #tpu.memory_space<vmem>>, %arg12: memref<1x64xf32, #tpu.memory_space<vmem>>, %arg13: memref<64x32xbf16, #tpu.memory_space<vmem>>, %arg14: memref<1x32xf32, #tpu.memory_space<vmem>>, %arg15: memref<32x32xbf16, #tpu.memory_space<vmem>>, %arg16: memref<32x32xbf16, #tpu.memory_space<vmem>>, %arg17: memref<32x32xbf16, #tpu.memory_space<vmem>>, %arg18: memref<1x32xf32, #tpu.memory_space<vmem>>, %arg19: memref<1x1xf32, #tpu.memory_space<vmem>>, %arg20: memref<32x32xbf16, #tpu.memory_space<vmem>>, %arg21: memref<32x32xbf16, #tpu.memory_space<vmem>>, %arg22: memref<1x32xf32, #tpu.memory_space<vmem>>, %arg23: memref<32x64xbf16, #tpu.memory_space<vmem>>, %arg24: memref<2x8x32xf32, #tpu.memory_space<vmem>>, %arg25: memref<2x10x32xf32, #tpu.memory_space<vmem>>, %arg26: memref<2x10xf32, #tpu.memory_space<vmem>>, %arg27: memref<64x32xbf16, #tpu.memory_space<vmem>>, %arg28: memref<1x32xf32, #tpu.memory_space<vmem>>, %arg29: memref<96x32xbf16, #tpu.memory_space<vmem>>, %arg30: memref<1x32xf32, #tpu.memory_space<vmem>>, %arg31: memref<64x3xbf16, #tpu.memory_space<vmem>>, %arg32: memref<6x2x64xf32, #tpu.memory_space<vmem>>, %arg33: memref<6x2x10xf32, #tpu.memory_space<vmem>>, %arg34: memref<6x2x3xf32, #tpu.memory_space<vmem>>, %arg35: memref<2x3xf32, #tpu.memory_space<vmem>>) attributes {dimension_semantics = [], scalar_prefetch = 0 : i64, scratch_operands = 0 : i64, tpu.core_type = #tpu.core_type<tc>} {
    %c0 = arith.constant 0 : index
    %c0_0 = arith.constant 0 : index
    %0 = vector.load %arg4[%c0, %c0_0] : memref<32x384xbf16, #tpu.memory_space<vmem>>, vector<32x384xbf16>
    %c0_1 = arith.constant 0 : index
    %c0_2 = arith.constant 0 : index
    %1 = vector.load %arg5[%c0_1, %c0_2] : memref<1x384xf32, #tpu.memory_space<vmem>>, vector<1x384xf32>
    %c0_3 = arith.constant 0 : index
    %c0_4 = arith.constant 0 : index
    %c0_5 = arith.constant 0 : index
    %2 = vector.load %arg6[%c0_3, %c0_4, %c0_5] : memref<4x96x32xbf16, #tpu.memory_space<vmem>>, vector<4x96x32xbf16>
    %c0_6 = arith.constant 0 : index
    %c0_7 = arith.constant 0 : index
    %c0_8 = arith.constant 0 : index
    %3 = vector.load %arg7[%c0_6, %c0_7, %c0_8] : memref<4x1x96xf32, #tpu.memory_space<vmem>>, vector<4x1x96xf32>
    %c0_9 = arith.constant 0 : index
    %c0_10 = arith.constant 0 : index
    %c0_11 = arith.constant 0 : index
    %4 = vector.load %arg8[%c0_9, %c0_10, %c0_11] : memref<3x3x32xbf16, #tpu.memory_space<vmem>>, vector<3x3x32xbf16>
    %c0_12 = arith.constant 0 : index
    %c0_13 = arith.constant 0 : index
    %5 = vector.load %arg9[%c0_12, %c0_13] : memref<1x3xf32, #tpu.memory_space<vmem>>, vector<1x3xf32>
    %c0_14 = arith.constant 0 : index
    %c0_15 = arith.constant 0 : index
    %6 = vector.load %arg10[%c0_14, %c0_15] : memref<32x64xbf16, #tpu.memory_space<vmem>>, vector<32x64xbf16>
    %c0_16 = arith.constant 0 : index
    %c0_17 = arith.constant 0 : index
    %7 = vector.load %arg11[%c0_16, %c0_17] : memref<32x64xbf16, #tpu.memory_space<vmem>>, vector<32x64xbf16>
    %c0_18 = arith.constant 0 : index
    %c0_19 = arith.constant 0 : index
    %8 = vector.load %arg12[%c0_18, %c0_19] : memref<1x64xf32, #tpu.memory_space<vmem>>, vector<1x64xf32>
    %c0_20 = arith.constant 0 : index
    %c0_21 = arith.constant 0 : index
    %9 = vector.load %arg13[%c0_20, %c0_21] : memref<64x32xbf16, #tpu.memory_space<vmem>>, vector<64x32xbf16>
    %c0_22 = arith.constant 0 : index
    %c0_23 = arith.constant 0 : index
    %10 = vector.load %arg14[%c0_22, %c0_23] : memref<1x32xf32, #tpu.memory_space<vmem>>, vector<1x32xf32>
    %c0_24 = arith.constant 0 : index
    %c0_25 = arith.constant 0 : index
    %11 = vector.load %arg15[%c0_24, %c0_25] : memref<32x32xbf16, #tpu.memory_space<vmem>>, vector<32x32xbf16>
    %c0_26 = arith.constant 0 : index
    %c0_27 = arith.constant 0 : index
    %12 = vector.load %arg16[%c0_26, %c0_27] : memref<32x32xbf16, #tpu.memory_space<vmem>>, vector<32x32xbf16>
    %c0_28 = arith.constant 0 : index
    %c0_29 = arith.constant 0 : index
    %13 = vector.load %arg17[%c0_28, %c0_29] : memref<32x32xbf16, #tpu.memory_space<vmem>>, vector<32x32xbf16>
    %c0_30 = arith.constant 0 : index
    %c0_31 = arith.constant 0 : index
    %14 = vector.load %arg18[%c0_30, %c0_31] : memref<1x32xf32, #tpu.memory_space<vmem>>, vector<1x32xf32>
    %c0_32 = arith.constant 0 : index
    %c0_33 = arith.constant 0 : index
    %15 = vector.load %arg19[%c0_32, %c0_33] : memref<1x1xf32, #tpu.memory_space<vmem>>, vector<1x1xf32>
    %c0_34 = arith.constant 0 : index
    %c0_35 = arith.constant 0 : index
    %16 = vector.load %arg20[%c0_34, %c0_35] : memref<32x32xbf16, #tpu.memory_space<vmem>>, vector<32x32xbf16>
    %c0_36 = arith.constant 0 : index
    %c0_37 = arith.constant 0 : index
    %17 = vector.load %arg21[%c0_36, %c0_37] : memref<32x32xbf16, #tpu.memory_space<vmem>>, vector<32x32xbf16>
    %c0_38 = arith.constant 0 : index
    %c0_39 = arith.constant 0 : index
    %18 = vector.load %arg22[%c0_38, %c0_39] : memref<1x32xf32, #tpu.memory_space<vmem>>, vector<1x32xf32>
    %c0_40 = arith.constant 0 : index
    %c0_41 = arith.constant 0 : index
    %19 = vector.load %arg23[%c0_40, %c0_41] : memref<32x64xbf16, #tpu.memory_space<vmem>>, vector<32x64xbf16>
    %c0_42 = arith.constant 0 : index
    %c0_43 = arith.constant 0 : index
    %c0_44 = arith.constant 0 : index
    %20 = vector.load %arg24[%c0_42, %c0_43, %c0_44] : memref<2x8x32xf32, #tpu.memory_space<vmem>>, vector<2x8x32xf32>
    %c0_45 = arith.constant 0 : index
    %c0_46 = arith.constant 0 : index
    %c0_47 = arith.constant 0 : index
    %21 = vector.load %arg25[%c0_45, %c0_46, %c0_47] : memref<2x10x32xf32, #tpu.memory_space<vmem>>, vector<2x10x32xf32>
    %c0_48 = arith.constant 0 : index
    %c0_49 = arith.constant 0 : index
    %22 = vector.load %arg26[%c0_48, %c0_49] : memref<2x10xf32, #tpu.memory_space<vmem>>, vector<2x10xf32>
    %c0_50 = arith.constant 0 : index
    %c0_51 = arith.constant 0 : index
    %23 = vector.load %arg1[%c0_50, %c0_51] : memref<2x64xf32, #tpu.memory_space<vmem>>, vector<2x64xf32>
    %c0_52 = arith.constant 0 : index
    %c0_53 = arith.constant 0 : index
    %24 = vector.load %arg2[%c0_52, %c0_53] : memref<64x32xbf16, #tpu.memory_space<vmem>>, vector<64x32xbf16>
    %25 = arith.truncf %23 : vector<2x64xf32> to vector<2x64xbf16>
    %cst = arith.constant dense<0.000000e+00> : vector<2x32xf32>
    %26 = tpu.matmul %25, %24, %cst {dimension_numbers = #tpu.dot_dimension_numbers<[1], [0], [0], [1], [0, 0, 1, 1], [], []>} : vector<2x64xbf16>, vector<64x32xbf16>, vector<2x32xf32> -> vector<2x32xf32>
    %c0_54 = arith.constant 0 : index
    %c0_55 = arith.constant 0 : index
    %27 = vector.load %arg3[%c0_54, %c0_55] : memref<1x32xf32, #tpu.memory_space<vmem>>, vector<1x32xf32>
    %28 = vector.broadcast %27 : vector<1x32xf32> to vector<2x32xf32>
    %29 = arith.addf %26, %28 : vector<2x32xf32>
    %cst_56 = arith.constant 0.000000e+00 : f32
    %30 = vector.broadcast %cst_56 : f32 to vector<2x32xf32>
    %31 = arith.maximumf %29, %30 : vector<2x32xf32>
    %32 = vector.shape_cast %31 : vector<2x32xf32> to vector<1x2x32xf32>
    %33 = vector.shape_cast %32 : vector<1x2x32xf32> to vector<1x2x32xf32>
    %34 = vector.broadcast %33 : vector<1x2x32xf32> to vector<4x2x32xf32>
    %c0_57 = arith.constant 0 : index
    %c0_58 = arith.constant 0 : index
    %c0_59 = arith.constant 0 : index
    %35 = vector.load %arg0[%c0_57, %c0_58, %c0_59] : memref<6x2x32xf32, #tpu.memory_space<vmem>>, vector<1x2x32xf32>
    %36 = vector.shape_cast %35 : vector<1x2x32xf32> to vector<2x32xf32>
    %37 = arith.truncf %36 : vector<2x32xf32> to vector<2x32xbf16>
    %cst_60 = arith.constant dense<0.000000e+00> : vector<2x384xf32>
    %38 = tpu.matmul %37, %0, %cst_60 {dimension_numbers = #tpu.dot_dimension_numbers<[1], [0], [0], [1], [0, 0, 1, 1], [], []>} : vector<2x32xbf16>, vector<32x384xbf16>, vector<2x384xf32> -> vector<2x384xf32>
    %39 = vector.broadcast %1 : vector<1x384xf32> to vector<2x384xf32>
    %40 = arith.addf %38, %39 : vector<2x384xf32>
    %41 = arith.truncf %34 : vector<4x2x32xf32> to vector<4x2x32xbf16>
    "tpu.trace_start"() <{level = 10 : i32, message = "kbh,kgh->kbg"}> : () -> ()
    %cst_61 = arith.constant dense<0.000000e+00> : vector<4x2x96xf32>
    %42 = tpu.matmul %41, %2, %cst_61 {dimension_numbers = #tpu.dot_dimension_numbers<[2], [2], [1], [1], [0, 0, 0, 1, 1, 1], [0], [0]>} : vector<4x2x32xbf16>, vector<4x96x32xbf16>, vector<4x2x96xf32> -> vector<4x2x96xf32>
    "tpu.trace_stop"() : () -> ()
    %43 = vector.broadcast %3 : vector<4x1x96xf32> to vector<4x2x96xf32>
    %44 = arith.addf %42, %43 : vector<4x2x96xf32>
    %45 = vector.extract_strided_slice %40 {offsets = [0, 0], sizes = [2, 96], strides = [1, 1]} : vector<2x384xf32> to vector<2x96xf32>
    %46 = vector.extract_strided_slice %44 {offsets = [0, 0, 0], sizes = [1, 2, 96], strides = [1, 1, 1]} : vector<4x2x96xf32> to vector<1x2x96xf32>
    %47 = vector.shape_cast %46 : vector<1x2x96xf32> to vector<2x96xf32>
    %48 = vector.extract_strided_slice %45 {offsets = [0, 0], sizes = [2, 32], strides = [1, 1]} : vector<2x96xf32> to vector<2x32xf32>
    %49 = vector.extract_strided_slice %47 {offsets = [0, 0], sizes = [2, 32], strides = [1, 1]} : vector<2x96xf32> to vector<2x32xf32>
    %50 = arith.addf %48, %49 : vector<2x32xf32>
    %51 = arith.negf %50 : vector<2x32xf32>
    %52 = math.exp %51 : vector<2x32xf32>
    %cst_62 = arith.constant 1.000000e+00 : f32
    %53 = vector.broadcast %cst_62 : f32 to vector<2x32xf32>
    %54 = arith.addf %53, %52 : vector<2x32xf32>
    %55 = arith.divf %53, %54 : vector<2x32xf32>
    %56 = vector.extract_strided_slice %45 {offsets = [0, 32], sizes = [2, 32], strides = [1, 1]} : vector<2x96xf32> to vector<2x32xf32>
    %57 = vector.extract_strided_slice %47 {offsets = [0, 32], sizes = [2, 32], strides = [1, 1]} : vector<2x96xf32> to vector<2x32xf32>
    %58 = arith.addf %56, %57 : vector<2x32xf32>
    %59 = arith.negf %58 : vector<2x32xf32>
    %60 = math.exp %59 : vector<2x32xf32>
    %cst_63 = arith.constant 1.000000e+00 : f32
    %61 = vector.broadcast %cst_63 : f32 to vector<2x32xf32>
    %62 = arith.addf %61, %60 : vector<2x32xf32>
    %63 = arith.divf %61, %62 : vector<2x32xf32>
    %64 = vector.extract_strided_slice %45 {offsets = [0, 64], sizes = [2, 32], strides = [1, 1]} : vector<2x96xf32> to vector<2x32xf32>
    %65 = vector.extract_strided_slice %47 {offsets = [0, 64], sizes = [2, 32], strides = [1, 1]} : vector<2x96xf32> to vector<2x32xf32>
    %66 = arith.mulf %55, %65 : vector<2x32xf32>
    %67 = arith.addf %64, %66 : vector<2x32xf32>
    %68 = math.tanh %67 : vector<2x32xf32>
    %cst_64 = arith.constant 1.000000e+00 : f32
    %69 = vector.broadcast %cst_64 : f32 to vector<2x32xf32>
    %70 = arith.subf %69, %63 : vector<2x32xf32>
    %71 = arith.mulf %70, %68 : vector<2x32xf32>
    %72 = vector.extract_strided_slice %34 {offsets = [0, 0, 0], sizes = [1, 2, 32], strides = [1, 1, 1]} : vector<4x2x32xf32> to vector<1x2x32xf32>
    %73 = vector.shape_cast %72 : vector<1x2x32xf32> to vector<2x32xf32>
    %74 = arith.mulf %63, %73 : vector<2x32xf32>
    %75 = arith.addf %71, %74 : vector<2x32xf32>
    %76 = vector.extract_strided_slice %40 {offsets = [0, 96], sizes = [2, 96], strides = [1, 1]} : vector<2x384xf32> to vector<2x96xf32>
    %77 = vector.extract_strided_slice %44 {offsets = [1, 0, 0], sizes = [1, 2, 96], strides = [1, 1, 1]} : vector<4x2x96xf32> to vector<1x2x96xf32>
    %78 = vector.shape_cast %77 : vector<1x2x96xf32> to vector<2x96xf32>
    %79 = vector.extract_strided_slice %76 {offsets = [0, 0], sizes = [2, 32], strides = [1, 1]} : vector<2x96xf32> to vector<2x32xf32>
    %80 = vector.extract_strided_slice %78 {offsets = [0, 0], sizes = [2, 32], strides = [1, 1]} : vector<2x96xf32> to vector<2x32xf32>
    %81 = arith.addf %79, %80 : vector<2x32xf32>
    %82 = arith.negf %81 : vector<2x32xf32>
    %83 = math.exp %82 : vector<2x32xf32>
    %cst_65 = arith.constant 1.000000e+00 : f32
    %84 = vector.broadcast %cst_65 : f32 to vector<2x32xf32>
    %85 = arith.addf %84, %83 : vector<2x32xf32>
    %86 = arith.divf %84, %85 : vector<2x32xf32>
    %87 = vector.extract_strided_slice %76 {offsets = [0, 32], sizes = [2, 32], strides = [1, 1]} : vector<2x96xf32> to vector<2x32xf32>
    %88 = vector.extract_strided_slice %78 {offsets = [0, 32], sizes = [2, 32], strides = [1, 1]} : vector<2x96xf32> to vector<2x32xf32>
    %89 = arith.addf %87, %88 : vector<2x32xf32>
    %90 = arith.negf %89 : vector<2x32xf32>
    %91 = math.exp %90 : vector<2x32xf32>
    %cst_66 = arith.constant 1.000000e+00 : f32
    %92 = vector.broadcast %cst_66 : f32 to vector<2x32xf32>
    %93 = arith.addf %92, %91 : vector<2x32xf32>
    %94 = arith.divf %92, %93 : vector<2x32xf32>
    %95 = vector.extract_strided_slice %76 {offsets = [0, 64], sizes = [2, 32], strides = [1, 1]} : vector<2x96xf32> to vector<2x32xf32>
    %96 = vector.extract_strided_slice %78 {offsets = [0, 64], sizes = [2, 32], strides = [1, 1]} : vector<2x96xf32> to vector<2x32xf32>
    %97 = arith.mulf %86, %96 : vector<2x32xf32>
    %98 = arith.addf %95, %97 : vector<2x32xf32>
    %99 = math.tanh %98 : vector<2x32xf32>
    %cst_67 = arith.constant 1.000000e+00 : f32
    %100 = vector.broadcast %cst_67 : f32 to vector<2x32xf32>
    %101 = arith.subf %100, %94 : vector<2x32xf32>
    %102 = arith.mulf %101, %99 : vector<2x32xf32>
    %103 = vector.extract_strided_slice %34 {offsets = [1, 0, 0], sizes = [1, 2, 32], strides = [1, 1, 1]} : vector<4x2x32xf32> to vector<1x2x32xf32>
    %104 = vector.shape_cast %103 : vector<1x2x32xf32> to vector<2x32xf32>
    %105 = arith.mulf %94, %104 : vector<2x32xf32>
    %106 = arith.addf %102, %105 : vector<2x32xf32>
    %107 = vector.extract_strided_slice %40 {offsets = [0, 192], sizes = [2, 96], strides = [1, 1]} : vector<2x384xf32> to vector<2x96xf32>
    %108 = vector.extract_strided_slice %44 {offsets = [2, 0, 0], sizes = [1, 2, 96], strides = [1, 1, 1]} : vector<4x2x96xf32> to vector<1x2x96xf32>
    %109 = vector.shape_cast %108 : vector<1x2x96xf32> to vector<2x96xf32>
    %110 = vector.extract_strided_slice %107 {offsets = [0, 0], sizes = [2, 32], strides = [1, 1]} : vector<2x96xf32> to vector<2x32xf32>
    %111 = vector.extract_strided_slice %109 {offsets = [0, 0], sizes = [2, 32], strides = [1, 1]} : vector<2x96xf32> to vector<2x32xf32>
    %112 = arith.addf %110, %111 : vector<2x32xf32>
    %113 = arith.negf %112 : vector<2x32xf32>
    %114 = math.exp %113 : vector<2x32xf32>
    %cst_68 = arith.constant 1.000000e+00 : f32
    %115 = vector.broadcast %cst_68 : f32 to vector<2x32xf32>
    %116 = arith.addf %115, %114 : vector<2x32xf32>
    %117 = arith.divf %115, %116 : vector<2x32xf32>
    %118 = vector.extract_strided_slice %107 {offsets = [0, 32], sizes = [2, 32], strides = [1, 1]} : vector<2x96xf32> to vector<2x32xf32>
    %119 = vector.extract_strided_slice %109 {offsets = [0, 32], sizes = [2, 32], strides = [1, 1]} : vector<2x96xf32> to vector<2x32xf32>
    %120 = arith.addf %118, %119 : vector<2x32xf32>
    %121 = arith.negf %120 : vector<2x32xf32>
    %122 = math.exp %121 : vector<2x32xf32>
    %cst_69 = arith.constant 1.000000e+00 : f32
    %123 = vector.broadcast %cst_69 : f32 to vector<2x32xf32>
    %124 = arith.addf %123, %122 : vector<2x32xf32>
    %125 = arith.divf %123, %124 : vector<2x32xf32>
    %126 = vector.extract_strided_slice %107 {offsets = [0, 64], sizes = [2, 32], strides = [1, 1]} : vector<2x96xf32> to vector<2x32xf32>
    %127 = vector.extract_strided_slice %109 {offsets = [0, 64], sizes = [2, 32], strides = [1, 1]} : vector<2x96xf32> to vector<2x32xf32>
    %128 = arith.mulf %117, %127 : vector<2x32xf32>
    %129 = arith.addf %126, %128 : vector<2x32xf32>
    %130 = math.tanh %129 : vector<2x32xf32>
    %cst_70 = arith.constant 1.000000e+00 : f32
    %131 = vector.broadcast %cst_70 : f32 to vector<2x32xf32>
    %132 = arith.subf %131, %125 : vector<2x32xf32>
    %133 = arith.mulf %132, %130 : vector<2x32xf32>
    %134 = vector.extract_strided_slice %34 {offsets = [2, 0, 0], sizes = [1, 2, 32], strides = [1, 1, 1]} : vector<4x2x32xf32> to vector<1x2x32xf32>
    %135 = vector.shape_cast %134 : vector<1x2x32xf32> to vector<2x32xf32>
    %136 = arith.mulf %125, %135 : vector<2x32xf32>
    %137 = arith.addf %133, %136 : vector<2x32xf32>
    %138 = vector.extract_strided_slice %40 {offsets = [0, 288], sizes = [2, 96], strides = [1, 1]} : vector<2x384xf32> to vector<2x96xf32>
    %139 = vector.extract_strided_slice %44 {offsets = [3, 0, 0], sizes = [1, 2, 96], strides = [1, 1, 1]} : vector<4x2x96xf32> to vector<1x2x96xf32>
    %140 = vector.shape_cast %139 : vector<1x2x96xf32> to vector<2x96xf32>
    %141 = vector.extract_strided_slice %138 {offsets = [0, 0], sizes = [2, 32], strides = [1, 1]} : vector<2x96xf32> to vector<2x32xf32>
    %142 = vector.extract_strided_slice %140 {offsets = [0, 0], sizes = [2, 32], strides = [1, 1]} : vector<2x96xf32> to vector<2x32xf32>
    %143 = arith.addf %141, %142 : vector<2x32xf32>
    %144 = arith.negf %143 : vector<2x32xf32>
    %145 = math.exp %144 : vector<2x32xf32>
    %cst_71 = arith.constant 1.000000e+00 : f32
    %146 = vector.broadcast %cst_71 : f32 to vector<2x32xf32>
    %147 = arith.addf %146, %145 : vector<2x32xf32>
    %148 = arith.divf %146, %147 : vector<2x32xf32>
    %149 = vector.extract_strided_slice %138 {offsets = [0, 32], sizes = [2, 32], strides = [1, 1]} : vector<2x96xf32> to vector<2x32xf32>
    %150 = vector.extract_strided_slice %140 {offsets = [0, 32], sizes = [2, 32], strides = [1, 1]} : vector<2x96xf32> to vector<2x32xf32>
    %151 = arith.addf %149, %150 : vector<2x32xf32>
    %152 = arith.negf %151 : vector<2x32xf32>
    %153 = math.exp %152 : vector<2x32xf32>
    %cst_72 = arith.constant 1.000000e+00 : f32
    %154 = vector.broadcast %cst_72 : f32 to vector<2x32xf32>
    %155 = arith.addf %154, %153 : vector<2x32xf32>
    %156 = arith.divf %154, %155 : vector<2x32xf32>
    %157 = vector.extract_strided_slice %138 {offsets = [0, 64], sizes = [2, 32], strides = [1, 1]} : vector<2x96xf32> to vector<2x32xf32>
    %158 = vector.extract_strided_slice %140 {offsets = [0, 64], sizes = [2, 32], strides = [1, 1]} : vector<2x96xf32> to vector<2x32xf32>
    %159 = arith.mulf %148, %158 : vector<2x32xf32>
    %160 = arith.addf %157, %159 : vector<2x32xf32>
    %161 = math.tanh %160 : vector<2x32xf32>
    %cst_73 = arith.constant 1.000000e+00 : f32
    %162 = vector.broadcast %cst_73 : f32 to vector<2x32xf32>
    %163 = arith.subf %162, %156 : vector<2x32xf32>
    %164 = arith.mulf %163, %161 : vector<2x32xf32>
    %165 = vector.extract_strided_slice %34 {offsets = [3, 0, 0], sizes = [1, 2, 32], strides = [1, 1, 1]} : vector<4x2x32xf32> to vector<1x2x32xf32>
    %166 = vector.shape_cast %165 : vector<1x2x32xf32> to vector<2x32xf32>
    %167 = arith.mulf %156, %166 : vector<2x32xf32>
    %168 = arith.addf %164, %167 : vector<2x32xf32>
    %169 = vector.shape_cast %75 : vector<2x32xf32> to vector<1x2x32xf32>
    %170 = vector.shape_cast %106 : vector<2x32xf32> to vector<1x2x32xf32>
    %171 = vector.shape_cast %137 : vector<2x32xf32> to vector<1x2x32xf32>
    %172 = vector.shape_cast %168 : vector<2x32xf32> to vector<1x2x32xf32>
    %173 = tpu.concatenate %169, %170, %171, %172 in 0 : vector<1x2x32xf32>, vector<1x2x32xf32>, vector<1x2x32xf32>, vector<1x2x32xf32> -> vector<4x2x32xf32>
    %174 = vector.extract_strided_slice %173 {offsets = [1, 0, 0], sizes = [3, 2, 32], strides = [1, 1, 1]} : vector<4x2x32xf32> to vector<3x2x32xf32>
    %175 = arith.truncf %174 : vector<3x2x32xf32> to vector<3x2x32xbf16>
    "tpu.trace_start"() <{level = 10 : i32, message = "dbh,doh->dbo"}> : () -> ()
    %cst_74 = arith.constant dense<0.000000e+00> : vector<3x2x3xf32>
    %176 = tpu.matmul %175, %4, %cst_74 {dimension_numbers = #tpu.dot_dimension_numbers<[2], [2], [1], [1], [0, 0, 0, 1, 1, 1], [0], [0]>} : vector<3x2x32xbf16>, vector<3x3x32xbf16>, vector<3x2x3xf32> -> vector<3x2x3xf32>
    "tpu.trace_stop"() : () -> ()
    %cst_75 = arith.constant dense<0.000000e+00> : vector<2x3xf32>
    %177 = vector.multi_reduction <add>, %176, %cst_75 [0] : vector<3x2x3xf32> to vector<2x3xf32>
    %178 = vector.broadcast %5 : vector<1x3xf32> to vector<2x3xf32>
    %179 = arith.addf %177, %178 : vector<2x3xf32>
    %cst_76 = arith.constant dense<0xFF800000> : vector<2xf32>
    %180 = vector.multi_reduction <maximumf>, %179, %cst_76 [1] : vector<2x3xf32> to vector<2xf32>
    %cst_77 = arith.constant 0xFF800000 : f32
    %181 = vector.broadcast %cst_77 : f32 to vector<2xf32>
    %182 = arith.maximumf %181, %180 : vector<2xf32>
    %183 = vector.shape_cast %182 : vector<2xf32> to vector<2x1xf32>
    %184 = vector.broadcast %183 : vector<2x1xf32> to vector<2x3xf32>
    %185 = arith.subf %179, %184 : vector<2x3xf32>
    %186 = math.exp %185 : vector<2x3xf32>
    %cst_78 = arith.constant dense<0.000000e+00> : vector<2xf32>
    %187 = vector.multi_reduction <add>, %186, %cst_78 [1] : vector<2x3xf32> to vector<2xf32>
    %188 = vector.shape_cast %187 : vector<2xf32> to vector<2x1xf32>
    %189 = vector.broadcast %188 : vector<2x1xf32> to vector<2x3xf32>
    %190 = arith.divf %186, %189 : vector<2x3xf32>
    %191 = vector.extract_strided_slice %190 {offsets = [0, 0], sizes = [2, 1], strides = [1, 1]} : vector<2x3xf32> to vector<2x1xf32>
    %192 = vector.broadcast %191 : vector<2x1xf32> to vector<2x32xf32>
    %193 = arith.mulf %192, %106 : vector<2x32xf32>
    %194 = vector.extract_strided_slice %190 {offsets = [0, 1], sizes = [2, 1], strides = [1, 1]} : vector<2x3xf32> to vector<2x1xf32>
    %195 = vector.broadcast %194 : vector<2x1xf32> to vector<2x32xf32>
    %196 = arith.mulf %195, %137 : vector<2x32xf32>
    %197 = arith.addf %193, %196 : vector<2x32xf32>
    %198 = vector.extract_strided_slice %190 {offsets = [0, 2], sizes = [2, 1], strides = [1, 1]} : vector<2x3xf32> to vector<2x1xf32>
    %199 = vector.broadcast %198 : vector<2x1xf32> to vector<2x32xf32>
    %200 = arith.mulf %199, %168 : vector<2x32xf32>
    %201 = arith.addf %197, %200 : vector<2x32xf32>
    %c0_79 = arith.constant 0 : index
    %c0_80 = arith.constant 0 : index
    %c0_81 = arith.constant 0 : index
    %202 = vector.load %arg34[%c0_79, %c0_80, %c0_81] : memref<6x2x3xf32, #tpu.memory_space<vmem>>, vector<1x2x3xf32>
    %203 = vector.shape_cast %202 : vector<1x2x3xf32> to vector<2x3xf32>
    %204 = vector.shape_cast %179 : vector<2x3xf32> to vector<1x2x3xf32>
    tpu.vector_store %arg34[%c0_79, %c0_80, %c0_81], %204 {strides = array<i32>} : memref<6x2x3xf32, #tpu.memory_space<vmem>>, vector<1x2x3xf32>,
    %205 = arith.truncf %75 : vector<2x32xf32> to vector<2x32xbf16>
    %cst_82 = arith.constant dense<0.000000e+00> : vector<2x64xf32>
    %206 = tpu.matmul %205, %6, %cst_82 {dimension_numbers = #tpu.dot_dimension_numbers<[1], [0], [0], [1], [0, 0, 1, 1], [], []>} : vector<2x32xbf16>, vector<32x64xbf16>, vector<2x64xf32> -> vector<2x64xf32>
    %207 = arith.truncf %201 : vector<2x32xf32> to vector<2x32xbf16>
    %cst_83 = arith.constant dense<0.000000e+00> : vector<2x64xf32>
    %208 = tpu.matmul %207, %7, %cst_83 {dimension_numbers = #tpu.dot_dimension_numbers<[1], [0], [0], [1], [0, 0, 1, 1], [], []>} : vector<2x32xbf16>, vector<32x64xbf16>, vector<2x64xf32> -> vector<2x64xf32>
    %209 = arith.addf %206, %208 : vector<2x64xf32>
    %210 = vector.broadcast %8 : vector<1x64xf32> to vector<2x64xf32>
    %211 = arith.addf %209, %210 : vector<2x64xf32>
    %cst_84 = arith.constant 0.000000e+00 : f32
    %212 = vector.broadcast %cst_84 : f32 to vector<2x64xf32>
    %213 = arith.cmpf oge, %211, %212 : vector<2x64xf32>
    %cst_85 = arith.constant 1.000000e-01 : f32
    %214 = vector.broadcast %cst_85 : f32 to vector<2x64xf32>
    %215 = arith.mulf %214, %211 : vector<2x64xf32>
    %216 = arith.select %213, %211, %215 : vector<2x64xi1>, vector<2x64xf32>
    %217 = arith.truncf %216 : vector<2x64xf32> to vector<2x64xbf16>
    %cst_86 = arith.constant dense<0.000000e+00> : vector<2x32xf32>
    %218 = tpu.matmul %217, %9, %cst_86 {dimension_numbers = #tpu.dot_dimension_numbers<[1], [0], [0], [1], [0, 0, 1, 1], [], []>} : vector<2x64xbf16>, vector<64x32xbf16>, vector<2x32xf32> -> vector<2x32xf32>
    %219 = vector.broadcast %10 : vector<1x32xf32> to vector<2x32xf32>
    %220 = arith.addf %218, %219 : vector<2x32xf32>
    %221 = vector.shape_cast %20 : vector<2x8x32xf32> to vector<16x32xf32>
    %222 = arith.truncf %221 : vector<16x32xf32> to vector<16x32xbf16>
    %cst_87 = arith.constant dense<0.000000e+00> : vector<16x32xf32>
    %223 = tpu.matmul %222, %11, %cst_87 {dimension_numbers = #tpu.dot_dimension_numbers<[1], [0], [0], [1], [0, 0, 1, 1], [], []>} : vector<16x32xbf16>, vector<32x32xbf16>, vector<16x32xf32> -> vector<16x32xf32>
    %224 = arith.truncf %220 : vector<2x32xf32> to vector<2x32xbf16>
    %cst_88 = arith.constant dense<0.000000e+00> : vector<2x32xf32>
    %225 = tpu.matmul %224, %12, %cst_88 {dimension_numbers = #tpu.dot_dimension_numbers<[1], [0], [0], [1], [0, 0, 1, 1], [], []>} : vector<2x32xbf16>, vector<32x32xbf16>, vector<2x32xf32> -> vector<2x32xf32>
    %226 = vector.shape_cast %223 : vector<16x32xf32> to vector<2x8x32xf32>
    %227 = vector.shape_cast %225 : vector<2x32xf32> to vector<2x1x32xf32>
    %228 = vector.broadcast %227 : vector<2x1x32xf32> to vector<2x8x32xf32>
    %229 = arith.addf %226, %228 : vector<2x8x32xf32>
    %230 = math.tanh %229 : vector<2x8x32xf32>
    %231 = vector.shape_cast %230 : vector<2x8x32xf32> to vector<16x32xf32>
    %232 = arith.truncf %231 : vector<16x32xf32> to vector<16x32xbf16>
    %cst_89 = arith.constant dense<0.000000e+00> : vector<16x32xf32>
    %233 = tpu.matmul %232, %13, %cst_89 {dimension_numbers = #tpu.dot_dimension_numbers<[1], [0], [0], [1], [0, 0, 1, 1], [], []>} : vector<16x32xbf16>, vector<32x32xbf16>, vector<16x32xf32> -> vector<16x32xf32>
    %234 = math.tanh %233 : vector<16x32xf32>
    %235 = vector.shape_cast %234 : vector<16x32xf32> to vector<2x8x32xf32>
    %236 = vector.shape_cast %14 : vector<1x32xf32> to vector<1x1x32xf32>
    %237 = vector.broadcast %236 : vector<1x1x32xf32> to vector<2x8x32xf32>
    %238 = arith.mulf %235, %237 : vector<2x8x32xf32>
    %cst_90 = arith.constant dense<0.000000e+00> : vector<2x8xf32>
    %239 = vector.multi_reduction <add>, %238, %cst_90 [2] : vector<2x8x32xf32> to vector<2x8xf32>
    %240 = vector.broadcast %15 : vector<1x1xf32> to vector<2x8xf32>
    %241 = arith.addf %239, %240 : vector<2x8xf32>
    %cst_91 = arith.constant dense<0xFF800000> : vector<2xf32>
    %242 = vector.multi_reduction <maximumf>, %241, %cst_91 [1] : vector<2x8xf32> to vector<2xf32>
    %cst_92 = arith.constant 0xFF800000 : f32
    %243 = vector.broadcast %cst_92 : f32 to vector<2xf32>
    %244 = arith.maximumf %243, %242 : vector<2xf32>
    %245 = vector.shape_cast %244 : vector<2xf32> to vector<2x1xf32>
    %246 = vector.broadcast %245 : vector<2x1xf32> to vector<2x8xf32>
    %247 = arith.subf %241, %246 : vector<2x8xf32>
    %248 = math.exp %247 : vector<2x8xf32>
    %cst_93 = arith.constant dense<0.000000e+00> : vector<2xf32>
    %249 = vector.multi_reduction <add>, %248, %cst_93 [1] : vector<2x8xf32> to vector<2xf32>
    %250 = vector.shape_cast %249 : vector<2xf32> to vector<2x1xf32>
    %251 = vector.broadcast %250 : vector<2x1xf32> to vector<2x8xf32>
    %252 = arith.divf %248, %251 : vector<2x8xf32>
    %253 = vector.shape_cast %252 : vector<2x8xf32> to vector<2x8x1xf32>
    %254 = vector.broadcast %253 : vector<2x8x1xf32> to vector<2x8x32xf32>
    %255 = arith.mulf %254, %20 : vector<2x8x32xf32>
    %cst_94 = arith.constant dense<0.000000e+00> : vector<2x32xf32>
    %256 = vector.multi_reduction <add>, %255, %cst_94 [1] : vector<2x8x32xf32> to vector<2x32xf32>
    %257 = arith.truncf %220 : vector<2x32xf32> to vector<2x32xbf16>
    %cst_95 = arith.constant dense<0.000000e+00> : vector<2x32xf32>
    %258 = tpu.matmul %257, %16, %cst_95 {dimension_numbers = #tpu.dot_dimension_numbers<[1], [0], [0], [1], [0, 0, 1, 1], [], []>} : vector<2x32xbf16>, vector<32x32xbf16>, vector<2x32xf32> -> vector<2x32xf32>
    %259 = arith.truncf %256 : vector<2x32xf32> to vector<2x32xbf16>
    %cst_96 = arith.constant dense<0.000000e+00> : vector<2x32xf32>
    %260 = tpu.matmul %259, %17, %cst_96 {dimension_numbers = #tpu.dot_dimension_numbers<[1], [0], [0], [1], [0, 0, 1, 1], [], []>} : vector<2x32xbf16>, vector<32x32xbf16>, vector<2x32xf32> -> vector<2x32xf32>
    %261 = arith.addf %258, %260 : vector<2x32xf32>
    %262 = vector.broadcast %18 : vector<1x32xf32> to vector<2x32xf32>
    %263 = arith.addf %261, %262 : vector<2x32xf32>
    %264 = math.tanh %263 : vector<2x32xf32>
    %265 = arith.truncf %264 : vector<2x32xf32> to vector<2x32xbf16>
    %cst_97 = arith.constant dense<0.000000e+00> : vector<2x64xf32>
    %266 = tpu.matmul %265, %19, %cst_97 {dimension_numbers = #tpu.dot_dimension_numbers<[1], [0], [0], [1], [0, 0, 1, 1], [], []>} : vector<2x32xbf16>, vector<32x64xbf16>, vector<2x64xf32> -> vector<2x64xf32>
    %c0_98 = arith.constant 0 : index
    %c0_99 = arith.constant 0 : index
    %c0_100 = arith.constant 0 : index
    %267 = vector.load %arg32[%c0_98, %c0_99, %c0_100] : memref<6x2x64xf32, #tpu.memory_space<vmem>>, vector<1x2x64xf32>
    %268 = vector.shape_cast %267 : vector<1x2x64xf32> to vector<2x64xf32>
    %269 = vector.shape_cast %266 : vector<2x64xf32> to vector<1x2x64xf32>
    tpu.vector_store %arg32[%c0_98, %c0_99, %c0_100], %269 {strides = array<i32>} : memref<6x2x64xf32, #tpu.memory_space<vmem>>, vector<1x2x64xf32>,
    %270 = vector.shape_cast %264 : vector<2x32xf32> to vector<2x1x32xf32>
    %271 = vector.broadcast %270 : vector<2x1x32xf32> to vector<2x10x32xf32>
    %272 = arith.mulf %21, %271 : vector<2x10x32xf32>
    %cst_101 = arith.constant dense<0.000000e+00> : vector<2x10xf32>
    %273 = vector.multi_reduction <add>, %272, %cst_101 [2] : vector<2x10x32xf32> to vector<2x10xf32>
    %274 = arith.mulf %273, %22 : vector<2x10xf32>
    %c0_102 = arith.constant 0 : index
    %c0_103 = arith.constant 0 : index
    %c0_104 = arith.constant 0 : index
    %275 = vector.load %arg33[%c0_102, %c0_103, %c0_104] : memref<6x2x10xf32, #tpu.memory_space<vmem>>, vector<1x2x10xf32>
    %276 = vector.shape_cast %275 : vector<1x2x10xf32> to vector<2x10xf32>
    %277 = vector.shape_cast %274 : vector<2x10xf32> to vector<1x2x10xf32>
    tpu.vector_store %arg33[%c0_102, %c0_103, %c0_104], %277 {strides = array<i32>} : memref<6x2x10xf32, #tpu.memory_space<vmem>>, vector<1x2x10xf32>,
    %c1 = arith.constant 1 : index
    %c0_105 = arith.constant 0 : index
    %c0_106 = arith.constant 0 : index
    %278 = vector.load %arg0[%c1, %c0_105, %c0_106] : memref<6x2x32xf32, #tpu.memory_space<vmem>>, vector<1x2x32xf32>
    %279 = vector.shape_cast %278 : vector<1x2x32xf32> to vector<2x32xf32>
    %280 = arith.truncf %279 : vector<2x32xf32> to vector<2x32xbf16>
    %cst_107 = arith.constant dense<0.000000e+00> : vector<2x384xf32>
    %281 = tpu.matmul %280, %0, %cst_107 {dimension_numbers = #tpu.dot_dimension_numbers<[1], [0], [0], [1], [0, 0, 1, 1], [], []>} : vector<2x32xbf16>, vector<32x384xbf16>, vector<2x384xf32> -> vector<2x384xf32>
    %282 = vector.broadcast %1 : vector<1x384xf32> to vector<2x384xf32>
    %283 = arith.addf %281, %282 : vector<2x384xf32>
    %284 = arith.truncf %173 : vector<4x2x32xf32> to vector<4x2x32xbf16>
    "tpu.trace_start"() <{level = 10 : i32, message = "kbh,kgh->kbg"}> : () -> ()
    %cst_108 = arith.constant dense<0.000000e+00> : vector<4x2x96xf32>
    %285 = tpu.matmul %284, %2, %cst_108 {dimension_numbers = #tpu.dot_dimension_numbers<[2], [2], [1], [1], [0, 0, 0, 1, 1, 1], [0], [0]>} : vector<4x2x32xbf16>, vector<4x96x32xbf16>, vector<4x2x96xf32> -> vector<4x2x96xf32>
    "tpu.trace_stop"() : () -> ()
    %286 = vector.broadcast %3 : vector<4x1x96xf32> to vector<4x2x96xf32>
    %287 = arith.addf %285, %286 : vector<4x2x96xf32>
    %288 = vector.extract_strided_slice %283 {offsets = [0, 0], sizes = [2, 96], strides = [1, 1]} : vector<2x384xf32> to vector<2x96xf32>
    %289 = vector.extract_strided_slice %287 {offsets = [0, 0, 0], sizes = [1, 2, 96], strides = [1, 1, 1]} : vector<4x2x96xf32> to vector<1x2x96xf32>
    %290 = vector.shape_cast %289 : vector<1x2x96xf32> to vector<2x96xf32>
    %291 = vector.extract_strided_slice %288 {offsets = [0, 0], sizes = [2, 32], strides = [1, 1]} : vector<2x96xf32> to vector<2x32xf32>
    %292 = vector.extract_strided_slice %290 {offsets = [0, 0], sizes = [2, 32], strides = [1, 1]} : vector<2x96xf32> to vector<2x32xf32>
    %293 = arith.addf %291, %292 : vector<2x32xf32>
    %294 = arith.negf %293 : vector<2x32xf32>
    %295 = math.exp %294 : vector<2x32xf32>
    %cst_109 = arith.constant 1.000000e+00 : f32
    %296 = vector.broadcast %cst_109 : f32 to vector<2x32xf32>
    %297 = arith.addf %296, %295 : vector<2x32xf32>
    %298 = arith.divf %296, %297 : vector<2x32xf32>
    %299 = vector.extract_strided_slice %288 {offsets = [0, 32], sizes = [2, 32], strides = [1, 1]} : vector<2x96xf32> to vector<2x32xf32>
    %300 = vector.extract_strided_slice %290 {offsets = [0, 32], sizes = [2, 32], strides = [1, 1]} : vector<2x96xf32> to vector<2x32xf32>
    %301 = arith.addf %299, %300 : vector<2x32xf32>
    %302 = arith.negf %301 : vector<2x32xf32>
    %303 = math.exp %302 : vector<2x32xf32>
    %cst_110 = arith.constant 1.000000e+00 : f32
    %304 = vector.broadcast %cst_110 : f32 to vector<2x32xf32>
    %305 = arith.addf %304, %303 : vector<2x32xf32>
    %306 = arith.divf %304, %305 : vector<2x32xf32>
    %307 = vector.extract_strided_slice %288 {offsets = [0, 64], sizes = [2, 32], strides = [1, 1]} : vector<2x96xf32> to vector<2x32xf32>
    %308 = vector.extract_strided_slice %290 {offsets = [0, 64], sizes = [2, 32], strides = [1, 1]} : vector<2x96xf32> to vector<2x32xf32>
    %309 = arith.mulf %298, %308 : vector<2x32xf32>
    %310 = arith.addf %307, %309 : vector<2x32xf32>
    %311 = math.tanh %310 : vector<2x32xf32>
    %cst_111 = arith.constant 1.000000e+00 : f32
    %312 = vector.broadcast %cst_111 : f32 to vector<2x32xf32>
    %313 = arith.subf %312, %306 : vector<2x32xf32>
    %314 = arith.mulf %313, %311 : vector<2x32xf32>
    %315 = vector.extract_strided_slice %173 {offsets = [0, 0, 0], sizes = [1, 2, 32], strides = [1, 1, 1]} : vector<4x2x32xf32> to vector<1x2x32xf32>
    %316 = vector.shape_cast %315 : vector<1x2x32xf32> to vector<2x32xf32>
    %317 = arith.mulf %306, %316 : vector<2x32xf32>
    %318 = arith.addf %314, %317 : vector<2x32xf32>
    %319 = vector.extract_strided_slice %283 {offsets = [0, 96], sizes = [2, 96], strides = [1, 1]} : vector<2x384xf32> to vector<2x96xf32>
    %320 = vector.extract_strided_slice %287 {offsets = [1, 0, 0], sizes = [1, 2, 96], strides = [1, 1, 1]} : vector<4x2x96xf32> to vector<1x2x96xf32>
    %321 = vector.shape_cast %320 : vector<1x2x96xf32> to vector<2x96xf32>
    %322 = vector.extract_strided_slice %319 {offsets = [0, 0], sizes = [2, 32], strides = [1, 1]} : vector<2x96xf32> to vector<2x32xf32>
    %323 = vector.extract_strided_slice %321 {offsets = [0, 0], sizes = [2, 32], strides = [1, 1]} : vector<2x96xf32> to vector<2x32xf32>
    %324 = arith.addf %322, %323 : vector<2x32xf32>
    %325 = arith.negf %324 : vector<2x32xf32>
    %326 = math.exp %325 : vector<2x32xf32>
    %cst_112 = arith.constant 1.000000e+00 : f32
    %327 = vector.broadcast %cst_112 : f32 to vector<2x32xf32>
    %328 = arith.addf %327, %326 : vector<2x32xf32>
    %329 = arith.divf %327, %328 : vector<2x32xf32>
    %330 = vector.extract_strided_slice %319 {offsets = [0, 32], sizes = [2, 32], strides = [1, 1]} : vector<2x96xf32> to vector<2x32xf32>
    %331 = vector.extract_strided_slice %321 {offsets = [0, 32], sizes = [2, 32], strides = [1, 1]} : vector<2x96xf32> to vector<2x32xf32>
    %332 = arith.addf %330, %331 : vector<2x32xf32>
    %333 = arith.negf %332 : vector<2x32xf32>
    %334 = math.exp %333 : vector<2x32xf32>
    %cst_113 = arith.constant 1.000000e+00 : f32
    %335 = vector.broadcast %cst_113 : f32 to vector<2x32xf32>
    %336 = arith.addf %335, %334 : vector<2x32xf32>
    %337 = arith.divf %335, %336 : vector<2x32xf32>
    %338 = vector.extract_strided_slice %319 {offsets = [0, 64], sizes = [2, 32], strides = [1, 1]} : vector<2x96xf32> to vector<2x32xf32>
    %339 = vector.extract_strided_slice %321 {offsets = [0, 64], sizes = [2, 32], strides = [1, 1]} : vector<2x96xf32> to vector<2x32xf32>
    %340 = arith.mulf %329, %339 : vector<2x32xf32>
    %341 = arith.addf %338, %340 : vector<2x32xf32>
    %342 = math.tanh %341 : vector<2x32xf32>
    %cst_114 = arith.constant 1.000000e+00 : f32
    %343 = vector.broadcast %cst_114 : f32 to vector<2x32xf32>
    %344 = arith.subf %343, %337 : vector<2x32xf32>
    %345 = arith.mulf %344, %342 : vector<2x32xf32>
    %346 = vector.extract_strided_slice %173 {offsets = [1, 0, 0], sizes = [1, 2, 32], strides = [1, 1, 1]} : vector<4x2x32xf32> to vector<1x2x32xf32>
    %347 = vector.shape_cast %346 : vector<1x2x32xf32> to vector<2x32xf32>
    %348 = arith.mulf %337, %347 : vector<2x32xf32>
    %349 = arith.addf %345, %348 : vector<2x32xf32>
    %350 = vector.extract_strided_slice %283 {offsets = [0, 192], sizes = [2, 96], strides = [1, 1]} : vector<2x384xf32> to vector<2x96xf32>
    %351 = vector.extract_strided_slice %287 {offsets = [2, 0, 0], sizes = [1, 2, 96], strides = [1, 1, 1]} : vector<4x2x96xf32> to vector<1x2x96xf32>
    %352 = vector.shape_cast %351 : vector<1x2x96xf32> to vector<2x96xf32>
    %353 = vector.extract_strided_slice %350 {offsets = [0, 0], sizes = [2, 32], strides = [1, 1]} : vector<2x96xf32> to vector<2x32xf32>
    %354 = vector.extract_strided_slice %352 {offsets = [0, 0], sizes = [2, 32], strides = [1, 1]} : vector<2x96xf32> to vector<2x32xf32>
    %355 = arith.addf %353, %354 : vector<2x32xf32>
    %356 = arith.negf %355 : vector<2x32xf32>
    %357 = math.exp %356 : vector<2x32xf32>
    %cst_115 = arith.constant 1.000000e+00 : f32
    %358 = vector.broadcast %cst_115 : f32 to vector<2x32xf32>
    %359 = arith.addf %358, %357 : vector<2x32xf32>
    %360 = arith.divf %358, %359 : vector<2x32xf32>
    %361 = vector.extract_strided_slice %350 {offsets = [0, 32], sizes = [2, 32], strides = [1, 1]} : vector<2x96xf32> to vector<2x32xf32>
    %362 = vector.extract_strided_slice %352 {offsets = [0, 32], sizes = [2, 32], strides = [1, 1]} : vector<2x96xf32> to vector<2x32xf32>
    %363 = arith.addf %361, %362 : vector<2x32xf32>
    %364 = arith.negf %363 : vector<2x32xf32>
    %365 = math.exp %364 : vector<2x32xf32>
    %cst_116 = arith.constant 1.000000e+00 : f32
    %366 = vector.broadcast %cst_116 : f32 to vector<2x32xf32>
    %367 = arith.addf %366, %365 : vector<2x32xf32>
    %368 = arith.divf %366, %367 : vector<2x32xf32>
    %369 = vector.extract_strided_slice %350 {offsets = [0, 64], sizes = [2, 32], strides = [1, 1]} : vector<2x96xf32> to vector<2x32xf32>
    %370 = vector.extract_strided_slice %352 {offsets = [0, 64], sizes = [2, 32], strides = [1, 1]} : vector<2x96xf32> to vector<2x32xf32>
    %371 = arith.mulf %360, %370 : vector<2x32xf32>
    %372 = arith.addf %369, %371 : vector<2x32xf32>
    %373 = math.tanh %372 : vector<2x32xf32>
    %cst_117 = arith.constant 1.000000e+00 : f32
    %374 = vector.broadcast %cst_117 : f32 to vector<2x32xf32>
    %375 = arith.subf %374, %368 : vector<2x32xf32>
    %376 = arith.mulf %375, %373 : vector<2x32xf32>
    %377 = vector.extract_strided_slice %173 {offsets = [2, 0, 0], sizes = [1, 2, 32], strides = [1, 1, 1]} : vector<4x2x32xf32> to vector<1x2x32xf32>
    %378 = vector.shape_cast %377 : vector<1x2x32xf32> to vector<2x32xf32>
    %379 = arith.mulf %368, %378 : vector<2x32xf32>
    %380 = arith.addf %376, %379 : vector<2x32xf32>
    %381 = vector.extract_strided_slice %283 {offsets = [0, 288], sizes = [2, 96], strides = [1, 1]} : vector<2x384xf32> to vector<2x96xf32>
    %382 = vector.extract_strided_slice %287 {offsets = [3, 0, 0], sizes = [1, 2, 96], strides = [1, 1, 1]} : vector<4x2x96xf32> to vector<1x2x96xf32>
    %383 = vector.shape_cast %382 : vector<1x2x96xf32> to vector<2x96xf32>
    %384 = vector.extract_strided_slice %381 {offsets = [0, 0], sizes = [2, 32], strides = [1, 1]} : vector<2x96xf32> to vector<2x32xf32>
    %385 = vector.extract_strided_slice %383 {offsets = [0, 0], sizes = [2, 32], strides = [1, 1]} : vector<2x96xf32> to vector<2x32xf32>
    %386 = arith.addf %384, %385 : vector<2x32xf32>
    %387 = arith.negf %386 : vector<2x32xf32>
    %388 = math.exp %387 : vector<2x32xf32>
    %cst_118 = arith.constant 1.000000e+00 : f32
    %389 = vector.broadcast %cst_118 : f32 to vector<2x32xf32>
    %390 = arith.addf %389, %388 : vector<2x32xf32>
    %391 = arith.divf %389, %390 : vector<2x32xf32>
    %392 = vector.extract_strided_slice %381 {offsets = [0, 32], sizes = [2, 32], strides = [1, 1]} : vector<2x96xf32> to vector<2x32xf32>
    %393 = vector.extract_strided_slice %383 {offsets = [0, 32], sizes = [2, 32], strides = [1, 1]} : vector<2x96xf32> to vector<2x32xf32>
    %394 = arith.addf %392, %393 : vector<2x32xf32>
    %395 = arith.negf %394 : vector<2x32xf32>
    %396 = math.exp %395 : vector<2x32xf32>
    %cst_119 = arith.constant 1.000000e+00 : f32
    %397 = vector.broadcast %cst_119 : f32 to vector<2x32xf32>
    %398 = arith.addf %397, %396 : vector<2x32xf32>
    %399 = arith.divf %397, %398 : vector<2x32xf32>
    %400 = vector.extract_strided_slice %381 {offsets = [0, 64], sizes = [2, 32], strides = [1, 1]} : vector<2x96xf32> to vector<2x32xf32>
    %401 = vector.extract_strided_slice %383 {offsets = [0, 64], sizes = [2, 32], strides = [1, 1]} : vector<2x96xf32> to vector<2x32xf32>
    %402 = arith.mulf %391, %401 : vector<2x32xf32>
    %403 = arith.addf %400, %402 : vector<2x32xf32>
    %404 = math.tanh %403 : vector<2x32xf32>
    %cst_120 = arith.constant 1.000000e+00 : f32
    %405 = vector.broadcast %cst_120 : f32 to vector<2x32xf32>
    %406 = arith.subf %405, %399 : vector<2x32xf32>
    %407 = arith.mulf %406, %404 : vector<2x32xf32>
    %408 = vector.extract_strided_slice %173 {offsets = [3, 0, 0], sizes = [1, 2, 32], strides = [1, 1, 1]} : vector<4x2x32xf32> to vector<1x2x32xf32>
    %409 = vector.shape_cast %408 : vector<1x2x32xf32> to vector<2x32xf32>
    %410 = arith.mulf %399, %409 : vector<2x32xf32>
    %411 = arith.addf %407, %410 : vector<2x32xf32>
    %412 = vector.shape_cast %318 : vector<2x32xf32> to vector<1x2x32xf32>
    %413 = vector.shape_cast %349 : vector<2x32xf32> to vector<1x2x32xf32>
    %414 = vector.shape_cast %380 : vector<2x32xf32> to vector<1x2x32xf32>
    %415 = vector.shape_cast %411 : vector<2x32xf32> to vector<1x2x32xf32>
    %416 = tpu.concatenate %412, %413, %414, %415 in 0 : vector<1x2x32xf32>, vector<1x2x32xf32>, vector<1x2x32xf32>, vector<1x2x32xf32> -> vector<4x2x32xf32>
    %417 = vector.extract_strided_slice %416 {offsets = [1, 0, 0], sizes = [3, 2, 32], strides = [1, 1, 1]} : vector<4x2x32xf32> to vector<3x2x32xf32>
    %418 = arith.truncf %417 : vector<3x2x32xf32> to vector<3x2x32xbf16>
    "tpu.trace_start"() <{level = 10 : i32, message = "dbh,doh->dbo"}> : () -> ()
    %cst_121 = arith.constant dense<0.000000e+00> : vector<3x2x3xf32>
    %419 = tpu.matmul %418, %4, %cst_121 {dimension_numbers = #tpu.dot_dimension_numbers<[2], [2], [1], [1], [0, 0, 0, 1, 1, 1], [0], [0]>} : vector<3x2x32xbf16>, vector<3x3x32xbf16>, vector<3x2x3xf32> -> vector<3x2x3xf32>
    "tpu.trace_stop"() : () -> ()
    %cst_122 = arith.constant dense<0.000000e+00> : vector<2x3xf32>
    %420 = vector.multi_reduction <add>, %419, %cst_122 [0] : vector<3x2x3xf32> to vector<2x3xf32>
    %421 = vector.broadcast %5 : vector<1x3xf32> to vector<2x3xf32>
    %422 = arith.addf %420, %421 : vector<2x3xf32>
    %cst_123 = arith.constant dense<0xFF800000> : vector<2xf32>
    %423 = vector.multi_reduction <maximumf>, %422, %cst_123 [1] : vector<2x3xf32> to vector<2xf32>
    %cst_124 = arith.constant 0xFF800000 : f32
    %424 = vector.broadcast %cst_124 : f32 to vector<2xf32>
    %425 = arith.maximumf %424, %423 : vector<2xf32>
    %426 = vector.shape_cast %425 : vector<2xf32> to vector<2x1xf32>
    %427 = vector.broadcast %426 : vector<2x1xf32> to vector<2x3xf32>
    %428 = arith.subf %422, %427 : vector<2x3xf32>
    %429 = math.exp %428 : vector<2x3xf32>
    %cst_125 = arith.constant dense<0.000000e+00> : vector<2xf32>
    %430 = vector.multi_reduction <add>, %429, %cst_125 [1] : vector<2x3xf32> to vector<2xf32>
    %431 = vector.shape_cast %430 : vector<2xf32> to vector<2x1xf32>
    %432 = vector.broadcast %431 : vector<2x1xf32> to vector<2x3xf32>
    %433 = arith.divf %429, %432 : vector<2x3xf32>
    %434 = vector.extract_strided_slice %433 {offsets = [0, 0], sizes = [2, 1], strides = [1, 1]} : vector<2x3xf32> to vector<2x1xf32>
    %435 = vector.broadcast %434 : vector<2x1xf32> to vector<2x32xf32>
    %436 = arith.mulf %435, %349 : vector<2x32xf32>
    %437 = vector.extract_strided_slice %433 {offsets = [0, 1], sizes = [2, 1], strides = [1, 1]} : vector<2x3xf32> to vector<2x1xf32>
    %438 = vector.broadcast %437 : vector<2x1xf32> to vector<2x32xf32>
    %439 = arith.mulf %438, %380 : vector<2x32xf32>
    %440 = arith.addf %436, %439 : vector<2x32xf32>
    %441 = vector.extract_strided_slice %433 {offsets = [0, 2], sizes = [2, 1], strides = [1, 1]} : vector<2x3xf32> to vector<2x1xf32>
    %442 = vector.broadcast %441 : vector<2x1xf32> to vector<2x32xf32>
    %443 = arith.mulf %442, %411 : vector<2x32xf32>
    %444 = arith.addf %440, %443 : vector<2x32xf32>
    %c1_126 = arith.constant 1 : index
    %c0_127 = arith.constant 0 : index
    %c0_128 = arith.constant 0 : index
    %445 = vector.load %arg34[%c1_126, %c0_127, %c0_128] : memref<6x2x3xf32, #tpu.memory_space<vmem>>, vector<1x2x3xf32>
    %446 = vector.shape_cast %445 : vector<1x2x3xf32> to vector<2x3xf32>
    %447 = vector.shape_cast %422 : vector<2x3xf32> to vector<1x2x3xf32>
    tpu.vector_store %arg34[%c1_126, %c0_127, %c0_128], %447 {strides = array<i32>} : memref<6x2x3xf32, #tpu.memory_space<vmem>>, vector<1x2x3xf32>,
    %448 = arith.truncf %318 : vector<2x32xf32> to vector<2x32xbf16>
    %cst_129 = arith.constant dense<0.000000e+00> : vector<2x64xf32>
    %449 = tpu.matmul %448, %6, %cst_129 {dimension_numbers = #tpu.dot_dimension_numbers<[1], [0], [0], [1], [0, 0, 1, 1], [], []>} : vector<2x32xbf16>, vector<32x64xbf16>, vector<2x64xf32> -> vector<2x64xf32>
    %450 = arith.truncf %444 : vector<2x32xf32> to vector<2x32xbf16>
    %cst_130 = arith.constant dense<0.000000e+00> : vector<2x64xf32>
    %451 = tpu.matmul %450, %7, %cst_130 {dimension_numbers = #tpu.dot_dimension_numbers<[1], [0], [0], [1], [0, 0, 1, 1], [], []>} : vector<2x32xbf16>, vector<32x64xbf16>, vector<2x64xf32> -> vector<2x64xf32>
    %452 = arith.addf %449, %451 : vector<2x64xf32>
    %453 = vector.broadcast %8 : vector<1x64xf32> to vector<2x64xf32>
    %454 = arith.addf %452, %453 : vector<2x64xf32>
    %cst_131 = arith.constant 0.000000e+00 : f32
    %455 = vector.broadcast %cst_131 : f32 to vector<2x64xf32>
    %456 = arith.cmpf oge, %454, %455 : vector<2x64xf32>
    %cst_132 = arith.constant 1.000000e-01 : f32
    %457 = vector.broadcast %cst_132 : f32 to vector<2x64xf32>
    %458 = arith.mulf %457, %454 : vector<2x64xf32>
    %459 = arith.select %456, %454, %458 : vector<2x64xi1>, vector<2x64xf32>
    %460 = arith.truncf %459 : vector<2x64xf32> to vector<2x64xbf16>
    %cst_133 = arith.constant dense<0.000000e+00> : vector<2x32xf32>
    %461 = tpu.matmul %460, %9, %cst_133 {dimension_numbers = #tpu.dot_dimension_numbers<[1], [0], [0], [1], [0, 0, 1, 1], [], []>} : vector<2x64xbf16>, vector<64x32xbf16>, vector<2x32xf32> -> vector<2x32xf32>
    %462 = vector.broadcast %10 : vector<1x32xf32> to vector<2x32xf32>
    %463 = arith.addf %461, %462 : vector<2x32xf32>
    %464 = vector.shape_cast %20 : vector<2x8x32xf32> to vector<16x32xf32>
    %465 = arith.truncf %464 : vector<16x32xf32> to vector<16x32xbf16>
    %cst_134 = arith.constant dense<0.000000e+00> : vector<16x32xf32>
    %466 = tpu.matmul %465, %11, %cst_134 {dimension_numbers = #tpu.dot_dimension_numbers<[1], [0], [0], [1], [0, 0, 1, 1], [], []>} : vector<16x32xbf16>, vector<32x32xbf16>, vector<16x32xf32> -> vector<16x32xf32>
    %467 = arith.truncf %463 : vector<2x32xf32> to vector<2x32xbf16>
    %cst_135 = arith.constant dense<0.000000e+00> : vector<2x32xf32>
    %468 = tpu.matmul %467, %12, %cst_135 {dimension_numbers = #tpu.dot_dimension_numbers<[1], [0], [0], [1], [0, 0, 1, 1], [], []>} : vector<2x32xbf16>, vector<32x32xbf16>, vector<2x32xf32> -> vector<2x32xf32>
    %469 = vector.shape_cast %466 : vector<16x32xf32> to vector<2x8x32xf32>
    %470 = vector.shape_cast %468 : vector<2x32xf32> to vector<2x1x32xf32>
    %471 = vector.broadcast %470 : vector<2x1x32xf32> to vector<2x8x32xf32>
    %472 = arith.addf %469, %471 : vector<2x8x32xf32>
    %473 = math.tanh %472 : vector<2x8x32xf32>
    %474 = vector.shape_cast %473 : vector<2x8x32xf32> to vector<16x32xf32>
    %475 = arith.truncf %474 : vector<16x32xf32> to vector<16x32xbf16>
    %cst_136 = arith.constant dense<0.000000e+00> : vector<16x32xf32>
    %476 = tpu.matmul %475, %13, %cst_136 {dimension_numbers = #tpu.dot_dimension_numbers<[1], [0], [0], [1], [0, 0, 1, 1], [], []>} : vector<16x32xbf16>, vector<32x32xbf16>, vector<16x32xf32> -> vector<16x32xf32>
    %477 = math.tanh %476 : vector<16x32xf32>
    %478 = vector.shape_cast %477 : vector<16x32xf32> to vector<2x8x32xf32>
    %479 = vector.shape_cast %14 : vector<1x32xf32> to vector<1x1x32xf32>
    %480 = vector.broadcast %479 : vector<1x1x32xf32> to vector<2x8x32xf32>
    %481 = arith.mulf %478, %480 : vector<2x8x32xf32>
    %cst_137 = arith.constant dense<0.000000e+00> : vector<2x8xf32>
    %482 = vector.multi_reduction <add>, %481, %cst_137 [2] : vector<2x8x32xf32> to vector<2x8xf32>
    %483 = vector.broadcast %15 : vector<1x1xf32> to vector<2x8xf32>
    %484 = arith.addf %482, %483 : vector<2x8xf32>
    %cst_138 = arith.constant dense<0xFF800000> : vector<2xf32>
    %485 = vector.multi_reduction <maximumf>, %484, %cst_138 [1] : vector<2x8xf32> to vector<2xf32>
    %cst_139 = arith.constant 0xFF800000 : f32
    %486 = vector.broadcast %cst_139 : f32 to vector<2xf32>
    %487 = arith.maximumf %486, %485 : vector<2xf32>
    %488 = vector.shape_cast %487 : vector<2xf32> to vector<2x1xf32>
    %489 = vector.broadcast %488 : vector<2x1xf32> to vector<2x8xf32>
    %490 = arith.subf %484, %489 : vector<2x8xf32>
    %491 = math.exp %490 : vector<2x8xf32>
    %cst_140 = arith.constant dense<0.000000e+00> : vector<2xf32>
    %492 = vector.multi_reduction <add>, %491, %cst_140 [1] : vector<2x8xf32> to vector<2xf32>
    %493 = vector.shape_cast %492 : vector<2xf32> to vector<2x1xf32>
    %494 = vector.broadcast %493 : vector<2x1xf32> to vector<2x8xf32>
    %495 = arith.divf %491, %494 : vector<2x8xf32>
    %496 = vector.shape_cast %495 : vector<2x8xf32> to vector<2x8x1xf32>
    %497 = vector.broadcast %496 : vector<2x8x1xf32> to vector<2x8x32xf32>
    %498 = arith.mulf %497, %20 : vector<2x8x32xf32>
    %cst_141 = arith.constant dense<0.000000e+00> : vector<2x32xf32>
    %499 = vector.multi_reduction <add>, %498, %cst_141 [1] : vector<2x8x32xf32> to vector<2x32xf32>
    %500 = arith.truncf %463 : vector<2x32xf32> to vector<2x32xbf16>
    %cst_142 = arith.constant dense<0.000000e+00> : vector<2x32xf32>
    %501 = tpu.matmul %500, %16, %cst_142 {dimension_numbers = #tpu.dot_dimension_numbers<[1], [0], [0], [1], [0, 0, 1, 1], [], []>} : vector<2x32xbf16>, vector<32x32xbf16>, vector<2x32xf32> -> vector<2x32xf32>
    %502 = arith.truncf %499 : vector<2x32xf32> to vector<2x32xbf16>
    %cst_143 = arith.constant dense<0.000000e+00> : vector<2x32xf32>
    %503 = tpu.matmul %502, %17, %cst_143 {dimension_numbers = #tpu.dot_dimension_numbers<[1], [0], [0], [1], [0, 0, 1, 1], [], []>} : vector<2x32xbf16>, vector<32x32xbf16>, vector<2x32xf32> -> vector<2x32xf32>
    %504 = arith.addf %501, %503 : vector<2x32xf32>
    %505 = vector.broadcast %18 : vector<1x32xf32> to vector<2x32xf32>
    %506 = arith.addf %504, %505 : vector<2x32xf32>
    %507 = math.tanh %506 : vector<2x32xf32>
    %508 = arith.truncf %507 : vector<2x32xf32> to vector<2x32xbf16>
    %cst_144 = arith.constant dense<0.000000e+00> : vector<2x64xf32>
    %509 = tpu.matmul %508, %19, %cst_144 {dimension_numbers = #tpu.dot_dimension_numbers<[1], [0], [0], [1], [0, 0, 1, 1], [], []>} : vector<2x32xbf16>, vector<32x64xbf16>, vector<2x64xf32> -> vector<2x64xf32>
    %c1_145 = arith.constant 1 : index
    %c0_146 = arith.constant 0 : index
    %c0_147 = arith.constant 0 : index
    %510 = vector.load %arg32[%c1_145, %c0_146, %c0_147] : memref<6x2x64xf32, #tpu.memory_space<vmem>>, vector<1x2x64xf32>
    %511 = vector.shape_cast %510 : vector<1x2x64xf32> to vector<2x64xf32>
    %512 = vector.shape_cast %509 : vector<2x64xf32> to vector<1x2x64xf32>
    tpu.vector_store %arg32[%c1_145, %c0_146, %c0_147], %512 {strides = array<i32>} : memref<6x2x64xf32, #tpu.memory_space<vmem>>, vector<1x2x64xf32>,
    %513 = vector.shape_cast %507 : vector<2x32xf32> to vector<2x1x32xf32>
    %514 = vector.broadcast %513 : vector<2x1x32xf32> to vector<2x10x32xf32>
    %515 = arith.mulf %21, %514 : vector<2x10x32xf32>
    %cst_148 = arith.constant dense<0.000000e+00> : vector<2x10xf32>
    %516 = vector.multi_reduction <add>, %515, %cst_148 [2] : vector<2x10x32xf32> to vector<2x10xf32>
    %517 = arith.mulf %516, %22 : vector<2x10xf32>
    %c1_149 = arith.constant 1 : index
    %c0_150 = arith.constant 0 : index
    %c0_151 = arith.constant 0 : index
    %518 = vector.load %arg33[%c1_149, %c0_150, %c0_151] : memref<6x2x10xf32, #tpu.memory_space<vmem>>, vector<1x2x10xf32>
    %519 = vector.shape_cast %518 : vector<1x2x10xf32> to vector<2x10xf32>
    %520 = vector.shape_cast %517 : vector<2x10xf32> to vector<1x2x10xf32>
    tpu.vector_store %arg33[%c1_149, %c0_150, %c0_151], %520 {strides = array<i32>} : memref<6x2x10xf32, #tpu.memory_space<vmem>>, vector<1x2x10xf32>,
    %c2 = arith.constant 2 : index
    %c0_152 = arith.constant 0 : index
    %c0_153 = arith.constant 0 : index
    %521 = vector.load %arg0[%c2, %c0_152, %c0_153] : memref<6x2x32xf32, #tpu.memory_space<vmem>>, vector<1x2x32xf32>
    %522 = vector.shape_cast %521 : vector<1x2x32xf32> to vector<2x32xf32>
    %523 = arith.truncf %522 : vector<2x32xf32> to vector<2x32xbf16>
    %cst_154 = arith.constant dense<0.000000e+00> : vector<2x384xf32>
    %524 = tpu.matmul %523, %0, %cst_154 {dimension_numbers = #tpu.dot_dimension_numbers<[1], [0], [0], [1], [0, 0, 1, 1], [], []>} : vector<2x32xbf16>, vector<32x384xbf16>, vector<2x384xf32> -> vector<2x384xf32>
    %525 = vector.broadcast %1 : vector<1x384xf32> to vector<2x384xf32>
    %526 = arith.addf %524, %525 : vector<2x384xf32>
    %527 = arith.truncf %416 : vector<4x2x32xf32> to vector<4x2x32xbf16>
    "tpu.trace_start"() <{level = 10 : i32, message = "kbh,kgh->kbg"}> : () -> ()
    %cst_155 = arith.constant dense<0.000000e+00> : vector<4x2x96xf32>
    %528 = tpu.matmul %527, %2, %cst_155 {dimension_numbers = #tpu.dot_dimension_numbers<[2], [2], [1], [1], [0, 0, 0, 1, 1, 1], [0], [0]>} : vector<4x2x32xbf16>, vector<4x96x32xbf16>, vector<4x2x96xf32> -> vector<4x2x96xf32>
    "tpu.trace_stop"() : () -> ()
    %529 = vector.broadcast %3 : vector<4x1x96xf32> to vector<4x2x96xf32>
    %530 = arith.addf %528, %529 : vector<4x2x96xf32>
    %531 = vector.extract_strided_slice %526 {offsets = [0, 0], sizes = [2, 96], strides = [1, 1]} : vector<2x384xf32> to vector<2x96xf32>
    %532 = vector.extract_strided_slice %530 {offsets = [0, 0, 0], sizes = [1, 2, 96], strides = [1, 1, 1]} : vector<4x2x96xf32> to vector<1x2x96xf32>
    %533 = vector.shape_cast %532 : vector<1x2x96xf32> to vector<2x96xf32>
    %534 = vector.extract_strided_slice %531 {offsets = [0, 0], sizes = [2, 32], strides = [1, 1]} : vector<2x96xf32> to vector<2x32xf32>
    %535 = vector.extract_strided_slice %533 {offsets = [0, 0], sizes = [2, 32], strides = [1, 1]} : vector<2x96xf32> to vector<2x32xf32>
    %536 = arith.addf %534, %535 : vector<2x32xf32>
    %537 = arith.negf %536 : vector<2x32xf32>
    %538 = math.exp %537 : vector<2x32xf32>
    %cst_156 = arith.constant 1.000000e+00 : f32
    %539 = vector.broadcast %cst_156 : f32 to vector<2x32xf32>
    %540 = arith.addf %539, %538 : vector<2x32xf32>
    %541 = arith.divf %539, %540 : vector<2x32xf32>
    %542 = vector.extract_strided_slice %531 {offsets = [0, 32], sizes = [2, 32], strides = [1, 1]} : vector<2x96xf32> to vector<2x32xf32>
    %543 = vector.extract_strided_slice %533 {offsets = [0, 32], sizes = [2, 32], strides = [1, 1]} : vector<2x96xf32> to vector<2x32xf32>
    %544 = arith.addf %542, %543 : vector<2x32xf32>
    %545 = arith.negf %544 : vector<2x32xf32>
    %546 = math.exp %545 : vector<2x32xf32>
    %cst_157 = arith.constant 1.000000e+00 : f32
    %547 = vector.broadcast %cst_157 : f32 to vector<2x32xf32>
    %548 = arith.addf %547, %546 : vector<2x32xf32>
    %549 = arith.divf %547, %548 : vector<2x32xf32>
    %550 = vector.extract_strided_slice %531 {offsets = [0, 64], sizes = [2, 32], strides = [1, 1]} : vector<2x96xf32> to vector<2x32xf32>
    %551 = vector.extract_strided_slice %533 {offsets = [0, 64], sizes = [2, 32], strides = [1, 1]} : vector<2x96xf32> to vector<2x32xf32>
    %552 = arith.mulf %541, %551 : vector<2x32xf32>
    %553 = arith.addf %550, %552 : vector<2x32xf32>
    %554 = math.tanh %553 : vector<2x32xf32>
    %cst_158 = arith.constant 1.000000e+00 : f32
    %555 = vector.broadcast %cst_158 : f32 to vector<2x32xf32>
    %556 = arith.subf %555, %549 : vector<2x32xf32>
    %557 = arith.mulf %556, %554 : vector<2x32xf32>
    %558 = vector.extract_strided_slice %416 {offsets = [0, 0, 0], sizes = [1, 2, 32], strides = [1, 1, 1]} : vector<4x2x32xf32> to vector<1x2x32xf32>
    %559 = vector.shape_cast %558 : vector<1x2x32xf32> to vector<2x32xf32>
    %560 = arith.mulf %549, %559 : vector<2x32xf32>
    %561 = arith.addf %557, %560 : vector<2x32xf32>
    %562 = vector.extract_strided_slice %526 {offsets = [0, 96], sizes = [2, 96], strides = [1, 1]} : vector<2x384xf32> to vector<2x96xf32>
    %563 = vector.extract_strided_slice %530 {offsets = [1, 0, 0], sizes = [1, 2, 96], strides = [1, 1, 1]} : vector<4x2x96xf32> to vector<1x2x96xf32>
    %564 = vector.shape_cast %563 : vector<1x2x96xf32> to vector<2x96xf32>
    %565 = vector.extract_strided_slice %562 {offsets = [0, 0], sizes = [2, 32], strides = [1, 1]} : vector<2x96xf32> to vector<2x32xf32>
    %566 = vector.extract_strided_slice %564 {offsets = [0, 0], sizes = [2, 32], strides = [1, 1]} : vector<2x96xf32> to vector<2x32xf32>
    %567 = arith.addf %565, %566 : vector<2x32xf32>
    %568 = arith.negf %567 : vector<2x32xf32>
    %569 = math.exp %568 : vector<2x32xf32>
    %cst_159 = arith.constant 1.000000e+00 : f32
    %570 = vector.broadcast %cst_159 : f32 to vector<2x32xf32>
    %571 = arith.addf %570, %569 : vector<2x32xf32>
    %572 = arith.divf %570, %571 : vector<2x32xf32>
    %573 = vector.extract_strided_slice %562 {offsets = [0, 32], sizes = [2, 32], strides = [1, 1]} : vector<2x96xf32> to vector<2x32xf32>
    %574 = vector.extract_strided_slice %564 {offsets = [0, 32], sizes = [2, 32], strides = [1, 1]} : vector<2x96xf32> to vector<2x32xf32>
    %575 = arith.addf %573, %574 : vector<2x32xf32>
    %576 = arith.negf %575 : vector<2x32xf32>
    %577 = math.exp %576 : vector<2x32xf32>
    %cst_160 = arith.constant 1.000000e+00 : f32
    %578 = vector.broadcast %cst_160 : f32 to vector<2x32xf32>
    %579 = arith.addf %578, %577 : vector<2x32xf32>
    %580 = arith.divf %578, %579 : vector<2x32xf32>
    %581 = vector.extract_strided_slice %562 {offsets = [0, 64], sizes = [2, 32], strides = [1, 1]} : vector<2x96xf32> to vector<2x32xf32>
    %582 = vector.extract_strided_slice %564 {offsets = [0, 64], sizes = [2, 32], strides = [1, 1]} : vector<2x96xf32> to vector<2x32xf32>
    %583 = arith.mulf %572, %582 : vector<2x32xf32>
    %584 = arith.addf %581, %583 : vector<2x32xf32>
    %585 = math.tanh %584 : vector<2x32xf32>
    %cst_161 = arith.constant 1.000000e+00 : f32
    %586 = vector.broadcast %cst_161 : f32 to vector<2x32xf32>
    %587 = arith.subf %586, %580 : vector<2x32xf32>
    %588 = arith.mulf %587, %585 : vector<2x32xf32>
    %589 = vector.extract_strided_slice %416 {offsets = [1, 0, 0], sizes = [1, 2, 32], strides = [1, 1, 1]} : vector<4x2x32xf32> to vector<1x2x32xf32>
    %590 = vector.shape_cast %589 : vector<1x2x32xf32> to vector<2x32xf32>
    %591 = arith.mulf %580, %590 : vector<2x32xf32>
    %592 = arith.addf %588, %591 : vector<2x32xf32>
    %593 = vector.extract_strided_slice %526 {offsets = [0, 192], sizes = [2, 96], strides = [1, 1]} : vector<2x384xf32> to vector<2x96xf32>
    %594 = vector.extract_strided_slice %530 {offsets = [2, 0, 0], sizes = [1, 2, 96], strides = [1, 1, 1]} : vector<4x2x96xf32> to vector<1x2x96xf32>
    %595 = vector.shape_cast %594 : vector<1x2x96xf32> to vector<2x96xf32>
    %596 = vector.extract_strided_slice %593 {offsets = [0, 0], sizes = [2, 32], strides = [1, 1]} : vector<2x96xf32> to vector<2x32xf32>
    %597 = vector.extract_strided_slice %595 {offsets = [0, 0], sizes = [2, 32], strides = [1, 1]} : vector<2x96xf32> to vector<2x32xf32>
    %598 = arith.addf %596, %597 : vector<2x32xf32>
    %599 = arith.negf %598 : vector<2x32xf32>
    %600 = math.exp %599 : vector<2x32xf32>
    %cst_162 = arith.constant 1.000000e+00 : f32
    %601 = vector.broadcast %cst_162 : f32 to vector<2x32xf32>
    %602 = arith.addf %601, %600 : vector<2x32xf32>
    %603 = arith.divf %601, %602 : vector<2x32xf32>
    %604 = vector.extract_strided_slice %593 {offsets = [0, 32], sizes = [2, 32], strides = [1, 1]} : vector<2x96xf32> to vector<2x32xf32>
    %605 = vector.extract_strided_slice %595 {offsets = [0, 32], sizes = [2, 32], strides = [1, 1]} : vector<2x96xf32> to vector<2x32xf32>
    %606 = arith.addf %604, %605 : vector<2x32xf32>
    %607 = arith.negf %606 : vector<2x32xf32>
    %608 = math.exp %607 : vector<2x32xf32>
    %cst_163 = arith.constant 1.000000e+00 : f32
    %609 = vector.broadcast %cst_163 : f32 to vector<2x32xf32>
    %610 = arith.addf %609, %608 : vector<2x32xf32>
    %611 = arith.divf %609, %610 : vector<2x32xf32>
    %612 = vector.extract_strided_slice %593 {offsets = [0, 64], sizes = [2, 32], strides = [1, 1]} : vector<2x96xf32> to vector<2x32xf32>
    %613 = vector.extract_strided_slice %595 {offsets = [0, 64], sizes = [2, 32], strides = [1, 1]} : vector<2x96xf32> to vector<2x32xf32>
    %614 = arith.mulf %603, %613 : vector<2x32xf32>
    %615 = arith.addf %612, %614 : vector<2x32xf32>
    %616 = math.tanh %615 : vector<2x32xf32>
    %cst_164 = arith.constant 1.000000e+00 : f32
    %617 = vector.broadcast %cst_164 : f32 to vector<2x32xf32>
    %618 = arith.subf %617, %611 : vector<2x32xf32>
    %619 = arith.mulf %618, %616 : vector<2x32xf32>
    %620 = vector.extract_strided_slice %416 {offsets = [2, 0, 0], sizes = [1, 2, 32], strides = [1, 1, 1]} : vector<4x2x32xf32> to vector<1x2x32xf32>
    %621 = vector.shape_cast %620 : vector<1x2x32xf32> to vector<2x32xf32>
    %622 = arith.mulf %611, %621 : vector<2x32xf32>
    %623 = arith.addf %619, %622 : vector<2x32xf32>
    %624 = vector.extract_strided_slice %526 {offsets = [0, 288], sizes = [2, 96], strides = [1, 1]} : vector<2x384xf32> to vector<2x96xf32>
    %625 = vector.extract_strided_slice %530 {offsets = [3, 0, 0], sizes = [1, 2, 96], strides = [1, 1, 1]} : vector<4x2x96xf32> to vector<1x2x96xf32>
    %626 = vector.shape_cast %625 : vector<1x2x96xf32> to vector<2x96xf32>
    %627 = vector.extract_strided_slice %624 {offsets = [0, 0], sizes = [2, 32], strides = [1, 1]} : vector<2x96xf32> to vector<2x32xf32>
    %628 = vector.extract_strided_slice %626 {offsets = [0, 0], sizes = [2, 32], strides = [1, 1]} : vector<2x96xf32> to vector<2x32xf32>
    %629 = arith.addf %627, %628 : vector<2x32xf32>
    %630 = arith.negf %629 : vector<2x32xf32>
    %631 = math.exp %630 : vector<2x32xf32>
    %cst_165 = arith.constant 1.000000e+00 : f32
    %632 = vector.broadcast %cst_165 : f32 to vector<2x32xf32>
    %633 = arith.addf %632, %631 : vector<2x32xf32>
    %634 = arith.divf %632, %633 : vector<2x32xf32>
    %635 = vector.extract_strided_slice %624 {offsets = [0, 32], sizes = [2, 32], strides = [1, 1]} : vector<2x96xf32> to vector<2x32xf32>
    %636 = vector.extract_strided_slice %626 {offsets = [0, 32], sizes = [2, 32], strides = [1, 1]} : vector<2x96xf32> to vector<2x32xf32>
    %637 = arith.addf %635, %636 : vector<2x32xf32>
    %638 = arith.negf %637 : vector<2x32xf32>
    %639 = math.exp %638 : vector<2x32xf32>
    %cst_166 = arith.constant 1.000000e+00 : f32
    %640 = vector.broadcast %cst_166 : f32 to vector<2x32xf32>
    %641 = arith.addf %640, %639 : vector<2x32xf32>
    %642 = arith.divf %640, %641 : vector<2x32xf32>
    %643 = vector.extract_strided_slice %624 {offsets = [0, 64], sizes = [2, 32], strides = [1, 1]} : vector<2x96xf32> to vector<2x32xf32>
    %644 = vector.extract_strided_slice %626 {offsets = [0, 64], sizes = [2, 32], strides = [1, 1]} : vector<2x96xf32> to vector<2x32xf32>
    %645 = arith.mulf %634, %644 : vector<2x32xf32>
    %646 = arith.addf %643, %645 : vector<2x32xf32>
    %647 = math.tanh %646 : vector<2x32xf32>
    %cst_167 = arith.constant 1.000000e+00 : f32
    %648 = vector.broadcast %cst_167 : f32 to vector<2x32xf32>
    %649 = arith.subf %648, %642 : vector<2x32xf32>
    %650 = arith.mulf %649, %647 : vector<2x32xf32>
    %651 = vector.extract_strided_slice %416 {offsets = [3, 0, 0], sizes = [1, 2, 32], strides = [1, 1, 1]} : vector<4x2x32xf32> to vector<1x2x32xf32>
    %652 = vector.shape_cast %651 : vector<1x2x32xf32> to vector<2x32xf32>
    %653 = arith.mulf %642, %652 : vector<2x32xf32>
    %654 = arith.addf %650, %653 : vector<2x32xf32>
    %655 = vector.shape_cast %561 : vector<2x32xf32> to vector<1x2x32xf32>
    %656 = vector.shape_cast %592 : vector<2x32xf32> to vector<1x2x32xf32>
    %657 = vector.shape_cast %623 : vector<2x32xf32> to vector<1x2x32xf32>
    %658 = vector.shape_cast %654 : vector<2x32xf32> to vector<1x2x32xf32>
    %659 = tpu.concatenate %655, %656, %657, %658 in 0 : vector<1x2x32xf32>, vector<1x2x32xf32>, vector<1x2x32xf32>, vector<1x2x32xf32> -> vector<4x2x32xf32>
    %660 = vector.extract_strided_slice %659 {offsets = [1, 0, 0], sizes = [3, 2, 32], strides = [1, 1, 1]} : vector<4x2x32xf32> to vector<3x2x32xf32>
    %661 = arith.truncf %660 : vector<3x2x32xf32> to vector<3x2x32xbf16>
    "tpu.trace_start"() <{level = 10 : i32, message = "dbh,doh->dbo"}> : () -> ()
    %cst_168 = arith.constant dense<0.000000e+00> : vector<3x2x3xf32>
    %662 = tpu.matmul %661, %4, %cst_168 {dimension_numbers = #tpu.dot_dimension_numbers<[2], [2], [1], [1], [0, 0, 0, 1, 1, 1], [0], [0]>} : vector<3x2x32xbf16>, vector<3x3x32xbf16>, vector<3x2x3xf32> -> vector<3x2x3xf32>
    "tpu.trace_stop"() : () -> ()
    %cst_169 = arith.constant dense<0.000000e+00> : vector<2x3xf32>
    %663 = vector.multi_reduction <add>, %662, %cst_169 [0] : vector<3x2x3xf32> to vector<2x3xf32>
    %664 = vector.broadcast %5 : vector<1x3xf32> to vector<2x3xf32>
    %665 = arith.addf %663, %664 : vector<2x3xf32>
    %cst_170 = arith.constant dense<0xFF800000> : vector<2xf32>
    %666 = vector.multi_reduction <maximumf>, %665, %cst_170 [1] : vector<2x3xf32> to vector<2xf32>
    %cst_171 = arith.constant 0xFF800000 : f32
    %667 = vector.broadcast %cst_171 : f32 to vector<2xf32>
    %668 = arith.maximumf %667, %666 : vector<2xf32>
    %669 = vector.shape_cast %668 : vector<2xf32> to vector<2x1xf32>
    %670 = vector.broadcast %669 : vector<2x1xf32> to vector<2x3xf32>
    %671 = arith.subf %665, %670 : vector<2x3xf32>
    %672 = math.exp %671 : vector<2x3xf32>
    %cst_172 = arith.constant dense<0.000000e+00> : vector<2xf32>
    %673 = vector.multi_reduction <add>, %672, %cst_172 [1] : vector<2x3xf32> to vector<2xf32>
    %674 = vector.shape_cast %673 : vector<2xf32> to vector<2x1xf32>
    %675 = vector.broadcast %674 : vector<2x1xf32> to vector<2x3xf32>
    %676 = arith.divf %672, %675 : vector<2x3xf32>
    %677 = vector.extract_strided_slice %676 {offsets = [0, 0], sizes = [2, 1], strides = [1, 1]} : vector<2x3xf32> to vector<2x1xf32>
    %678 = vector.broadcast %677 : vector<2x1xf32> to vector<2x32xf32>
    %679 = arith.mulf %678, %592 : vector<2x32xf32>
    %680 = vector.extract_strided_slice %676 {offsets = [0, 1], sizes = [2, 1], strides = [1, 1]} : vector<2x3xf32> to vector<2x1xf32>
    %681 = vector.broadcast %680 : vector<2x1xf32> to vector<2x32xf32>
    %682 = arith.mulf %681, %623 : vector<2x32xf32>
    %683 = arith.addf %679, %682 : vector<2x32xf32>
    %684 = vector.extract_strided_slice %676 {offsets = [0, 2], sizes = [2, 1], strides = [1, 1]} : vector<2x3xf32> to vector<2x1xf32>
    %685 = vector.broadcast %684 : vector<2x1xf32> to vector<2x32xf32>
    %686 = arith.mulf %685, %654 : vector<2x32xf32>
    %687 = arith.addf %683, %686 : vector<2x32xf32>
    %c2_173 = arith.constant 2 : index
    %c0_174 = arith.constant 0 : index
    %c0_175 = arith.constant 0 : index
    %688 = vector.load %arg34[%c2_173, %c0_174, %c0_175] : memref<6x2x3xf32, #tpu.memory_space<vmem>>, vector<1x2x3xf32>
    %689 = vector.shape_cast %688 : vector<1x2x3xf32> to vector<2x3xf32>
    %690 = vector.shape_cast %665 : vector<2x3xf32> to vector<1x2x3xf32>
    tpu.vector_store %arg34[%c2_173, %c0_174, %c0_175], %690 {strides = array<i32>} : memref<6x2x3xf32, #tpu.memory_space<vmem>>, vector<1x2x3xf32>,
    %691 = arith.truncf %561 : vector<2x32xf32> to vector<2x32xbf16>
    %cst_176 = arith.constant dense<0.000000e+00> : vector<2x64xf32>
    %692 = tpu.matmul %691, %6, %cst_176 {dimension_numbers = #tpu.dot_dimension_numbers<[1], [0], [0], [1], [0, 0, 1, 1], [], []>} : vector<2x32xbf16>, vector<32x64xbf16>, vector<2x64xf32> -> vector<2x64xf32>
    %693 = arith.truncf %687 : vector<2x32xf32> to vector<2x32xbf16>
    %cst_177 = arith.constant dense<0.000000e+00> : vector<2x64xf32>
    %694 = tpu.matmul %693, %7, %cst_177 {dimension_numbers = #tpu.dot_dimension_numbers<[1], [0], [0], [1], [0, 0, 1, 1], [], []>} : vector<2x32xbf16>, vector<32x64xbf16>, vector<2x64xf32> -> vector<2x64xf32>
    %695 = arith.addf %692, %694 : vector<2x64xf32>
    %696 = vector.broadcast %8 : vector<1x64xf32> to vector<2x64xf32>
    %697 = arith.addf %695, %696 : vector<2x64xf32>
    %cst_178 = arith.constant 0.000000e+00 : f32
    %698 = vector.broadcast %cst_178 : f32 to vector<2x64xf32>
    %699 = arith.cmpf oge, %697, %698 : vector<2x64xf32>
    %cst_179 = arith.constant 1.000000e-01 : f32
    %700 = vector.broadcast %cst_179 : f32 to vector<2x64xf32>
    %701 = arith.mulf %700, %697 : vector<2x64xf32>
    %702 = arith.select %699, %697, %701 : vector<2x64xi1>, vector<2x64xf32>
    %703 = arith.truncf %702 : vector<2x64xf32> to vector<2x64xbf16>
    %cst_180 = arith.constant dense<0.000000e+00> : vector<2x32xf32>
    %704 = tpu.matmul %703, %9, %cst_180 {dimension_numbers = #tpu.dot_dimension_numbers<[1], [0], [0], [1], [0, 0, 1, 1], [], []>} : vector<2x64xbf16>, vector<64x32xbf16>, vector<2x32xf32> -> vector<2x32xf32>
    %705 = vector.broadcast %10 : vector<1x32xf32> to vector<2x32xf32>
    %706 = arith.addf %704, %705 : vector<2x32xf32>
    %707 = vector.shape_cast %20 : vector<2x8x32xf32> to vector<16x32xf32>
    %708 = arith.truncf %707 : vector<16x32xf32> to vector<16x32xbf16>
    %cst_181 = arith.constant dense<0.000000e+00> : vector<16x32xf32>
    %709 = tpu.matmul %708, %11, %cst_181 {dimension_numbers = #tpu.dot_dimension_numbers<[1], [0], [0], [1], [0, 0, 1, 1], [], []>} : vector<16x32xbf16>, vector<32x32xbf16>, vector<16x32xf32> -> vector<16x32xf32>
    %710 = arith.truncf %706 : vector<2x32xf32> to vector<2x32xbf16>
    %cst_182 = arith.constant dense<0.000000e+00> : vector<2x32xf32>
    %711 = tpu.matmul %710, %12, %cst_182 {dimension_numbers = #tpu.dot_dimension_numbers<[1], [0], [0], [1], [0, 0, 1, 1], [], []>} : vector<2x32xbf16>, vector<32x32xbf16>, vector<2x32xf32> -> vector<2x32xf32>
    %712 = vector.shape_cast %709 : vector<16x32xf32> to vector<2x8x32xf32>
    %713 = vector.shape_cast %711 : vector<2x32xf32> to vector<2x1x32xf32>
    %714 = vector.broadcast %713 : vector<2x1x32xf32> to vector<2x8x32xf32>
    %715 = arith.addf %712, %714 : vector<2x8x32xf32>
    %716 = math.tanh %715 : vector<2x8x32xf32>
    %717 = vector.shape_cast %716 : vector<2x8x32xf32> to vector<16x32xf32>
    %718 = arith.truncf %717 : vector<16x32xf32> to vector<16x32xbf16>
    %cst_183 = arith.constant dense<0.000000e+00> : vector<16x32xf32>
    %719 = tpu.matmul %718, %13, %cst_183 {dimension_numbers = #tpu.dot_dimension_numbers<[1], [0], [0], [1], [0, 0, 1, 1], [], []>} : vector<16x32xbf16>, vector<32x32xbf16>, vector<16x32xf32> -> vector<16x32xf32>
    %720 = math.tanh %719 : vector<16x32xf32>
    %721 = vector.shape_cast %720 : vector<16x32xf32> to vector<2x8x32xf32>
    %722 = vector.shape_cast %14 : vector<1x32xf32> to vector<1x1x32xf32>
    %723 = vector.broadcast %722 : vector<1x1x32xf32> to vector<2x8x32xf32>
    %724 = arith.mulf %721, %723 : vector<2x8x32xf32>
    %cst_184 = arith.constant dense<0.000000e+00> : vector<2x8xf32>
    %725 = vector.multi_reduction <add>, %724, %cst_184 [2] : vector<2x8x32xf32> to vector<2x8xf32>
    %726 = vector.broadcast %15 : vector<1x1xf32> to vector<2x8xf32>
    %727 = arith.addf %725, %726 : vector<2x8xf32>
    %cst_185 = arith.constant dense<0xFF800000> : vector<2xf32>
    %728 = vector.multi_reduction <maximumf>, %727, %cst_185 [1] : vector<2x8xf32> to vector<2xf32>
    %cst_186 = arith.constant 0xFF800000 : f32
    %729 = vector.broadcast %cst_186 : f32 to vector<2xf32>
    %730 = arith.maximumf %729, %728 : vector<2xf32>
    %731 = vector.shape_cast %730 : vector<2xf32> to vector<2x1xf32>
    %732 = vector.broadcast %731 : vector<2x1xf32> to vector<2x8xf32>
    %733 = arith.subf %727, %732 : vector<2x8xf32>
    %734 = math.exp %733 : vector<2x8xf32>
    %cst_187 = arith.constant dense<0.000000e+00> : vector<2xf32>
    %735 = vector.multi_reduction <add>, %734, %cst_187 [1] : vector<2x8xf32> to vector<2xf32>
    %736 = vector.shape_cast %735 : vector<2xf32> to vector<2x1xf32>
    %737 = vector.broadcast %736 : vector<2x1xf32> to vector<2x8xf32>
    %738 = arith.divf %734, %737 : vector<2x8xf32>
    %739 = vector.shape_cast %738 : vector<2x8xf32> to vector<2x8x1xf32>
    %740 = vector.broadcast %739 : vector<2x8x1xf32> to vector<2x8x32xf32>
    %741 = arith.mulf %740, %20 : vector<2x8x32xf32>
    %cst_188 = arith.constant dense<0.000000e+00> : vector<2x32xf32>
    %742 = vector.multi_reduction <add>, %741, %cst_188 [1] : vector<2x8x32xf32> to vector<2x32xf32>
    %743 = arith.truncf %706 : vector<2x32xf32> to vector<2x32xbf16>
    %cst_189 = arith.constant dense<0.000000e+00> : vector<2x32xf32>
    %744 = tpu.matmul %743, %16, %cst_189 {dimension_numbers = #tpu.dot_dimension_numbers<[1], [0], [0], [1], [0, 0, 1, 1], [], []>} : vector<2x32xbf16>, vector<32x32xbf16>, vector<2x32xf32> -> vector<2x32xf32>
    %745 = arith.truncf %742 : vector<2x32xf32> to vector<2x32xbf16>
    %cst_190 = arith.constant dense<0.000000e+00> : vector<2x32xf32>
    %746 = tpu.matmul %745, %17, %cst_190 {dimension_numbers = #tpu.dot_dimension_numbers<[1], [0], [0], [1], [0, 0, 1, 1], [], []>} : vector<2x32xbf16>, vector<32x32xbf16>, vector<2x32xf32> -> vector<2x32xf32>
    %747 = arith.addf %744, %746 : vector<2x32xf32>
    %748 = vector.broadcast %18 : vector<1x32xf32> to vector<2x32xf32>
    %749 = arith.addf %747, %748 : vector<2x32xf32>
    %750 = math.tanh %749 : vector<2x32xf32>
    %751 = arith.truncf %750 : vector<2x32xf32> to vector<2x32xbf16>
    %cst_191 = arith.constant dense<0.000000e+00> : vector<2x64xf32>
    %752 = tpu.matmul %751, %19, %cst_191 {dimension_numbers = #tpu.dot_dimension_numbers<[1], [0], [0], [1], [0, 0, 1, 1], [], []>} : vector<2x32xbf16>, vector<32x64xbf16>, vector<2x64xf32> -> vector<2x64xf32>
    %c2_192 = arith.constant 2 : index
    %c0_193 = arith.constant 0 : index
    %c0_194 = arith.constant 0 : index
    %753 = vector.load %arg32[%c2_192, %c0_193, %c0_194] : memref<6x2x64xf32, #tpu.memory_space<vmem>>, vector<1x2x64xf32>
    %754 = vector.shape_cast %753 : vector<1x2x64xf32> to vector<2x64xf32>
    %755 = vector.shape_cast %752 : vector<2x64xf32> to vector<1x2x64xf32>
    tpu.vector_store %arg32[%c2_192, %c0_193, %c0_194], %755 {strides = array<i32>} : memref<6x2x64xf32, #tpu.memory_space<vmem>>, vector<1x2x64xf32>,
    %756 = vector.shape_cast %750 : vector<2x32xf32> to vector<2x1x32xf32>
    %757 = vector.broadcast %756 : vector<2x1x32xf32> to vector<2x10x32xf32>
    %758 = arith.mulf %21, %757 : vector<2x10x32xf32>
    %cst_195 = arith.constant dense<0.000000e+00> : vector<2x10xf32>
    %759 = vector.multi_reduction <add>, %758, %cst_195 [2] : vector<2x10x32xf32> to vector<2x10xf32>
    %760 = arith.mulf %759, %22 : vector<2x10xf32>
    %c2_196 = arith.constant 2 : index
    %c0_197 = arith.constant 0 : index
    %c0_198 = arith.constant 0 : index
    %761 = vector.load %arg33[%c2_196, %c0_197, %c0_198] : memref<6x2x10xf32, #tpu.memory_space<vmem>>, vector<1x2x10xf32>
    %762 = vector.shape_cast %761 : vector<1x2x10xf32> to vector<2x10xf32>
    %763 = vector.shape_cast %760 : vector<2x10xf32> to vector<1x2x10xf32>
    tpu.vector_store %arg33[%c2_196, %c0_197, %c0_198], %763 {strides = array<i32>} : memref<6x2x10xf32, #tpu.memory_space<vmem>>, vector<1x2x10xf32>,
    %c3 = arith.constant 3 : index
    %c0_199 = arith.constant 0 : index
    %c0_200 = arith.constant 0 : index
    %764 = vector.load %arg0[%c3, %c0_199, %c0_200] : memref<6x2x32xf32, #tpu.memory_space<vmem>>, vector<1x2x32xf32>
    %765 = vector.shape_cast %764 : vector<1x2x32xf32> to vector<2x32xf32>
    %766 = arith.truncf %765 : vector<2x32xf32> to vector<2x32xbf16>
    %cst_201 = arith.constant dense<0.000000e+00> : vector<2x384xf32>
    %767 = tpu.matmul %766, %0, %cst_201 {dimension_numbers = #tpu.dot_dimension_numbers<[1], [0], [0], [1], [0, 0, 1, 1], [], []>} : vector<2x32xbf16>, vector<32x384xbf16>, vector<2x384xf32> -> vector<2x384xf32>
    %768 = vector.broadcast %1 : vector<1x384xf32> to vector<2x384xf32>
    %769 = arith.addf %767, %768 : vector<2x384xf32>
    %770 = arith.truncf %659 : vector<4x2x32xf32> to vector<4x2x32xbf16>
    "tpu.trace_start"() <{level = 10 : i32, message = "kbh,kgh->kbg"}> : () -> ()
    %cst_202 = arith.constant dense<0.000000e+00> : vector<4x2x96xf32>
    %771 = tpu.matmul %770, %2, %cst_202 {dimension_numbers = #tpu.dot_dimension_numbers<[2], [2], [1], [1], [0, 0, 0, 1, 1, 1], [0], [0]>} : vector<4x2x32xbf16>, vector<4x96x32xbf16>, vector<4x2x96xf32> -> vector<4x2x96xf32>
    "tpu.trace_stop"() : () -> ()
    %772 = vector.broadcast %3 : vector<4x1x96xf32> to vector<4x2x96xf32>
    %773 = arith.addf %771, %772 : vector<4x2x96xf32>
    %774 = vector.extract_strided_slice %769 {offsets = [0, 0], sizes = [2, 96], strides = [1, 1]} : vector<2x384xf32> to vector<2x96xf32>
    %775 = vector.extract_strided_slice %773 {offsets = [0, 0, 0], sizes = [1, 2, 96], strides = [1, 1, 1]} : vector<4x2x96xf32> to vector<1x2x96xf32>
    %776 = vector.shape_cast %775 : vector<1x2x96xf32> to vector<2x96xf32>
    %777 = vector.extract_strided_slice %774 {offsets = [0, 0], sizes = [2, 32], strides = [1, 1]} : vector<2x96xf32> to vector<2x32xf32>
    %778 = vector.extract_strided_slice %776 {offsets = [0, 0], sizes = [2, 32], strides = [1, 1]} : vector<2x96xf32> to vector<2x32xf32>
    %779 = arith.addf %777, %778 : vector<2x32xf32>
    %780 = arith.negf %779 : vector<2x32xf32>
    %781 = math.exp %780 : vector<2x32xf32>
    %cst_203 = arith.constant 1.000000e+00 : f32
    %782 = vector.broadcast %cst_203 : f32 to vector<2x32xf32>
    %783 = arith.addf %782, %781 : vector<2x32xf32>
    %784 = arith.divf %782, %783 : vector<2x32xf32>
    %785 = vector.extract_strided_slice %774 {offsets = [0, 32], sizes = [2, 32], strides = [1, 1]} : vector<2x96xf32> to vector<2x32xf32>
    %786 = vector.extract_strided_slice %776 {offsets = [0, 32], sizes = [2, 32], strides = [1, 1]} : vector<2x96xf32> to vector<2x32xf32>
    %787 = arith.addf %785, %786 : vector<2x32xf32>
    %788 = arith.negf %787 : vector<2x32xf32>
    %789 = math.exp %788 : vector<2x32xf32>
    %cst_204 = arith.constant 1.000000e+00 : f32
    %790 = vector.broadcast %cst_204 : f32 to vector<2x32xf32>
    %791 = arith.addf %790, %789 : vector<2x32xf32>
    %792 = arith.divf %790, %791 : vector<2x32xf32>
    %793 = vector.extract_strided_slice %774 {offsets = [0, 64], sizes = [2, 32], strides = [1, 1]} : vector<2x96xf32> to vector<2x32xf32>
    %794 = vector.extract_strided_slice %776 {offsets = [0, 64], sizes = [2, 32], strides = [1, 1]} : vector<2x96xf32> to vector<2x32xf32>
    %795 = arith.mulf %784, %794 : vector<2x32xf32>
    %796 = arith.addf %793, %795 : vector<2x32xf32>
    %797 = math.tanh %796 : vector<2x32xf32>
    %cst_205 = arith.constant 1.000000e+00 : f32
    %798 = vector.broadcast %cst_205 : f32 to vector<2x32xf32>
    %799 = arith.subf %798, %792 : vector<2x32xf32>
    %800 = arith.mulf %799, %797 : vector<2x32xf32>
    %801 = vector.extract_strided_slice %659 {offsets = [0, 0, 0], sizes = [1, 2, 32], strides = [1, 1, 1]} : vector<4x2x32xf32> to vector<1x2x32xf32>
    %802 = vector.shape_cast %801 : vector<1x2x32xf32> to vector<2x32xf32>
    %803 = arith.mulf %792, %802 : vector<2x32xf32>
    %804 = arith.addf %800, %803 : vector<2x32xf32>
    %805 = vector.extract_strided_slice %769 {offsets = [0, 96], sizes = [2, 96], strides = [1, 1]} : vector<2x384xf32> to vector<2x96xf32>
    %806 = vector.extract_strided_slice %773 {offsets = [1, 0, 0], sizes = [1, 2, 96], strides = [1, 1, 1]} : vector<4x2x96xf32> to vector<1x2x96xf32>
    %807 = vector.shape_cast %806 : vector<1x2x96xf32> to vector<2x96xf32>
    %808 = vector.extract_strided_slice %805 {offsets = [0, 0], sizes = [2, 32], strides = [1, 1]} : vector<2x96xf32> to vector<2x32xf32>
    %809 = vector.extract_strided_slice %807 {offsets = [0, 0], sizes = [2, 32], strides = [1, 1]} : vector<2x96xf32> to vector<2x32xf32>
    %810 = arith.addf %808, %809 : vector<2x32xf32>
    %811 = arith.negf %810 : vector<2x32xf32>
    %812 = math.exp %811 : vector<2x32xf32>
    %cst_206 = arith.constant 1.000000e+00 : f32
    %813 = vector.broadcast %cst_206 : f32 to vector<2x32xf32>
    %814 = arith.addf %813, %812 : vector<2x32xf32>
    %815 = arith.divf %813, %814 : vector<2x32xf32>
    %816 = vector.extract_strided_slice %805 {offsets = [0, 32], sizes = [2, 32], strides = [1, 1]} : vector<2x96xf32> to vector<2x32xf32>
    %817 = vector.extract_strided_slice %807 {offsets = [0, 32], sizes = [2, 32], strides = [1, 1]} : vector<2x96xf32> to vector<2x32xf32>
    %818 = arith.addf %816, %817 : vector<2x32xf32>
    %819 = arith.negf %818 : vector<2x32xf32>
    %820 = math.exp %819 : vector<2x32xf32>
    %cst_207 = arith.constant 1.000000e+00 : f32
    %821 = vector.broadcast %cst_207 : f32 to vector<2x32xf32>
    %822 = arith.addf %821, %820 : vector<2x32xf32>
    %823 = arith.divf %821, %822 : vector<2x32xf32>
    %824 = vector.extract_strided_slice %805 {offsets = [0, 64], sizes = [2, 32], strides = [1, 1]} : vector<2x96xf32> to vector<2x32xf32>
    %825 = vector.extract_strided_slice %807 {offsets = [0, 64], sizes = [2, 32], strides = [1, 1]} : vector<2x96xf32> to vector<2x32xf32>
    %826 = arith.mulf %815, %825 : vector<2x32xf32>
    %827 = arith.addf %824, %826 : vector<2x32xf32>
    %828 = math.tanh %827 : vector<2x32xf32>
    %cst_208 = arith.constant 1.000000e+00 : f32
    %829 = vector.broadcast %cst_208 : f32 to vector<2x32xf32>
    %830 = arith.subf %829, %823 : vector<2x32xf32>
    %831 = arith.mulf %830, %828 : vector<2x32xf32>
    %832 = vector.extract_strided_slice %659 {offsets = [1, 0, 0], sizes = [1, 2, 32], strides = [1, 1, 1]} : vector<4x2x32xf32> to vector<1x2x32xf32>
    %833 = vector.shape_cast %832 : vector<1x2x32xf32> to vector<2x32xf32>
    %834 = arith.mulf %823, %833 : vector<2x32xf32>
    %835 = arith.addf %831, %834 : vector<2x32xf32>
    %836 = vector.extract_strided_slice %769 {offsets = [0, 192], sizes = [2, 96], strides = [1, 1]} : vector<2x384xf32> to vector<2x96xf32>
    %837 = vector.extract_strided_slice %773 {offsets = [2, 0, 0], sizes = [1, 2, 96], strides = [1, 1, 1]} : vector<4x2x96xf32> to vector<1x2x96xf32>
    %838 = vector.shape_cast %837 : vector<1x2x96xf32> to vector<2x96xf32>
    %839 = vector.extract_strided_slice %836 {offsets = [0, 0], sizes = [2, 32], strides = [1, 1]} : vector<2x96xf32> to vector<2x32xf32>
    %840 = vector.extract_strided_slice %838 {offsets = [0, 0], sizes = [2, 32], strides = [1, 1]} : vector<2x96xf32> to vector<2x32xf32>
    %841 = arith.addf %839, %840 : vector<2x32xf32>
    %842 = arith.negf %841 : vector<2x32xf32>
    %843 = math.exp %842 : vector<2x32xf32>
    %cst_209 = arith.constant 1.000000e+00 : f32
    %844 = vector.broadcast %cst_209 : f32 to vector<2x32xf32>
    %845 = arith.addf %844, %843 : vector<2x32xf32>
    %846 = arith.divf %844, %845 : vector<2x32xf32>
    %847 = vector.extract_strided_slice %836 {offsets = [0, 32], sizes = [2, 32], strides = [1, 1]} : vector<2x96xf32> to vector<2x32xf32>
    %848 = vector.extract_strided_slice %838 {offsets = [0, 32], sizes = [2, 32], strides = [1, 1]} : vector<2x96xf32> to vector<2x32xf32>
    %849 = arith.addf %847, %848 : vector<2x32xf32>
    %850 = arith.negf %849 : vector<2x32xf32>
    %851 = math.exp %850 : vector<2x32xf32>
    %cst_210 = arith.constant 1.000000e+00 : f32
    %852 = vector.broadcast %cst_210 : f32 to vector<2x32xf32>
    %853 = arith.addf %852, %851 : vector<2x32xf32>
    %854 = arith.divf %852, %853 : vector<2x32xf32>
    %855 = vector.extract_strided_slice %836 {offsets = [0, 64], sizes = [2, 32], strides = [1, 1]} : vector<2x96xf32> to vector<2x32xf32>
    %856 = vector.extract_strided_slice %838 {offsets = [0, 64], sizes = [2, 32], strides = [1, 1]} : vector<2x96xf32> to vector<2x32xf32>
    %857 = arith.mulf %846, %856 : vector<2x32xf32>
    %858 = arith.addf %855, %857 : vector<2x32xf32>
    %859 = math.tanh %858 : vector<2x32xf32>
    %cst_211 = arith.constant 1.000000e+00 : f32
    %860 = vector.broadcast %cst_211 : f32 to vector<2x32xf32>
    %861 = arith.subf %860, %854 : vector<2x32xf32>
    %862 = arith.mulf %861, %859 : vector<2x32xf32>
    %863 = vector.extract_strided_slice %659 {offsets = [2, 0, 0], sizes = [1, 2, 32], strides = [1, 1, 1]} : vector<4x2x32xf32> to vector<1x2x32xf32>
    %864 = vector.shape_cast %863 : vector<1x2x32xf32> to vector<2x32xf32>
    %865 = arith.mulf %854, %864 : vector<2x32xf32>
    %866 = arith.addf %862, %865 : vector<2x32xf32>
    %867 = vector.extract_strided_slice %769 {offsets = [0, 288], sizes = [2, 96], strides = [1, 1]} : vector<2x384xf32> to vector<2x96xf32>
    %868 = vector.extract_strided_slice %773 {offsets = [3, 0, 0], sizes = [1, 2, 96], strides = [1, 1, 1]} : vector<4x2x96xf32> to vector<1x2x96xf32>
    %869 = vector.shape_cast %868 : vector<1x2x96xf32> to vector<2x96xf32>
    %870 = vector.extract_strided_slice %867 {offsets = [0, 0], sizes = [2, 32], strides = [1, 1]} : vector<2x96xf32> to vector<2x32xf32>
    %871 = vector.extract_strided_slice %869 {offsets = [0, 0], sizes = [2, 32], strides = [1, 1]} : vector<2x96xf32> to vector<2x32xf32>
    %872 = arith.addf %870, %871 : vector<2x32xf32>
    %873 = arith.negf %872 : vector<2x32xf32>
    %874 = math.exp %873 : vector<2x32xf32>
    %cst_212 = arith.constant 1.000000e+00 : f32
    %875 = vector.broadcast %cst_212 : f32 to vector<2x32xf32>
    %876 = arith.addf %875, %874 : vector<2x32xf32>
    %877 = arith.divf %875, %876 : vector<2x32xf32>
    %878 = vector.extract_strided_slice %867 {offsets = [0, 32], sizes = [2, 32], strides = [1, 1]} : vector<2x96xf32> to vector<2x32xf32>
    %879 = vector.extract_strided_slice %869 {offsets = [0, 32], sizes = [2, 32], strides = [1, 1]} : vector<2x96xf32> to vector<2x32xf32>
    %880 = arith.addf %878, %879 : vector<2x32xf32>
    %881 = arith.negf %880 : vector<2x32xf32>
    %882 = math.exp %881 : vector<2x32xf32>
    %cst_213 = arith.constant 1.000000e+00 : f32
    %883 = vector.broadcast %cst_213 : f32 to vector<2x32xf32>
    %884 = arith.addf %883, %882 : vector<2x32xf32>
    %885 = arith.divf %883, %884 : vector<2x32xf32>
    %886 = vector.extract_strided_slice %867 {offsets = [0, 64], sizes = [2, 32], strides = [1, 1]} : vector<2x96xf32> to vector<2x32xf32>
    %887 = vector.extract_strided_slice %869 {offsets = [0, 64], sizes = [2, 32], strides = [1, 1]} : vector<2x96xf32> to vector<2x32xf32>
    %888 = arith.mulf %877, %887 : vector<2x32xf32>
    %889 = arith.addf %886, %888 : vector<2x32xf32>
    %890 = math.tanh %889 : vector<2x32xf32>
    %cst_214 = arith.constant 1.000000e+00 : f32
    %891 = vector.broadcast %cst_214 : f32 to vector<2x32xf32>
    %892 = arith.subf %891, %885 : vector<2x32xf32>
    %893 = arith.mulf %892, %890 : vector<2x32xf32>
    %894 = vector.extract_strided_slice %659 {offsets = [3, 0, 0], sizes = [1, 2, 32], strides = [1, 1, 1]} : vector<4x2x32xf32> to vector<1x2x32xf32>
    %895 = vector.shape_cast %894 : vector<1x2x32xf32> to vector<2x32xf32>
    %896 = arith.mulf %885, %895 : vector<2x32xf32>
    %897 = arith.addf %893, %896 : vector<2x32xf32>
    %898 = vector.shape_cast %804 : vector<2x32xf32> to vector<1x2x32xf32>
    %899 = vector.shape_cast %835 : vector<2x32xf32> to vector<1x2x32xf32>
    %900 = vector.shape_cast %866 : vector<2x32xf32> to vector<1x2x32xf32>
    %901 = vector.shape_cast %897 : vector<2x32xf32> to vector<1x2x32xf32>
    %902 = tpu.concatenate %898, %899, %900, %901 in 0 : vector<1x2x32xf32>, vector<1x2x32xf32>, vector<1x2x32xf32>, vector<1x2x32xf32> -> vector<4x2x32xf32>
    %903 = vector.extract_strided_slice %902 {offsets = [1, 0, 0], sizes = [3, 2, 32], strides = [1, 1, 1]} : vector<4x2x32xf32> to vector<3x2x32xf32>
    %904 = arith.truncf %903 : vector<3x2x32xf32> to vector<3x2x32xbf16>
    "tpu.trace_start"() <{level = 10 : i32, message = "dbh,doh->dbo"}> : () -> ()
    %cst_215 = arith.constant dense<0.000000e+00> : vector<3x2x3xf32>
    %905 = tpu.matmul %904, %4, %cst_215 {dimension_numbers = #tpu.dot_dimension_numbers<[2], [2], [1], [1], [0, 0, 0, 1, 1, 1], [0], [0]>} : vector<3x2x32xbf16>, vector<3x3x32xbf16>, vector<3x2x3xf32> -> vector<3x2x3xf32>
    "tpu.trace_stop"() : () -> ()
    %cst_216 = arith.constant dense<0.000000e+00> : vector<2x3xf32>
    %906 = vector.multi_reduction <add>, %905, %cst_216 [0] : vector<3x2x3xf32> to vector<2x3xf32>
    %907 = vector.broadcast %5 : vector<1x3xf32> to vector<2x3xf32>
    %908 = arith.addf %906, %907 : vector<2x3xf32>
    %cst_217 = arith.constant dense<0xFF800000> : vector<2xf32>
    %909 = vector.multi_reduction <maximumf>, %908, %cst_217 [1] : vector<2x3xf32> to vector<2xf32>
    %cst_218 = arith.constant 0xFF800000 : f32
    %910 = vector.broadcast %cst_218 : f32 to vector<2xf32>
    %911 = arith.maximumf %910, %909 : vector<2xf32>
    %912 = vector.shape_cast %911 : vector<2xf32> to vector<2x1xf32>
    %913 = vector.broadcast %912 : vector<2x1xf32> to vector<2x3xf32>
    %914 = arith.subf %908, %913 : vector<2x3xf32>
    %915 = math.exp %914 : vector<2x3xf32>
    %cst_219 = arith.constant dense<0.000000e+00> : vector<2xf32>
    %916 = vector.multi_reduction <add>, %915, %cst_219 [1] : vector<2x3xf32> to vector<2xf32>
    %917 = vector.shape_cast %916 : vector<2xf32> to vector<2x1xf32>
    %918 = vector.broadcast %917 : vector<2x1xf32> to vector<2x3xf32>
    %919 = arith.divf %915, %918 : vector<2x3xf32>
    %920 = vector.extract_strided_slice %919 {offsets = [0, 0], sizes = [2, 1], strides = [1, 1]} : vector<2x3xf32> to vector<2x1xf32>
    %921 = vector.broadcast %920 : vector<2x1xf32> to vector<2x32xf32>
    %922 = arith.mulf %921, %835 : vector<2x32xf32>
    %923 = vector.extract_strided_slice %919 {offsets = [0, 1], sizes = [2, 1], strides = [1, 1]} : vector<2x3xf32> to vector<2x1xf32>
    %924 = vector.broadcast %923 : vector<2x1xf32> to vector<2x32xf32>
    %925 = arith.mulf %924, %866 : vector<2x32xf32>
    %926 = arith.addf %922, %925 : vector<2x32xf32>
    %927 = vector.extract_strided_slice %919 {offsets = [0, 2], sizes = [2, 1], strides = [1, 1]} : vector<2x3xf32> to vector<2x1xf32>
    %928 = vector.broadcast %927 : vector<2x1xf32> to vector<2x32xf32>
    %929 = arith.mulf %928, %897 : vector<2x32xf32>
    %930 = arith.addf %926, %929 : vector<2x32xf32>
    %c3_220 = arith.constant 3 : index
    %c0_221 = arith.constant 0 : index
    %c0_222 = arith.constant 0 : index
    %931 = vector.load %arg34[%c3_220, %c0_221, %c0_222] : memref<6x2x3xf32, #tpu.memory_space<vmem>>, vector<1x2x3xf32>
    %932 = vector.shape_cast %931 : vector<1x2x3xf32> to vector<2x3xf32>
    %933 = vector.shape_cast %908 : vector<2x3xf32> to vector<1x2x3xf32>
    tpu.vector_store %arg34[%c3_220, %c0_221, %c0_222], %933 {strides = array<i32>} : memref<6x2x3xf32, #tpu.memory_space<vmem>>, vector<1x2x3xf32>,
    %934 = arith.truncf %804 : vector<2x32xf32> to vector<2x32xbf16>
    %cst_223 = arith.constant dense<0.000000e+00> : vector<2x64xf32>
    %935 = tpu.matmul %934, %6, %cst_223 {dimension_numbers = #tpu.dot_dimension_numbers<[1], [0], [0], [1], [0, 0, 1, 1], [], []>} : vector<2x32xbf16>, vector<32x64xbf16>, vector<2x64xf32> -> vector<2x64xf32>
    %936 = arith.truncf %930 : vector<2x32xf32> to vector<2x32xbf16>
    %cst_224 = arith.constant dense<0.000000e+00> : vector<2x64xf32>
    %937 = tpu.matmul %936, %7, %cst_224 {dimension_numbers = #tpu.dot_dimension_numbers<[1], [0], [0], [1], [0, 0, 1, 1], [], []>} : vector<2x32xbf16>, vector<32x64xbf16>, vector<2x64xf32> -> vector<2x64xf32>
    %938 = arith.addf %935, %937 : vector<2x64xf32>
    %939 = vector.broadcast %8 : vector<1x64xf32> to vector<2x64xf32>
    %940 = arith.addf %938, %939 : vector<2x64xf32>
    %cst_225 = arith.constant 0.000000e+00 : f32
    %941 = vector.broadcast %cst_225 : f32 to vector<2x64xf32>
    %942 = arith.cmpf oge, %940, %941 : vector<2x64xf32>
    %cst_226 = arith.constant 1.000000e-01 : f32
    %943 = vector.broadcast %cst_226 : f32 to vector<2x64xf32>
    %944 = arith.mulf %943, %940 : vector<2x64xf32>
    %945 = arith.select %942, %940, %944 : vector<2x64xi1>, vector<2x64xf32>
    %946 = arith.truncf %945 : vector<2x64xf32> to vector<2x64xbf16>
    %cst_227 = arith.constant dense<0.000000e+00> : vector<2x32xf32>
    %947 = tpu.matmul %946, %9, %cst_227 {dimension_numbers = #tpu.dot_dimension_numbers<[1], [0], [0], [1], [0, 0, 1, 1], [], []>} : vector<2x64xbf16>, vector<64x32xbf16>, vector<2x32xf32> -> vector<2x32xf32>
    %948 = vector.broadcast %10 : vector<1x32xf32> to vector<2x32xf32>
    %949 = arith.addf %947, %948 : vector<2x32xf32>
    %950 = vector.shape_cast %20 : vector<2x8x32xf32> to vector<16x32xf32>
    %951 = arith.truncf %950 : vector<16x32xf32> to vector<16x32xbf16>
    %cst_228 = arith.constant dense<0.000000e+00> : vector<16x32xf32>
    %952 = tpu.matmul %951, %11, %cst_228 {dimension_numbers = #tpu.dot_dimension_numbers<[1], [0], [0], [1], [0, 0, 1, 1], [], []>} : vector<16x32xbf16>, vector<32x32xbf16>, vector<16x32xf32> -> vector<16x32xf32>
    %953 = arith.truncf %949 : vector<2x32xf32> to vector<2x32xbf16>
    %cst_229 = arith.constant dense<0.000000e+00> : vector<2x32xf32>
    %954 = tpu.matmul %953, %12, %cst_229 {dimension_numbers = #tpu.dot_dimension_numbers<[1], [0], [0], [1], [0, 0, 1, 1], [], []>} : vector<2x32xbf16>, vector<32x32xbf16>, vector<2x32xf32> -> vector<2x32xf32>
    %955 = vector.shape_cast %952 : vector<16x32xf32> to vector<2x8x32xf32>
    %956 = vector.shape_cast %954 : vector<2x32xf32> to vector<2x1x32xf32>
    %957 = vector.broadcast %956 : vector<2x1x32xf32> to vector<2x8x32xf32>
    %958 = arith.addf %955, %957 : vector<2x8x32xf32>
    %959 = math.tanh %958 : vector<2x8x32xf32>
    %960 = vector.shape_cast %959 : vector<2x8x32xf32> to vector<16x32xf32>
    %961 = arith.truncf %960 : vector<16x32xf32> to vector<16x32xbf16>
    %cst_230 = arith.constant dense<0.000000e+00> : vector<16x32xf32>
    %962 = tpu.matmul %961, %13, %cst_230 {dimension_numbers = #tpu.dot_dimension_numbers<[1], [0], [0], [1], [0, 0, 1, 1], [], []>} : vector<16x32xbf16>, vector<32x32xbf16>, vector<16x32xf32> -> vector<16x32xf32>
    %963 = math.tanh %962 : vector<16x32xf32>
    %964 = vector.shape_cast %963 : vector<16x32xf32> to vector<2x8x32xf32>
    %965 = vector.shape_cast %14 : vector<1x32xf32> to vector<1x1x32xf32>
    %966 = vector.broadcast %965 : vector<1x1x32xf32> to vector<2x8x32xf32>
    %967 = arith.mulf %964, %966 : vector<2x8x32xf32>
    %cst_231 = arith.constant dense<0.000000e+00> : vector<2x8xf32>
    %968 = vector.multi_reduction <add>, %967, %cst_231 [2] : vector<2x8x32xf32> to vector<2x8xf32>
    %969 = vector.broadcast %15 : vector<1x1xf32> to vector<2x8xf32>
    %970 = arith.addf %968, %969 : vector<2x8xf32>
    %cst_232 = arith.constant dense<0xFF800000> : vector<2xf32>
    %971 = vector.multi_reduction <maximumf>, %970, %cst_232 [1] : vector<2x8xf32> to vector<2xf32>
    %cst_233 = arith.constant 0xFF800000 : f32
    %972 = vector.broadcast %cst_233 : f32 to vector<2xf32>
    %973 = arith.maximumf %972, %971 : vector<2xf32>
    %974 = vector.shape_cast %973 : vector<2xf32> to vector<2x1xf32>
    %975 = vector.broadcast %974 : vector<2x1xf32> to vector<2x8xf32>
    %976 = arith.subf %970, %975 : vector<2x8xf32>
    %977 = math.exp %976 : vector<2x8xf32>
    %cst_234 = arith.constant dense<0.000000e+00> : vector<2xf32>
    %978 = vector.multi_reduction <add>, %977, %cst_234 [1] : vector<2x8xf32> to vector<2xf32>
    %979 = vector.shape_cast %978 : vector<2xf32> to vector<2x1xf32>
    %980 = vector.broadcast %979 : vector<2x1xf32> to vector<2x8xf32>
    %981 = arith.divf %977, %980 : vector<2x8xf32>
    %982 = vector.shape_cast %981 : vector<2x8xf32> to vector<2x8x1xf32>
    %983 = vector.broadcast %982 : vector<2x8x1xf32> to vector<2x8x32xf32>
    %984 = arith.mulf %983, %20 : vector<2x8x32xf32>
    %cst_235 = arith.constant dense<0.000000e+00> : vector<2x32xf32>
    %985 = vector.multi_reduction <add>, %984, %cst_235 [1] : vector<2x8x32xf32> to vector<2x32xf32>
    %986 = arith.truncf %949 : vector<2x32xf32> to vector<2x32xbf16>
    %cst_236 = arith.constant dense<0.000000e+00> : vector<2x32xf32>
    %987 = tpu.matmul %986, %16, %cst_236 {dimension_numbers = #tpu.dot_dimension_numbers<[1], [0], [0], [1], [0, 0, 1, 1], [], []>} : vector<2x32xbf16>, vector<32x32xbf16>, vector<2x32xf32> -> vector<2x32xf32>
    %988 = arith.truncf %985 : vector<2x32xf32> to vector<2x32xbf16>
    %cst_237 = arith.constant dense<0.000000e+00> : vector<2x32xf32>
    %989 = tpu.matmul %988, %17, %cst_237 {dimension_numbers = #tpu.dot_dimension_numbers<[1], [0], [0], [1], [0, 0, 1, 1], [], []>} : vector<2x32xbf16>, vector<32x32xbf16>, vector<2x32xf32> -> vector<2x32xf32>
    %990 = arith.addf %987, %989 : vector<2x32xf32>
    %991 = vector.broadcast %18 : vector<1x32xf32> to vector<2x32xf32>
    %992 = arith.addf %990, %991 : vector<2x32xf32>
    %993 = math.tanh %992 : vector<2x32xf32>
    %994 = arith.truncf %993 : vector<2x32xf32> to vector<2x32xbf16>
    %cst_238 = arith.constant dense<0.000000e+00> : vector<2x64xf32>
    %995 = tpu.matmul %994, %19, %cst_238 {dimension_numbers = #tpu.dot_dimension_numbers<[1], [0], [0], [1], [0, 0, 1, 1], [], []>} : vector<2x32xbf16>, vector<32x64xbf16>, vector<2x64xf32> -> vector<2x64xf32>
    %c3_239 = arith.constant 3 : index
    %c0_240 = arith.constant 0 : index
    %c0_241 = arith.constant 0 : index
    %996 = vector.load %arg32[%c3_239, %c0_240, %c0_241] : memref<6x2x64xf32, #tpu.memory_space<vmem>>, vector<1x2x64xf32>
    %997 = vector.shape_cast %996 : vector<1x2x64xf32> to vector<2x64xf32>
    %998 = vector.shape_cast %995 : vector<2x64xf32> to vector<1x2x64xf32>
    tpu.vector_store %arg32[%c3_239, %c0_240, %c0_241], %998 {strides = array<i32>} : memref<6x2x64xf32, #tpu.memory_space<vmem>>, vector<1x2x64xf32>,
    %999 = vector.shape_cast %993 : vector<2x32xf32> to vector<2x1x32xf32>
    %1000 = vector.broadcast %999 : vector<2x1x32xf32> to vector<2x10x32xf32>
    %1001 = arith.mulf %21, %1000 : vector<2x10x32xf32>
    %cst_242 = arith.constant dense<0.000000e+00> : vector<2x10xf32>
    %1002 = vector.multi_reduction <add>, %1001, %cst_242 [2] : vector<2x10x32xf32> to vector<2x10xf32>
    %1003 = arith.mulf %1002, %22 : vector<2x10xf32>
    %c3_243 = arith.constant 3 : index
    %c0_244 = arith.constant 0 : index
    %c0_245 = arith.constant 0 : index
    %1004 = vector.load %arg33[%c3_243, %c0_244, %c0_245] : memref<6x2x10xf32, #tpu.memory_space<vmem>>, vector<1x2x10xf32>
    %1005 = vector.shape_cast %1004 : vector<1x2x10xf32> to vector<2x10xf32>
    %1006 = vector.shape_cast %1003 : vector<2x10xf32> to vector<1x2x10xf32>
    tpu.vector_store %arg33[%c3_243, %c0_244, %c0_245], %1006 {strides = array<i32>} : memref<6x2x10xf32, #tpu.memory_space<vmem>>, vector<1x2x10xf32>,
    %c4 = arith.constant 4 : index
    %c0_246 = arith.constant 0 : index
    %c0_247 = arith.constant 0 : index
    %1007 = vector.load %arg0[%c4, %c0_246, %c0_247] : memref<6x2x32xf32, #tpu.memory_space<vmem>>, vector<1x2x32xf32>
    %1008 = vector.shape_cast %1007 : vector<1x2x32xf32> to vector<2x32xf32>
    %1009 = arith.truncf %1008 : vector<2x32xf32> to vector<2x32xbf16>
    %cst_248 = arith.constant dense<0.000000e+00> : vector<2x384xf32>
    %1010 = tpu.matmul %1009, %0, %cst_248 {dimension_numbers = #tpu.dot_dimension_numbers<[1], [0], [0], [1], [0, 0, 1, 1], [], []>} : vector<2x32xbf16>, vector<32x384xbf16>, vector<2x384xf32> -> vector<2x384xf32>
    %1011 = vector.broadcast %1 : vector<1x384xf32> to vector<2x384xf32>
    %1012 = arith.addf %1010, %1011 : vector<2x384xf32>
    %1013 = arith.truncf %902 : vector<4x2x32xf32> to vector<4x2x32xbf16>
    "tpu.trace_start"() <{level = 10 : i32, message = "kbh,kgh->kbg"}> : () -> ()
    %cst_249 = arith.constant dense<0.000000e+00> : vector<4x2x96xf32>
    %1014 = tpu.matmul %1013, %2, %cst_249 {dimension_numbers = #tpu.dot_dimension_numbers<[2], [2], [1], [1], [0, 0, 0, 1, 1, 1], [0], [0]>} : vector<4x2x32xbf16>, vector<4x96x32xbf16>, vector<4x2x96xf32> -> vector<4x2x96xf32>
    "tpu.trace_stop"() : () -> ()
    %1015 = vector.broadcast %3 : vector<4x1x96xf32> to vector<4x2x96xf32>
    %1016 = arith.addf %1014, %1015 : vector<4x2x96xf32>
    %1017 = vector.extract_strided_slice %1012 {offsets = [0, 0], sizes = [2, 96], strides = [1, 1]} : vector<2x384xf32> to vector<2x96xf32>
    %1018 = vector.extract_strided_slice %1016 {offsets = [0, 0, 0], sizes = [1, 2, 96], strides = [1, 1, 1]} : vector<4x2x96xf32> to vector<1x2x96xf32>
    %1019 = vector.shape_cast %1018 : vector<1x2x96xf32> to vector<2x96xf32>
    %1020 = vector.extract_strided_slice %1017 {offsets = [0, 0], sizes = [2, 32], strides = [1, 1]} : vector<2x96xf32> to vector<2x32xf32>
    %1021 = vector.extract_strided_slice %1019 {offsets = [0, 0], sizes = [2, 32], strides = [1, 1]} : vector<2x96xf32> to vector<2x32xf32>
    %1022 = arith.addf %1020, %1021 : vector<2x32xf32>
    %1023 = arith.negf %1022 : vector<2x32xf32>
    %1024 = math.exp %1023 : vector<2x32xf32>
    %cst_250 = arith.constant 1.000000e+00 : f32
    %1025 = vector.broadcast %cst_250 : f32 to vector<2x32xf32>
    %1026 = arith.addf %1025, %1024 : vector<2x32xf32>
    %1027 = arith.divf %1025, %1026 : vector<2x32xf32>
    %1028 = vector.extract_strided_slice %1017 {offsets = [0, 32], sizes = [2, 32], strides = [1, 1]} : vector<2x96xf32> to vector<2x32xf32>
    %1029 = vector.extract_strided_slice %1019 {offsets = [0, 32], sizes = [2, 32], strides = [1, 1]} : vector<2x96xf32> to vector<2x32xf32>
    %1030 = arith.addf %1028, %1029 : vector<2x32xf32>
    %1031 = arith.negf %1030 : vector<2x32xf32>
    %1032 = math.exp %1031 : vector<2x32xf32>
    %cst_251 = arith.constant 1.000000e+00 : f32
    %1033 = vector.broadcast %cst_251 : f32 to vector<2x32xf32>
    %1034 = arith.addf %1033, %1032 : vector<2x32xf32>
    %1035 = arith.divf %1033, %1034 : vector<2x32xf32>
    %1036 = vector.extract_strided_slice %1017 {offsets = [0, 64], sizes = [2, 32], strides = [1, 1]} : vector<2x96xf32> to vector<2x32xf32>
    %1037 = vector.extract_strided_slice %1019 {offsets = [0, 64], sizes = [2, 32], strides = [1, 1]} : vector<2x96xf32> to vector<2x32xf32>
    %1038 = arith.mulf %1027, %1037 : vector<2x32xf32>
    %1039 = arith.addf %1036, %1038 : vector<2x32xf32>
    %1040 = math.tanh %1039 : vector<2x32xf32>
    %cst_252 = arith.constant 1.000000e+00 : f32
    %1041 = vector.broadcast %cst_252 : f32 to vector<2x32xf32>
    %1042 = arith.subf %1041, %1035 : vector<2x32xf32>
    %1043 = arith.mulf %1042, %1040 : vector<2x32xf32>
    %1044 = vector.extract_strided_slice %902 {offsets = [0, 0, 0], sizes = [1, 2, 32], strides = [1, 1, 1]} : vector<4x2x32xf32> to vector<1x2x32xf32>
    %1045 = vector.shape_cast %1044 : vector<1x2x32xf32> to vector<2x32xf32>
    %1046 = arith.mulf %1035, %1045 : vector<2x32xf32>
    %1047 = arith.addf %1043, %1046 : vector<2x32xf32>
    %1048 = vector.extract_strided_slice %1012 {offsets = [0, 96], sizes = [2, 96], strides = [1, 1]} : vector<2x384xf32> to vector<2x96xf32>
    %1049 = vector.extract_strided_slice %1016 {offsets = [1, 0, 0], sizes = [1, 2, 96], strides = [1, 1, 1]} : vector<4x2x96xf32> to vector<1x2x96xf32>
    %1050 = vector.shape_cast %1049 : vector<1x2x96xf32> to vector<2x96xf32>
    %1051 = vector.extract_strided_slice %1048 {offsets = [0, 0], sizes = [2, 32], strides = [1, 1]} : vector<2x96xf32> to vector<2x32xf32>
    %1052 = vector.extract_strided_slice %1050 {offsets = [0, 0], sizes = [2, 32], strides = [1, 1]} : vector<2x96xf32> to vector<2x32xf32>
    %1053 = arith.addf %1051, %1052 : vector<2x32xf32>
    %1054 = arith.negf %1053 : vector<2x32xf32>
    %1055 = math.exp %1054 : vector<2x32xf32>
    %cst_253 = arith.constant 1.000000e+00 : f32
    %1056 = vector.broadcast %cst_253 : f32 to vector<2x32xf32>
    %1057 = arith.addf %1056, %1055 : vector<2x32xf32>
    %1058 = arith.divf %1056, %1057 : vector<2x32xf32>
    %1059 = vector.extract_strided_slice %1048 {offsets = [0, 32], sizes = [2, 32], strides = [1, 1]} : vector<2x96xf32> to vector<2x32xf32>
    %1060 = vector.extract_strided_slice %1050 {offsets = [0, 32], sizes = [2, 32], strides = [1, 1]} : vector<2x96xf32> to vector<2x32xf32>
    %1061 = arith.addf %1059, %1060 : vector<2x32xf32>
    %1062 = arith.negf %1061 : vector<2x32xf32>
    %1063 = math.exp %1062 : vector<2x32xf32>
    %cst_254 = arith.constant 1.000000e+00 : f32
    %1064 = vector.broadcast %cst_254 : f32 to vector<2x32xf32>
    %1065 = arith.addf %1064, %1063 : vector<2x32xf32>
    %1066 = arith.divf %1064, %1065 : vector<2x32xf32>
    %1067 = vector.extract_strided_slice %1048 {offsets = [0, 64], sizes = [2, 32], strides = [1, 1]} : vector<2x96xf32> to vector<2x32xf32>
    %1068 = vector.extract_strided_slice %1050 {offsets = [0, 64], sizes = [2, 32], strides = [1, 1]} : vector<2x96xf32> to vector<2x32xf32>
    %1069 = arith.mulf %1058, %1068 : vector<2x32xf32>
    %1070 = arith.addf %1067, %1069 : vector<2x32xf32>
    %1071 = math.tanh %1070 : vector<2x32xf32>
    %cst_255 = arith.constant 1.000000e+00 : f32
    %1072 = vector.broadcast %cst_255 : f32 to vector<2x32xf32>
    %1073 = arith.subf %1072, %1066 : vector<2x32xf32>
    %1074 = arith.mulf %1073, %1071 : vector<2x32xf32>
    %1075 = vector.extract_strided_slice %902 {offsets = [1, 0, 0], sizes = [1, 2, 32], strides = [1, 1, 1]} : vector<4x2x32xf32> to vector<1x2x32xf32>
    %1076 = vector.shape_cast %1075 : vector<1x2x32xf32> to vector<2x32xf32>
    %1077 = arith.mulf %1066, %1076 : vector<2x32xf32>
    %1078 = arith.addf %1074, %1077 : vector<2x32xf32>
    %1079 = vector.extract_strided_slice %1012 {offsets = [0, 192], sizes = [2, 96], strides = [1, 1]} : vector<2x384xf32> to vector<2x96xf32>
    %1080 = vector.extract_strided_slice %1016 {offsets = [2, 0, 0], sizes = [1, 2, 96], strides = [1, 1, 1]} : vector<4x2x96xf32> to vector<1x2x96xf32>
    %1081 = vector.shape_cast %1080 : vector<1x2x96xf32> to vector<2x96xf32>
    %1082 = vector.extract_strided_slice %1079 {offsets = [0, 0], sizes = [2, 32], strides = [1, 1]} : vector<2x96xf32> to vector<2x32xf32>
    %1083 = vector.extract_strided_slice %1081 {offsets = [0, 0], sizes = [2, 32], strides = [1, 1]} : vector<2x96xf32> to vector<2x32xf32>
    %1084 = arith.addf %1082, %1083 : vector<2x32xf32>
    %1085 = arith.negf %1084 : vector<2x32xf32>
    %1086 = math.exp %1085 : vector<2x32xf32>
    %cst_256 = arith.constant 1.000000e+00 : f32
    %1087 = vector.broadcast %cst_256 : f32 to vector<2x32xf32>
    %1088 = arith.addf %1087, %1086 : vector<2x32xf32>
    %1089 = arith.divf %1087, %1088 : vector<2x32xf32>
    %1090 = vector.extract_strided_slice %1079 {offsets = [0, 32], sizes = [2, 32], strides = [1, 1]} : vector<2x96xf32> to vector<2x32xf32>
    %1091 = vector.extract_strided_slice %1081 {offsets = [0, 32], sizes = [2, 32], strides = [1, 1]} : vector<2x96xf32> to vector<2x32xf32>
    %1092 = arith.addf %1090, %1091 : vector<2x32xf32>
    %1093 = arith.negf %1092 : vector<2x32xf32>
    %1094 = math.exp %1093 : vector<2x32xf32>
    %cst_257 = arith.constant 1.000000e+00 : f32
    %1095 = vector.broadcast %cst_257 : f32 to vector<2x32xf32>
    %1096 = arith.addf %1095, %1094 : vector<2x32xf32>
    %1097 = arith.divf %1095, %1096 : vector<2x32xf32>
    %1098 = vector.extract_strided_slice %1079 {offsets = [0, 64], sizes = [2, 32], strides = [1, 1]} : vector<2x96xf32> to vector<2x32xf32>
    %1099 = vector.extract_strided_slice %1081 {offsets = [0, 64], sizes = [2, 32], strides = [1, 1]} : vector<2x96xf32> to vector<2x32xf32>
    %1100 = arith.mulf %1089, %1099 : vector<2x32xf32>
    %1101 = arith.addf %1098, %1100 : vector<2x32xf32>
    %1102 = math.tanh %1101 : vector<2x32xf32>
    %cst_258 = arith.constant 1.000000e+00 : f32
    %1103 = vector.broadcast %cst_258 : f32 to vector<2x32xf32>
    %1104 = arith.subf %1103, %1097 : vector<2x32xf32>
    %1105 = arith.mulf %1104, %1102 : vector<2x32xf32>
    %1106 = vector.extract_strided_slice %902 {offsets = [2, 0, 0], sizes = [1, 2, 32], strides = [1, 1, 1]} : vector<4x2x32xf32> to vector<1x2x32xf32>
    %1107 = vector.shape_cast %1106 : vector<1x2x32xf32> to vector<2x32xf32>
    %1108 = arith.mulf %1097, %1107 : vector<2x32xf32>
    %1109 = arith.addf %1105, %1108 : vector<2x32xf32>
    %1110 = vector.extract_strided_slice %1012 {offsets = [0, 288], sizes = [2, 96], strides = [1, 1]} : vector<2x384xf32> to vector<2x96xf32>
    %1111 = vector.extract_strided_slice %1016 {offsets = [3, 0, 0], sizes = [1, 2, 96], strides = [1, 1, 1]} : vector<4x2x96xf32> to vector<1x2x96xf32>
    %1112 = vector.shape_cast %1111 : vector<1x2x96xf32> to vector<2x96xf32>
    %1113 = vector.extract_strided_slice %1110 {offsets = [0, 0], sizes = [2, 32], strides = [1, 1]} : vector<2x96xf32> to vector<2x32xf32>
    %1114 = vector.extract_strided_slice %1112 {offsets = [0, 0], sizes = [2, 32], strides = [1, 1]} : vector<2x96xf32> to vector<2x32xf32>
    %1115 = arith.addf %1113, %1114 : vector<2x32xf32>
    %1116 = arith.negf %1115 : vector<2x32xf32>
    %1117 = math.exp %1116 : vector<2x32xf32>
    %cst_259 = arith.constant 1.000000e+00 : f32
    %1118 = vector.broadcast %cst_259 : f32 to vector<2x32xf32>
    %1119 = arith.addf %1118, %1117 : vector<2x32xf32>
    %1120 = arith.divf %1118, %1119 : vector<2x32xf32>
    %1121 = vector.extract_strided_slice %1110 {offsets = [0, 32], sizes = [2, 32], strides = [1, 1]} : vector<2x96xf32> to vector<2x32xf32>
    %1122 = vector.extract_strided_slice %1112 {offsets = [0, 32], sizes = [2, 32], strides = [1, 1]} : vector<2x96xf32> to vector<2x32xf32>
    %1123 = arith.addf %1121, %1122 : vector<2x32xf32>
    %1124 = arith.negf %1123 : vector<2x32xf32>
    %1125 = math.exp %1124 : vector<2x32xf32>
    %cst_260 = arith.constant 1.000000e+00 : f32
    %1126 = vector.broadcast %cst_260 : f32 to vector<2x32xf32>
    %1127 = arith.addf %1126, %1125 : vector<2x32xf32>
    %1128 = arith.divf %1126, %1127 : vector<2x32xf32>
    %1129 = vector.extract_strided_slice %1110 {offsets = [0, 64], sizes = [2, 32], strides = [1, 1]} : vector<2x96xf32> to vector<2x32xf32>
    %1130 = vector.extract_strided_slice %1112 {offsets = [0, 64], sizes = [2, 32], strides = [1, 1]} : vector<2x96xf32> to vector<2x32xf32>
    %1131 = arith.mulf %1120, %1130 : vector<2x32xf32>
    %1132 = arith.addf %1129, %1131 : vector<2x32xf32>
    %1133 = math.tanh %1132 : vector<2x32xf32>
    %cst_261 = arith.constant 1.000000e+00 : f32
    %1134 = vector.broadcast %cst_261 : f32 to vector<2x32xf32>
    %1135 = arith.subf %1134, %1128 : vector<2x32xf32>
    %1136 = arith.mulf %1135, %1133 : vector<2x32xf32>
    %1137 = vector.extract_strided_slice %902 {offsets = [3, 0, 0], sizes = [1, 2, 32], strides = [1, 1, 1]} : vector<4x2x32xf32> to vector<1x2x32xf32>
    %1138 = vector.shape_cast %1137 : vector<1x2x32xf32> to vector<2x32xf32>
    %1139 = arith.mulf %1128, %1138 : vector<2x32xf32>
    %1140 = arith.addf %1136, %1139 : vector<2x32xf32>
    %1141 = vector.shape_cast %1047 : vector<2x32xf32> to vector<1x2x32xf32>
    %1142 = vector.shape_cast %1078 : vector<2x32xf32> to vector<1x2x32xf32>
    %1143 = vector.shape_cast %1109 : vector<2x32xf32> to vector<1x2x32xf32>
    %1144 = vector.shape_cast %1140 : vector<2x32xf32> to vector<1x2x32xf32>
    %1145 = tpu.concatenate %1141, %1142, %1143, %1144 in 0 : vector<1x2x32xf32>, vector<1x2x32xf32>, vector<1x2x32xf32>, vector<1x2x32xf32> -> vector<4x2x32xf32>
    %1146 = vector.extract_strided_slice %1145 {offsets = [1, 0, 0], sizes = [3, 2, 32], strides = [1, 1, 1]} : vector<4x2x32xf32> to vector<3x2x32xf32>
    %1147 = arith.truncf %1146 : vector<3x2x32xf32> to vector<3x2x32xbf16>
    "tpu.trace_start"() <{level = 10 : i32, message = "dbh,doh->dbo"}> : () -> ()
    %cst_262 = arith.constant dense<0.000000e+00> : vector<3x2x3xf32>
    %1148 = tpu.matmul %1147, %4, %cst_262 {dimension_numbers = #tpu.dot_dimension_numbers<[2], [2], [1], [1], [0, 0, 0, 1, 1, 1], [0], [0]>} : vector<3x2x32xbf16>, vector<3x3x32xbf16>, vector<3x2x3xf32> -> vector<3x2x3xf32>
    "tpu.trace_stop"() : () -> ()
    %cst_263 = arith.constant dense<0.000000e+00> : vector<2x3xf32>
    %1149 = vector.multi_reduction <add>, %1148, %cst_263 [0] : vector<3x2x3xf32> to vector<2x3xf32>
    %1150 = vector.broadcast %5 : vector<1x3xf32> to vector<2x3xf32>
    %1151 = arith.addf %1149, %1150 : vector<2x3xf32>
    %cst_264 = arith.constant dense<0xFF800000> : vector<2xf32>
    %1152 = vector.multi_reduction <maximumf>, %1151, %cst_264 [1] : vector<2x3xf32> to vector<2xf32>
    %cst_265 = arith.constant 0xFF800000 : f32
    %1153 = vector.broadcast %cst_265 : f32 to vector<2xf32>
    %1154 = arith.maximumf %1153, %1152 : vector<2xf32>
    %1155 = vector.shape_cast %1154 : vector<2xf32> to vector<2x1xf32>
    %1156 = vector.broadcast %1155 : vector<2x1xf32> to vector<2x3xf32>
    %1157 = arith.subf %1151, %1156 : vector<2x3xf32>
    %1158 = math.exp %1157 : vector<2x3xf32>
    %cst_266 = arith.constant dense<0.000000e+00> : vector<2xf32>
    %1159 = vector.multi_reduction <add>, %1158, %cst_266 [1] : vector<2x3xf32> to vector<2xf32>
    %1160 = vector.shape_cast %1159 : vector<2xf32> to vector<2x1xf32>
    %1161 = vector.broadcast %1160 : vector<2x1xf32> to vector<2x3xf32>
    %1162 = arith.divf %1158, %1161 : vector<2x3xf32>
    %1163 = vector.extract_strided_slice %1162 {offsets = [0, 0], sizes = [2, 1], strides = [1, 1]} : vector<2x3xf32> to vector<2x1xf32>
    %1164 = vector.broadcast %1163 : vector<2x1xf32> to vector<2x32xf32>
    %1165 = arith.mulf %1164, %1078 : vector<2x32xf32>
    %1166 = vector.extract_strided_slice %1162 {offsets = [0, 1], sizes = [2, 1], strides = [1, 1]} : vector<2x3xf32> to vector<2x1xf32>
    %1167 = vector.broadcast %1166 : vector<2x1xf32> to vector<2x32xf32>
    %1168 = arith.mulf %1167, %1109 : vector<2x32xf32>
    %1169 = arith.addf %1165, %1168 : vector<2x32xf32>
    %1170 = vector.extract_strided_slice %1162 {offsets = [0, 2], sizes = [2, 1], strides = [1, 1]} : vector<2x3xf32> to vector<2x1xf32>
    %1171 = vector.broadcast %1170 : vector<2x1xf32> to vector<2x32xf32>
    %1172 = arith.mulf %1171, %1140 : vector<2x32xf32>
    %1173 = arith.addf %1169, %1172 : vector<2x32xf32>
    %c4_267 = arith.constant 4 : index
    %c0_268 = arith.constant 0 : index
    %c0_269 = arith.constant 0 : index
    %1174 = vector.load %arg34[%c4_267, %c0_268, %c0_269] : memref<6x2x3xf32, #tpu.memory_space<vmem>>, vector<1x2x3xf32>
    %1175 = vector.shape_cast %1174 : vector<1x2x3xf32> to vector<2x3xf32>
    %1176 = vector.shape_cast %1151 : vector<2x3xf32> to vector<1x2x3xf32>
    tpu.vector_store %arg34[%c4_267, %c0_268, %c0_269], %1176 {strides = array<i32>} : memref<6x2x3xf32, #tpu.memory_space<vmem>>, vector<1x2x3xf32>,
    %1177 = arith.truncf %1047 : vector<2x32xf32> to vector<2x32xbf16>
    %cst_270 = arith.constant dense<0.000000e+00> : vector<2x64xf32>
    %1178 = tpu.matmul %1177, %6, %cst_270 {dimension_numbers = #tpu.dot_dimension_numbers<[1], [0], [0], [1], [0, 0, 1, 1], [], []>} : vector<2x32xbf16>, vector<32x64xbf16>, vector<2x64xf32> -> vector<2x64xf32>
    %1179 = arith.truncf %1173 : vector<2x32xf32> to vector<2x32xbf16>
    %cst_271 = arith.constant dense<0.000000e+00> : vector<2x64xf32>
    %1180 = tpu.matmul %1179, %7, %cst_271 {dimension_numbers = #tpu.dot_dimension_numbers<[1], [0], [0], [1], [0, 0, 1, 1], [], []>} : vector<2x32xbf16>, vector<32x64xbf16>, vector<2x64xf32> -> vector<2x64xf32>
    %1181 = arith.addf %1178, %1180 : vector<2x64xf32>
    %1182 = vector.broadcast %8 : vector<1x64xf32> to vector<2x64xf32>
    %1183 = arith.addf %1181, %1182 : vector<2x64xf32>
    %cst_272 = arith.constant 0.000000e+00 : f32
    %1184 = vector.broadcast %cst_272 : f32 to vector<2x64xf32>
    %1185 = arith.cmpf oge, %1183, %1184 : vector<2x64xf32>
    %cst_273 = arith.constant 1.000000e-01 : f32
    %1186 = vector.broadcast %cst_273 : f32 to vector<2x64xf32>
    %1187 = arith.mulf %1186, %1183 : vector<2x64xf32>
    %1188 = arith.select %1185, %1183, %1187 : vector<2x64xi1>, vector<2x64xf32>
    %1189 = arith.truncf %1188 : vector<2x64xf32> to vector<2x64xbf16>
    %cst_274 = arith.constant dense<0.000000e+00> : vector<2x32xf32>
    %1190 = tpu.matmul %1189, %9, %cst_274 {dimension_numbers = #tpu.dot_dimension_numbers<[1], [0], [0], [1], [0, 0, 1, 1], [], []>} : vector<2x64xbf16>, vector<64x32xbf16>, vector<2x32xf32> -> vector<2x32xf32>
    %1191 = vector.broadcast %10 : vector<1x32xf32> to vector<2x32xf32>
    %1192 = arith.addf %1190, %1191 : vector<2x32xf32>
    %1193 = vector.shape_cast %20 : vector<2x8x32xf32> to vector<16x32xf32>
    %1194 = arith.truncf %1193 : vector<16x32xf32> to vector<16x32xbf16>
    %cst_275 = arith.constant dense<0.000000e+00> : vector<16x32xf32>
    %1195 = tpu.matmul %1194, %11, %cst_275 {dimension_numbers = #tpu.dot_dimension_numbers<[1], [0], [0], [1], [0, 0, 1, 1], [], []>} : vector<16x32xbf16>, vector<32x32xbf16>, vector<16x32xf32> -> vector<16x32xf32>
    %1196 = arith.truncf %1192 : vector<2x32xf32> to vector<2x32xbf16>
    %cst_276 = arith.constant dense<0.000000e+00> : vector<2x32xf32>
    %1197 = tpu.matmul %1196, %12, %cst_276 {dimension_numbers = #tpu.dot_dimension_numbers<[1], [0], [0], [1], [0, 0, 1, 1], [], []>} : vector<2x32xbf16>, vector<32x32xbf16>, vector<2x32xf32> -> vector<2x32xf32>
    %1198 = vector.shape_cast %1195 : vector<16x32xf32> to vector<2x8x32xf32>
    %1199 = vector.shape_cast %1197 : vector<2x32xf32> to vector<2x1x32xf32>
    %1200 = vector.broadcast %1199 : vector<2x1x32xf32> to vector<2x8x32xf32>
    %1201 = arith.addf %1198, %1200 : vector<2x8x32xf32>
    %1202 = math.tanh %1201 : vector<2x8x32xf32>
    %1203 = vector.shape_cast %1202 : vector<2x8x32xf32> to vector<16x32xf32>
    %1204 = arith.truncf %1203 : vector<16x32xf32> to vector<16x32xbf16>
    %cst_277 = arith.constant dense<0.000000e+00> : vector<16x32xf32>
    %1205 = tpu.matmul %1204, %13, %cst_277 {dimension_numbers = #tpu.dot_dimension_numbers<[1], [0], [0], [1], [0, 0, 1, 1], [], []>} : vector<16x32xbf16>, vector<32x32xbf16>, vector<16x32xf32> -> vector<16x32xf32>
    %1206 = math.tanh %1205 : vector<16x32xf32>
    %1207 = vector.shape_cast %1206 : vector<16x32xf32> to vector<2x8x32xf32>
    %1208 = vector.shape_cast %14 : vector<1x32xf32> to vector<1x1x32xf32>
    %1209 = vector.broadcast %1208 : vector<1x1x32xf32> to vector<2x8x32xf32>
    %1210 = arith.mulf %1207, %1209 : vector<2x8x32xf32>
    %cst_278 = arith.constant dense<0.000000e+00> : vector<2x8xf32>
    %1211 = vector.multi_reduction <add>, %1210, %cst_278 [2] : vector<2x8x32xf32> to vector<2x8xf32>
    %1212 = vector.broadcast %15 : vector<1x1xf32> to vector<2x8xf32>
    %1213 = arith.addf %1211, %1212 : vector<2x8xf32>
    %cst_279 = arith.constant dense<0xFF800000> : vector<2xf32>
    %1214 = vector.multi_reduction <maximumf>, %1213, %cst_279 [1] : vector<2x8xf32> to vector<2xf32>
    %cst_280 = arith.constant 0xFF800000 : f32
    %1215 = vector.broadcast %cst_280 : f32 to vector<2xf32>
    %1216 = arith.maximumf %1215, %1214 : vector<2xf32>
    %1217 = vector.shape_cast %1216 : vector<2xf32> to vector<2x1xf32>
    %1218 = vector.broadcast %1217 : vector<2x1xf32> to vector<2x8xf32>
    %1219 = arith.subf %1213, %1218 : vector<2x8xf32>
    %1220 = math.exp %1219 : vector<2x8xf32>
    %cst_281 = arith.constant dense<0.000000e+00> : vector<2xf32>
    %1221 = vector.multi_reduction <add>, %1220, %cst_281 [1] : vector<2x8xf32> to vector<2xf32>
    %1222 = vector.shape_cast %1221 : vector<2xf32> to vector<2x1xf32>
    %1223 = vector.broadcast %1222 : vector<2x1xf32> to vector<2x8xf32>
    %1224 = arith.divf %1220, %1223 : vector<2x8xf32>
    %1225 = vector.shape_cast %1224 : vector<2x8xf32> to vector<2x8x1xf32>
    %1226 = vector.broadcast %1225 : vector<2x8x1xf32> to vector<2x8x32xf32>
    %1227 = arith.mulf %1226, %20 : vector<2x8x32xf32>
    %cst_282 = arith.constant dense<0.000000e+00> : vector<2x32xf32>
    %1228 = vector.multi_reduction <add>, %1227, %cst_282 [1] : vector<2x8x32xf32> to vector<2x32xf32>
    %1229 = arith.truncf %1192 : vector<2x32xf32> to vector<2x32xbf16>
    %cst_283 = arith.constant dense<0.000000e+00> : vector<2x32xf32>
    %1230 = tpu.matmul %1229, %16, %cst_283 {dimension_numbers = #tpu.dot_dimension_numbers<[1], [0], [0], [1], [0, 0, 1, 1], [], []>} : vector<2x32xbf16>, vector<32x32xbf16>, vector<2x32xf32> -> vector<2x32xf32>
    %1231 = arith.truncf %1228 : vector<2x32xf32> to vector<2x32xbf16>
    %cst_284 = arith.constant dense<0.000000e+00> : vector<2x32xf32>
    %1232 = tpu.matmul %1231, %17, %cst_284 {dimension_numbers = #tpu.dot_dimension_numbers<[1], [0], [0], [1], [0, 0, 1, 1], [], []>} : vector<2x32xbf16>, vector<32x32xbf16>, vector<2x32xf32> -> vector<2x32xf32>
    %1233 = arith.addf %1230, %1232 : vector<2x32xf32>
    %1234 = vector.broadcast %18 : vector<1x32xf32> to vector<2x32xf32>
    %1235 = arith.addf %1233, %1234 : vector<2x32xf32>
    %1236 = math.tanh %1235 : vector<2x32xf32>
    %1237 = arith.truncf %1236 : vector<2x32xf32> to vector<2x32xbf16>
    %cst_285 = arith.constant dense<0.000000e+00> : vector<2x64xf32>
    %1238 = tpu.matmul %1237, %19, %cst_285 {dimension_numbers = #tpu.dot_dimension_numbers<[1], [0], [0], [1], [0, 0, 1, 1], [], []>} : vector<2x32xbf16>, vector<32x64xbf16>, vector<2x64xf32> -> vector<2x64xf32>
    %c4_286 = arith.constant 4 : index
    %c0_287 = arith.constant 0 : index
    %c0_288 = arith.constant 0 : index
    %1239 = vector.load %arg32[%c4_286, %c0_287, %c0_288] : memref<6x2x64xf32, #tpu.memory_space<vmem>>, vector<1x2x64xf32>
    %1240 = vector.shape_cast %1239 : vector<1x2x64xf32> to vector<2x64xf32>
    %1241 = vector.shape_cast %1238 : vector<2x64xf32> to vector<1x2x64xf32>
    tpu.vector_store %arg32[%c4_286, %c0_287, %c0_288], %1241 {strides = array<i32>} : memref<6x2x64xf32, #tpu.memory_space<vmem>>, vector<1x2x64xf32>,
    %1242 = vector.shape_cast %1236 : vector<2x32xf32> to vector<2x1x32xf32>
    %1243 = vector.broadcast %1242 : vector<2x1x32xf32> to vector<2x10x32xf32>
    %1244 = arith.mulf %21, %1243 : vector<2x10x32xf32>
    %cst_289 = arith.constant dense<0.000000e+00> : vector<2x10xf32>
    %1245 = vector.multi_reduction <add>, %1244, %cst_289 [2] : vector<2x10x32xf32> to vector<2x10xf32>
    %1246 = arith.mulf %1245, %22 : vector<2x10xf32>
    %c4_290 = arith.constant 4 : index
    %c0_291 = arith.constant 0 : index
    %c0_292 = arith.constant 0 : index
    %1247 = vector.load %arg33[%c4_290, %c0_291, %c0_292] : memref<6x2x10xf32, #tpu.memory_space<vmem>>, vector<1x2x10xf32>
    %1248 = vector.shape_cast %1247 : vector<1x2x10xf32> to vector<2x10xf32>
    %1249 = vector.shape_cast %1246 : vector<2x10xf32> to vector<1x2x10xf32>
    tpu.vector_store %arg33[%c4_290, %c0_291, %c0_292], %1249 {strides = array<i32>} : memref<6x2x10xf32, #tpu.memory_space<vmem>>, vector<1x2x10xf32>,
    %c5 = arith.constant 5 : index
    %c0_293 = arith.constant 0 : index
    %c0_294 = arith.constant 0 : index
    %1250 = vector.load %arg0[%c5, %c0_293, %c0_294] : memref<6x2x32xf32, #tpu.memory_space<vmem>>, vector<1x2x32xf32>
    %1251 = vector.shape_cast %1250 : vector<1x2x32xf32> to vector<2x32xf32>
    %1252 = arith.truncf %1251 : vector<2x32xf32> to vector<2x32xbf16>
    %cst_295 = arith.constant dense<0.000000e+00> : vector<2x384xf32>
    %1253 = tpu.matmul %1252, %0, %cst_295 {dimension_numbers = #tpu.dot_dimension_numbers<[1], [0], [0], [1], [0, 0, 1, 1], [], []>} : vector<2x32xbf16>, vector<32x384xbf16>, vector<2x384xf32> -> vector<2x384xf32>
    %1254 = vector.broadcast %1 : vector<1x384xf32> to vector<2x384xf32>
    %1255 = arith.addf %1253, %1254 : vector<2x384xf32>
    %1256 = arith.truncf %1145 : vector<4x2x32xf32> to vector<4x2x32xbf16>
    "tpu.trace_start"() <{level = 10 : i32, message = "kbh,kgh->kbg"}> : () -> ()
    %cst_296 = arith.constant dense<0.000000e+00> : vector<4x2x96xf32>
    %1257 = tpu.matmul %1256, %2, %cst_296 {dimension_numbers = #tpu.dot_dimension_numbers<[2], [2], [1], [1], [0, 0, 0, 1, 1, 1], [0], [0]>} : vector<4x2x32xbf16>, vector<4x96x32xbf16>, vector<4x2x96xf32> -> vector<4x2x96xf32>
    "tpu.trace_stop"() : () -> ()
    %1258 = vector.broadcast %3 : vector<4x1x96xf32> to vector<4x2x96xf32>
    %1259 = arith.addf %1257, %1258 : vector<4x2x96xf32>
    %1260 = vector.extract_strided_slice %1255 {offsets = [0, 0], sizes = [2, 96], strides = [1, 1]} : vector<2x384xf32> to vector<2x96xf32>
    %1261 = vector.extract_strided_slice %1259 {offsets = [0, 0, 0], sizes = [1, 2, 96], strides = [1, 1, 1]} : vector<4x2x96xf32> to vector<1x2x96xf32>
    %1262 = vector.shape_cast %1261 : vector<1x2x96xf32> to vector<2x96xf32>
    %1263 = vector.extract_strided_slice %1260 {offsets = [0, 0], sizes = [2, 32], strides = [1, 1]} : vector<2x96xf32> to vector<2x32xf32>
    %1264 = vector.extract_strided_slice %1262 {offsets = [0, 0], sizes = [2, 32], strides = [1, 1]} : vector<2x96xf32> to vector<2x32xf32>
    %1265 = arith.addf %1263, %1264 : vector<2x32xf32>
    %1266 = arith.negf %1265 : vector<2x32xf32>
    %1267 = math.exp %1266 : vector<2x32xf32>
    %cst_297 = arith.constant 1.000000e+00 : f32
    %1268 = vector.broadcast %cst_297 : f32 to vector<2x32xf32>
    %1269 = arith.addf %1268, %1267 : vector<2x32xf32>
    %1270 = arith.divf %1268, %1269 : vector<2x32xf32>
    %1271 = vector.extract_strided_slice %1260 {offsets = [0, 32], sizes = [2, 32], strides = [1, 1]} : vector<2x96xf32> to vector<2x32xf32>
    %1272 = vector.extract_strided_slice %1262 {offsets = [0, 32], sizes = [2, 32], strides = [1, 1]} : vector<2x96xf32> to vector<2x32xf32>
    %1273 = arith.addf %1271, %1272 : vector<2x32xf32>
    %1274 = arith.negf %1273 : vector<2x32xf32>
    %1275 = math.exp %1274 : vector<2x32xf32>
    %cst_298 = arith.constant 1.000000e+00 : f32
    %1276 = vector.broadcast %cst_298 : f32 to vector<2x32xf32>
    %1277 = arith.addf %1276, %1275 : vector<2x32xf32>
    %1278 = arith.divf %1276, %1277 : vector<2x32xf32>
    %1279 = vector.extract_strided_slice %1260 {offsets = [0, 64], sizes = [2, 32], strides = [1, 1]} : vector<2x96xf32> to vector<2x32xf32>
    %1280 = vector.extract_strided_slice %1262 {offsets = [0, 64], sizes = [2, 32], strides = [1, 1]} : vector<2x96xf32> to vector<2x32xf32>
    %1281 = arith.mulf %1270, %1280 : vector<2x32xf32>
    %1282 = arith.addf %1279, %1281 : vector<2x32xf32>
    %1283 = math.tanh %1282 : vector<2x32xf32>
    %cst_299 = arith.constant 1.000000e+00 : f32
    %1284 = vector.broadcast %cst_299 : f32 to vector<2x32xf32>
    %1285 = arith.subf %1284, %1278 : vector<2x32xf32>
    %1286 = arith.mulf %1285, %1283 : vector<2x32xf32>
    %1287 = vector.extract_strided_slice %1145 {offsets = [0, 0, 0], sizes = [1, 2, 32], strides = [1, 1, 1]} : vector<4x2x32xf32> to vector<1x2x32xf32>
    %1288 = vector.shape_cast %1287 : vector<1x2x32xf32> to vector<2x32xf32>
    %1289 = arith.mulf %1278, %1288 : vector<2x32xf32>
    %1290 = arith.addf %1286, %1289 : vector<2x32xf32>
    %1291 = vector.extract_strided_slice %1255 {offsets = [0, 96], sizes = [2, 96], strides = [1, 1]} : vector<2x384xf32> to vector<2x96xf32>
    %1292 = vector.extract_strided_slice %1259 {offsets = [1, 0, 0], sizes = [1, 2, 96], strides = [1, 1, 1]} : vector<4x2x96xf32> to vector<1x2x96xf32>
    %1293 = vector.shape_cast %1292 : vector<1x2x96xf32> to vector<2x96xf32>
    %1294 = vector.extract_strided_slice %1291 {offsets = [0, 0], sizes = [2, 32], strides = [1, 1]} : vector<2x96xf32> to vector<2x32xf32>
    %1295 = vector.extract_strided_slice %1293 {offsets = [0, 0], sizes = [2, 32], strides = [1, 1]} : vector<2x96xf32> to vector<2x32xf32>
    %1296 = arith.addf %1294, %1295 : vector<2x32xf32>
    %1297 = arith.negf %1296 : vector<2x32xf32>
    %1298 = math.exp %1297 : vector<2x32xf32>
    %cst_300 = arith.constant 1.000000e+00 : f32
    %1299 = vector.broadcast %cst_300 : f32 to vector<2x32xf32>
    %1300 = arith.addf %1299, %1298 : vector<2x32xf32>
    %1301 = arith.divf %1299, %1300 : vector<2x32xf32>
    %1302 = vector.extract_strided_slice %1291 {offsets = [0, 32], sizes = [2, 32], strides = [1, 1]} : vector<2x96xf32> to vector<2x32xf32>
    %1303 = vector.extract_strided_slice %1293 {offsets = [0, 32], sizes = [2, 32], strides = [1, 1]} : vector<2x96xf32> to vector<2x32xf32>
    %1304 = arith.addf %1302, %1303 : vector<2x32xf32>
    %1305 = arith.negf %1304 : vector<2x32xf32>
    %1306 = math.exp %1305 : vector<2x32xf32>
    %cst_301 = arith.constant 1.000000e+00 : f32
    %1307 = vector.broadcast %cst_301 : f32 to vector<2x32xf32>
    %1308 = arith.addf %1307, %1306 : vector<2x32xf32>
    %1309 = arith.divf %1307, %1308 : vector<2x32xf32>
    %1310 = vector.extract_strided_slice %1291 {offsets = [0, 64], sizes = [2, 32], strides = [1, 1]} : vector<2x96xf32> to vector<2x32xf32>
    %1311 = vector.extract_strided_slice %1293 {offsets = [0, 64], sizes = [2, 32], strides = [1, 1]} : vector<2x96xf32> to vector<2x32xf32>
    %1312 = arith.mulf %1301, %1311 : vector<2x32xf32>
    %1313 = arith.addf %1310, %1312 : vector<2x32xf32>
    %1314 = math.tanh %1313 : vector<2x32xf32>
    %cst_302 = arith.constant 1.000000e+00 : f32
    %1315 = vector.broadcast %cst_302 : f32 to vector<2x32xf32>
    %1316 = arith.subf %1315, %1309 : vector<2x32xf32>
    %1317 = arith.mulf %1316, %1314 : vector<2x32xf32>
    %1318 = vector.extract_strided_slice %1145 {offsets = [1, 0, 0], sizes = [1, 2, 32], strides = [1, 1, 1]} : vector<4x2x32xf32> to vector<1x2x32xf32>
    %1319 = vector.shape_cast %1318 : vector<1x2x32xf32> to vector<2x32xf32>
    %1320 = arith.mulf %1309, %1319 : vector<2x32xf32>
    %1321 = arith.addf %1317, %1320 : vector<2x32xf32>
    %1322 = vector.extract_strided_slice %1255 {offsets = [0, 192], sizes = [2, 96], strides = [1, 1]} : vector<2x384xf32> to vector<2x96xf32>
    %1323 = vector.extract_strided_slice %1259 {offsets = [2, 0, 0], sizes = [1, 2, 96], strides = [1, 1, 1]} : vector<4x2x96xf32> to vector<1x2x96xf32>
    %1324 = vector.shape_cast %1323 : vector<1x2x96xf32> to vector<2x96xf32>
    %1325 = vector.extract_strided_slice %1322 {offsets = [0, 0], sizes = [2, 32], strides = [1, 1]} : vector<2x96xf32> to vector<2x32xf32>
    %1326 = vector.extract_strided_slice %1324 {offsets = [0, 0], sizes = [2, 32], strides = [1, 1]} : vector<2x96xf32> to vector<2x32xf32>
    %1327 = arith.addf %1325, %1326 : vector<2x32xf32>
    %1328 = arith.negf %1327 : vector<2x32xf32>
    %1329 = math.exp %1328 : vector<2x32xf32>
    %cst_303 = arith.constant 1.000000e+00 : f32
    %1330 = vector.broadcast %cst_303 : f32 to vector<2x32xf32>
    %1331 = arith.addf %1330, %1329 : vector<2x32xf32>
    %1332 = arith.divf %1330, %1331 : vector<2x32xf32>
    %1333 = vector.extract_strided_slice %1322 {offsets = [0, 32], sizes = [2, 32], strides = [1, 1]} : vector<2x96xf32> to vector<2x32xf32>
    %1334 = vector.extract_strided_slice %1324 {offsets = [0, 32], sizes = [2, 32], strides = [1, 1]} : vector<2x96xf32> to vector<2x32xf32>
    %1335 = arith.addf %1333, %1334 : vector<2x32xf32>
    %1336 = arith.negf %1335 : vector<2x32xf32>
    %1337 = math.exp %1336 : vector<2x32xf32>
    %cst_304 = arith.constant 1.000000e+00 : f32
    %1338 = vector.broadcast %cst_304 : f32 to vector<2x32xf32>
    %1339 = arith.addf %1338, %1337 : vector<2x32xf32>
    %1340 = arith.divf %1338, %1339 : vector<2x32xf32>
    %1341 = vector.extract_strided_slice %1322 {offsets = [0, 64], sizes = [2, 32], strides = [1, 1]} : vector<2x96xf32> to vector<2x32xf32>
    %1342 = vector.extract_strided_slice %1324 {offsets = [0, 64], sizes = [2, 32], strides = [1, 1]} : vector<2x96xf32> to vector<2x32xf32>
    %1343 = arith.mulf %1332, %1342 : vector<2x32xf32>
    %1344 = arith.addf %1341, %1343 : vector<2x32xf32>
    %1345 = math.tanh %1344 : vector<2x32xf32>
    %cst_305 = arith.constant 1.000000e+00 : f32
    %1346 = vector.broadcast %cst_305 : f32 to vector<2x32xf32>
    %1347 = arith.subf %1346, %1340 : vector<2x32xf32>
    %1348 = arith.mulf %1347, %1345 : vector<2x32xf32>
    %1349 = vector.extract_strided_slice %1145 {offsets = [2, 0, 0], sizes = [1, 2, 32], strides = [1, 1, 1]} : vector<4x2x32xf32> to vector<1x2x32xf32>
    %1350 = vector.shape_cast %1349 : vector<1x2x32xf32> to vector<2x32xf32>
    %1351 = arith.mulf %1340, %1350 : vector<2x32xf32>
    %1352 = arith.addf %1348, %1351 : vector<2x32xf32>
    %1353 = vector.extract_strided_slice %1255 {offsets = [0, 288], sizes = [2, 96], strides = [1, 1]} : vector<2x384xf32> to vector<2x96xf32>
    %1354 = vector.extract_strided_slice %1259 {offsets = [3, 0, 0], sizes = [1, 2, 96], strides = [1, 1, 1]} : vector<4x2x96xf32> to vector<1x2x96xf32>
    %1355 = vector.shape_cast %1354 : vector<1x2x96xf32> to vector<2x96xf32>
    %1356 = vector.extract_strided_slice %1353 {offsets = [0, 0], sizes = [2, 32], strides = [1, 1]} : vector<2x96xf32> to vector<2x32xf32>
    %1357 = vector.extract_strided_slice %1355 {offsets = [0, 0], sizes = [2, 32], strides = [1, 1]} : vector<2x96xf32> to vector<2x32xf32>
    %1358 = arith.addf %1356, %1357 : vector<2x32xf32>
    %1359 = arith.negf %1358 : vector<2x32xf32>
    %1360 = math.exp %1359 : vector<2x32xf32>
    %cst_306 = arith.constant 1.000000e+00 : f32
    %1361 = vector.broadcast %cst_306 : f32 to vector<2x32xf32>
    %1362 = arith.addf %1361, %1360 : vector<2x32xf32>
    %1363 = arith.divf %1361, %1362 : vector<2x32xf32>
    %1364 = vector.extract_strided_slice %1353 {offsets = [0, 32], sizes = [2, 32], strides = [1, 1]} : vector<2x96xf32> to vector<2x32xf32>
    %1365 = vector.extract_strided_slice %1355 {offsets = [0, 32], sizes = [2, 32], strides = [1, 1]} : vector<2x96xf32> to vector<2x32xf32>
    %1366 = arith.addf %1364, %1365 : vector<2x32xf32>
    %1367 = arith.negf %1366 : vector<2x32xf32>
    %1368 = math.exp %1367 : vector<2x32xf32>
    %cst_307 = arith.constant 1.000000e+00 : f32
    %1369 = vector.broadcast %cst_307 : f32 to vector<2x32xf32>
    %1370 = arith.addf %1369, %1368 : vector<2x32xf32>
    %1371 = arith.divf %1369, %1370 : vector<2x32xf32>
    %1372 = vector.extract_strided_slice %1353 {offsets = [0, 64], sizes = [2, 32], strides = [1, 1]} : vector<2x96xf32> to vector<2x32xf32>
    %1373 = vector.extract_strided_slice %1355 {offsets = [0, 64], sizes = [2, 32], strides = [1, 1]} : vector<2x96xf32> to vector<2x32xf32>
    %1374 = arith.mulf %1363, %1373 : vector<2x32xf32>
    %1375 = arith.addf %1372, %1374 : vector<2x32xf32>
    %1376 = math.tanh %1375 : vector<2x32xf32>
    %cst_308 = arith.constant 1.000000e+00 : f32
    %1377 = vector.broadcast %cst_308 : f32 to vector<2x32xf32>
    %1378 = arith.subf %1377, %1371 : vector<2x32xf32>
    %1379 = arith.mulf %1378, %1376 : vector<2x32xf32>
    %1380 = vector.extract_strided_slice %1145 {offsets = [3, 0, 0], sizes = [1, 2, 32], strides = [1, 1, 1]} : vector<4x2x32xf32> to vector<1x2x32xf32>
    %1381 = vector.shape_cast %1380 : vector<1x2x32xf32> to vector<2x32xf32>
    %1382 = arith.mulf %1371, %1381 : vector<2x32xf32>
    %1383 = arith.addf %1379, %1382 : vector<2x32xf32>
    %1384 = vector.shape_cast %1290 : vector<2x32xf32> to vector<1x2x32xf32>
    %1385 = vector.shape_cast %1321 : vector<2x32xf32> to vector<1x2x32xf32>
    %1386 = vector.shape_cast %1352 : vector<2x32xf32> to vector<1x2x32xf32>
    %1387 = vector.shape_cast %1383 : vector<2x32xf32> to vector<1x2x32xf32>
    %1388 = tpu.concatenate %1384, %1385, %1386, %1387 in 0 : vector<1x2x32xf32>, vector<1x2x32xf32>, vector<1x2x32xf32>, vector<1x2x32xf32> -> vector<4x2x32xf32>
    %1389 = vector.extract_strided_slice %1388 {offsets = [1, 0, 0], sizes = [3, 2, 32], strides = [1, 1, 1]} : vector<4x2x32xf32> to vector<3x2x32xf32>
    %1390 = arith.truncf %1389 : vector<3x2x32xf32> to vector<3x2x32xbf16>
    "tpu.trace_start"() <{level = 10 : i32, message = "dbh,doh->dbo"}> : () -> ()
    %cst_309 = arith.constant dense<0.000000e+00> : vector<3x2x3xf32>
    %1391 = tpu.matmul %1390, %4, %cst_309 {dimension_numbers = #tpu.dot_dimension_numbers<[2], [2], [1], [1], [0, 0, 0, 1, 1, 1], [0], [0]>} : vector<3x2x32xbf16>, vector<3x3x32xbf16>, vector<3x2x3xf32> -> vector<3x2x3xf32>
    "tpu.trace_stop"() : () -> ()
    %cst_310 = arith.constant dense<0.000000e+00> : vector<2x3xf32>
    %1392 = vector.multi_reduction <add>, %1391, %cst_310 [0] : vector<3x2x3xf32> to vector<2x3xf32>
    %1393 = vector.broadcast %5 : vector<1x3xf32> to vector<2x3xf32>
    %1394 = arith.addf %1392, %1393 : vector<2x3xf32>
    %cst_311 = arith.constant dense<0xFF800000> : vector<2xf32>
    %1395 = vector.multi_reduction <maximumf>, %1394, %cst_311 [1] : vector<2x3xf32> to vector<2xf32>
    %cst_312 = arith.constant 0xFF800000 : f32
    %1396 = vector.broadcast %cst_312 : f32 to vector<2xf32>
    %1397 = arith.maximumf %1396, %1395 : vector<2xf32>
    %1398 = vector.shape_cast %1397 : vector<2xf32> to vector<2x1xf32>
    %1399 = vector.broadcast %1398 : vector<2x1xf32> to vector<2x3xf32>
    %1400 = arith.subf %1394, %1399 : vector<2x3xf32>
    %1401 = math.exp %1400 : vector<2x3xf32>
    %cst_313 = arith.constant dense<0.000000e+00> : vector<2xf32>
    %1402 = vector.multi_reduction <add>, %1401, %cst_313 [1] : vector<2x3xf32> to vector<2xf32>
    %1403 = vector.shape_cast %1402 : vector<2xf32> to vector<2x1xf32>
    %1404 = vector.broadcast %1403 : vector<2x1xf32> to vector<2x3xf32>
    %1405 = arith.divf %1401, %1404 : vector<2x3xf32>
    %1406 = vector.extract_strided_slice %1405 {offsets = [0, 0], sizes = [2, 1], strides = [1, 1]} : vector<2x3xf32> to vector<2x1xf32>
    %1407 = vector.broadcast %1406 : vector<2x1xf32> to vector<2x32xf32>
    %1408 = arith.mulf %1407, %1321 : vector<2x32xf32>
    %1409 = vector.extract_strided_slice %1405 {offsets = [0, 1], sizes = [2, 1], strides = [1, 1]} : vector<2x3xf32> to vector<2x1xf32>
    %1410 = vector.broadcast %1409 : vector<2x1xf32> to vector<2x32xf32>
    %1411 = arith.mulf %1410, %1352 : vector<2x32xf32>
    %1412 = arith.addf %1408, %1411 : vector<2x32xf32>
    %1413 = vector.extract_strided_slice %1405 {offsets = [0, 2], sizes = [2, 1], strides = [1, 1]} : vector<2x3xf32> to vector<2x1xf32>
    %1414 = vector.broadcast %1413 : vector<2x1xf32> to vector<2x32xf32>
    %1415 = arith.mulf %1414, %1383 : vector<2x32xf32>
    %1416 = arith.addf %1412, %1415 : vector<2x32xf32>
    %c5_314 = arith.constant 5 : index
    %c0_315 = arith.constant 0 : index
    %c0_316 = arith.constant 0 : index
    %1417 = vector.load %arg34[%c5_314, %c0_315, %c0_316] : memref<6x2x3xf32, #tpu.memory_space<vmem>>, vector<1x2x3xf32>
    %1418 = vector.shape_cast %1417 : vector<1x2x3xf32> to vector<2x3xf32>
    %1419 = vector.shape_cast %1394 : vector<2x3xf32> to vector<1x2x3xf32>
    tpu.vector_store %arg34[%c5_314, %c0_315, %c0_316], %1419 {strides = array<i32>} : memref<6x2x3xf32, #tpu.memory_space<vmem>>, vector<1x2x3xf32>,
    %1420 = arith.truncf %1290 : vector<2x32xf32> to vector<2x32xbf16>
    %cst_317 = arith.constant dense<0.000000e+00> : vector<2x64xf32>
    %1421 = tpu.matmul %1420, %6, %cst_317 {dimension_numbers = #tpu.dot_dimension_numbers<[1], [0], [0], [1], [0, 0, 1, 1], [], []>} : vector<2x32xbf16>, vector<32x64xbf16>, vector<2x64xf32> -> vector<2x64xf32>
    %1422 = arith.truncf %1416 : vector<2x32xf32> to vector<2x32xbf16>
    %cst_318 = arith.constant dense<0.000000e+00> : vector<2x64xf32>
    %1423 = tpu.matmul %1422, %7, %cst_318 {dimension_numbers = #tpu.dot_dimension_numbers<[1], [0], [0], [1], [0, 0, 1, 1], [], []>} : vector<2x32xbf16>, vector<32x64xbf16>, vector<2x64xf32> -> vector<2x64xf32>
    %1424 = arith.addf %1421, %1423 : vector<2x64xf32>
    %1425 = vector.broadcast %8 : vector<1x64xf32> to vector<2x64xf32>
    %1426 = arith.addf %1424, %1425 : vector<2x64xf32>
    %cst_319 = arith.constant 0.000000e+00 : f32
    %1427 = vector.broadcast %cst_319 : f32 to vector<2x64xf32>
    %1428 = arith.cmpf oge, %1426, %1427 : vector<2x64xf32>
    %cst_320 = arith.constant 1.000000e-01 : f32
    %1429 = vector.broadcast %cst_320 : f32 to vector<2x64xf32>
    %1430 = arith.mulf %1429, %1426 : vector<2x64xf32>
    %1431 = arith.select %1428, %1426, %1430 : vector<2x64xi1>, vector<2x64xf32>
    %1432 = arith.truncf %1431 : vector<2x64xf32> to vector<2x64xbf16>
    %cst_321 = arith.constant dense<0.000000e+00> : vector<2x32xf32>
    %1433 = tpu.matmul %1432, %9, %cst_321 {dimension_numbers = #tpu.dot_dimension_numbers<[1], [0], [0], [1], [0, 0, 1, 1], [], []>} : vector<2x64xbf16>, vector<64x32xbf16>, vector<2x32xf32> -> vector<2x32xf32>
    %1434 = vector.broadcast %10 : vector<1x32xf32> to vector<2x32xf32>
    %1435 = arith.addf %1433, %1434 : vector<2x32xf32>
    %1436 = vector.shape_cast %20 : vector<2x8x32xf32> to vector<16x32xf32>
    %1437 = arith.truncf %1436 : vector<16x32xf32> to vector<16x32xbf16>
    %cst_322 = arith.constant dense<0.000000e+00> : vector<16x32xf32>
    %1438 = tpu.matmul %1437, %11, %cst_322 {dimension_numbers = #tpu.dot_dimension_numbers<[1], [0], [0], [1], [0, 0, 1, 1], [], []>} : vector<16x32xbf16>, vector<32x32xbf16>, vector<16x32xf32> -> vector<16x32xf32>
    %1439 = arith.truncf %1435 : vector<2x32xf32> to vector<2x32xbf16>
    %cst_323 = arith.constant dense<0.000000e+00> : vector<2x32xf32>
    %1440 = tpu.matmul %1439, %12, %cst_323 {dimension_numbers = #tpu.dot_dimension_numbers<[1], [0], [0], [1], [0, 0, 1, 1], [], []>} : vector<2x32xbf16>, vector<32x32xbf16>, vector<2x32xf32> -> vector<2x32xf32>
    %1441 = vector.shape_cast %1438 : vector<16x32xf32> to vector<2x8x32xf32>
    %1442 = vector.shape_cast %1440 : vector<2x32xf32> to vector<2x1x32xf32>
    %1443 = vector.broadcast %1442 : vector<2x1x32xf32> to vector<2x8x32xf32>
    %1444 = arith.addf %1441, %1443 : vector<2x8x32xf32>
    %1445 = math.tanh %1444 : vector<2x8x32xf32>
    %1446 = vector.shape_cast %1445 : vector<2x8x32xf32> to vector<16x32xf32>
    %1447 = arith.truncf %1446 : vector<16x32xf32> to vector<16x32xbf16>
    %cst_324 = arith.constant dense<0.000000e+00> : vector<16x32xf32>
    %1448 = tpu.matmul %1447, %13, %cst_324 {dimension_numbers = #tpu.dot_dimension_numbers<[1], [0], [0], [1], [0, 0, 1, 1], [], []>} : vector<16x32xbf16>, vector<32x32xbf16>, vector<16x32xf32> -> vector<16x32xf32>
    %1449 = math.tanh %1448 : vector<16x32xf32>
    %1450 = vector.shape_cast %1449 : vector<16x32xf32> to vector<2x8x32xf32>
    %1451 = vector.shape_cast %14 : vector<1x32xf32> to vector<1x1x32xf32>
    %1452 = vector.broadcast %1451 : vector<1x1x32xf32> to vector<2x8x32xf32>
    %1453 = arith.mulf %1450, %1452 : vector<2x8x32xf32>
    %cst_325 = arith.constant dense<0.000000e+00> : vector<2x8xf32>
    %1454 = vector.multi_reduction <add>, %1453, %cst_325 [2] : vector<2x8x32xf32> to vector<2x8xf32>
    %1455 = vector.broadcast %15 : vector<1x1xf32> to vector<2x8xf32>
    %1456 = arith.addf %1454, %1455 : vector<2x8xf32>
    %cst_326 = arith.constant dense<0xFF800000> : vector<2xf32>
    %1457 = vector.multi_reduction <maximumf>, %1456, %cst_326 [1] : vector<2x8xf32> to vector<2xf32>
    %cst_327 = arith.constant 0xFF800000 : f32
    %1458 = vector.broadcast %cst_327 : f32 to vector<2xf32>
    %1459 = arith.maximumf %1458, %1457 : vector<2xf32>
    %1460 = vector.shape_cast %1459 : vector<2xf32> to vector<2x1xf32>
    %1461 = vector.broadcast %1460 : vector<2x1xf32> to vector<2x8xf32>
    %1462 = arith.subf %1456, %1461 : vector<2x8xf32>
    %1463 = math.exp %1462 : vector<2x8xf32>
    %cst_328 = arith.constant dense<0.000000e+00> : vector<2xf32>
    %1464 = vector.multi_reduction <add>, %1463, %cst_328 [1] : vector<2x8xf32> to vector<2xf32>
    %1465 = vector.shape_cast %1464 : vector<2xf32> to vector<2x1xf32>
    %1466 = vector.broadcast %1465 : vector<2x1xf32> to vector<2x8xf32>
    %1467 = arith.divf %1463, %1466 : vector<2x8xf32>
    %1468 = vector.shape_cast %1467 : vector<2x8xf32> to vector<2x8x1xf32>
    %1469 = vector.broadcast %1468 : vector<2x8x1xf32> to vector<2x8x32xf32>
    %1470 = arith.mulf %1469, %20 : vector<2x8x32xf32>
    %cst_329 = arith.constant dense<0.000000e+00> : vector<2x32xf32>
    %1471 = vector.multi_reduction <add>, %1470, %cst_329 [1] : vector<2x8x32xf32> to vector<2x32xf32>
    %1472 = arith.truncf %1435 : vector<2x32xf32> to vector<2x32xbf16>
    %cst_330 = arith.constant dense<0.000000e+00> : vector<2x32xf32>
    %1473 = tpu.matmul %1472, %16, %cst_330 {dimension_numbers = #tpu.dot_dimension_numbers<[1], [0], [0], [1], [0, 0, 1, 1], [], []>} : vector<2x32xbf16>, vector<32x32xbf16>, vector<2x32xf32> -> vector<2x32xf32>
    %1474 = arith.truncf %1471 : vector<2x32xf32> to vector<2x32xbf16>
    %cst_331 = arith.constant dense<0.000000e+00> : vector<2x32xf32>
    %1475 = tpu.matmul %1474, %17, %cst_331 {dimension_numbers = #tpu.dot_dimension_numbers<[1], [0], [0], [1], [0, 0, 1, 1], [], []>} : vector<2x32xbf16>, vector<32x32xbf16>, vector<2x32xf32> -> vector<2x32xf32>
    %1476 = arith.addf %1473, %1475 : vector<2x32xf32>
    %1477 = vector.broadcast %18 : vector<1x32xf32> to vector<2x32xf32>
    %1478 = arith.addf %1476, %1477 : vector<2x32xf32>
    %1479 = math.tanh %1478 : vector<2x32xf32>
    %1480 = arith.truncf %1479 : vector<2x32xf32> to vector<2x32xbf16>
    %cst_332 = arith.constant dense<0.000000e+00> : vector<2x64xf32>
    %1481 = tpu.matmul %1480, %19, %cst_332 {dimension_numbers = #tpu.dot_dimension_numbers<[1], [0], [0], [1], [0, 0, 1, 1], [], []>} : vector<2x32xbf16>, vector<32x64xbf16>, vector<2x64xf32> -> vector<2x64xf32>
    %c5_333 = arith.constant 5 : index
    %c0_334 = arith.constant 0 : index
    %c0_335 = arith.constant 0 : index
    %1482 = vector.load %arg32[%c5_333, %c0_334, %c0_335] : memref<6x2x64xf32, #tpu.memory_space<vmem>>, vector<1x2x64xf32>
    %1483 = vector.shape_cast %1482 : vector<1x2x64xf32> to vector<2x64xf32>
    %1484 = vector.shape_cast %1481 : vector<2x64xf32> to vector<1x2x64xf32>
    tpu.vector_store %arg32[%c5_333, %c0_334, %c0_335], %1484 {strides = array<i32>} : memref<6x2x64xf32, #tpu.memory_space<vmem>>, vector<1x2x64xf32>,
    %1485 = vector.shape_cast %1479 : vector<2x32xf32> to vector<2x1x32xf32>
    %1486 = vector.broadcast %1485 : vector<2x1x32xf32> to vector<2x10x32xf32>
    %1487 = arith.mulf %21, %1486 : vector<2x10x32xf32>
    %cst_336 = arith.constant dense<0.000000e+00> : vector<2x10xf32>
    %1488 = vector.multi_reduction <add>, %1487, %cst_336 [2] : vector<2x10x32xf32> to vector<2x10xf32>
    %1489 = arith.mulf %1488, %22 : vector<2x10xf32>
    %c5_337 = arith.constant 5 : index
    %c0_338 = arith.constant 0 : index
    %c0_339 = arith.constant 0 : index
    %1490 = vector.load %arg33[%c5_337, %c0_338, %c0_339] : memref<6x2x10xf32, #tpu.memory_space<vmem>>, vector<1x2x10xf32>
    %1491 = vector.shape_cast %1490 : vector<1x2x10xf32> to vector<2x10xf32>
    %1492 = vector.shape_cast %1489 : vector<2x10xf32> to vector<1x2x10xf32>
    tpu.vector_store %arg33[%c5_337, %c0_338, %c0_339], %1492 {strides = array<i32>} : memref<6x2x10xf32, #tpu.memory_space<vmem>>, vector<1x2x10xf32>,
    %1493 = vector.shape_cast %75 : vector<2x32xf32> to vector<2x1x32xf32>
    %1494 = vector.shape_cast %318 : vector<2x32xf32> to vector<2x1x32xf32>
    %1495 = vector.shape_cast %561 : vector<2x32xf32> to vector<2x1x32xf32>
    %1496 = vector.shape_cast %804 : vector<2x32xf32> to vector<2x1x32xf32>
    %1497 = vector.shape_cast %1047 : vector<2x32xf32> to vector<2x1x32xf32>
    %1498 = vector.shape_cast %1290 : vector<2x32xf32> to vector<2x1x32xf32>
    %1499 = tpu.concatenate %1493, %1494, %1495, %1496, %1497, %1498 in 1 : vector<2x1x32xf32>, vector<2x1x32xf32>, vector<2x1x32xf32>, vector<2x1x32xf32>, vector<2x1x32xf32>, vector<2x1x32xf32> -> vector<2x6x32xf32>
    %1500 = vector.extract_strided_slice %1499 {offsets = [0, 0, 0], sizes = [2, 5, 32], strides = [1, 1, 1]} : vector<2x6x32xf32> to vector<2x5x32xf32>
    %1501 = vector.extract_strided_slice %1499 {offsets = [0, 1, 0], sizes = [2, 5, 32], strides = [1, 1, 1]} : vector<2x6x32xf32> to vector<2x5x32xf32>
    %1502 = tpu.concatenate %1500, %1501 in 2 : vector<2x5x32xf32>, vector<2x5x32xf32> -> vector<2x5x64xf32>
    %1503 = vector.shape_cast %1502 : vector<2x5x64xf32> to vector<10x64xf32>
    %c0_340 = arith.constant 0 : index
    %c0_341 = arith.constant 0 : index
    %1504 = vector.load %arg27[%c0_340, %c0_341] : memref<64x32xbf16, #tpu.memory_space<vmem>>, vector<64x32xbf16>
    %1505 = arith.truncf %1503 : vector<10x64xf32> to vector<10x64xbf16>
    %cst_342 = arith.constant dense<0.000000e+00> : vector<10x32xf32>
    %1506 = tpu.matmul %1505, %1504, %cst_342 {dimension_numbers = #tpu.dot_dimension_numbers<[1], [0], [0], [1], [0, 0, 1, 1], [], []>} : vector<10x64xbf16>, vector<64x32xbf16>, vector<10x32xf32> -> vector<10x32xf32>
    %c0_343 = arith.constant 0 : index
    %c0_344 = arith.constant 0 : index
    %1507 = vector.load %arg28[%c0_343, %c0_344] : memref<1x32xf32, #tpu.memory_space<vmem>>, vector<1x32xf32>
    %1508 = vector.broadcast %1507 : vector<1x32xf32> to vector<10x32xf32>
    %1509 = arith.addf %1506, %1508 : vector<10x32xf32>
    %cst_345 = arith.constant 0.000000e+00 : f32
    %1510 = vector.broadcast %cst_345 : f32 to vector<10x32xf32>
    %1511 = arith.maximumf %1509, %1510 : vector<10x32xf32>
    %1512 = vector.shape_cast %1511 : vector<10x32xf32> to vector<2x5x32xf32>
    %cst_346 = arith.constant dense<0xFF800000> : vector<2x32xf32>
    %1513 = vector.multi_reduction <maximumf>, %1512, %cst_346 [1] : vector<2x5x32xf32> to vector<2x32xf32>
    %1514 = vector.extract_strided_slice %1499 {offsets = [0, 0, 0], sizes = [2, 4, 32], strides = [1, 1, 1]} : vector<2x6x32xf32> to vector<2x4x32xf32>
    %1515 = vector.extract_strided_slice %1499 {offsets = [0, 1, 0], sizes = [2, 4, 32], strides = [1, 1, 1]} : vector<2x6x32xf32> to vector<2x4x32xf32>
    %1516 = vector.extract_strided_slice %1499 {offsets = [0, 2, 0], sizes = [2, 4, 32], strides = [1, 1, 1]} : vector<2x6x32xf32> to vector<2x4x32xf32>
    %1517 = tpu.concatenate %1514, %1515, %1516 in 2 : vector<2x4x32xf32>, vector<2x4x32xf32>, vector<2x4x32xf32> -> vector<2x4x96xf32>
    %1518 = vector.shape_cast %1517 : vector<2x4x96xf32> to vector<8x96xf32>
    %c0_347 = arith.constant 0 : index
    %c0_348 = arith.constant 0 : index
    %1519 = vector.load %arg29[%c0_347, %c0_348] : memref<96x32xbf16, #tpu.memory_space<vmem>>, vector<96x32xbf16>
    %1520 = arith.truncf %1518 : vector<8x96xf32> to vector<8x96xbf16>
    %cst_349 = arith.constant dense<0.000000e+00> : vector<8x32xf32>
    %1521 = tpu.matmul %1520, %1519, %cst_349 {dimension_numbers = #tpu.dot_dimension_numbers<[1], [0], [0], [1], [0, 0, 1, 1], [], []>} : vector<8x96xbf16>, vector<96x32xbf16>, vector<8x32xf32> -> vector<8x32xf32>
    %c0_350 = arith.constant 0 : index
    %c0_351 = arith.constant 0 : index
    %1522 = vector.load %arg30[%c0_350, %c0_351] : memref<1x32xf32, #tpu.memory_space<vmem>>, vector<1x32xf32>
    %1523 = vector.broadcast %1522 : vector<1x32xf32> to vector<8x32xf32>
    %1524 = arith.addf %1521, %1523 : vector<8x32xf32>
    %cst_352 = arith.constant 0.000000e+00 : f32
    %1525 = vector.broadcast %cst_352 : f32 to vector<8x32xf32>
    %1526 = arith.maximumf %1524, %1525 : vector<8x32xf32>
    %1527 = vector.shape_cast %1526 : vector<8x32xf32> to vector<2x4x32xf32>
    %cst_353 = arith.constant dense<0xFF800000> : vector<2x32xf32>
    %1528 = vector.multi_reduction <maximumf>, %1527, %cst_353 [1] : vector<2x4x32xf32> to vector<2x32xf32>
    %1529 = tpu.concatenate %1513, %1528 in 1 : vector<2x32xf32>, vector<2x32xf32> -> vector<2x64xf32>
    %c0_354 = arith.constant 0 : index
    %c0_355 = arith.constant 0 : index
    %1530 = vector.load %arg31[%c0_354, %c0_355] : memref<64x3xbf16, #tpu.memory_space<vmem>>, vector<64x3xbf16>
    %1531 = arith.truncf %1529 : vector<2x64xf32> to vector<2x64xbf16>
    %cst_356 = arith.constant dense<0.000000e+00> : vector<2x3xf32>
    %1532 = tpu.matmul %1531, %1530, %cst_356 {dimension_numbers = #tpu.dot_dimension_numbers<[1], [0], [0], [1], [0, 0, 1, 1], [], []>} : vector<2x64xbf16>, vector<64x3xbf16>, vector<2x3xf32> -> vector<2x3xf32>
    %cst_357 = arith.constant 0.000000e+00 : f32
    %1533 = vector.broadcast %cst_357 : f32 to vector<2x3xf32>
    %1534 = arith.cmpf oge, %1532, %1533 : vector<2x3xf32>
    %cst_358 = arith.constant 1.000000e-01 : f32
    %1535 = vector.broadcast %cst_358 : f32 to vector<2x3xf32>
    %1536 = arith.mulf %1535, %1532 : vector<2x3xf32>
    %1537 = arith.select %1534, %1532, %1536 : vector<2x3xi1>, vector<2x3xf32>
    %1538 = arith.negf %1537 : vector<2x3xf32>
    %1539 = math.exp %1538 : vector<2x3xf32>
    %cst_359 = arith.constant 1.000000e+00 : f32
    %1540 = vector.broadcast %cst_359 : f32 to vector<2x3xf32>
    %1541 = arith.addf %1540, %1539 : vector<2x3xf32>
    %1542 = arith.divf %1540, %1541 : vector<2x3xf32>
    %c0_360 = arith.constant 0 : index
    %c0_361 = arith.constant 0 : index
    %1543 = vector.load %arg35[%c0_360, %c0_361] : memref<2x3xf32, #tpu.memory_space<vmem>>, vector<2x3xf32>
    tpu.vector_store %arg35[%c0_360, %c0_361], %1542 {strides = array<i32>} : memref<2x3xf32, #tpu.memory_space<vmem>>, vector<2x3xf32>,
    return
  }
}

</mosaic_0001>

<bundles_post_ra>
// kernel: _forward_core.1
= control target key start
LH: loop header
LB: loop body
LE: loop exit
PB: predicated region body
PF: predicated region fallthrough
CT: control target
= control target key end

     0   :  { %s11072_s6 = smov 1   ;;  %s11073_s10 = smov 2   ;;  %s13893_s0 = inlined_call_operand.smem [shape: u32[36], index: -1, kind: input, shape index: {}] }
   0x1   :  { %s11128_s5 = sld [smem:[%s13893_s0]]   ;;  %s11074_s14 = smov 3  }
   0x2   :  { %s11133_s9 = sld [smem:[%s13893_s0 + %s11072_s6]]   ;;  %s11075_s18 = smov 4  }
   0x3   :  { %s11138_s13 = sld [smem:[%s13893_s0 + %s11073_s10]]   ;;  %s11076_s22 = smov 5  }
   0x4   :  { %s11143_s17 = sld [smem:[%s13893_s0 + %s11074_s14]]   ;;  %s11077_s26 = smov 6  }
   0x5   :  { %s11148_s21 = sld [smem:[%s13893_s0 + %s11075_s18]]   ;;  %s11078_s30 = smov 7  }
   0x6   :  { %s11153_s25 = sld [smem:[%s13893_s0 + %s11076_s22]]   ;;  %s11079_s4 = smov 8  }
   0x7   :  { %s11158_s29 = sld [smem:[%s13893_s0 + %s11077_s26]]   ;;  %s11080_s10 = smov 9  }
   0x8   :  { %s11163_s3 = sld [smem:[%s13893_s0 + %s11078_s30]]   ;;  %s11081_s15 = smov 10  }
   0x9   :  { %s11168_s8 = sld [smem:[%s13893_s0 + %s11079_s4]]   ;;  %s11082_s20 = smov 11  }
   0xa   :  { %s11173_s14 = sld [smem:[%s13893_s0 + %s11080_s10]]   ;;  %s11083_s26 = smov 12  }
   0xb   :  { %s11178_s19 = sld [smem:[%s13893_s0 + %s11081_s15]]   ;;  %s11084_s1 = smov 13  }
   0xc   :  { %s11183_s24 = sld [smem:[%s13893_s0 + %s11082_s20]]   ;;  %s11085_s7 = smov 14  }
   0xd   :  { %s11188_s30 = sld [smem:[%s13893_s0 + %s11083_s26]]   ;;  %s11086_s15 = smov 15  }
   0xe   :  { %s11193_s6 = sld [smem:[%s13893_s0 + %s11084_s1]]   ;;  %s11087_s22 = smov 16  }
   0xf   :  { %s11198_s12 = sld [smem:[%s13893_s0 + %s11085_s7]]   ;;  %s11088_s28 = smov 17  }
  0x10   :  { %s11203_s20 = sld [smem:[%s13893_s0 + %s11086_s15]]   ;;  %s11089_s7 = smov 18  }
  0x11   :  { %s11208_s27 = sld [smem:[%s13893_s0 + %s11087_s22]]   ;;  %s11090_s15 = smov 19  }
  0x12   :  { %s11213_s4 = sld [smem:[%s13893_s0 + %s11088_s28]]   ;;  %s11091_s23 = smov 20  }
  0x13   :  { %14015 = sst [smem:[#allocation10_spill]] %s11188_s30  ;;  %s11092_s1 = smov 21  }
  0x14   :  { %s8813_s30 = sld [smem:[%s13893_s0 + %s11090_s15]]   ;;  %s11093_s10 = smov 22  }
  0x15   :  { %14016 = sst [smem:[#allocation11_spill]] %s11198_s12  ;;  %s11094_s16 = smov 23  }
  0x16   :  { %14017 = sst [smem:[#allocation12_spill]] %s11203_s20  ;;  %s11099_s22 = smov 28  }
  0x17   :  { %14018 = sst [smem:[#allocation13_spill]] %s11208_s27 }
  0x18   :  { %14019 = sst [smem:[#allocation14_spill]] %s11213_s4 }
  0x19   :  { %s11218_s12 = sld [smem:[%s13893_s0 + %s11089_s7]]  }
  0x1a   :  { %s11226_s27 = sld [smem:[%s13893_s0 + %s11091_s23]]   ;;  %s11095_s23 = smov 24   ;;  %v77_v0 = vstv %s8813_s30 }
  0x1b   :  { %s11231_s4 = sld [smem:[%s13893_s0 + %s11092_s1]]   ;;  %s11096_s1 = smov 25   ;;  %78 = vst [vmem:[#allocation2] sm:$0x1] %v77_v0 }
  0x1c   :  { %s11241_s20 = sld [smem:[%s13893_s0 + %s11094_s16]]   ;;  %s11098_s16 = smov 27  }
  0x1d   :  { %s11100_s30 = smov 29  }
  0x1e   :  { %s11271_s7 = sld [smem:[%s13893_s0 + %s11100_s30]]   ;;  %s11104_s30 = smov 33  }
  0x1f   :  { %14020 = sst [smem:[#allocation15_spill]] %s11218_s12 }
  0x20   :  { %14021 = sst [smem:[#allocation16_spill]] %s11226_s27 }
  0x21   :  { %14022 = sst [smem:[#allocation17_spill]] %s11231_s4 }
  0x22   :  { %s11236_s12 = sld [smem:[%s13893_s0 + %s11093_s10]]   ;;  %s11097_s10 = smov 26  }
  0x23   :  { %14024 = sst [smem:[#allocation19_spill]] %s11241_s20  ;;  %s11103_s20 = smov 32  }
  0x24   :  { %s11246_s27 = sld [smem:[%s13893_s0 + %s11095_s23]]  }
  0x25   :  { %s11251_s4 = sld [smem:[%s13893_s0 + %s11096_s1]]  }
  0x26   :  { %s11256_s15 = sld [smem:[%s13893_s0 + %s11097_s10]]   ;;  %s11101_s10 = smov 30  }
  0x27   :  { %s11261_s23 = sld [smem:[%s13893_s0 + %s11098_s16]]  }
  0x28   :  { %14023 = sst [smem:[#allocation18_spill]] %s11236_s12  ;;  %s11102_s12 = smov 31  }
  0x29   :  { %s11266_s1 = sld [smem:[%s13893_s0 + %s11099_s22]]  }
  0x2a   :  { %14029 = sst [smem:[#allocation24_spill]] %s11271_s7 }
  0x2b   :  { %14025 = sst [smem:[#allocation20_spill]] %s11251_s4 }
  0x2c   :  { %14026 = sst [smem:[#allocation21_spill]] %s11256_s15  ;;  %s11105_s15 = smov 34  }
  0x2d   :  { %14027 = sst [smem:[#allocation22_spill]] %s11261_s23 }
  0x2e   :  { %s11276_s4 = sld [smem:[%s13893_s0 + %s11101_s10]]  }
  0x2f   :  { %14028 = sst [smem:[#allocation23_spill]] %s11266_s1 }
  0x30   :  { %s11281_s23 = sld [smem:[%s13893_s0 + %s11102_s12]]   ;;  %s11106_s12 = smov 35  }
  0x31   :  { %s11286_s1 = sld [smem:[%s13893_s0 + %s11103_s20]]  }
  0x32   :  { %s11291_s7 = sld [smem:[%s13893_s0 + %s11104_s30]]  }
  0x34   :  { %14030 = sst [smem:[#allocation25_spill]] %s11276_s4 }
  0x35   :  { %s11296_s4 = sld [smem:[%s13893_s0 + %s11105_s15]]  }
  0x36   :  { %14031 = sst [smem:[#allocation26_spill]] %s11281_s23 }
  0x37   :  { %s11301_s23 = sld [smem:[%s13893_s0 + %s11106_s12]]  }
  0x38   :  { %79 = vsyncpa [#allocation4], 0  ;;  %v10544_v1 = vld [vmem:[%s11138_s13 + $0x18] sm:$0xff]   ;;  %v13919_v2 = vmov 0.0   ;;  %v10545_v3 = vld [vmem:[%s11138_s13 + $0x10] sm:$0xff]   ;;  %vm11108_vm0 = vmmov 0  }
  0x39   :  { %9464 = vmatprep.subr.bf16.mxu0 %v13919_v2  ;;  %9472 = vmatprep.mubr.msk.bf16.mxu0 %vm11108_vm0, %v13919_v2  ;;  %v13913_v4 = vmov 0   ;;  %v10548_v5 = vld [vmem:[%s11148_s21 + $0x1c] ss:$12 sps:$4 sm:$0xff]   ;;  %v10550_v6 = vld [vmem:[%s11148_s21 + $0x18] ss:$12 sps:$4 sm:$0xff]   ;;  %vm399_vm1 = vcmask 261120  }
  0x3a   :  { %9465 = vmatpush3.bf16.msra.mxu0 %v10544_v1  ;;  %435 = vmatprep.mubr.bf16.mxu1 %v13913_v4  ;;  %v10546_v7 = vld [vmem:[%s11138_s13 + $0x8] sm:$0xff]   ;;  %v10551_v8 = vld [vmem:[%s11148_s21 + $0x4] ss:$12 sps:$4 sm:$0xff]   ;;  %v349_v10 = vld [vmem:[%s11128_s5] sm:$0x3]  ;;  %vm304_vm2 = vcmask 523264  }
  0x3b   :  { %9466 = vmatprep.subr.bf16.mxu0 %v13919_v2  ;;  %415 = vmatprep.subr.bf16.mxu1 %v10548_v5  ;;  %v10553_v9 = vld [vmem:[%s11148_s21] ss:$12 sps:$4 sm:$0xff]   ;;  %v350_v13 = vpack.c.bf16 %v349_v10, %v349_v10  ;;  %v10555_v17 = vld [vmem:[%s11148_s21 + $0x8] ss:$12 sps:$4 sm:$0xff]   ;;  %v10557_v19 = vld [vmem:[%s11158_s29 + $0x58] sm:$0xff]  }
  0x3c   :  { %416 = vmatpush1.bf16.msra.mxu1 %v10550_v6  ;;  %v10547_v11 = vld [vmem:[%s11138_s13] sm:$0xff]   ;;  %v10556_v14 = vld [vmem:[%s11158_s29 + $0x28] sm:$0xff]   ;;  %v10559_v21 = vld [vmem:[%s11158_s29 + $0x50] sm:$0xff]   ;;  %v11347_v27 = vsel %vm399_vm1, %v10557_v19, 0 }
  0x3d   :  { %417 = vmatprep.subr.bf16.mxu1 %v10551_v8  ;;  %v263_v12 = vld [vmem:[%s11133_s9] sm:$0x3]  ;;  %v11327_v18 = vsel %vm399_vm1, %v10556_v14, 0  ;;  %v10560_v22 = vld [vmem:[%s11158_s29 + $0x18] sm:$0xff]   ;;  %v10561_v23 = vld [vmem:[%s11158_s29 + $0x48] sm:$0xff]   ;;  %v11353_v29 = vsel %vm399_vm1, %v10559_v21, 0 }
  0x3e   :  { %9467 = vmatpush3.bf16.msra.mxu0 %v10545_v3  ;;  %v10554_v15 = vld [vmem:[%s11148_s21 + $0x20] ss:$12 sps:$4 sm:$0xff]   ;;  %v272_v16 = vpack.c.bf16 %v263_v12, %v263_v12  ;;  %14032 = vst [vmem:[#allocation27_spill] sm:$0xff] %v11327_v18  ;;  %v10562_v24 = vld [vmem:[%s11158_s29 + $0x10] sm:$0xff]   ;;  %v11356_v30 = vsel %vm399_vm1, %v10560_v22, 0  ;;  %v11359_v31 = vsel %vm399_vm1, %v10561_v23, 0 }
  0x3f   :  { %9468 = vmatprep.subr.bf16.mxu0 %v13919_v2  ;;  %v10558_v20 = vld [vmem:[%s11158_s29 + $0x20] sm:$0xff]   ;;  %v10564_v26 = vld [vmem:[%s11158_s29 + $0x8] sm:$0xff]   ;;  %14034 = vst [vmem:[#allocation29_spill] sm:$0xff] %v11356_v30  ;;  %v11362_v32 = vsel %vm399_vm1, %v10562_v24, 0  ;;  %v10565_v35 = vld [vmem:[%s11158_s29 + $0x38] sm:$0xff]  }
  0x40   :  { %418 = vmatpush1.bf16.msra.mxu1 %v10553_v9  ;;  %v10563_v25 = vld [vmem:[%s11158_s29 + $0x40] sm:$0xff]   ;;  %v11350_v28 = vsel %vm399_vm1, %v10558_v20, 0  ;;  %14035 = vst [vmem:[#allocation30_spill] sm:$0xff] %v11362_v32  ;;  %v11369_v34 = vsel %vm399_vm1, %v10564_v26, 0  ;;  %v11392_v37 = vsel %vm399_vm1, %v10565_v35, 0 }
  0x41   :  { %9476 = vmatprep.subr.bf16.mxu1 %v13919_v2  ;;  %14033 = vst [vmem:[#allocation28_spill] sm:$0xff] %v11350_v28  ;;  %v11366_v33 = vsel %vm399_vm1, %v10563_v25, 0  ;;  %14036 = vst [vmem:[#allocation31_spill] sm:$0xff] %v11369_v34  ;;  %v10566_v36 = vld [vmem:[%s11158_s29] sm:$0xff]  }
  0x42   :  { %9469 = vmatpush3.bf16.msra.mxu0 %v10546_v7 }
  0x43   :  { %9470 = vmatprep.subr.bf16.mxu0 %v13919_v2  ;;  %8842 = vmatmul.mubr.msk.bf16.vlgmr.msra.gmra.mxu1 %vm399_vm1, %v350_v13 }
  0x44   :  { %9477 = vmatpush3.bf16.msra.mxu1 %v10554_v15  ;;  %9480 = vmatprep.mubr.msk.bf16.mxu1 %vm11108_vm0, %v13919_v2 }
  0x45   :  { %9478 = vmatprep.subr.bf16.mxu1 %v13919_v2 }
  0x46   :  { %9471 = vmatpush3.bf16.msra.mxu0 %v10547_v11 }
  0x47   :  { %9484 = vmatprep.subr.bf16.mxu0 %v13919_v2 }
  0x48   :  { %9479 = vmatpush3.bf16.msra.mxu1 %v10555_v17 }
  0x49   :  { %9473 = vmatmul.mubr.msk.bf16.vlgmr.msra.gmra.mxu0 %vm304_vm2, %v272_v16  ;;  %9500 = vmatprep.subr.bf16.mxu1 %v13919_v2 }
  0x4a   :  { %9485 = vmatpush3.bf16.xpose.msra.mxu0 %v11327_v18  ;;  %9496 = vmatprep.mubr.msk.bf16.mxu0 %vm11108_vm0, %v13919_v2 }
  0x4b   :  { %9486 = vmatprep.subr.bf16.mxu0 %v13919_v2  ;;  %9481 = vmatmul.mubr.msk.bf16.vlgmr.msra.gmra.mxu1 %vm399_vm1, %v350_v13 }
  0x4c   :  { %9501 = vmatpush3.bf16.xpose.msra.mxu1 %v11347_v27  ;;  %9512 = vmatprep.mubr.msk.bf16.mxu1 %vm11108_vm0, %v13919_v2 }
  0x4d   :  { %9502 = vmatprep.subr.bf16.mxu1 %v13919_v2 }
  0x52   :  { %9487 = vmatpush3.bf16.xpose.msra.mxu0 %v11350_v28 }
  0x53   :  { %9488 = vmatprep.subr.bf16.mxu0 %v13919_v2 }
  0x54   :  { %9503 = vmatpush3.bf16.xpose.msra.mxu1 %v11353_v29 }
  0x55   :  { %9504 = vmatprep.subr.bf16.mxu1 %v13919_v2 }
  0x5a   :  { %9489 = vmatpush3.bf16.xpose.msra.mxu0 %v11356_v30 }
  0x5b   :  { %9490 = vmatprep.subr.bf16.mxu0 %v13919_v2 }
  0x5c   :  { %9505 = vmatpush3.bf16.xpose.msra.mxu1 %v11359_v31 }
  0x5d   :  { %9506 = vmatprep.subr.bf16.mxu1 %v13919_v2 }
  0x62   :  { %9491 = vmatpush3.bf16.xpose.msra.mxu0 %v11362_v32 }
  0x63   :  { %9492 = vmatprep.subr.bf16.mxu0 %v13919_v2 }
  0x64   :  { %9507 = vmatpush3.bf16.xpose.msra.mxu1 %v11366_v33 }
  0x65   :  { %9508 = vmatprep.subr.bf16.mxu1 %v13919_v2 }
  0x6a   :  { %9493 = vmatpush3.bf16.xpose.msra.mxu0 %v11369_v34 }
  0x6b   :  { %9494 = vmatprep.subr.bf16.mxu0 %v13919_v2 }
  0x6c   :  { %80 = vsyncpa [#allocation6], 0  ;;  %v11395_v38 = vsel %vm399_vm1, %v10566_v36, 0  ;;  %9509 = vmatpush3.bf16.xpose.msra.mxu1 %v11392_v37  ;;  %v10567_v39 = vld [vmem:[%s11158_s29 + $0x30] sm:$0xff]   ;;  %v8830_v41 = vld [vmem:[%s11143_s17] ss:$0 sm:$0xff] }
  0x6d   :  { %14037 = vst [vmem:[#allocation32_spill] sm:$0xff] %v11395_v38  ;;  %9510 = vmatprep.subr.bf16.mxu1 %v13919_v2  ;;  %v11403_v40 = vsel %vm399_vm1, %v10567_v39, 0  ;;  %v10568_v46 = vld [vmem:[%s11158_s29 + $0x88] sm:$0xff]   ;;  %v10569_v47 = vld [vmem:[%s11158_s29 + $0xb8] sm:$0xff]   ;;  %v10570_v59 = vld [vmem:[%s11158_s29 + $0x80] sm:$0xff]   ;;  %s11110_s0 = smov 96  }
  0x6e   :  { %v11419_v54 = vsel %vm399_vm1, %v10568_v46, 0  ;;  %v11422_v55 = vsel %vm399_vm1, %v10569_v47, 0  ;;  %v10571_v60 = vld [vmem:[%s11158_s29 + $0xb0] sm:$0xff]   ;;  %v11439_v63 = vsel %vm399_vm1, %v10570_v59, 0  ;;  %v10572_v1 = vld [vmem:[%s11158_s29 + $0x78] sm:$0xff]   ;;  %v10573_v3 = vld [vmem:[%s11158_s29 + $0xa8] sm:$0xff]   ;;  %v13908_v59 = vlaneseq }
  0x6f   :  { %14038 = vst [vmem:[#allocation33_spill] sm:$0xff] %v11419_v54  ;;  %14039 = vst [vmem:[#allocation34_spill] sm:$0xff] %v11439_v63  ;;  %v11442_v0 = vsel %vm399_vm1, %v10571_v60, 0  ;;  %v11451_v5 = vsel %vm399_vm1, %v10572_v1, 0  ;;  %v11454_v6 = vsel %vm399_vm1, %v10573_v3, 0  ;;  %v10574_v7 = vld [vmem:[%s11158_s29 + $0x70] sm:$0xff]  }
  0x70   :  { %14040 = vst [vmem:[#allocation35_spill] sm:$0xff] %v11451_v5  ;;  %v10575_v8 = vld [vmem:[%s11158_s29 + $0xa0] sm:$0xff]   ;;  %v11463_v9 = vsel %vm399_vm1, %v10574_v7, 0  ;;  %v10576_v11 = vld [vmem:[%s11158_s29 + $0x68] sm:$0xff]   ;;  %v10577_v12 = vld [vmem:[%s11158_s29 + $0x98] sm:$0xff]   ;;  %s11111_s9 = smov 64  }
  0x71   :  { %14041 = vst [vmem:[#allocation36_spill] sm:$0xff] %v11463_v9  ;;  %v11466_v10 = vsel %vm399_vm1, %v10575_v8, 0  ;;  %v11475_v13 = vsel %vm399_vm1, %v10576_v11, 0  ;;  %v11478_v14 = vsel %vm399_vm1, %v10577_v12, 0  ;;  %v10578_v15 = vld [vmem:[%s11158_s29 + $0x60] sm:$0xff]   ;;  %v10579_v16 = vld [vmem:[%s11158_s29 + $0x90] sm:$0xff]  }
  0x72   :  { %9495 = vmatpush3.bf16.xpose.msra.mxu0 %v11395_v38  ;;  %14042 = vst [vmem:[#allocation37_spill] sm:$0xff] %v11475_v13  ;;  %v11487_v17 = vsel %vm399_vm1, %v10578_v15, 0  ;;  %v11490_v19 = vsel %vm399_vm1, %v10579_v16, 0  ;;  %v8845_v20 = vld [vmem:[%s11163_s3 + $0x1] ss:$0 sm:$0xff]  ;;  %s11112_s13 = smov 32  }
  0x73   :  { %9516 = vmatprep.subr.bf16.mxu0 %v13919_v2  ;;  %14043 = vst [vmem:[#allocation38_spill] sm:$0xff] %v11487_v17  ;;  %v11513_v60 = vshrl.u32 %v13908_v59, 7  ;;  %vm1153_vm3 = vcmask 17408   ;;  %s14050_s17 = sld [smem:[#allocation12_spill]]  ;;  %vm1649_vm5 = vcmask 1041409   ;;  %vm1652_vm6 = vcmask 58368  }
  0x74   :  { %9511 = vmatpush3.bf16.xpose.msra.mxu1 %v11403_v40  ;;  %s14052_s29 = sld [smem:[#allocation10_spill]]  ;;  %vm1914_vm7 = vcmask 517120   ;;  %vm1956_vm13 = vcmask 254976   ;;  %vm8087_vm14 = vcmask 1040384   ;;  %vm8090_vm15 = vcmask 1041408  }
  0x75   :  { %9532 = vmatprep.subr.bf16.mxu1 %v13919_v2  ;;  %14044 = vst [vmem:[#allocation39_spill] sm:$0xff] %v11513_v60  ;;  %v11528_v16 = vsub.s32 1, %v11513_v60  ;;  %s14056_s20 = sld [smem:[#allocation14_spill]] }
  0x76   :  { %s14063_s22 = sld [smem:[#allocation16_spill]] }
  0x77   :  { %14046 = vst [vmem:[#allocation41_spill] sm:$0xff] %v11528_v16  ;;  %s14070_s26 = sld [smem:[#allocation15_spill]] }
  0x78   :  { %s14077_s30 = sld [smem:[#allocation17_spill]] }
  0x79   :  { %s14079_s28 = sld [smem:[#allocation19_spill]] }
  0x7a   :  { %s14080_s2 = sld [smem:[#allocation18_spill]] }
 0x103   :  { %v11408_v42 = vpop.f32.mrf.mxu1 }
 0x105   :  { %v11410_v44 = vpop.f32.mrf.mxu1 }
 0x107   :  { %v441_v49 = vpop.f32.mrf.mxu1 }
 0x109   :  { %v342_v43 = vpop.f32.mrf.mxu0  ;;  %v442_v52 = vpop.f32.mrf.mxu1 }
 0x10a   :  { %v343_v45 = vadd.f32 %v8830_v41, %v342_v43  ;;  %v8846_v41 = vld [vmem:[%s11163_s3 + $0x2] ss:$0 sm:$0xff]  ;;  %v8847_v43 = vld [vmem:[%s11163_s3 + $0x3] ss:$0 sm:$0xff] }
 0x10b   :  { %v9474_v48 = vpop.f32.mrf.mxu0  ;;  %v11424_v57 = vpop.f32.mrf.mxu1 }
 0x10c   :  { %v11414_v50 = vmax.f32 %v343_v45, 0.0 }
 0x10d   :  { %v345_v51 = vpop.f32.mrf.mxu0  ;;  %v9482_v58 = vpop.f32.mrf.mxu1 }
 0x10e   :  { %v484_v53 = vpack.c.bf16 %v11414_v50, %v11414_v50 }
 0x10f   :  { %v9475_v56 = vpop.f32.mrf.mxu0  ;;  %v481_v61 = vpop.f32.mrf.mxu1 }
 0x110   :  { %9497 = vmatmul.mubr.msk.bf16.vlgmr.msra.gmra.mxu0 %vm399_vm1, %v484_v53  ;;  %9513 = vmatmul.mubr.msk.bf16.vlgmr.msra.gmra.mxu1 %vm399_vm1, %v484_v53  ;;  %v11516_v61 = vsub.s32 0, %v11513_v60 }
 0x111   :  { %9517 = vmatpush3.bf16.xpose.msra.mxu0 %v11419_v54  ;;  %9533 = vmatpush3.bf16.xpose.msra.mxu1 %v11422_v55  ;;  %v9483_v62 = vpop.f32.mrf.mxu1 }
 0x112   :  { %9518 = vmatprep.subr.bf16.mxu0 %v13919_v2  ;;  %9534 = vmatprep.subr.bf16.mxu1 %v13919_v2  ;;  %14045 = vst [vmem:[#allocation40_spill] sm:$0xff] %v11516_v61  ;;  %v154_v62 = vld [vmem:[%s11153_s25] sm:$0x7]  ;;  %s14051_s25 = sld [smem:[#allocation13_spill]] }
 0x113   :  { %9528 = vmatprep.mubr.msk.bf16.mxu0 %vm11108_vm0, %v13919_v2  ;;  %9544 = vmatprep.mubr.msk.bf16.mxu1 %vm11108_vm0, %v13919_v2  ;;  %v11520_v1 = vrot.slane %v154_v62, %v11516_v61 }
 0x115   :  { %v11524_v7 = vadd.f32 %v11408_v42, %v11520_v1 }
 0x119   :  { %9519 = vmatpush3.bf16.xpose.msra.mxu0 %v11439_v63  ;;  %9535 = vmatpush3.bf16.xpose.msra.mxu1 %v11442_v0 }
 0x11a   :  { %9520 = vmatprep.subr.bf16.mxu0 %v13919_v2  ;;  %9536 = vmatprep.subr.bf16.mxu1 %v13919_v2 }
 0x121   :  { %9521 = vmatpush3.bf16.xpose.msra.mxu0 %v11451_v5  ;;  %9537 = vmatpush3.bf16.xpose.msra.mxu1 %v11454_v6 }
 0x122   :  { %9522 = vmatprep.subr.bf16.mxu0 %v13919_v2  ;;  %9538 = vmatprep.subr.bf16.mxu1 %v13919_v2 }
 0x129   :  { %9523 = vmatpush3.bf16.xpose.msra.mxu0 %v11463_v9  ;;  %9539 = vmatpush3.bf16.xpose.msra.mxu1 %v11466_v10 }
 0x12a   :  { %9524 = vmatprep.subr.bf16.mxu0 %v13919_v2  ;;  %9540 = vmatprep.subr.bf16.mxu1 %v13919_v2 }
 0x131   :  { %9525 = vmatpush3.bf16.xpose.msra.mxu0 %v11475_v13  ;;  %9541 = vmatpush3.bf16.xpose.msra.mxu1 %v11478_v14 }
 0x132   :  { %9526 = vmatprep.subr.bf16.mxu0 %v13919_v2  ;;  %9542 = vmatprep.subr.bf16.mxu1 %v13919_v2 }
 0x139   :  { %9527 = vmatpush3.bf16.xpose.msra.mxu0 %v11487_v17  ;;  %9543 = vmatpush3.bf16.xpose.msra.mxu1 %v11490_v19 }
 0x13a   :  { %9548 = vmatprep.subr.bf16.mxu0 %v13919_v2  ;;  %9554 = vmatprep.subr.bf16.mxu1 %v13919_v2 }
 0x140   :  { %9529 = vmatmul.mubr.msk.bf16.vlgmr.msra.gmra.mxu0 %vm399_vm1, %v484_v53  ;;  %9545 = vmatmul.mubr.msk.bf16.vlgmr.msra.gmra.mxu1 %vm399_vm1, %v484_v53 }
 0x141   :  { %9550 = vmatprep.mubr.msk.bf16.mxu0 %vm11108_vm0, %v13919_v2  ;;  %9556 = vmatprep.mubr.msk.bf16.mxu1 %vm11108_vm0, %v13919_v2 }
 0x1d0   :  { %v11503_v21 = vpop.f32.mrf.mxu0  ;;  %v682_v22 = vpop.f32.mrf.mxu1 }
 0x1d1   :  { %v683_v23 = vadd.f32 %v8845_v20, %v682_v22  ;;  %v362_v20 = vsub.s32 2, %v11513_v60  ;;  %v11532_v22 = vrot.slane %v154_v62, %v11528_v16 }
 0x1d2   :  { %v9498_v24 = vpop.f32.mrf.mxu0  ;;  %v9514_v25 = vpop.f32.mrf.mxu1 }
 0x1d3   :  { %895 = vrot.lane.b32.xlu0 %v683_v23, %s11110_s0  ;;  %v440_v42 = vadd.f32 %v11410_v44, %v11532_v22 }
 0x1d4   :  { %v597_v26 = vpop.f32.mrf.mxu0  ;;  %v685_v35 = vpop.f32.mrf.mxu1 }
 0x1d6   :  { %v9499_v36 = vpop.f32.mrf.mxu0  ;;  %v9515_v39 = vpop.f32.mrf.mxu1 }
 0x200   :  { %v770_v45 = vpop.f32.mrf.mxu0  ;;  %v858_v46 = vpop.f32.mrf.mxu1 }
 0x201   :  { %v771_v47 = vadd.f32 %v8846_v41, %v770_v45  ;;  %v859_v48 = vadd.f32 %v8847_v43, %v858_v46 }
 0x202   :  { %v9530_v49 = vpop.f32.mrf.mxu0  ;;  %v9546_v51 = vpop.f32.mrf.mxu1 }
 0x203   :  { %931 = vrot.lane.b32.xlu0 %v771_v47, %s11111_s9  ;;  %960 = vrot.lane.b32.xlu1 %v859_v48, %s11112_s13 }
 0x204   :  { %v773_v52 = vpop.f32.mrf.mxu0  ;;  %v861_v53 = vpop.f32.mrf.mxu1 }
 0x206   :  { %v9531_v56 = vpop.f32.mrf.mxu0  ;;  %v9547_v58 = vpop.f32.mrf.mxu1 }
 0x207   :  { %970 = vrot.lane.b32.xlu0 %v859_v48, %s11110_s0  ;;  %912 = vrot.lane.b32.xlu1 %v683_v23, %s11112_s13  ;;  %v11534_v23 = vrot.slane %v154_v62, %v362_v20 }
 0x209   :  { %v479_v24 = vadd.f32 %v11424_v57, %v11534_v23 }
 0x245   :  { %v896_v3 = vpop.permute.xlu0 %895 }
 0x246   :  { %v898_v8 = vadd.f32 %v896_v3, %v11524_v7 }
 0x248   :  { %v8877_v11 = vmul.f32 -1.442695, %v898_v8 }
 0x24a   :  { %10614 = vpow2.f32 %v8877_v11 }
 0x257   :  { %v10615_v12 = vpop.eup %10614 }
 0x258   :  { %v902_v15 = vadd.f32 1.0, %v10615_v12 }
 0x25a   :  { %10616 = vrcp.f32 %v902_v15 }
 0x267   :  { %v10617_v43 = vpop.eup %10616 }
 0x275   :  { %v932_v25 = vpop.permute.xlu0 %931  ;;  %v961_v26 = vpop.permute.xlu1 %960 }
 0x276   :  { %v934_v35 = vadd.f32 %v932_v25, %v440_v42  ;;  %v963_v36 = vadd.f32 %v961_v26, %v479_v24 }
 0x278   :  { %v8879_v39 = vmul.f32 -1.442695, %v934_v35  ;;  %v8880_v41 = vmul.f32 -1.442695, %v963_v36  ;;  %v905_v35 = vadd.f32 %v896_v3, %v440_v42 }
 0x279   :  { %v913_v45 = vpop.permute.xlu1 %912  ;;  %v971_v53 = vpop.permute.xlu0 %970 }
 0x27a   :  { %10618 = vpow2.f32 %v8879_v39  ;;  %v915_v46 = vmul.f32 %v10617_v43, %v913_v45  ;;  %v8878_v36 = vmul.f32 -1.442695, %v905_v35 }
 0x27b   :  { %10620 = vpow2.f32 %v8880_v41 }
 0x27c   :  { %917 = vrot.lane.b32.xlu1 %v915_v46, %s11111_s9 }
 0x287   :  { %v10619_v48 = vpop.eup %10618 }
 0x288   :  { %v10621_v49 = vpop.eup %10620  ;;  %v938_v51 = vadd.f32 1.0, %v10619_v48 }
 0x289   :  { %v967_v44 = vadd.f32 1.0, %v10621_v49 }
 0x28a   :  { %10622 = vrcp.f32 %v938_v51 }
 0x28b   :  { %10624 = vrcp.f32 %v967_v44 }
 0x297   :  { %v10623_v57 = vpop.eup %10622 }
 0x298   :  { %v10625_v52 = vpop.eup %10624  ;;  %v941_v56 = vmul.f32 %v10623_v57, %v771_v47  ;;  %v948_v44 = vsub.f32 1.0, %v10623_v57 }
 0x299   :  { %v973_v58 = vmul.f32 %v10625_v52, %v971_v53 }
 0x29a   :  { %943 = vrot.lane.b32.xlu0 %v941_v56, %s11111_s9 }
 0x29b   :  { %975 = vrot.lane.b32.xlu1 %v973_v58, %s11111_s9  ;;  %v207_v58 = vld [vmem:[%s11168_s8] sm:$0x3] }
 0x2ee   :  { %v918_v62 = vpop.permute.xlu1 %917 }
 0x2ef   :  { %v920_v8 = vadd.f32 %v918_v62, %v440_v42 }
 0x2f1   :  { %10626 = vtanh.f32 %v920_v8  ;;  %v980_v8 = vsub.f32 1.0, %v10625_v52 }
 0x2fe   :  { %v10627_v11 = vpop.eup %10626 }
 0x2ff   :  { %924 = vrot.lane.b32.xlu0 %v10627_v11, %s11110_s0  ;;  %v11559_v11 = vsel %vm399_vm1, %v207_v58, 0 }
 0x300   :  { %14047 = vst [vmem:[#allocation42_spill] sm:$0xff] %v11559_v11  ;;  %9549 = vmatpush3.bf16.xpose.msra.mxu0 %v11559_v11 }
 0x301   :  { %9560 = vmatprep.subr.bf16.mxu0 %v13919_v2 }
 0x303   :  { %954 = vrot.lane.b32.xlu0 %v11414_v50, %s11110_s0 }
 0x307   :  { %986 = vrot.lane.b32.xlu0 %v11414_v50, %s11111_s9 }
 0x30c   :  { %v944_v12 = vpop.permute.xlu0 %943 }
 0x30d   :  { %v946_v15 = vadd.f32 %v944_v12, %v479_v24  ;;  %v976_v47 = vpop.permute.xlu1 %975 }
 0x30e   :  { %v978_v20 = vadd.f32 %v976_v47, %v479_v24 }
 0x30f   :  { %10628 = vtanh.f32 %v946_v15 }
 0x310   :  { %10630 = vtanh.f32 %v978_v20  ;;  %v208_v20 = vld [vmem:[%s11168_s8 + $0x2] sm:$0x3] }
 0x311   :  { %10632 = vpow2.f32 %v8878_v36 }
 0x31c   :  { %v10629_v25 = vpop.eup %10628 }
 0x31d   :  { %950 = vrot.lane.b32.xlu1 %v10629_v25, %s11110_s0  ;;  %v10631_v26 = vpop.eup %10630  ;;  %v11571_v25 = vsel %vm399_vm1, %v208_v20, 0 }
 0x31e   :  { %v10633_v39 = vpop.eup %10632  ;;  %9555 = vmatpush3.bf16.xpose.msra.mxu1 %v11571_v25 }
 0x31f   :  { %v909_v41 = vadd.f32 1.0, %v10633_v39  ;;  %9566 = vmatprep.subr.bf16.mxu1 %v13919_v2 }
 0x321   :  { %982 = vrot.lane.b32.xlu1 %v10631_v26, %s11110_s0  ;;  %10634 = vrcp.f32 %v909_v41 }
 0x32e   :  { %v10635_v43 = vpop.eup %10634 }
 0x32f   :  { %v922_v45 = vsub.f32 1.0, %v10635_v43  ;;  %v928_v48 = vmul.f32 %v10635_v43, %v11414_v50  ;;  %v8844_v43 = vld [vmem:[%s11163_s3] ss:$0 sm:$0xff] }
 0x371   :  { %v925_v46 = vpop.permute.xlu0 %924 }
 0x372   :  { %v927_v24 = vmul.f32 %v925_v46, %v922_v45  ;;  %v595_v45 = vadd.f32 %v8844_v43, %v11503_v21  ;;  %v209_v46 = vld [vmem:[%s11168_s8 + $0x4] sm:$0x3]  ;;  %v8884_v43 = vld [vmem:[%s11173_s14] ss:$0 sm:$0xff]  ;;  %s14054_s8 = sld [smem:[#allocation11_spill]] }
 0x374   :  { %v11551_v49 = vadd.f32 %v928_v48, %v927_v24  ;;  %v11595_v48 = vsel %vm399_vm1, %v209_v46, 0 }
 0x375   :  { %v955_v51 = vpop.permute.xlu0 %954  ;;  %14048 = vst [vmem:[#allocation43_spill] sm:$0xff] %v11595_v48 }
 0x376   :  { %992 = vrot.lane.b32.xlu1 %v11551_v49, %s11112_s13  ;;  %v957_v42 = vmul.f32 %v10623_v57, %v955_v51 }
 0x379   :  { %v987_v56 = vpop.permute.xlu0 %986 }
 0x37a   :  { %v989_v15 = vmul.f32 %v10625_v52, %v987_v56  ;;  %v864_v56 = vadd.f32 %v595_v45, %v11524_v7 }
 0x37c   :  { %v8876_v58 = vmul.f32 -1.442695, %v864_v56 }
 0x37e   :  { %10636 = vpow2.f32 %v8876_v58 }
 0x38f   :  { %v951_v3 = vpop.permute.xlu1 %950 }
 0x390   :  { %v953_v53 = vmul.f32 %v951_v3, %v948_v44 }
 0x392   :  { %v11556_v62 = vadd.f32 %v957_v42, %v953_v53 }
 0x393   :  { %v983_v12 = vpop.permute.xlu1 %982 }
 0x394   :  { %v985_v47 = vmul.f32 %v983_v12, %v980_v8  ;;  %996 = vrot.lane.b32.xlu0 %v11556_v62, %s11111_s9 }
 0x396   :  { %v11565_v57 = vadd.f32 %v989_v15, %v985_v47 }
 0x398   :  { %1000 = vrot.lane.b32.xlu1 %v11565_v57, %s11110_s0 }
 0x3e8   :  { %v11575_v52 = vpop.permute.xlu1 %992 }
 0x3e9   :  { %v1003_v26 = vpack.c.bf16 %v11575_v52, %v11575_v52 }
 0x3eb   :  { %1007 = vrot.lane.b32.xlu0 %v1003_v26, %s11110_s0 }
 0x406   :  { %v11580_v35 = vpop.permute.xlu0 %996 }
 0x407   :  { %v1004_v36 = vpack.c.bf16 %v11580_v35, %v11580_v35 }
 0x409   :  { %1056 = vrot.lane.b32.xlu1 %v1004_v36, %s11110_s0 }
 0x40a   :  { %v11585_v39 = vpop.permute.xlu1 %1000 }
 0x40b   :  { %v1005_v41 = vpack.c.bf16 %v11585_v39, %v11585_v39 }
 0x40d   :  { %1105 = vrot.lane.b32.xlu0 %v1005_v41, %s11110_s0  ;;  %v10637_v41 = vpop.eup %10636 }
 0x411   :  { %872 = vrot.lane.b32.xlu0 %v595_v45, %s11111_s9 }
 0x45d   :  { %v11597_v24 = vpop.permute.xlu0 %1007 }
 0x45e   :  { %9551 = vmatmul.mubr.msk.bf16.vlgmr.msra.gmra.mxu0 %vm399_vm1, %v11597_v24 }
 0x45f   :  { %9561 = vmatpush3.bf16.xpose.msra.mxu0 %v11595_v48  ;;  %9562 = vmatprep.mubr.msk.bf16.mxu0 %vm11108_vm0, %v13919_v2 }
 0x460   :  { %9574 = vmatprep.subr.bf16.mxu0 %v13919_v2 }
 0x47b   :  { %v11605_v51 = vpop.permute.xlu1 %1056 }
 0x47c   :  { %9557 = vmatmul.mubr.msk.bf16.vlgmr.msra.gmra.mxu1 %vm399_vm1, %v11605_v51 }
 0x47d   :  { %9570 = vmatprep.mubr.msk.bf16.mxu1 %vm11108_vm0, %v13919_v2 }
 0x47f   :  { %v11611_v21 = vpop.permute.xlu0 %1105 }
 0x480   :  { %9563 = vmatmul.mubr.msk.bf16.vlgmr.msra.gmra.mxu0 %vm399_vm1, %v11611_v21 }
 0x481   :  { %9578 = vmatprep.mubr.msk.bf16.mxu0 %vm11108_vm0, %v13919_v2 }
 0x51e   :  { %v1049_v44 = vpop.f32.mrf.mxu0 }
 0x51f   :  { %v1154_v47 = vsel %vm1153_vm3, %v1049_v44, 0.0  ;;  %v873_v44 = vpop.permute.xlu0 %872 }
 0x520   :  { %v9552_v3 = vpop.f32.mrf.mxu0 }
 0x522   :  { %v1052_v42 = vpop.f32.mrf.mxu0 }
 0x524   :  { %v9553_v53 = vpop.f32.mrf.mxu0 }
 0x525   :  { %v868_v53 = vadd.f32 1.0, %v10637_v41 }
 0x527   :  { %10638 = vrcp.f32 %v868_v53 }
 0x53c   :  { %v1098_v8 = vpop.f32.mrf.mxu1 }
 0x53d   :  { %v1155_v12 = vsel %vm1153_vm3, %v1098_v8, 0.0 }
 0x53e   :  { %v9558_v15 = vpop.f32.mrf.mxu1  ;;  %v1156_v20 = vadd.f32 %v1155_v12, %v1154_v47  ;;  %v10639_v12 = vpop.eup %10638 }
 0x53f   :  { %v875_v15 = vmul.f32 %v10639_v12, %v873_v44 }
 0x540   :  { %v1101_v26 = vpop.f32.mrf.mxu1  ;;  %v1147_v36 = vpop.f32.mrf.mxu0 }
 0x541   :  { %v1157_v46 = vsel %vm1153_vm3, %v1147_v36, 0.0 }
 0x542   :  { %v1158_v3 = vadd.f32 %v1157_v46, %v1156_v20  ;;  %v9559_v42 = vpop.f32.mrf.mxu1  ;;  %v9564_v45 = vpop.f32.mrf.mxu0 }
 0x544   :  { %v1165_v56 = vadd.f32 %v8884_v43, %v1158_v3  ;;  %v1150_v58 = vpop.f32.mrf.mxu0  ;;  %v13909_v43 = vmov 2  }
 0x545   :  { %10521 = vset.pattern.permute.xlu1 %v13909_v43  ;;  %v11636_v58 = vld [vmem:[%s11183_s24 + $0x8] sm:$0xff]  }
 0x546   :  { %1203 = vst.msk [vmem:[%s11296_s4] sm:$0x3] %vm1153_vm3, %v1165_v56  ;;  %v9565_v59 = vpop.f32.mrf.mxu0  ;;  %v1166_v8 = vsel %vm1153_vm3, %v1165_v56, -inf  ;;  %9567 = vmatpush3.bf16.msra.mxu1 %v11636_v58 }
 0x547   :  { %1167 = vmax.xlane.f32.xlu1 %v1166_v8  ;;  %v13911_v59 = vmov 1   ;;  %9568 = vmatprep.subr.bf16.mxu1 %v13919_v2  ;;  %v11644_v8 = vld [vmem:[%s11183_s24] sm:$0xff]  }
 0x548   :  { %10520 = vset.pattern.permute.xlu0 %v13911_v59 }
 0x54a   :  { %9569 = vmatpush3.bf16.msra.mxu1 %v11644_v8 }
 0x54b   :  { %9582 = vmatprep.subr.bf16.mxu1 %v13919_v2 }
 0x558   :  { %877 = vrot.lane.b32.xlu1 %v875_v15, %s11111_s9 }
 0x5d0   :  { %v1168_v47 = vpop.xlane.xlu1 %1167 }
 0x5d1   :  { %v1169_v26 = vsub.f32 %v1165_v56, %v1168_v47 }
 0x5d3   :  { %v1170_v20 = vmul.f32 1.442695, %v1169_v26 }
 0x5d4   :  { %v878_v46 = vpop.permute.xlu1 %877 }
 0x5d5   :  { %10640 = vpow2.f32 %v1170_v20  ;;  %v880_v42 = vadd.f32 %v878_v46, %v11524_v7  ;;  %v11641_v7 = vld [vmem:[%s11178_s19 + $0x8] sm:$0xff]  }
 0x5d6   :  { %9575 = vmatpush3.bf16.msra.mxu0 %v11641_v7 }
 0x5d7   :  { %9576 = vmatprep.subr.bf16.mxu0 %v13919_v2 }
 0x5e2   :  { %v10641_v36 = vpop.eup %10640 }
 0x5e3   :  { %v1172_v41 = vsel %vm1153_vm3, %v10641_v36, 0.0 }
 0x5e4   :  { %1173 = vadd.xlane.f32.xlu0 %v1172_v41 }
 0x66d   :  { %v1174_v3 = vpop.xlane.xlu0 %1173 }
 0x66e   :  { %10642 = vrcp.f32 %v1174_v3 }
 0x66f   :  { %10644 = vtanh.f32 %v880_v42 }
 0x67b   :  { %v10643_v45 = vpop.eup %10642 }
 0x67c   :  { %v1176_v53 = vmul.f32 %v10643_v45, %v10641_v36  ;;  %v10645_v56 = vpop.eup %10644  ;;  %v882_v36 = vsub.f32 1.0, %v10639_v12 }
 0x67e   :  { %1184 = vperm.xlu0 %10520, %v1176_v53   ;;  %1194 = vperm.xlu1 %10521, %v1176_v53  }
 0x682   :  { %884 = vrot.lane.b32.xlu1 %v10645_v56, %s11110_s0  ;;  %10523 = vset.pattern.permute.xlu0 %v13913_v4 }
 0x683   :  { %10522 = vset.pattern.permute.xlu1 %v13913_v4 }
 0x686   :  { %889 = vrot.lane.b32.xlu1 %v11414_v50, %s11112_s13  ;;  %v11651_v50 = vld [vmem:[%s11178_s19] sm:$0xff]  }
 0x687   :  { %9577 = vmatpush3.bf16.msra.mxu0 %v11651_v50 }
 0x688   :  { %9594 = vmatprep.subr.bf16.mxu0 %v13919_v2 }
 0x68a   :  { %1179 = vperm.xlu1 %10522, %v1176_v53  }
 0x6f9   :  { %v1185_v44 = vpop.permute.xlu0 %1184  ;;  %v1195_v15 = vpop.permute.xlu1 %1194 }
 0x6fa   :  { %v1187_v47 = vmul.f32 %v1185_v44, %v11556_v62  ;;  %v1197_v20 = vmul.f32 %v1195_v15, %v11565_v57 }
 0x6fc   :  { %1189 = vrot.lane.b32.xlu1 %v1187_v47, %s11112_s13  ;;  %v10584_v47 = vld [vmem:[%s11193_s6 + $0x18] sm:$0xff]  }
 0x6fd   :  { %v885_v26 = vpop.permute.xlu1 %884 }
 0x6fe   :  { %v887_v46 = vmul.f32 %v885_v26, %v882_v36  ;;  %v10587_v36 = vld [vmem:[%s11193_s6] sm:$0xff]  }
 0x700   :  { %1199 = vrot.lane.b32.xlu1 %v1197_v20, %s11111_s9  ;;  %v10586_v20 = vld [vmem:[%s11193_s6 + $0x8] sm:$0xff]  }
 0x701   :  { %v890_v41 = vpop.permute.xlu1 %889 }
 0x702   :  { %v892_v3 = vmul.f32 %v10639_v12, %v890_v41  ;;  %v10588_v41 = vld [vmem:[%s14050_s17 + $0x8] sm:$0xff]  }
 0x704   :  { %v11659_v42 = vadd.f32 %v892_v3, %v887_v46  ;;  %v10589_v46 = vld [vmem:[%s14050_s17] sm:$0xff]  }
 0x705   :  { %v1180_v62 = vpop.permute.xlu1 %1179  ;;  %v11685_v3 = vld [vmem:[%s11246_s27] sm:$0xff] }
 0x706   :  { %14049 = vst [vmem:[#allocation44_spill] sm:$0xff] %v11659_v42  ;;  %v1204_v45 = vpack.c.bf16 %v11659_v42, %v11659_v42  ;;  %v1182_v56 = vmul.f32 %v1180_v62, %v11551_v49  ;;  %v10585_v49 = vld [vmem:[%s11193_s6 + $0x10] sm:$0xff]  }
 0x708   :  { %1262 = vrot.lane.b32.xlu1 %v1204_v45, %s11110_s0  ;;  %v11688_v45 = vld [vmem:[%s11246_s27 + $0x8] sm:$0xff] }
 0x709   :  { %v1403_v62 = vpack.c.bf16 %v11688_v45, %v11685_v3 }
 0x76e   :  { %v1190_v53 = vpop.permute.xlu1 %1189 }
 0x76f   :  { %v1192_v57 = vadd.f32 %v1190_v53, %v1182_v56  ;;  %v11694_v53 = vld [vmem:[%s14051_s25 + $0x8] sm:$0xff]  }
 0x772   :  { %v1200_v44 = vpop.permute.xlu1 %1199 }
 0x773   :  { %v1202_v15 = vadd.f32 %v1200_v44, %v1192_v57 }
 0x775   :  { %v1205_v26 = vpack.c.bf16 %v1202_v15, %v1202_v15  ;;  %v11703_v15 = vld [vmem:[%s14052_s29] ss:$0 sm:$0xff] }
 0x776   :  { %14053 = vst [vmem:[#allocation45_spill] sm:$0xff] %v11703_v15 }
 0x777   :  { %9571 = vmatmul.mubr.msk.bf16.vlgmr.msra.gmra.mxu1 %vm399_vm1, %v1205_v26 }
 0x778   :  { %9583 = vmatpush3.bf16.msra.mxu1 %v10584_v47  ;;  %9590 = vmatprep.mubr.msk.bf16.mxu1 %vm11108_vm0, %v13919_v2 }
 0x779   :  { %9584 = vmatprep.subr.bf16.mxu1 %v13919_v2 }
 0x77a   :  { %v11670_v12 = vpop.permute.xlu1 %1262 }
 0x77b   :  { %9579 = vmatmul.mubr.msk.bf16.vlgmr.msra.gmra.mxu0 %vm399_vm1, %v11670_v12 }
 0x77c   :  { %9598 = vmatprep.mubr.msk.bf16.mxu0 %vm11108_vm0, %v13919_v2  ;;  %9585 = vmatpush3.bf16.msra.mxu1 %v10585_v49 }
 0x77d   :  { %9586 = vmatprep.subr.bf16.mxu1 %v13919_v2  ;;  %9595 = vmatpush3.bf16.msra.mxu0 %v10588_v41 }
 0x77e   :  { %9596 = vmatprep.subr.bf16.mxu0 %v13919_v2 }
 0x780   :  { %9587 = vmatpush3.bf16.msra.mxu1 %v10586_v20 }
 0x781   :  { %9588 = vmatprep.subr.bf16.mxu1 %v13919_v2  ;;  %9597 = vmatpush3.bf16.msra.mxu0 %v10589_v46 }
 0x782   :  { %9602 = vmatprep.subr.bf16.mxu0 %v13919_v2 }
 0x784   :  { %9589 = vmatpush3.bf16.msra.mxu1 %v10587_v36  ;;  %9599 = vmatmul.mubr.msk.bf16.vlgmr.msra.gmra.mxu0 %vm399_vm1, %v1403_v62 }
 0x785   :  { %9610 = vmatprep.subr.bf16.mxu1 %v13919_v2  ;;  %9603 = vmatpush3.bf16.msra.mxu0 %v11694_v53 }
 0x786   :  { %9606 = vmatprep.mubr.msk.bf16.mxu0 %vm11108_vm0, %v13919_v2  ;;  %9604 = vmatprep.subr.bf16.mxu0 %v13919_v2 }
 0x837   :  { %v1255_v56 = vpop.f32.mrf.mxu1 }
 0x839   :  { %v9572_v57 = vpop.f32.mrf.mxu1 }
 0x83a   :  { %v11710_v57 = vld [vmem:[%s14051_s25] sm:$0xff]  }
 0x83b   :  { %v1258_v44 = vpop.f32.mrf.mxu1  ;;  %v1313_v47 = vpop.f32.mrf.mxu0  ;;  %14055 = vst [vmem:[#allocation46_spill] sm:$0xff] %v11710_v57  ;;  %9605 = vmatpush3.bf16.msra.mxu0 %v11710_v57 }
 0x83c   :  { %v1314_v26 = vadd.f32 %v1313_v47, %v1255_v56  ;;  %9618 = vmatprep.subr.bf16.mxu0 %v13919_v2 }
 0x83d   :  { %v9573_v49 = vpop.f32.mrf.mxu1  ;;  %v9580_v20 = vpop.f32.mrf.mxu0 }
 0x83e   :  { %v1325_v36 = vadd.f32 %v11703_v15, %v1314_v26 }
 0x83f   :  { %v1316_v41 = vpop.f32.mrf.mxu0 }
 0x840   :  { %vm1326_vm4 = vcmp.ge.f32.partialorder %v1325_v36, 0.0  ;;  %v1327_v46 = vmul.f32 0.1, %v1325_v36 }
 0x841   :  { %v9581_v62 = vpop.f32.mrf.mxu0 }
 0x842   :  { %v1328_v43 = vsel %vm1326_vm4, %v1325_v36, %v1327_v46  ;;  %v11726_v62 = vld [vmem:[%s14056_s20 + $0x8] sm:$0xff]   ;;  %vm8093_vm4 = vcmask 1042432  }
 0x843   :  { %v1329_v59 = vpack.c.bf16 %v1328_v43, %v1328_v43  ;;  %v11719_v43 = vld [vmem:[%s14054_s8] ss:$0 sm:$0xff]  ;;  %14060 = vst [vmem:[#allocation50_spill] sm:$0xff] %v11726_v62 }
 0x844   :  { %v11714_v56 = vpop.f32.mrf.mxu0  ;;  %14059 = vst [vmem:[#allocation49_spill] sm:$0xff] %v11719_v43 }
 0x845   :  { %9591 = vmatmul.mubr.msk.bf16.vlgmr.msra.gmra.mxu1 %vm304_vm2, %v1329_v59  ;;  %14057 = vst [vmem:[#allocation47_spill] sm:$0xff] %v11714_v56 }
 0x846   :  { %9614 = vmatprep.mubr.msk.bf16.mxu1 %vm11108_vm0, %v13919_v2  ;;  %v9600_v44 = vpop.f32.mrf.mxu0  ;;  %9611 = vmatpush3.bf16.msra.mxu1 %v11726_v62 }
 0x847   :  { %v11730_v44 = vld [vmem:[%s14056_s20] sm:$0xff]   ;;  %9612 = vmatprep.subr.bf16.mxu1 %v13919_v2 }
 0x848   :  { %v11716_v47 = vpop.f32.mrf.mxu0  ;;  %14061 = vst [vmem:[#allocation51_spill] sm:$0xff] %v11730_v44 }
 0x849   :  { %14058 = vst [vmem:[#allocation48_spill] sm:$0xff] %v11716_v47 }
 0x84a   :  { %v9601_v26 = vpop.f32.mrf.mxu0  ;;  %9613 = vmatpush3.bf16.msra.mxu1 %v11730_v44 }
 0x84b   :  { %9626 = vmatprep.subr.bf16.mxu1 %v13919_v2  ;;  %v11115_v26 = vmov 1966171168  }
 0x905   :  { %v1397_v59 = vpop.f32.mrf.mxu1 }
 0x906   :  { %v1398_v49 = vadd.f32 %v11719_v43, %v1397_v59  ;;  %v1518_v59 = vunpack.c.l.s4 %v11115_v26 }
 0x907   :  { %v9592_v20 = vpop.f32.mrf.mxu1 }
 0x908   :  { %v1460_v36 = vpack.c.bf16 %v1398_v49, %v1398_v49  ;;  %v1519_v49 = vunpack.c.0.s8 %v1518_v59 }
 0x909   :  { %v1400_v41 = vpop.f32.mrf.mxu1 }
 0x90a   :  { %9607 = vmatmul.mubr.msk.bf16.vlgmr.msra.gmra.mxu0 %vm399_vm1, %v1460_v36  ;;  %v11736_v20 = vsub.s32 %v1519_v49, %v11513_v60 }
 0x90b   :  { %v9593_v46 = vpop.f32.mrf.mxu1  ;;  %9622 = vmatprep.mubr.msk.bf16.mxu0 %vm11108_vm0, %v13919_v2 }
 0x90c   :  { %14062 = vst [vmem:[#allocation52_spill] sm:$0xff] %v11736_v20 }
 0x9ca   :  { %v1510_v41 = vpop.f32.mrf.mxu0 }
 0x9cb   :  { %v1523_v46 = vrot.slane %v1510_v41, %v11736_v20 }
 0x9cc   :  { %v9608_v4 = vpop.f32.mrf.mxu0 }
 0x9cd   :  { %v1524_v62 = vcombine.high %v1523_v46, %v1523_v46  ;;  %v1531_v43 = vrot.slane %v1523_v46, %v11736_v20  ;;  %v14067_v46 = vmov 0  }
 0x9ce   :  { %v1513_v15 = vpop.f32.mrf.mxu0 }
 0x9cf   :  { %v1538_v44 = vrot.slane %v1524_v62, %v11736_v20  ;;  %v1542_v2 = vrot.slane %v1531_v43, %v11516_v61  ;;  %v11746_v15 = vld [vmem:[%s14063_s22 + $0x8] sm:$0xff]  }
 0x9d0   :  { %v9609_v57 = vpop.f32.mrf.mxu0  ;;  %v11758_v43 = vld [vmem:[%s11148_s21 + $0x1c] ss:$12 sps:$4 sm:$0xff]  }
 0x9d1   :  { %v1546_v26 = vrot.slane %v1538_v44, %v11516_v61  ;;  %v1549_v59 = vadd.f32 %v1542_v2, %v11714_v56  ;;  %v11751_v57 = vld [vmem:[%s14063_s22] sm:$0xff]   ;;  %v14064_v2 = vmov 0.0   ;;  %14065 = vst [vmem:[#allocation53_spill] sm:$0xff] %v11758_v43 }
 0x9d2   :  { %v11763_v44 = vld [vmem:[%s11148_s21 + $0x18] ss:$12 sps:$4 sm:$0xff]  }
 0x9d3   :  { %v1550_v49 = vadd.f32 %v1546_v26, %v11716_v47  ;;  %10646 = vtanh.f32 %v1549_v59  ;;  %14066 = vst [vmem:[#allocation54_spill] sm:$0xff] %v11763_v44  ;;  %v8919_v26 = vld [vmem:[%s11128_s5 + $0x2] sm:$0x3]  ;;  %v11769_v59 = vld [vmem:[%s11148_s21 + $0x4] ss:$12 sps:$4 sm:$0xff]  }
 0x9d4   :  { %14068 = vst [vmem:[#allocation55_spill] sm:$0xff] %v11769_v59 }
 0x9d5   :  { %10648 = vtanh.f32 %v1550_v49  ;;  %v11772_v49 = vpack.c.bf16 %v8919_v26, %v8919_v26 }
 0x9e0   :  { %v10647_v4 = vpop.eup %10646 }
 0x9e2   :  { %v10649_v41 = vpop.eup %10648 }
 0x9e3   :  { %v1553_v62 = vpack.c.bf16 %v10649_v41, %v10647_v4  ;;  %v11775_v4 = vld [vmem:[%s11148_s21] ss:$12 sps:$4 sm:$0xff]  }
 0x9e4   :  { %14069 = vst [vmem:[#allocation56_spill] sm:$0xff] %v11775_v4 }
 0x9e5   :  { %9615 = vmatmul.mubr.msk.bf16.vlgmr.msra.gmra.mxu1 %vm399_vm1, %v1553_v62 }
 0x9e6   :  { %9627 = vmatpush3.bf16.msra.mxu1 %v11746_v15  ;;  %9630 = vmatprep.mubr.msk.bf16.mxu1 %vm11108_vm0, %v14064_v2 }
 0x9e7   :  { %9628 = vmatprep.subr.bf16.mxu1 %v14064_v2 }
 0x9ea   :  { %9629 = vmatpush3.bf16.msra.mxu1 %v11751_v57 }
 0x9eb   :  { %2055 = vmatprep.subr.bf16.mxu1 %v11758_v43 }
 0x9ed   :  { %9631 = vmatmul.mubr.msk.bf16.vlgmr.msra.gmra.mxu1 %vm399_vm1, %v1460_v36 }
 0x9ee   :  { %2056 = vmatpush1.bf16.msra.mxu1 %v11763_v44  ;;  %2075 = vmatprep.mubr.bf16.mxu1 %v14067_v46 }
 0x9ef   :  { %2057 = vmatprep.subr.bf16.mxu1 %v11769_v59  ;;  %v14076_v59 = vmov 1  }
 0x9f2   :  { %2058 = vmatpush1.bf16.msra.mxu1 %v11775_v4 }
 0x9f3   :  { %9650 = vmatprep.subr.bf16.mxu1 %v14064_v2 }
 0x9f5   :  { %8920 = vmatmul.mubr.msk.bf16.vlgmr.msra.gmra.mxu1 %vm399_vm1, %v11772_v49 }
 0x9f6   :  { %9651 = vmatpush3.bf16.xpose.msra.mxu1 %v11327_v18  ;;  %9662 = vmatprep.mubr.msk.bf16.mxu1 %vm11108_vm0, %v14064_v2  ;;  %v14072_v18 = vlaneseq }
 0x9f7   :  { %9652 = vmatprep.subr.bf16.mxu1 %v14064_v2 }
 0x9f8   :  { %v11835_v4 = vand.u32 127, %v14072_v18 }
 0x9fa   :  { %14073 = vst [vmem:[#allocation58_spill] sm:$0xff] %v11835_v4 }
 0x9fe   :  { %9653 = vmatpush3.bf16.xpose.msra.mxu1 %v11350_v28 }
 0x9ff   :  { %9654 = vmatprep.subr.bf16.mxu1 %v14064_v2 }
 0xa06   :  { %9655 = vmatpush3.bf16.xpose.msra.mxu1 %v11356_v30 }
 0xa07   :  { %9656 = vmatprep.subr.bf16.mxu1 %v14064_v2 }
 0xa0e   :  { %9657 = vmatpush3.bf16.xpose.msra.mxu1 %v11362_v32 }
 0xa0f   :  { %9658 = vmatprep.subr.bf16.mxu1 %v14064_v2 }
 0xa16   :  { %9659 = vmatpush3.bf16.xpose.msra.mxu1 %v11369_v34 }
 0xa17   :  { %9660 = vmatprep.subr.bf16.mxu1 %v14064_v2 }
 0xa1e   :  { %9661 = vmatpush3.bf16.xpose.msra.mxu1 %v11395_v38 }
 0xa1f   :  { %9682 = vmatprep.subr.bf16.mxu1 %v14064_v2 }
 0xa25   :  { %9663 = vmatmul.mubr.msk.bf16.vlgmr.msra.gmra.mxu1 %vm399_vm1, %v11670_v12 }
 0xa26   :  { %9683 = vmatpush3.bf16.xpose.msra.mxu1 %v11419_v54  ;;  %9694 = vmatprep.mubr.msk.bf16.mxu1 %vm11108_vm0, %v14064_v2 }
 0xa27   :  { %9684 = vmatprep.subr.bf16.mxu1 %v14064_v2 }
 0xa2e   :  { %9685 = vmatpush3.bf16.xpose.msra.mxu1 %v11439_v63 }
 0xa2f   :  { %9686 = vmatprep.subr.bf16.mxu1 %v14064_v2 }
 0xa36   :  { %9687 = vmatpush3.bf16.xpose.msra.mxu1 %v11451_v5 }
 0xa37   :  { %9688 = vmatprep.subr.bf16.mxu1 %v14064_v2 }
 0xa3e   :  { %9689 = vmatpush3.bf16.xpose.msra.mxu1 %v11463_v9  ;;  %v11820_v9 = vld [vmem:[%s14070_s26] ss:$0 sm:$0xff] }
 0xa3f   :  { %9690 = vmatprep.subr.bf16.mxu1 %v14064_v2  ;;  %14071 = vst [vmem:[#allocation57_spill] sm:$0xff] %v11820_v9 }
 0xa46   :  { %9691 = vmatpush3.bf16.xpose.msra.mxu1 %v11475_v13 }
 0xa47   :  { %9692 = vmatprep.subr.bf16.mxu1 %v14064_v2 }
 0xa4e   :  { %9693 = vmatpush3.bf16.xpose.msra.mxu1 %v11487_v17 }
 0xa4f   :  { %9714 = vmatprep.subr.bf16.mxu1 %v14064_v2 }
 0xa55   :  { %9695 = vmatmul.mubr.msk.bf16.vlgmr.msra.gmra.mxu1 %vm399_vm1, %v11605_v51 }
 0xa56   :  { %9715 = vmatpush3.bf16.xpose.msra.mxu1 %v11559_v11  ;;  %9716 = vmatprep.mubr.msk.bf16.mxu1 %vm11108_vm0, %v14064_v2 }
 0xa57   :  { %9726 = vmatprep.subr.bf16.mxu1 %v14064_v2 }
 0xaa5   :  { %v1603_v12 = vpop.f32.mrf.mxu1 }
 0xaa6   :  { %10650 = vtanh.f32 %v1603_v12 }
 0xaa7   :  { %v9616_v36 = vpop.f32.mrf.mxu1 }
 0xaa9   :  { %v1606_v41 = vpop.f32.mrf.mxu1 }
 0xaaa   :  { %10652 = vtanh.f32 %v1606_v41 }
 0xaab   :  { %v9617_v62 = vpop.f32.mrf.mxu1 }
 0xaac   :  { %v8908_v62 = vld [vmem:[#allocation2] ss:$0 sm:$0xff] }
 0xaad   :  { %v11817_v26 = vpop.f32.mrf.mxu1 }
 0xaaf   :  { %v9632_v17 = vpop.f32.mrf.mxu1 }
 0xab1   :  { %v1847_v13 = vpop.f32.mrf.mxu1 }
 0xab3   :  { %v10651_v51 = vpop.eup %10650  ;;  %v9633_v5 = vpop.f32.mrf.mxu1 }
 0xab4   :  { %v1618_v11 = vmul.f32 %v10651_v51, %v11820_v9 }
 0xab5   :  { %v11823_v63 = vpop.f32.mrf.mxu1 }
 0xab6   :  { %v1620_v54 = vsel %vm399_vm1, %v1618_v11, 0.0 }
 0xab7   :  { %v10653_v38 = vpop.eup %10652  ;;  %1621 = vadd.xlane.f32.xlu1 %v1620_v54  ;;  %v11826_v12 = vpop.f32.mrf.mxu1 }
 0xab8   :  { %v1619_v36 = vmul.f32 %v10653_v38, %v11820_v9 }
 0xab9   :  { %v2081_v41 = vpop.f32.mrf.mxu1 }
 0xaba   :  { %v1623_v17 = vsel %vm399_vm1, %v1619_v36, 0.0  ;;  %v11839_v36 = vsub.s32 %v11835_v4, %v11513_v60 }
 0xabb   :  { %1624 = vadd.xlane.f32.xlu0 %v1623_v17  ;;  %v2082_v13 = vpop.f32.mrf.mxu1 }
 0xabc   :  { %14074 = vst [vmem:[#allocation59_spill] sm:$0xff] %v11839_v36 }
 0xad1   :  { %1632 = vperm.xlu0 %10523, %v8908_v62  }
 0xae5   :  { %v11830_v5 = vpop.f32.mrf.mxu1 }
 0xae7   :  { %v9664_v51 = vpop.f32.mrf.mxu1 }
 0xae9   :  { %v2161_v34 = vpop.f32.mrf.mxu1 }
 0xaeb   :  { %v9665_v32 = vpop.f32.mrf.mxu1 }
 0xb15   :  { %v11832_v30 = vpop.f32.mrf.mxu1 }
 0xb17   :  { %v9696_v11 = vpop.f32.mrf.mxu1 }
 0xb19   :  { %v2241_v54 = vpop.f32.mrf.mxu1 }
 0xb1b   :  { %v9697_v28 = vpop.f32.mrf.mxu1 }
 0xb40   :  { %v1622_v41 = vpop.xlane.xlu1 %1621 }
 0xb44   :  { %v1625_v38 = vpop.xlane.xlu0 %1624 }
 0xb4c   :  { %v11841_v17 = vpop.permute.xlu0 %1632 }
 0xb4d   :  { %14075 = vst [vmem:[#allocation60_spill] sm:$0xff] %v11841_v17  ;;  %v1635_v13 = vadd.f32 %v11841_v17, %v1622_v41  ;;  %v1636_v32 = vadd.f32 %v11841_v17, %v1625_v38 }
 0xb4f   :  { %v1644_v34 = vrot.slane %v1635_v13, %v11839_v36  ;;  %v1648_v28 = vrot.slane %v1636_v32, %v11839_v36 }
 0xb51   :  { %v1650_v18 = vsel %vm1649_vm5, %v1648_v28, %v1644_v34 }
 0xb52   :  { %v1653_v62 = vsel %vm1652_vm6, %v1650_v18, -inf }
 0xb53   :  { %1654 = vmax.xlane.f32.xlu1 %v1653_v62 }
 0xbdc   :  { %v1655_v51 = vpop.xlane.xlu1 %1654 }
 0xbdd   :  { %v1660_v11 = vrot.slane %v1655_v51, %v11516_v61  ;;  %v1664_v54 = vrot.slane %v1655_v51, %v11528_v16 }
 0xbdf   :  { %v1667_v60 = vsub.f32 %v1635_v13, %v1660_v11  ;;  %v1668_v41 = vsub.f32 %v1636_v32, %v1664_v54 }
 0xbe1   :  { %v1669_v4 = vmul.f32 1.442695, %v1667_v60  ;;  %v1671_v38 = vmul.f32 1.442695, %v1668_v41 }
 0xbe3   :  { %10654 = vpow2.f32 %v1669_v4 }
 0xbe4   :  { %10656 = vpow2.f32 %v1671_v38 }
 0xbf0   :  { %v10655_v17 = vpop.eup %10654 }
 0xbf1   :  { %1676 = vperm.xlu1 %10522, %v10655_v17   ;;  %v10657_v9 = vpop.eup %10656 }
 0xbf5   :  { %1679 = vperm.xlu1 %10522, %v10657_v9  }
 0xbf9   :  { %10524 = vset.pattern.permute.xlu1 %v14076_v59 }
 0xc6c   :  { %v1677_v34 = vpop.permute.xlu1 %1676 }
 0xc6d   :  { %v1684_v18 = vrot.slane %v1677_v34, %v11839_v36  ;;  %v14078_v34 = vmov 2  }
 0xc70   :  { %v1680_v28 = vpop.permute.xlu1 %1679 }
 0xc71   :  { %v1688_v62 = vrot.slane %v1680_v28, %v11839_v36  ;;  %v11860_v28 = vld [vmem:[%s14077_s30 + $0x8] sm:$0xff]  }
 0xc72   :  { %9619 = vmatpush3.bf16.msra.mxu0 %v11860_v28 }
 0xc73   :  { %v1689_v13 = vsel %vm1649_vm5, %v1688_v62, %v1684_v18  ;;  %9620 = vmatprep.subr.bf16.mxu0 %v14064_v2  ;;  %v11865_v18 = vld [vmem:[%s14077_s30] sm:$0xff]  }
 0xc74   :  { %v1691_v60 = vsel %vm1652_vm6, %v1689_v13, 0.0 }
 0xc75   :  { %1692 = vadd.xlane.f32.xlu1 %v1691_v60 }
 0xc76   :  { %9621 = vmatpush3.bf16.msra.mxu0 %v11865_v18 }
 0xc77   :  { %9634 = vmatprep.subr.bf16.mxu0 %v14064_v2 }
 0xcfe   :  { %v1693_v4 = vpop.xlane.xlu1 %1692 }
 0xcff   :  { %v1698_v32 = vrot.slane %v1693_v4, %v11516_v61  ;;  %v1702_v51 = vrot.slane %v1693_v4, %v11528_v16 }
 0xd01   :  { %10658 = vrcp.f32 %v1698_v32 }
 0xd02   :  { %10660 = vrcp.f32 %v1702_v51 }
 0xd0e   :  { %v10659_v11 = vpop.eup %10658 }
 0xd0f   :  { %v1706_v54 = vmul.f32 %v10659_v11, %v10655_v17  ;;  %v10661_v41 = vpop.eup %10660 }
 0xd10   :  { %v1708_v38 = vmul.f32 %v10661_v41, %v10657_v9 }
 0xd11   :  { %1711 = vperm.xlu0 %10523, %v1706_v54  }
 0xd15   :  { %1716 = vperm.xlu0 %10523, %v1708_v38  }
 0xd19   :  { %10525 = vset.pattern.permute.xlu0 %v14078_v34 }
 0xd8c   :  { %v1712_v62 = vpop.permute.xlu0 %1711 }
 0xd8d   :  { %v1719_v17 = vmul.f32 %v1712_v62, %v11685_v3 }
 0xd8f   :  { %v1721_v9 = vsel %vm399_vm1, %v1719_v17, 0.0 }
 0xd90   :  { %v1722_v13 = vrot.slane %v1721_v9, 4  ;;  %v1717_v60 = vpop.permute.xlu0 %1716 }
 0xd91   :  { %v1720_v4 = vmul.f32 %v1717_v60, %v11688_v45  ;;  %v11878_v60 = vld [vmem:[%s14079_s28 + $0x8] sm:$0xff]  }
 0xd92   :  { %v1723_v32 = vadd.f32 %v1722_v13, %v1721_v9 }
 0xd93   :  { %v1728_v51 = vsel %vm399_vm1, %v1720_v4, 0.0 }
 0xd94   :  { %v1724_v11 = vrot.slane %v1723_v32, 2  ;;  %v1729_v54 = vrot.slane %v1728_v51, 4 }
 0xd96   :  { %v1725_v41 = vadd.f32 %v1724_v11, %v1723_v32  ;;  %v1730_v38 = vadd.f32 %v1729_v54, %v1728_v51  ;;  %v11898_v54 = vld [vmem:[%s11148_s21 + $0x20] ss:$12 sps:$4 sm:$0xff]  }
 0xd98   :  { %v1726_v34 = vrot.slane %v1725_v41, 1  ;;  %v1731_v59 = vrot.slane %v1730_v38, 2 }
 0xd9a   :  { %v1727_v16 = vadd.f32 %v1726_v34, %v1725_v41  ;;  %v1732_v36 = vadd.f32 %v1731_v59, %v1730_v38  ;;  %v11882_v59 = vld [vmem:[%s14079_s28] sm:$0xff]  }
 0xd9c   :  { %v1733_v3 = vrot.slane %v1732_v36, 1  ;;  %v1735_v62 = vpack.c.bf16 %v1727_v16, %v1727_v16  ;;  %v11888_v16 = vld [vmem:[%s14080_s2] ss:$0 sm:$0xff] }
 0xd9e   :  { %v1734_v17 = vadd.f32 %v1733_v3, %v1732_v36  ;;  %v1739_v43 = vunpack.c.l.b16 %v1735_v62 }
 0xda0   :  { %v1736_v44 = vpack.c.bf16 %v1734_v17, %v1734_v17 }
 0xda2   :  { %v1740_v45 = vunpack.c.l.b16 %v1736_v44 }
 0xda4   :  { %v1741_v9 = vsel %vm1649_vm5, %v1740_v45, %v1739_v43 }
 0xda5   :  { %v1742_v13 = vpack.c.b16 %v1741_v9, %v1741_v9  ;;  %v11949_v9 = vld [vmem:[%s11163_s3 + $0x1] ss:$0 sm:$0xff] }
 0xda7   :  { %9623 = vmatmul.mubr.msk.bf16.vlgmr.msra.gmra.mxu0 %vm399_vm1, %v1742_v13 }
 0xda8   :  { %9638 = vmatprep.mubr.msk.bf16.mxu0 %vm11108_vm0, %v14064_v2  ;;  %9635 = vmatpush3.bf16.msra.mxu0 %v11878_v60 }
 0xda9   :  { %9636 = vmatprep.subr.bf16.mxu0 %v14064_v2 }
 0xdac   :  { %9637 = vmatpush3.bf16.msra.mxu0 %v11882_v59 }
 0xdad   :  { %9642 = vmatprep.subr.bf16.mxu0 %v14064_v2 }
 0xe67   :  { %v1792_v43 = vpop.f32.mrf.mxu0 }
 0xe68   :  { %v1845_v44 = vadd.f32 %v11817_v26, %v1792_v43  ;;  %v11905_v26 = vld [vmem:[%s11148_s21 + $0x8] ss:$12 sps:$4 sm:$0xff]  }
 0xe69   :  { %v9624_v36 = vpop.f32.mrf.mxu0 }
 0xe6a   :  { %v1856_v34 = vadd.f32 %v11888_v16, %v1845_v44  ;;  %v11954_v36 = vld [vmem:[%s11163_s3 + $0x2] ss:$0 sm:$0xff] }
 0xe6b   :  { %v1795_v4 = vpop.f32.mrf.mxu0 }
 0xe6c   :  { %10662 = vtanh.f32 %v1856_v34  ;;  %v2239_v34 = vadd.f32 %v11954_v36, %v11832_v30 }
 0xe6d   :  { %v9625_v32 = vpop.f32.mrf.mxu0 }
 0xe79   :  { %v11892_v51 = vpop.eup %10662 }
 0xe7a   :  { %14081 = vst [vmem:[#allocation61_spill] sm:$0xff] %v11892_v51  ;;  %v1858_v11 = vpack.c.bf16 %v11892_v51, %v11892_v51 }
 0xe7c   :  { %9639 = vmatmul.mubr.msk.bf16.vlgmr.msra.gmra.mxu0 %vm399_vm1, %v1858_v11  ;;  %v11960_v11 = vld [vmem:[%s11163_s3 + $0x3] ss:$0 sm:$0xff] }
 0xe7d   :  { %9643 = vmatpush3.bf16.msra.mxu0 %v11898_v54  ;;  %9646 = vmatprep.mubr.msk.bf16.mxu0 %vm11108_vm0, %v14064_v2 }
 0xe7e   :  { %9644 = vmatprep.subr.bf16.mxu0 %v14064_v2 }
 0xe81   :  { %9645 = vmatpush3.bf16.msra.mxu0 %v11905_v26 }
 0xe82   :  { %9666 = vmatprep.subr.bf16.mxu0 %v14064_v2 }
 0xe84   :  { %9647 = vmatmul.mubr.msk.bf16.vlgmr.msra.gmra.mxu0 %vm399_vm1, %v11772_v49 }
 0xe85   :  { %9667 = vmatpush3.bf16.xpose.msra.mxu0 %v11347_v27  ;;  %9678 = vmatprep.mubr.msk.bf16.mxu0 %vm11108_vm0, %v14064_v2 }
 0xe86   :  { %9668 = vmatprep.subr.bf16.mxu0 %v14064_v2 }
 0xe8d   :  { %9669 = vmatpush3.bf16.xpose.msra.mxu0 %v11353_v29 }
 0xe8e   :  { %9670 = vmatprep.subr.bf16.mxu0 %v14064_v2 }
 0xe95   :  { %9671 = vmatpush3.bf16.xpose.msra.mxu0 %v11359_v31 }
 0xe96   :  { %9672 = vmatprep.subr.bf16.mxu0 %v14064_v2 }
 0xe9d   :  { %9673 = vmatpush3.bf16.xpose.msra.mxu0 %v11366_v33 }
 0xe9e   :  { %9674 = vmatprep.subr.bf16.mxu0 %v14064_v2 }
 0xea5   :  { %9675 = vmatpush3.bf16.xpose.msra.mxu0 %v11392_v37 }
 0xea6   :  { %9676 = vmatprep.subr.bf16.mxu0 %v14064_v2 }
 0xead   :  { %9677 = vmatpush3.bf16.xpose.msra.mxu0 %v11403_v40 }
 0xeae   :  { %9698 = vmatprep.subr.bf16.mxu0 %v14064_v2 }
 0xeb4   :  { %9679 = vmatmul.mubr.msk.bf16.vlgmr.msra.gmra.mxu0 %vm399_vm1, %v11597_v24 }
 0xeb5   :  { %9699 = vmatpush3.bf16.xpose.msra.mxu0 %v11422_v55  ;;  %9710 = vmatprep.mubr.msk.bf16.mxu0 %vm11108_vm0, %v14064_v2 }
 0xeb6   :  { %9700 = vmatprep.subr.bf16.mxu0 %v14064_v2 }
 0xebd   :  { %9701 = vmatpush3.bf16.xpose.msra.mxu0 %v11442_v0 }
 0xebe   :  { %9702 = vmatprep.subr.bf16.mxu0 %v14064_v2 }
 0xec5   :  { %9703 = vmatpush3.bf16.xpose.msra.mxu0 %v11454_v6 }
 0xec6   :  { %9704 = vmatprep.subr.bf16.mxu0 %v14064_v2 }
 0xecd   :  { %9705 = vmatpush3.bf16.xpose.msra.mxu0 %v11466_v10 }
 0xece   :  { %9706 = vmatprep.subr.bf16.mxu0 %v14064_v2 }
 0xed5   :  { %9707 = vmatpush3.bf16.xpose.msra.mxu0 %v11478_v14 }
 0xed6   :  { %9708 = vmatprep.subr.bf16.mxu0 %v14064_v2 }
 0xedd   :  { %9709 = vmatpush3.bf16.xpose.msra.mxu0 %v11490_v19 }
 0xede   :  { %9720 = vmatprep.subr.bf16.mxu0 %v14064_v2 }
 0xee4   :  { %9711 = vmatmul.mubr.msk.bf16.vlgmr.msra.gmra.mxu0 %vm399_vm1, %v11611_v21 }
 0xee5   :  { %9721 = vmatpush3.bf16.xpose.msra.mxu0 %v11571_v25  ;;  %9722 = vmatprep.mubr.msk.bf16.mxu0 %vm11108_vm0, %v14064_v2 }
 0xee6   :  { %9732 = vmatprep.subr.bf16.mxu0 %v14064_v2 }
 0xf3c   :  { %v1908_v24 = vpop.f32.mrf.mxu0 }
 0xf3d   :  { %1915 = vst.msk [vmem:[#allocation3] sm:$0x3] %vm1914_vm7, %v1908_v24 }
 0xf3e   :  { %v9640_v49 = vpop.f32.mrf.mxu0 }
 0xf40   :  { %v1911_v41 = vpop.f32.mrf.mxu0 }
 0xf42   :  { %v9641_v38 = vpop.f32.mrf.mxu0 }
 0xf44   :  { %v2118_v3 = vpop.f32.mrf.mxu0 }
 0xf46   :  { %v9648_v62 = vpop.f32.mrf.mxu0 }
 0xf47   :  { %v11974_v62 = vadd.f32 %v11823_v63, %v11520_v1  ;;  %v2119_v63 = vadd.f32 %v2118_v3, %v11534_v23 }
 0xf48   :  { %v2121_v17 = vpop.f32.mrf.mxu0 }
 0xf4a   :  { %v9649_v21 = vpop.f32.mrf.mxu0 }
 0xf4b   :  { %v2080_v21 = vadd.f32 %v11826_v12, %v11532_v22 }
 0xf74   :  { %v2198_v45 = vpop.f32.mrf.mxu0 }
 0xf75   :  { %v2199_v13 = vadd.f32 %v11949_v9, %v2198_v45 }
 0xf76   :  { %v9680_v43 = vpop.f32.mrf.mxu0 }
 0xf77   :  { %2311 = vrot.lane.b32.xlu0 %v2199_v13, %s11110_s0 }
 0xf78   :  { %v2201_v44 = vpop.f32.mrf.mxu0 }
 0xf7a   :  { %v9681_v4 = vpop.f32.mrf.mxu0 }
 0xf7b   :  { %2350 = vrot.lane.b32.xlu0 %v2239_v34, %s11111_s9 }
 0xfa4   :  { %v2278_v32 = vpop.f32.mrf.mxu0 }
 0xfa5   :  { %v2279_v24 = vadd.f32 %v11960_v11, %v2278_v32 }
 0xfa6   :  { %v9712_v49 = vpop.f32.mrf.mxu0 }
 0xfa7   :  { %2389 = vrot.lane.b32.xlu1 %v2279_v24, %s11110_s0  ;;  %2379 = vrot.lane.b32.xlu0 %v2279_v24, %s11112_s13 }
 0xfa8   :  { %v2281_v41 = vpop.f32.mrf.mxu0 }
 0xfaa   :  { %v9713_v38 = vpop.f32.mrf.mxu0 }
 0xfab   :  { %2344 = vrot.lane.b32.xlu1 %v11575_v52, %s11110_s0  ;;  %2328 = vrot.lane.b32.xlu0 %v2199_v13, %s11112_s13 }
 0xfaf   :  { %2373 = vrot.lane.b32.xlu1 %v11580_v35, %s11111_s9 }
 0xfb3   :  { %2405 = vrot.lane.b32.xlu1 %v11585_v39, %s11112_s13 }
 0xfe9   :  { %v2312_v30 = vpop.permute.xlu0 %2311 }
 0xfea   :  { %v2314_v45 = vadd.f32 %v2312_v30, %v11974_v62 }
 0xfec   :  { %v8927_v43 = vmul.f32 -1.442695, %v2314_v45 }
 0xfed   :  { %v2351_v17 = vpop.permute.xlu0 %2350 }
 0xfee   :  { %v2353_v52 = vadd.f32 %v2351_v17, %v2080_v21  ;;  %10664 = vpow2.f32 %v8927_v43 }
 0xff0   :  { %v8929_v13 = vmul.f32 -1.442695, %v2353_v52 }
 0xff2   :  { %10666 = vpow2.f32 %v8929_v13 }
 0xffb   :  { %v10665_v35 = vpop.eup %10664 }
 0xffc   :  { %v2318_v4 = vadd.f32 1.0, %v10665_v35 }
 0xffe   :  { %10668 = vrcp.f32 %v2318_v4 }
 0xfff   :  { %v10667_v44 = vpop.eup %10666 }
0x1000   :  { %v2357_v39 = vadd.f32 1.0, %v10667_v44 }
0x1002   :  { %10670 = vrcp.f32 %v2357_v39 }
0x100b   :  { %v10669_v41 = vpop.eup %10668 }
0x100f   :  { %v10671_v17 = vpop.eup %10670 }
0x1010   :  { %v2360_v45 = vmul.f32 %v10671_v17, %v2239_v34 }
0x1019   :  { %v2380_v32 = vpop.permute.xlu0 %2379  ;;  %v2390_v35 = vpop.permute.xlu1 %2389 }
0x101a   :  { %v2382_v24 = vadd.f32 %v2380_v32, %v2119_v63 }
0x101c   :  { %v8930_v49 = vmul.f32 -1.442695, %v2382_v24 }
0x101d   :  { %v2329_v12 = vpop.permute.xlu0 %2328 }
0x101e   :  { %10672 = vpow2.f32 %v8930_v49  ;;  %v2331_v38 = vmul.f32 %v10669_v41, %v2329_v12 }
0x1020   :  { %2333 = vrot.lane.b32.xlu0 %v2331_v38, %s11111_s9  ;;  %v2321_v38 = vadd.f32 %v2312_v30, %v2080_v21 }
0x1024   :  { %2362 = vrot.lane.b32.xlu0 %v2360_v45, %s11111_s9  ;;  %v8928_v45 = vmul.f32 -1.442695, %v2321_v38 }
0x102b   :  { %v10673_v52 = vpop.eup %10672 }
0x102c   :  { %v2386_v43 = vadd.f32 1.0, %v10673_v52 }
0x102e   :  { %10674 = vrcp.f32 %v2386_v43 }
0x103b   :  { %v10675_v13 = vpop.eup %10674 }
0x103c   :  { %v2392_v44 = vmul.f32 %v10675_v13, %v2390_v35 }
0x103e   :  { %2394 = vrot.lane.b32.xlu0 %v2392_v44, %s11111_s9  ;;  %v2345_v44 = vpop.permute.xlu1 %2344 }
0x1092   :  { %v2334_v3 = vpop.permute.xlu0 %2333 }
0x1093   :  { %v2336_v4 = vadd.f32 %v2334_v3, %v2080_v21  ;;  %v2399_v21 = vsub.f32 1.0, %v10675_v13 }
0x1095   :  { %10676 = vtanh.f32 %v2336_v4 }
0x1096   :  { %v2363_v39 = vpop.permute.xlu0 %2362 }
0x1097   :  { %v2365_v32 = vadd.f32 %v2363_v39, %v2119_v63 }
0x1099   :  { %10678 = vtanh.f32 %v2365_v32 }
0x10a2   :  { %v10677_v24 = vpop.eup %10676 }
0x10a3   :  { %2340 = vrot.lane.b32.xlu0 %v10677_v24, %s11110_s0  ;;  %v2374_v24 = vpop.permute.xlu1 %2373 }
0x10a6   :  { %v10679_v34 = vpop.eup %10678 }
0x10a7   :  { %2369 = vrot.lane.b32.xlu0 %v10679_v34, %s11110_s0 }
0x10b0   :  { %v2395_v49 = vpop.permute.xlu0 %2394 }
0x10b1   :  { %v2397_v41 = vadd.f32 %v2395_v49, %v2119_v63  ;;  %v2367_v63 = vsub.f32 1.0, %v10671_v17 }
0x10b3   :  { %10680 = vtanh.f32 %v2397_v41  ;;  %v2376_v41 = vmul.f32 %v10671_v17, %v2374_v24 }
0x10b4   :  { %10682 = vpow2.f32 %v8928_v45 }
0x10c0   :  { %v10681_v12 = vpop.eup %10680 }
0x10c1   :  { %2401 = vrot.lane.b32.xlu0 %v10681_v12, %s11110_s0  ;;  %v10683_v52 = vpop.eup %10682  ;;  %v2406_v12 = vpop.permute.xlu1 %2405 }
0x10c2   :  { %v2325_v43 = vadd.f32 1.0, %v10683_v52  ;;  %v2408_v45 = vmul.f32 %v10675_v13, %v2406_v12 }
0x10c4   :  { %10684 = vrcp.f32 %v2325_v43 }
0x10d1   :  { %v10685_v35 = vpop.eup %10684 }
0x10d2   :  { %v2338_v3 = vsub.f32 1.0, %v10685_v35  ;;  %v2347_v39 = vmul.f32 %v10685_v35, %v2345_v44 }
0x1115   :  { %v2341_v4 = vpop.permute.xlu0 %2340 }
0x1116   :  { %v2343_v32 = vmul.f32 %v2341_v4, %v2338_v3  ;;  %v12014_v4 = vld [vmem:[%s11163_s3] ss:$0 sm:$0xff] }
0x1118   :  { %v11986_v34 = vadd.f32 %v2347_v39, %v2343_v32  ;;  %v2159_v39 = vadd.f32 %v12014_v4, %v11830_v5 }
0x1119   :  { %v2370_v49 = vpop.permute.xlu0 %2369 }
0x111a   :  { %v2372_v51 = vmul.f32 %v2370_v49, %v2367_v63  ;;  %2411 = vrot.lane.b32.xlu0 %v11986_v34, %s11112_s13 }
0x111c   :  { %v11990_v30 = vadd.f32 %v2376_v41, %v2372_v51 }
0x111e   :  { %2415 = vrot.lane.b32.xlu1 %v11990_v30, %s11111_s9 }
0x1133   :  { %v2402_v38 = vpop.permute.xlu0 %2401 }
0x1134   :  { %v2404_v52 = vmul.f32 %v2402_v38, %v2399_v21 }
0x1136   :  { %v11994_v43 = vadd.f32 %v2408_v45, %v2404_v52 }
0x1138   :  { %2419 = vrot.lane.b32.xlu0 %v11994_v43, %s11110_s0 }
0x118c   :  { %v11998_v17 = vpop.permute.xlu0 %2411 }
0x118d   :  { %v2422_v51 = vpack.c.bf16 %v11998_v17, %v11998_v17 }
0x118f   :  { %2426 = vrot.lane.b32.xlu1 %v2422_v51, %s11110_s0 }
0x1190   :  { %v12003_v35 = vpop.permute.xlu1 %2415 }
0x1191   :  { %v2423_v44 = vpack.c.bf16 %v12003_v35, %v12003_v35 }
0x1193   :  { %2472 = vrot.lane.b32.xlu0 %v2423_v44, %s11110_s0 }
0x11aa   :  { %v12008_v13 = vpop.permute.xlu0 %2419 }
0x11ab   :  { %v2424_v3 = vpack.c.bf16 %v12008_v13, %v12008_v13 }
0x11ad   :  { %2518 = vrot.lane.b32.xlu1 %v2424_v3, %s11110_s0 }
0x11b1   :  { %2292 = vrot.lane.b32.xlu1 %v2159_v39, %s11111_s9 }
0x1201   :  { %v12019_v32 = vpop.permute.xlu1 %2426 }
0x1202   :  { %9717 = vmatmul.mubr.msk.bf16.vlgmr.msra.gmra.mxu1 %vm399_vm1, %v12019_v32 }
0x1203   :  { %9727 = vmatpush3.bf16.xpose.msra.mxu1 %v11595_v48  ;;  %9728 = vmatprep.mubr.msk.bf16.mxu1 %vm11108_vm0, %v14064_v2  ;;  %v12052_v48 = vld [vmem:[%s11173_s14] ss:$0 sm:$0xff] }
0x1204   :  { %9740 = vmatprep.subr.bf16.mxu1 %v14064_v2 }
0x1205   :  { %v12027_v24 = vpop.permute.xlu0 %2472 }
0x1206   :  { %9723 = vmatmul.mubr.msk.bf16.vlgmr.msra.gmra.mxu0 %vm399_vm1, %v12027_v24 }
0x1207   :  { %9733 = vmatpush3.bf16.msra.mxu0 %v11636_v58  ;;  %9736 = vmatprep.mubr.msk.bf16.mxu0 %vm11108_vm0, %v14064_v2 }
0x1208   :  { %9734 = vmatprep.subr.bf16.mxu0 %v14064_v2 }
0x120b   :  { %9735 = vmatpush3.bf16.msra.mxu0 %v11644_v8 }
0x120c   :  { %9748 = vmatprep.subr.bf16.mxu0 %v14064_v2 }
0x121f   :  { %v12037_v5 = vpop.permute.xlu1 %2518 }
0x1220   :  { %9729 = vmatmul.mubr.msk.bf16.vlgmr.msra.gmra.mxu1 %vm399_vm1, %v12037_v5 }
0x1221   :  { %9741 = vmatpush3.bf16.msra.mxu1 %v11641_v7  ;;  %9744 = vmatprep.mubr.msk.bf16.mxu1 %vm11108_vm0, %v14064_v2  ;;  %v2284_v7 = vadd.f32 %v2159_v39, %v11974_v62 }
0x1222   :  { %9742 = vmatprep.subr.bf16.mxu1 %v14064_v2 }
0x1223   :  { %v8926_v45 = vmul.f32 -1.442695, %v2284_v7 }
0x1225   :  { %9743 = vmatpush3.bf16.msra.mxu1 %v11651_v50  ;;  %10686 = vpow2.f32 %v8926_v45 }
0x1226   :  { %9760 = vmatprep.subr.bf16.mxu1 %v14064_v2 }
0x12c2   :  { %v2465_v58 = vpop.f32.mrf.mxu1 }
0x12c3   :  { %v2563_v50 = vsel %vm1153_vm3, %v2465_v58, 0.0  ;;  %v2293_v58 = vpop.permute.xlu1 %2292 }
0x12c4   :  { %v9718_v8 = vpop.f32.mrf.mxu1 }
0x12c6   :  { %v2468_v63 = vpop.f32.mrf.mxu1  ;;  %v2511_v49 = vpop.f32.mrf.mxu0 }
0x12c7   :  { %v2564_v52 = vsel %vm1153_vm3, %v2511_v49, 0.0 }
0x12c8   :  { %v9719_v41 = vpop.f32.mrf.mxu1  ;;  %v9724_v21 = vpop.f32.mrf.mxu0  ;;  %v2565_v51 = vadd.f32 %v2564_v52, %v2563_v50 }
0x12ca   :  { %v2514_v12 = vpop.f32.mrf.mxu0 }
0x12cb   :  { %v10687_v12 = vpop.eup %10686 }
0x12cc   :  { %v9725_v38 = vpop.f32.mrf.mxu0  ;;  %v2288_v49 = vadd.f32 1.0, %v10687_v12 }
0x12ce   :  { %10688 = vrcp.f32 %v2288_v49 }
0x12db   :  { %v10689_v7 = vpop.eup %10688 }
0x12dc   :  { %v2295_v45 = vmul.f32 %v10689_v7, %v2293_v58 }
0x12e0   :  { %v2557_v44 = vpop.f32.mrf.mxu1 }
0x12e1   :  { %v2566_v3 = vsel %vm1153_vm3, %v2557_v44, 0.0 }
0x12e2   :  { %v2567_v8 = vadd.f32 %v2566_v3, %v2565_v51  ;;  %v9730_v63 = vpop.f32.mrf.mxu1 }
0x12e4   :  { %v2568_v41 = vadd.f32 %v12052_v48, %v2567_v8  ;;  %v2560_v21 = vpop.f32.mrf.mxu1 }
0x12e6   :  { %8934 = vst.msk [vmem:[%s11296_s4 + $0x2] sm:$0x3] %vm1153_vm3, %v2568_v41  ;;  %v9731_v39 = vpop.f32.mrf.mxu1  ;;  %v2569_v38 = vsel %vm1153_vm3, %v2568_v41, -inf }
0x12e7   :  { %2570 = vmax.xlane.f32.xlu0 %v2569_v38 }
0x12fd   :  { %2297 = vrot.lane.b32.xlu0 %v2295_v45, %s11111_s9 }
0x1370   :  { %v2571_v52 = vpop.xlane.xlu0 %2570 }
0x1371   :  { %v2572_v50 = vsub.f32 %v2568_v41, %v2571_v52 }
0x1373   :  { %v2573_v51 = vmul.f32 1.442695, %v2572_v50  ;;  %v2308_v50 = vmul.f32 %v10689_v7, %v11659_v42 }
0x1374   :  { %v2298_v8 = vpop.permute.xlu0 %2297 }
0x1375   :  { %10690 = vpow2.f32 %v2573_v51  ;;  %v2300_v21 = vadd.f32 %v2298_v8, %v11974_v62  ;;  %v2302_v62 = vsub.f32 1.0, %v10689_v7 }
0x1382   :  { %v10691_v44 = vpop.eup %10690 }
0x1383   :  { %v2575_v3 = vsel %vm1153_vm3, %v10691_v44, 0.0 }
0x1384   :  { %2576 = vadd.xlane.f32.xlu1 %v2575_v3 }
0x140d   :  { %v2577_v63 = vpop.xlane.xlu1 %2576 }
0x140e   :  { %10692 = vrcp.f32 %v2577_v63 }
0x140f   :  { %10694 = vtanh.f32 %v2300_v21 }
0x141b   :  { %v10693_v12 = vpop.eup %10692 }
0x141c   :  { %v2579_v39 = vmul.f32 %v10693_v12, %v10691_v44  ;;  %v10695_v38 = vpop.eup %10694 }
0x141e   :  { %2597 = vperm.xlu0 %10525, %v2579_v39   ;;  %2587 = vperm.xlu1 %10524, %v2579_v39  }
0x1422   :  { %10526 = vset.pattern.permute.xlu0 %v14067_v46  ;;  %2304 = vrot.lane.b32.xlu1 %v10695_v38, %s11110_s0  ;;  %v12081_v38 = vld [vmem:[%s11193_s6 + $0x18] sm:$0xff]  }
0x1423   :  { %2582 = vperm.xlu0 %10526, %v2579_v39   ;;  %10527 = vset.pattern.permute.xlu1 %v14067_v46 }
0x1499   :  { %v2588_v41 = vpop.permute.xlu1 %2587  ;;  %v2598_v58 = vpop.permute.xlu0 %2597 }
0x149a   :  { %v2590_v49 = vmul.f32 %v2588_v41, %v11990_v30  ;;  %v2600_v52 = vmul.f32 %v2598_v58, %v11994_v43  ;;  %v14083_v41 = vld [vmem:[#allocation46_spill] sm:$0xff] }
0x149c   :  { %2592 = vrot.lane.b32.xlu1 %v2590_v49, %s11112_s13  ;;  %v12099_v49 = vld [vmem:[%s11193_s6 + $0x8] sm:$0xff]  }
0x149d   :  { %v2305_v45 = vpop.permute.xlu1 %2304  ;;  %14084 = vst [vmem:[#allocation46_spill] sm:$0xff] %v12099_v49 }
0x149e   :  { %v2307_v51 = vmul.f32 %v2305_v45, %v2302_v62  ;;  %v2583_v30 = vpop.permute.xlu0 %2582 }
0x149f   :  { %v2585_v63 = vmul.f32 %v2583_v30, %v11986_v34  ;;  %v12092_v34 = vld [vmem:[%s11193_s6 + $0x10] sm:$0xff]  }
0x14a0   :  { %v12068_v44 = vadd.f32 %v2308_v50, %v2307_v51  ;;  %2602 = vrot.lane.b32.xlu1 %v2600_v52, %s11111_s9  ;;  %v14086_v51 = vld [vmem:[#allocation45_spill] sm:$0xff] }
0x14a2   :  { %14082 = vst [vmem:[#allocation62_spill] sm:$0xff] %v12068_v44  ;;  %v2608_v3 = vpack.c.bf16 %v12068_v44, %v12068_v44 }
0x14a4   :  { %2654 = vrot.lane.b32.xlu0 %v2608_v3, %s11110_s0 }
0x150e   :  { %v2593_v8 = vpop.permute.xlu1 %2592 }
0x150f   :  { %v2595_v21 = vadd.f32 %v2593_v8, %v2585_v63 }
0x1512   :  { %v2603_v43 = vpop.permute.xlu1 %2602 }
0x1513   :  { %v2605_v12 = vadd.f32 %v2603_v43, %v2595_v21 }
0x1515   :  { %v2609_v7 = vpack.c.bf16 %v2605_v12, %v2605_v12 }
0x1516   :  { %v12075_v39 = vpop.permute.xlu0 %2654 }
0x1517   :  { %9737 = vmatmul.mubr.msk.bf16.vlgmr.msra.gmra.mxu0 %vm399_vm1, %v2609_v7  ;;  %9745 = vmatmul.mubr.msk.bf16.vlgmr.msra.gmra.mxu1 %vm399_vm1, %v12075_v39 }
0x1518   :  { %9749 = vmatpush3.bf16.msra.mxu0 %v12081_v38  ;;  %9756 = vmatprep.mubr.msk.bf16.mxu0 %vm11108_vm0, %v14064_v2 }
0x1519   :  { %9750 = vmatprep.subr.bf16.mxu0 %v14064_v2  ;;  %9761 = vmatpush3.bf16.msra.mxu1 %v11694_v53  ;;  %v12104_v53 = vld [vmem:[%s11193_s6] sm:$0xff]  }
0x151a   :  { %9762 = vmatprep.subr.bf16.mxu1 %v14064_v2  ;;  %9764 = vmatprep.mubr.msk.bf16.mxu1 %vm11108_vm0, %v14064_v2  ;;  %14085 = vst [vmem:[#allocation63_spill] sm:$0xff] %v12104_v53 }
0x151c   :  { %9751 = vmatpush3.bf16.msra.mxu0 %v12092_v34 }
0x151d   :  { %9752 = vmatprep.subr.bf16.mxu0 %v14064_v2  ;;  %9763 = vmatpush3.bf16.msra.mxu1 %v14083_v41 }
0x151e   :  { %9768 = vmatprep.subr.bf16.mxu1 %v14064_v2 }
0x1520   :  { %9753 = vmatpush3.bf16.msra.mxu0 %v12099_v49 }
0x1521   :  { %9754 = vmatprep.subr.bf16.mxu0 %v14064_v2 }
0x1524   :  { %9755 = vmatpush3.bf16.msra.mxu0 %v12104_v53 }
0x1525   :  { %9776 = vmatprep.subr.bf16.mxu0 %v14064_v2 }
0x15d7   :  { %v2647_v58 = vpop.f32.mrf.mxu0  ;;  %v2693_v62 = vpop.f32.mrf.mxu1 }
0x15d8   :  { %v2694_v45 = vadd.f32 %v2693_v62, %v2647_v58  ;;  %v14087_v58 = vld [vmem:[#allocation49_spill] sm:$0xff] }
0x15d9   :  { %v9738_v52 = vpop.f32.mrf.mxu0  ;;  %v9746_v50 = vpop.f32.mrf.mxu1 }
0x15da   :  { %v2699_v3 = vadd.f32 %v14086_v51, %v2694_v45 }
0x15db   :  { %v2650_v30 = vpop.f32.mrf.mxu0  ;;  %v2696_v8 = vpop.f32.mrf.mxu1 }
0x15dc   :  { %vm2700_vm8 = vcmp.ge.f32.partialorder %v2699_v3, 0.0  ;;  %v2701_v63 = vmul.f32 0.1, %v2699_v3 }
0x15dd   :  { %v9739_v21 = vpop.f32.mrf.mxu0  ;;  %v9747_v43 = vpop.f32.mrf.mxu1 }
0x15de   :  { %v2702_v12 = vsel %vm2700_vm8, %v2699_v3, %v2701_v63  ;;  %v14088_v3 = vld [vmem:[#allocation50_spill] sm:$0xff]  ;;  %vm8099_vm8 = vcmask 1044480  }
0x15df   :  { %v2703_v7 = vpack.c.bf16 %v2702_v12, %v2702_v12 }
0x15e1   :  { %9757 = vmatmul.mubr.msk.bf16.vlgmr.msra.gmra.mxu0 %vm304_vm2, %v2703_v7 }
0x15e2   :  { %9777 = vmatpush3.bf16.msra.mxu0 %v11860_v28  ;;  %9780 = vmatprep.mubr.msk.bf16.mxu0 %vm11108_vm0, %v14064_v2  ;;  %v14089_v28 = vld [vmem:[#allocation51_spill] sm:$0xff] }
0x15e3   :  { %9778 = vmatprep.subr.bf16.mxu0 %v14064_v2 }
0x15e6   :  { %9779 = vmatpush3.bf16.msra.mxu0 %v11865_v18 }
0x15e7   :  { %9792 = vmatprep.subr.bf16.mxu0 %v14064_v2 }
0x16a1   :  { %v2741_v41 = vpop.f32.mrf.mxu0 }
0x16a2   :  { %v2742_v62 = vadd.f32 %v14087_v58, %v2741_v41 }
0x16a3   :  { %v9758_v45 = vpop.f32.mrf.mxu0 }
0x16a4   :  { %v2747_v52 = vpack.c.bf16 %v2742_v62, %v2742_v62 }
0x16a5   :  { %v2744_v50 = vpop.f32.mrf.mxu0 }
0x16a6   :  { %9765 = vmatmul.mubr.msk.bf16.vlgmr.msra.gmra.mxu1 %vm399_vm1, %v2747_v52 }
0x16a7   :  { %v9759_v51 = vpop.f32.mrf.mxu0  ;;  %9769 = vmatpush3.bf16.msra.mxu1 %v14088_v3  ;;  %9772 = vmatprep.mubr.msk.bf16.mxu1 %vm11108_vm0, %v14064_v2 }
0x16a8   :  { %9770 = vmatprep.subr.bf16.mxu1 %v14064_v2 }
0x16ab   :  { %9771 = vmatpush3.bf16.msra.mxu1 %v14089_v28  ;;  %v14090_v28 = vld [vmem:[#allocation53_spill] sm:$0xff] }
0x16ac   :  { %9784 = vmatprep.subr.bf16.mxu1 %v14064_v2 }
0x1766   :  { %v2785_v18 = vpop.f32.mrf.mxu1 }
0x1767   :  { %v2798_v30 = vrot.slane %v2785_v18, %v11736_v20  ;;  %v14091_v18 = vld [vmem:[#allocation54_spill] sm:$0xff] }
0x1768   :  { %v9766_v8 = vpop.f32.mrf.mxu1 }
0x1769   :  { %v2799_v63 = vcombine.high %v2798_v30, %v2798_v30  ;;  %v2806_v21 = vrot.slane %v2798_v30, %v11736_v20  ;;  %v8943_v30 = vld [vmem:[%s11128_s5 + $0x4] sm:$0x3]  ;;  %v14092_v8 = vld [vmem:[#allocation55_spill] sm:$0xff] }
0x176a   :  { %v2788_v43 = vpop.f32.mrf.mxu1 }
0x176b   :  { %v2813_v12 = vrot.slane %v2799_v63, %v11736_v20  ;;  %v2817_v7 = vrot.slane %v2806_v21, %v11516_v61  ;;  %v12143_v63 = vpack.c.bf16 %v8943_v30, %v8943_v30  ;;  %v14096_v21 = vld [vmem:[#allocation29_spill] sm:$0xff]  ;;  %v14097_v43 = vld [vmem:[#allocation30_spill] sm:$0xff] }
0x176c   :  { %v9767_v41 = vpop.f32.mrf.mxu1 }
0x176d   :  { %v2821_v58 = vrot.slane %v2813_v12, %v11516_v61  ;;  %v2824_v62 = vadd.f32 %v2817_v7, %v11714_v56  ;;  %v14098_v12 = vld [vmem:[#allocation31_spill] sm:$0xff]  ;;  %v14099_v7 = vld [vmem:[#allocation32_spill] sm:$0xff]  ;;  %v14100_v41 = vld [vmem:[#allocation33_spill] sm:$0xff]  ;;  %v14111_v56 = vmov 1  }
0x176f   :  { %v2825_v45 = vadd.f32 %v2821_v58, %v11716_v47  ;;  %10696 = vtanh.f32 %v2824_v62  ;;  %v14101_v58 = vld [vmem:[#allocation34_spill] sm:$0xff]  ;;  %v14102_v62 = vld [vmem:[#allocation35_spill] sm:$0xff] }
0x1771   :  { %10698 = vtanh.f32 %v2825_v45  ;;  %v14103_v45 = vld [vmem:[#allocation36_spill] sm:$0xff] }
0x177c   :  { %v10697_v50 = vpop.eup %10696 }
0x177e   :  { %v10699_v51 = vpop.eup %10698 }
0x177f   :  { %v2828_v3 = vpack.c.bf16 %v10699_v51, %v10697_v50  ;;  %v14105_v50 = vld [vmem:[#allocation38_spill] sm:$0xff] }
0x1780   :  { %v14106_v51 = vld [vmem:[#allocation42_spill] sm:$0xff] }
0x1781   :  { %9773 = vmatmul.mubr.msk.bf16.vlgmr.msra.gmra.mxu1 %vm399_vm1, %v2828_v3 }
0x1782   :  { %9785 = vmatpush3.bf16.msra.mxu1 %v11746_v15  ;;  %9788 = vmatprep.mubr.msk.bf16.mxu1 %vm11108_vm0, %v14064_v2  ;;  %v14093_v15 = vld [vmem:[#allocation56_spill] sm:$0xff] }
0x1783   :  { %9786 = vmatprep.subr.bf16.mxu1 %v14064_v2 }
0x1786   :  { %9787 = vmatpush3.bf16.msra.mxu1 %v11751_v57  ;;  %v14094_v57 = vld [vmem:[#allocation27_spill] sm:$0xff] }
0x1787   :  { %3227 = vmatprep.subr.bf16.mxu1 %v14090_v28 }
0x1789   :  { %9789 = vmatmul.mubr.msk.bf16.vlgmr.msra.gmra.mxu1 %vm399_vm1, %v2747_v52  ;;  %v14095_v52 = vld [vmem:[#allocation28_spill] sm:$0xff] }
0x178a   :  { %3228 = vmatpush1.bf16.msra.mxu1 %v14091_v18  ;;  %3247 = vmatprep.mubr.bf16.mxu1 %v14067_v46 }
0x178b   :  { %3229 = vmatprep.subr.bf16.mxu1 %v14092_v8 }
0x178e   :  { %3230 = vmatpush1.bf16.msra.mxu1 %v14093_v15 }
0x178f   :  { %9808 = vmatprep.subr.bf16.mxu1 %v14064_v2 }
0x1791   :  { %8944 = vmatmul.mubr.msk.bf16.vlgmr.msra.gmra.mxu1 %vm399_vm1, %v12143_v63 }
0x1792   :  { %9809 = vmatpush3.bf16.xpose.msra.mxu1 %v14094_v57  ;;  %9820 = vmatprep.mubr.msk.bf16.mxu1 %vm11108_vm0, %v14064_v2 }
0x1793   :  { %9810 = vmatprep.subr.bf16.mxu1 %v14064_v2 }
0x179a   :  { %9811 = vmatpush3.bf16.xpose.msra.mxu1 %v14095_v52 }
0x179b   :  { %9812 = vmatprep.subr.bf16.mxu1 %v14064_v2 }
0x17a2   :  { %9813 = vmatpush3.bf16.xpose.msra.mxu1 %v14096_v21  ;;  %v14108_v21 = vld [vmem:[#allocation60_spill] sm:$0xff] }
0x17a3   :  { %9814 = vmatprep.subr.bf16.mxu1 %v14064_v2 }
0x17aa   :  { %9815 = vmatpush3.bf16.xpose.msra.mxu1 %v14097_v43 }
0x17ab   :  { %9816 = vmatprep.subr.bf16.mxu1 %v14064_v2 }
0x17b2   :  { %9817 = vmatpush3.bf16.xpose.msra.mxu1 %v14098_v12 }
0x17b3   :  { %9818 = vmatprep.subr.bf16.mxu1 %v14064_v2 }
0x17ba   :  { %9819 = vmatpush3.bf16.xpose.msra.mxu1 %v14099_v7 }
0x17bb   :  { %9840 = vmatprep.subr.bf16.mxu1 %v14064_v2 }
0x17c1   :  { %9821 = vmatmul.mubr.msk.bf16.vlgmr.msra.gmra.mxu1 %vm399_vm1, %v12075_v39  ;;  %v14104_v39 = vld [vmem:[#allocation37_spill] sm:$0xff] }
0x17c2   :  { %9841 = vmatpush3.bf16.xpose.msra.mxu1 %v14100_v41  ;;  %9852 = vmatprep.mubr.msk.bf16.mxu1 %vm11108_vm0, %v14064_v2 }
0x17c3   :  { %9842 = vmatprep.subr.bf16.mxu1 %v14064_v2 }
0x17ca   :  { %9843 = vmatpush3.bf16.xpose.msra.mxu1 %v14101_v58 }
0x17cb   :  { %9844 = vmatprep.subr.bf16.mxu1 %v14064_v2 }
0x17d2   :  { %9845 = vmatpush3.bf16.xpose.msra.mxu1 %v14102_v62 }
0x17d3   :  { %9846 = vmatprep.subr.bf16.mxu1 %v14064_v2 }
0x17da   :  { %9847 = vmatpush3.bf16.xpose.msra.mxu1 %v14103_v45 }
0x17db   :  { %9848 = vmatprep.subr.bf16.mxu1 %v14064_v2 }
0x17e2   :  { %9849 = vmatpush3.bf16.xpose.msra.mxu1 %v14104_v39 }
0x17e3   :  { %9850 = vmatprep.subr.bf16.mxu1 %v14064_v2 }
0x17ea   :  { %9851 = vmatpush3.bf16.xpose.msra.mxu1 %v14105_v50 }
0x17eb   :  { %9872 = vmatprep.subr.bf16.mxu1 %v14064_v2 }
0x17f1   :  { %9853 = vmatmul.mubr.msk.bf16.vlgmr.msra.gmra.mxu1 %vm399_vm1, %v12027_v24  ;;  %v14107_v24 = vld [vmem:[#allocation57_spill] sm:$0xff] }
0x17f2   :  { %9873 = vmatpush3.bf16.xpose.msra.mxu1 %v14106_v51  ;;  %9874 = vmatprep.mubr.msk.bf16.mxu1 %vm11108_vm0, %v14064_v2 }
0x17f3   :  { %9884 = vmatprep.subr.bf16.mxu1 %v14064_v2 }
0x1841   :  { %v2866_v3 = vpop.f32.mrf.mxu1 }
0x1842   :  { %10700 = vtanh.f32 %v2866_v3 }
0x1843   :  { %v9774_v28 = vpop.f32.mrf.mxu1 }
0x1845   :  { %v2869_v18 = vpop.f32.mrf.mxu1 }
0x1846   :  { %10702 = vtanh.f32 %v2869_v18 }
0x1847   :  { %v9775_v30 = vpop.f32.mrf.mxu1 }
0x1849   :  { %v12185_v8 = vpop.f32.mrf.mxu1 }
0x184b   :  { %v9790_v15 = vpop.f32.mrf.mxu1 }
0x184d   :  { %v3067_v42 = vpop.f32.mrf.mxu1 }
0x184f   :  { %v10701_v50 = vpop.eup %10700  ;;  %v9791_v39 = vpop.f32.mrf.mxu1 }
0x1850   :  { %v2875_v45 = vmul.f32 %v10701_v50, %v14107_v24 }
0x1851   :  { %v12188_v51 = vpop.f32.mrf.mxu1 }
0x1852   :  { %v2877_v62 = vsel %vm399_vm1, %v2875_v45, 0.0 }
0x1853   :  { %v10703_v58 = vpop.eup %10702  ;;  %2878 = vadd.xlane.f32.xlu1 %v2877_v62  ;;  %v12191_v41 = vpop.f32.mrf.mxu1 }
0x1854   :  { %v2876_v3 = vmul.f32 %v10703_v58, %v14107_v24  ;;  %v14109_v24 = vld [vmem:[#allocation59_spill] sm:$0xff] }
0x1855   :  { %v3253_v28 = vpop.f32.mrf.mxu1 }
0x1856   :  { %v2880_v18 = vsel %vm399_vm1, %v2876_v3, 0.0 }
0x1857   :  { %2881 = vadd.xlane.f32.xlu0 %v2880_v18  ;;  %v3254_v30 = vpop.f32.mrf.mxu1 }
0x1881   :  { %v12195_v42 = vpop.f32.mrf.mxu1 }
0x1883   :  { %v9822_v39 = vpop.f32.mrf.mxu1 }
0x1885   :  { %v3333_v15 = vpop.f32.mrf.mxu1 }
0x1886   :  { %v14110_v15 = vld [vmem:[#allocation41_spill] sm:$0xff] }
0x1887   :  { %v9823_v50 = vpop.f32.mrf.mxu1 }
0x18b1   :  { %v12197_v7 = vpop.f32.mrf.mxu1 }
0x18b3   :  { %v9854_v12 = vpop.f32.mrf.mxu1 }
0x18b5   :  { %v3413_v45 = vpop.f32.mrf.mxu1 }
0x18b7   :  { %v9855_v43 = vpop.f32.mrf.mxu1 }
0x18dc   :  { %v2879_v62 = vpop.xlane.xlu1 %2878 }
0x18dd   :  { %v2883_v52 = vadd.f32 %v2879_v62, %v14108_v21 }
0x18df   :  { %v2890_v3 = vrot.slane %v2883_v52, %v14109_v24 }
0x18e0   :  { %v2882_v57 = vpop.xlane.xlu0 %2881 }
0x18e1   :  { %v2884_v58 = vadd.f32 %v2882_v57, %v14108_v21 }
0x18e3   :  { %v2894_v28 = vrot.slane %v2884_v58, %v14109_v24 }
0x18e5   :  { %v2895_v18 = vsel %vm1649_vm5, %v2894_v28, %v2890_v3 }
0x18e6   :  { %v2897_v30 = vsel %vm1652_vm6, %v2895_v18, -inf }
0x18e7   :  { %2898 = vmax.xlane.f32.xlu0 %v2897_v30 }
0x1970   :  { %v2899_v39 = vpop.xlane.xlu0 %2898 }
0x1971   :  { %v2904_v12 = vrot.slane %v2899_v39, %v11516_v61  ;;  %v2908_v43 = vrot.slane %v2899_v39, %v14110_v15 }
0x1973   :  { %v2911_v50 = vsub.f32 %v2883_v52, %v2904_v12  ;;  %v2912_v45 = vsub.f32 %v2884_v58, %v2908_v43 }
0x1975   :  { %v2913_v62 = vmul.f32 1.442695, %v2911_v50  ;;  %v2915_v47 = vmul.f32 1.442695, %v2912_v45 }
0x1977   :  { %10704 = vpow2.f32 %v2913_v62 }
0x1978   :  { %10706 = vpow2.f32 %v2915_v47 }
0x1984   :  { %v10705_v57 = vpop.eup %10704 }
0x1985   :  { %v10707_v21 = vpop.eup %10706  ;;  %2920 = vperm.xlu1 %10527, %v10705_v57  }
0x1986   :  { %2923 = vperm.xlu0 %10526, %v10707_v21  }
0x1989   :  { %10528 = vset.pattern.permute.xlu1 %v14111_v56  ;;  %v12221_v56 = vld [vmem:[%s11246_s27 + $0x8] sm:$0xff] }
0x1a00   :  { %v2921_v3 = vpop.permute.xlu1 %2920 }
0x1a01   :  { %v2924_v28 = vpop.permute.xlu0 %2923  ;;  %v2928_v18 = vrot.slane %v2921_v3, %v14109_v24  ;;  %v14112_v3 = vmov 2  }
0x1a02   :  { %v2932_v30 = vrot.slane %v2924_v28, %v14109_v24 }
0x1a04   :  { %v2933_v39 = vsel %vm1649_vm5, %v2932_v30, %v2928_v18  ;;  %v12216_v18 = vld [vmem:[%s11246_s27] sm:$0xff] }
0x1a05   :  { %v2935_v52 = vsel %vm1652_vm6, %v2933_v39, 0.0  ;;  %14113 = vst [vmem:[#allocation45_spill] sm:$0xff] %v12216_v18 }
0x1a06   :  { %2936 = vadd.xlane.f32.xlu1 %v2935_v52 }
0x1a8f   :  { %v2937_v58 = vpop.xlane.xlu1 %2936 }
0x1a90   :  { %v2942_v47 = vrot.slane %v2937_v58, %v11516_v61  ;;  %v2946_v12 = vrot.slane %v2937_v58, %v14110_v15 }
0x1a92   :  { %10708 = vrcp.f32 %v2942_v47 }
0x1a93   :  { %10710 = vrcp.f32 %v2946_v12 }
0x1a9f   :  { %v10709_v43 = vpop.eup %10708 }
0x1aa0   :  { %v2950_v50 = vmul.f32 %v10709_v43, %v10705_v57  ;;  %v10711_v45 = vpop.eup %10710 }
0x1aa1   :  { %v2952_v62 = vmul.f32 %v10711_v45, %v10707_v21 }
0x1aa2   :  { %2955 = vperm.xlu0 %10526, %v2950_v50  }
0x1aa6   :  { %2960 = vperm.xlu0 %10526, %v2952_v62  }
0x1aaa   :  { %10529 = vset.pattern.permute.xlu0 %v14112_v3 }
0x1b1d   :  { %v2956_v28 = vpop.permute.xlu0 %2955 }
0x1b1e   :  { %v2963_v30 = vmul.f32 %v12216_v18, %v2956_v28 }
0x1b20   :  { %v2965_v39 = vsel %vm399_vm1, %v2963_v30, 0.0 }
0x1b21   :  { %v2966_v52 = vrot.slane %v2965_v39, 4  ;;  %v2961_v58 = vpop.permute.xlu0 %2960 }
0x1b22   :  { %v2964_v47 = vmul.f32 %v12221_v56, %v2961_v58 }
0x1b23   :  { %v2967_v57 = vadd.f32 %v2966_v52, %v2965_v39 }
0x1b24   :  { %v2972_v12 = vsel %vm399_vm1, %v2964_v47, 0.0 }
0x1b25   :  { %v2968_v21 = vrot.slane %v2967_v57, 2  ;;  %v2973_v43 = vrot.slane %v2972_v12, 4 }
0x1b27   :  { %v2969_v50 = vadd.f32 %v2968_v21, %v2967_v57  ;;  %v2974_v45 = vadd.f32 %v2973_v43, %v2972_v12  ;;  %v3411_v57 = vadd.f32 %v11954_v36, %v12197_v7 }
0x1b29   :  { %v2970_v62 = vrot.slane %v2969_v50, 1  ;;  %v2975_v3 = vrot.slane %v2974_v45, 2 }
0x1b2b   :  { %v2971_v15 = vadd.f32 %v2970_v62, %v2969_v50  ;;  %v2976_v24 = vadd.f32 %v2975_v3, %v2974_v45 }
0x1b2d   :  { %v2977_v28 = vrot.slane %v2976_v24, 1  ;;  %v2979_v18 = vpack.c.bf16 %v2971_v15, %v2971_v15 }
0x1b2f   :  { %v2978_v30 = vadd.f32 %v2977_v28, %v2976_v24  ;;  %v2983_v20 = vunpack.c.l.b16 %v2979_v18  ;;  %v3252_v28 = vadd.f32 %v12191_v41, %v11532_v22 }
0x1b31   :  { %v2980_v61 = vpack.c.bf16 %v2978_v30, %v2978_v30 }
0x1b33   :  { %v2984_v53 = vunpack.c.l.b16 %v2980_v61 }
0x1b35   :  { %v2985_v49 = vsel %vm1649_vm5, %v2984_v53, %v2983_v20 }
0x1b36   :  { %v2986_v58 = vpack.c.b16 %v2985_v49, %v2985_v49 }
0x1b38   :  { %9781 = vmatmul.mubr.msk.bf16.vlgmr.msra.gmra.mxu0 %vm399_vm1, %v2986_v58  ;;  %v12298_v58 = vadd.f32 %v12188_v51, %v11520_v1 }
0x1b39   :  { %9793 = vmatpush3.bf16.msra.mxu0 %v11878_v60  ;;  %9796 = vmatprep.mubr.msk.bf16.mxu0 %vm11108_vm0, %v14064_v2 }
0x1b3a   :  { %9794 = vmatprep.subr.bf16.mxu0 %v14064_v2 }
0x1b3d   :  { %9795 = vmatpush3.bf16.msra.mxu0 %v11882_v59 }
0x1b3e   :  { %9800 = vmatprep.subr.bf16.mxu0 %v14064_v2 }
0x1bf8   :  { %v3024_v24 = vpop.f32.mrf.mxu0 }
0x1bf9   :  { %v3065_v15 = vadd.f32 %v12185_v8, %v3024_v24 }
0x1bfa   :  { %v9782_v61 = vpop.f32.mrf.mxu0 }
0x1bfb   :  { %v3070_v20 = vadd.f32 %v11888_v16, %v3065_v15 }
0x1bfc   :  { %v3027_v49 = vpop.f32.mrf.mxu0 }
0x1bfd   :  { %10712 = vtanh.f32 %v3070_v20 }
0x1bfe   :  { %v9783_v53 = vpop.f32.mrf.mxu0 }
0x1c0a   :  { %v12235_v3 = vpop.eup %10712 }
0x1c0b   :  { %14114 = vst [vmem:[#allocation49_spill] sm:$0xff] %v12235_v3  ;;  %v3072_v60 = vpack.c.bf16 %v12235_v3, %v12235_v3 }
0x1c0d   :  { %9797 = vmatmul.mubr.msk.bf16.vlgmr.msra.gmra.mxu0 %vm399_vm1, %v3072_v60 }
0x1c0e   :  { %9801 = vmatpush3.bf16.msra.mxu0 %v11898_v54  ;;  %9804 = vmatprep.mubr.msk.bf16.mxu0 %vm11108_vm0, %v14064_v2 }
0x1c0f   :  { %9802 = vmatprep.subr.bf16.mxu0 %v14064_v2 }
0x1c12   :  { %9803 = vmatpush3.bf16.msra.mxu0 %v11905_v26 }
0x1c13   :  { %9824 = vmatprep.subr.bf16.mxu0 %v14064_v2 }
0x1c15   :  { %9805 = vmatmul.mubr.msk.bf16.vlgmr.msra.gmra.mxu0 %vm399_vm1, %v12143_v63 }
0x1c16   :  { %9825 = vmatpush3.bf16.xpose.msra.mxu0 %v11347_v27  ;;  %9836 = vmatprep.mubr.msk.bf16.mxu0 %vm11108_vm0, %v14064_v2 }
0x1c17   :  { %9826 = vmatprep.subr.bf16.mxu0 %v14064_v2 }
0x1c1e   :  { %9827 = vmatpush3.bf16.xpose.msra.mxu0 %v11353_v29 }
0x1c1f   :  { %9828 = vmatprep.subr.bf16.mxu0 %v14064_v2 }
0x1c26   :  { %9829 = vmatpush3.bf16.xpose.msra.mxu0 %v11359_v31 }
0x1c27   :  { %9830 = vmatprep.subr.bf16.mxu0 %v14064_v2 }
0x1c2e   :  { %9831 = vmatpush3.bf16.xpose.msra.mxu0 %v11366_v33 }
0x1c2f   :  { %9832 = vmatprep.subr.bf16.mxu0 %v14064_v2 }
0x1c36   :  { %9833 = vmatpush3.bf16.xpose.msra.mxu0 %v11392_v37 }
0x1c37   :  { %9834 = vmatprep.subr.bf16.mxu0 %v14064_v2 }
0x1c3e   :  { %9835 = vmatpush3.bf16.xpose.msra.mxu0 %v11403_v40 }
0x1c3f   :  { %9856 = vmatprep.subr.bf16.mxu0 %v14064_v2 }
0x1c45   :  { %9837 = vmatmul.mubr.msk.bf16.vlgmr.msra.gmra.mxu0 %vm399_vm1, %v12019_v32 }
0x1c46   :  { %9857 = vmatpush3.bf16.xpose.msra.mxu0 %v11422_v55  ;;  %9868 = vmatprep.mubr.msk.bf16.mxu0 %vm11108_vm0, %v14064_v2 }
0x1c47   :  { %9858 = vmatprep.subr.bf16.mxu0 %v14064_v2 }
0x1c4e   :  { %9859 = vmatpush3.bf16.xpose.msra.mxu0 %v11442_v0 }
0x1c4f   :  { %9860 = vmatprep.subr.bf16.mxu0 %v14064_v2 }
0x1c56   :  { %9861 = vmatpush3.bf16.xpose.msra.mxu0 %v11454_v6 }
0x1c57   :  { %9862 = vmatprep.subr.bf16.mxu0 %v14064_v2 }
0x1c5e   :  { %9863 = vmatpush3.bf16.xpose.msra.mxu0 %v11466_v10 }
0x1c5f   :  { %9864 = vmatprep.subr.bf16.mxu0 %v14064_v2 }
0x1c66   :  { %9865 = vmatpush3.bf16.xpose.msra.mxu0 %v11478_v14 }
0x1c67   :  { %9866 = vmatprep.subr.bf16.mxu0 %v14064_v2 }
0x1c6e   :  { %9867 = vmatpush3.bf16.xpose.msra.mxu0 %v11490_v19 }
0x1c6f   :  { %9878 = vmatprep.subr.bf16.mxu0 %v14064_v2 }
0x1c75   :  { %9869 = vmatmul.mubr.msk.bf16.vlgmr.msra.gmra.mxu0 %vm399_vm1, %v12037_v5 }
0x1c76   :  { %9879 = vmatpush3.bf16.xpose.msra.mxu0 %v11571_v25  ;;  %9880 = vmatprep.mubr.msk.bf16.mxu0 %vm11108_vm0, %v14064_v2 }
0x1c77   :  { %9890 = vmatprep.subr.bf16.mxu0 %v14064_v2 }
0x1ccd   :  { %v3110_v59 = vpop.f32.mrf.mxu0 }
0x1cce   :  { %3117 = vst.msk [vmem:[#allocation3 + $0x2] sm:$0x3] %vm1914_vm7, %v3110_v59 }
0x1ccf   :  { %v9798_v16 = vpop.f32.mrf.mxu0 }
0x1cd1   :  { %v3113_v54 = vpop.f32.mrf.mxu0 }
0x1cd3   :  { %v9799_v26 = vpop.f32.mrf.mxu0 }
0x1cd5   :  { %v3290_v32 = vpop.f32.mrf.mxu0 }
0x1cd6   :  { %v3291_v51 = vadd.f32 %v3290_v32, %v11534_v23 }
0x1cd7   :  { %v9806_v63 = vpop.f32.mrf.mxu0 }
0x1cd9   :  { %v3293_v8 = vpop.f32.mrf.mxu0 }
0x1cdb   :  { %v9807_v18 = vpop.f32.mrf.mxu0 }
0x1d05   :  { %v3370_v39 = vpop.f32.mrf.mxu0 }
0x1d06   :  { %v3371_v5 = vadd.f32 %v11949_v9, %v3370_v39 }
0x1d07   :  { %v9838_v52 = vpop.f32.mrf.mxu0 }
0x1d08   :  { %3483 = vrot.lane.b32.xlu0 %v3371_v5, %s11110_s0 }
0x1d09   :  { %v3373_v47 = vpop.f32.mrf.mxu0 }
0x1d0b   :  { %v9839_v12 = vpop.f32.mrf.mxu0 }
0x1d0c   :  { %3522 = vrot.lane.b32.xlu0 %v3411_v57, %s11111_s9 }
0x1d35   :  { %v3450_v21 = vpop.f32.mrf.mxu0 }
0x1d36   :  { %v3451_v43 = vadd.f32 %v11960_v11, %v3450_v21 }
0x1d37   :  { %v9870_v50 = vpop.f32.mrf.mxu0 }
0x1d38   :  { %3551 = vrot.lane.b32.xlu0 %v3451_v43, %s11112_s13 }
0x1d39   :  { %v3453_v45 = vpop.f32.mrf.mxu0 }
0x1d3b   :  { %v9871_v62 = vpop.f32.mrf.mxu0 }
0x1d3c   :  { %3500 = vrot.lane.b32.xlu0 %v3371_v5, %s11112_s13 }
0x1d40   :  { %3561 = vrot.lane.b32.xlu0 %v3451_v43, %s11110_s0 }
0x1d7a   :  { %v3484_v9 = vpop.permute.xlu0 %3483 }
0x1d7b   :  { %v3486_v11 = vadd.f32 %v3484_v9, %v12298_v58  ;;  %v3493_v45 = vadd.f32 %v3484_v9, %v3252_v28 }
0x1d7d   :  { %v8951_v24 = vmul.f32 -1.442695, %v3486_v11 }
0x1d7e   :  { %v3523_v36 = vpop.permute.xlu0 %3522 }
0x1d7f   :  { %v3525_v7 = vadd.f32 %v3523_v36, %v3252_v28 }
0x1d81   :  { %v8953_v30 = vmul.f32 -1.442695, %v3525_v7 }
0x1d83   :  { %10714 = vpow2.f32 %v8953_v30 }
0x1d84   :  { %10716 = vpow2.f32 %v8951_v24 }
0x1d90   :  { %v10715_v15 = vpop.eup %10714 }
0x1d91   :  { %v3529_v61 = vadd.f32 1.0, %v10715_v15  ;;  %v10717_v20 = vpop.eup %10716 }
0x1d92   :  { %v3490_v49 = vadd.f32 1.0, %v10717_v20 }
0x1d93   :  { %10718 = vrcp.f32 %v3529_v61 }
0x1d94   :  { %10720 = vrcp.f32 %v3490_v49 }
0x1da0   :  { %v10719_v53 = vpop.eup %10718 }
0x1da1   :  { %v3532_v41 = vmul.f32 %v10719_v53, %v3411_v57  ;;  %v10721_v54 = vpop.eup %10720 }
0x1da3   :  { %3534 = vrot.lane.b32.xlu1 %v3532_v41, %s11111_s9  ;;  %v3539_v41 = vsub.f32 1.0, %v10719_v53 }
0x1da7   :  { %3545 = vrot.lane.b32.xlu1 %v12003_v35, %s11111_s9 }
0x1daa   :  { %v3552_v60 = vpop.permute.xlu0 %3551 }
0x1dab   :  { %v3554_v59 = vadd.f32 %v3552_v60, %v3291_v51  ;;  %3577 = vrot.lane.b32.xlu1 %v12008_v13, %s11112_s13 }
0x1dad   :  { %v8954_v16 = vmul.f32 -1.442695, %v3554_v59 }
0x1dae   :  { %v3501_v26 = vpop.permute.xlu0 %3500 }
0x1daf   :  { %10722 = vpow2.f32 %v8954_v16  ;;  %v3503_v63 = vmul.f32 %v10721_v54, %v3501_v26 }
0x1db1   :  { %3505 = vrot.lane.b32.xlu0 %v3503_v63, %s11111_s9 }
0x1db2   :  { %v3562_v5 = vpop.permute.xlu0 %3561 }
0x1dbc   :  { %v10723_v8 = vpop.eup %10722 }
0x1dbd   :  { %v3558_v18 = vadd.f32 1.0, %v10723_v8 }
0x1dbf   :  { %10724 = vrcp.f32 %v3558_v18 }
0x1dcc   :  { %v10725_v39 = vpop.eup %10724 }
0x1dcd   :  { %v3564_v35 = vmul.f32 %v10725_v39, %v3562_v5  ;;  %v3571_v16 = vsub.f32 1.0, %v10725_v39 }
0x1dcf   :  { %3566 = vrot.lane.b32.xlu0 %v3564_v35, %s11111_s9 }
0x1dd3   :  { %3516 = vrot.lane.b32.xlu0 %v11998_v17, %s11110_s0  ;;  %v8952_v17 = vmul.f32 -1.442695, %v3493_v45 }
0x1e15   :  { %v3535_v32 = vpop.permute.xlu1 %3534 }
0x1e16   :  { %v3537_v47 = vadd.f32 %v3535_v32, %v3291_v51 }
0x1e19   :  { %v3546_v20 = vpop.permute.xlu1 %3545 }
0x1e1a   :  { %v3548_v60 = vmul.f32 %v10719_v53, %v3546_v20 }
0x1e23   :  { %v3506_v13 = vpop.permute.xlu0 %3505 }
0x1e24   :  { %v3508_v52 = vadd.f32 %v3506_v13, %v3252_v28  ;;  %v3578_v28 = vpop.permute.xlu1 %3577  ;;  %v3331_v13 = vadd.f32 %v12014_v4, %v12195_v42  ;;  %v12357_v4 = vld [vmem:[%s11183_s24 + $0x8] sm:$0xff]   ;;  %v12364_v42 = vld [vmem:[%s11183_s24] sm:$0xff]  }
0x1e25   :  { %v3580_v26 = vmul.f32 %v10725_v39, %v3578_v28 }
0x1e26   :  { %10726 = vtanh.f32 %v3508_v52 }
0x1e27   :  { %10728 = vtanh.f32 %v3537_v47  ;;  %v14115_v47 = vld [vmem:[#allocation43_spill] sm:$0xff] }
0x1e33   :  { %v10727_v57 = vpop.eup %10726 }
0x1e34   :  { %3512 = vrot.lane.b32.xlu0 %v10727_v57, %s11110_s0  ;;  %v10729_v12 = vpop.eup %10728 }
0x1e38   :  { %3541 = vrot.lane.b32.xlu0 %v10729_v12, %s11110_s0 }
0x1e41   :  { %v3567_v21 = vpop.permute.xlu0 %3566 }
0x1e42   :  { %v3569_v43 = vadd.f32 %v3567_v21, %v3291_v51  ;;  %v12373_v21 = vld [vmem:[%s11178_s19 + $0x8] sm:$0xff]  }
0x1e44   :  { %10730 = vtanh.f32 %v3569_v43  ;;  %v12380_v43 = vld [vmem:[%s11178_s19] sm:$0xff]  }
0x1e45   :  { %10732 = vpow2.f32 %v8952_v17  ;;  %v3517_v30 = vpop.permute.xlu0 %3516 }
0x1e51   :  { %v10731_v50 = vpop.eup %10730 }
0x1e52   :  { %3573 = vrot.lane.b32.xlu0 %v10731_v50, %s11110_s0  ;;  %v10733_v62 = vpop.eup %10732 }
0x1e53   :  { %v3497_v36 = vadd.f32 1.0, %v10733_v62 }
0x1e55   :  { %10734 = vrcp.f32 %v3497_v36 }
0x1e62   :  { %v10735_v7 = vpop.eup %10734 }
0x1e63   :  { %v3510_v11 = vsub.f32 1.0, %v10735_v7  ;;  %v3519_v15 = vmul.f32 %v10735_v7, %v3517_v30 }
0x1ea6   :  { %v3513_v24 = vpop.permute.xlu0 %3512 }
0x1ea7   :  { %v3515_v61 = vmul.f32 %v3513_v24, %v3510_v11  ;;  %v3456_v24 = vadd.f32 %v3331_v13, %v12298_v58 }
0x1ea9   :  { %v12314_v49 = vadd.f32 %v3519_v15, %v3515_v61  ;;  %v8950_v15 = vmul.f32 -1.442695, %v3456_v24 }
0x1eaa   :  { %v3542_v51 = vpop.permute.xlu0 %3541 }
0x1eab   :  { %v3544_v59 = vmul.f32 %v3542_v51, %v3539_v41  ;;  %3583 = vrot.lane.b32.xlu0 %v12314_v49, %s11112_s13  ;;  %10736 = vpow2.f32 %v8950_v15 }
0x1ead   :  { %v12318_v9 = vadd.f32 %v3548_v60, %v3544_v59 }
0x1eaf   :  { %3587 = vrot.lane.b32.xlu1 %v12318_v9, %s11111_s9 }
0x1ec4   :  { %v3574_v54 = vpop.permute.xlu0 %3573 }
0x1ec5   :  { %v3576_v63 = vmul.f32 %v3574_v54, %v3571_v16 }
0x1ec7   :  { %v12322_v8 = vadd.f32 %v3580_v26, %v3576_v63  ;;  %v10737_v26 = vpop.eup %10736 }
0x1ec9   :  { %3591 = vrot.lane.b32.xlu0 %v12322_v8, %s11110_s0 }
0x1f1d   :  { %v12326_v53 = vpop.permute.xlu0 %3583 }
0x1f1e   :  { %v3594_v18 = vpack.c.bf16 %v12326_v53, %v12326_v53 }
0x1f20   :  { %3598 = vrot.lane.b32.xlu1 %v3594_v18, %s11110_s0 }
0x1f21   :  { %v12331_v5 = vpop.permute.xlu1 %3587 }
0x1f22   :  { %v3595_v35 = vpack.c.bf16 %v12331_v5, %v12331_v5 }
0x1f24   :  { %3644 = vrot.lane.b32.xlu0 %v3595_v35, %s11110_s0  ;;  %v3460_v35 = vadd.f32 1.0, %v10737_v26 }
0x1f26   :  { %10738 = vrcp.f32 %v3460_v35 }
0x1f3b   :  { %v12336_v39 = vpop.permute.xlu0 %3591 }
0x1f3c   :  { %v3596_v32 = vpack.c.bf16 %v12336_v39, %v12336_v39 }
0x1f3e   :  { %3690 = vrot.lane.b32.xlu1 %v3596_v32, %s11110_s0 }
0x1f42   :  { %3464 = vrot.lane.b32.xlu1 %v3331_v13, %s11111_s9  ;;  %v10739_v13 = vpop.eup %10738 }
0x1f92   :  { %v12344_v52 = vpop.permute.xlu1 %3598 }
0x1f93   :  { %9875 = vmatmul.mubr.msk.bf16.vlgmr.msra.gmra.mxu1 %vm399_vm1, %v12344_v52 }
0x1f94   :  { %9885 = vmatpush3.bf16.xpose.msra.mxu1 %v14115_v47  ;;  %9886 = vmatprep.mubr.msk.bf16.mxu1 %vm11108_vm0, %v14064_v2 }
0x1f95   :  { %9898 = vmatprep.subr.bf16.mxu1 %v14064_v2 }
0x1f96   :  { %v12352_v57 = vpop.permute.xlu0 %3644 }
0x1f97   :  { %9881 = vmatmul.mubr.msk.bf16.vlgmr.msra.gmra.mxu0 %vm399_vm1, %v12352_v57 }
0x1f98   :  { %9891 = vmatpush3.bf16.msra.mxu0 %v12357_v4  ;;  %9894 = vmatprep.mubr.msk.bf16.mxu0 %vm11108_vm0, %v14064_v2 }
0x1f99   :  { %9892 = vmatprep.subr.bf16.mxu0 %v14064_v2 }
0x1f9c   :  { %9893 = vmatpush3.bf16.msra.mxu0 %v12364_v42 }
0x1f9d   :  { %9906 = vmatprep.subr.bf16.mxu0 %v14064_v2 }
0x1fb0   :  { %v12368_v12 = vpop.permute.xlu1 %3690 }
0x1fb1   :  { %9887 = vmatmul.mubr.msk.bf16.vlgmr.msra.gmra.mxu1 %vm399_vm1, %v12368_v12 }
0x1fb2   :  { %9899 = vmatpush3.bf16.msra.mxu1 %v12373_v21  ;;  %9902 = vmatprep.mubr.msk.bf16.mxu1 %vm11108_vm0, %v14064_v2 }
0x1fb3   :  { %9900 = vmatprep.subr.bf16.mxu1 %v14064_v2 }
0x1fb4   :  { %v3465_v32 = vpop.permute.xlu1 %3464 }
0x1fb6   :  { %9901 = vmatpush3.bf16.msra.mxu1 %v12380_v43 }
0x1fb7   :  { %9918 = vmatprep.subr.bf16.mxu1 %v14064_v2 }
0x2053   :  { %v3637_v50 = vpop.f32.mrf.mxu1 }
0x2054   :  { %v3735_v20 = vsel %vm1153_vm3, %v3637_v50, 0.0  ;;  %v3467_v50 = vmul.f32 %v10739_v13, %v3465_v32 }
0x2055   :  { %v9876_v45 = vpop.f32.mrf.mxu1 }
0x2057   :  { %v3640_v17 = vpop.f32.mrf.mxu1  ;;  %v3683_v62 = vpop.f32.mrf.mxu0 }
0x2058   :  { %v3736_v61 = vsel %vm1153_vm3, %v3683_v62, 0.0 }
0x2059   :  { %v9877_v36 = vpop.f32.mrf.mxu1  ;;  %v9882_v7 = vpop.f32.mrf.mxu0  ;;  %v3737_v41 = vadd.f32 %v3736_v61, %v3735_v20 }
0x205b   :  { %v3686_v30 = vpop.f32.mrf.mxu0 }
0x205d   :  { %v9883_v11 = vpop.f32.mrf.mxu0 }
0x2071   :  { %v3729_v51 = vpop.f32.mrf.mxu1 }
0x2072   :  { %v3738_v60 = vsel %vm1153_vm3, %v3729_v51, 0.0 }
0x2073   :  { %v3739_v59 = vadd.f32 %v3738_v60, %v3737_v41  ;;  %v9888_v28 = vpop.f32.mrf.mxu1 }
0x2074   :  { %v3480_v28 = vmul.f32 %v10739_v13, %v12068_v44  ;;  %v14141_v44 = vld [vmem:[#allocation42_spill] sm:$0xff] }
0x2075   :  { %v3740_v16 = vadd.f32 %v12052_v48, %v3739_v59  ;;  %v3732_v54 = vpop.f32.mrf.mxu1 }
0x2077   :  { %8958 = vst.msk [vmem:[%s11296_s4 + $0x4] sm:$0x3] %vm1153_vm3, %v3740_v16  ;;  %v9889_v63 = vpop.f32.mrf.mxu1  ;;  %v3741_v18 = vsel %vm1153_vm3, %v3740_v16, -inf }
0x2078   :  { %3742 = vmax.xlane.f32.xlu0 %v3741_v18 }
0x208e   :  { %3469 = vrot.lane.b32.xlu0 %v3467_v50, %s11111_s9 }
0x2101   :  { %v3743_v45 = vpop.xlane.xlu0 %3742 }
0x2102   :  { %v3744_v17 = vsub.f32 %v3740_v16, %v3743_v45  ;;  %v14117_v45 = vld [vmem:[#allocation46_spill] sm:$0xff] }
0x2104   :  { %v3745_v62 = vmul.f32 1.442695, %v3744_v17  ;;  %v14118_v17 = vld [vmem:[#allocation63_spill] sm:$0xff] }
0x2105   :  { %v3470_v7 = vpop.permute.xlu0 %3469 }
0x2106   :  { %10740 = vpow2.f32 %v3745_v62  ;;  %v3472_v11 = vadd.f32 %v3470_v7, %v12298_v58  ;;  %v3474_v58 = vsub.f32 1.0, %v10739_v13 }
0x2113   :  { %v10741_v48 = vpop.eup %10740 }
0x2114   :  { %v3747_v36 = vsel %vm1153_vm3, %v10741_v48, 0.0 }
0x2115   :  { %3748 = vadd.xlane.f32.xlu1 %v3747_v36 }
0x219e   :  { %v3749_v30 = vpop.xlane.xlu1 %3748 }
0x219f   :  { %10742 = vrcp.f32 %v3749_v30  ;;  %v12437_v30 = vld [vmem:[%s14052_s29] ss:$0 sm:$0xff] }
0x21a0   :  { %10744 = vtanh.f32 %v3472_v11 }
0x21ac   :  { %v10743_v24 = vpop.eup %10742 }
0x21ad   :  { %v3751_v15 = vmul.f32 %v10743_v24, %v10741_v48  ;;  %v10745_v61 = vpop.eup %10744 }
0x21af   :  { %3769 = vperm.xlu0 %10529, %v3751_v15   ;;  %3759 = vperm.xlu1 %10528, %v3751_v15  }
0x21b3   :  { %10530 = vset.pattern.permute.xlu0 %v14067_v46  ;;  %3476 = vrot.lane.b32.xlu1 %v10745_v61, %s11110_s0 }
0x21b4   :  { %3754 = vperm.xlu0 %10530, %v3751_v15   ;;  %10531 = vset.pattern.permute.xlu1 %v14067_v46 }
0x222a   :  { %v3760_v20 = vpop.permute.xlu1 %3759  ;;  %v3770_v51 = vpop.permute.xlu0 %3769 }
0x222b   :  { %v3762_v41 = vmul.f32 %v3760_v20, %v12318_v9  ;;  %v3772_v59 = vmul.f32 %v3770_v51, %v12322_v8 }
0x222d   :  { %3764 = vrot.lane.b32.xlu1 %v3762_v41, %s11112_s13 }
0x222e   :  { %v3477_v60 = vpop.permute.xlu1 %3476 }
0x222f   :  { %v3479_v16 = vmul.f32 %v3477_v60, %v3474_v58  ;;  %v3755_v9 = vpop.permute.xlu0 %3754  ;;  %v12442_v60 = vld [vmem:[%s14077_s30 + $0x8] sm:$0xff]  }
0x2230   :  { %v3757_v18 = vmul.f32 %v3755_v9, %v12314_v49  ;;  %v12419_v49 = vld [vmem:[%s14051_s25 + $0x8] sm:$0xff]  }
0x2231   :  { %v12402_v54 = vadd.f32 %v3480_v28, %v3479_v16  ;;  %3774 = vrot.lane.b32.xlu1 %v3772_v59, %s11111_s9  ;;  %v12449_v59 = vld [vmem:[%s14077_s30] sm:$0xff]  }
0x2232   :  { %v12454_v16 = vld [vmem:[%s14054_s8] ss:$0 sm:$0xff] }
0x2233   :  { %14116 = vst [vmem:[#allocation50_spill] sm:$0xff] %v12402_v54  ;;  %v3780_v26 = vpack.c.bf16 %v12402_v54, %v12402_v54 }
0x2235   :  { %3826 = vrot.lane.b32.xlu0 %v3780_v26, %s11110_s0 }
0x229f   :  { %v3765_v63 = vpop.permute.xlu1 %3764 }
0x22a0   :  { %v3767_v35 = vadd.f32 %v3765_v63, %v3757_v18 }
0x22a3   :  { %v3775_v8 = vpop.permute.xlu1 %3774 }
0x22a4   :  { %v3777_v32 = vadd.f32 %v3775_v8, %v3767_v35  ;;  %v12459_v8 = vld [vmem:[%s14056_s20 + $0x8] sm:$0xff]  }
0x22a6   :  { %v3781_v13 = vpack.c.bf16 %v3777_v32, %v3777_v32  ;;  %v12466_v32 = vld [vmem:[%s14056_s20] sm:$0xff]  }
0x22a7   :  { %v12409_v50 = vpop.permute.xlu0 %3826 }
0x22a8   :  { %9895 = vmatmul.mubr.msk.bf16.vlgmr.msra.gmra.mxu0 %vm399_vm1, %v3781_v13  ;;  %9903 = vmatmul.mubr.msk.bf16.vlgmr.msra.gmra.mxu1 %vm399_vm1, %v12409_v50 }
0x22a9   :  { %9907 = vmatpush3.bf16.msra.mxu0 %v12081_v38  ;;  %9914 = vmatprep.mubr.msk.bf16.mxu0 %vm11108_vm0, %v14064_v2  ;;  %v12428_v38 = vld [vmem:[%s14051_s25] sm:$0xff]  }
0x22aa   :  { %9908 = vmatprep.subr.bf16.mxu0 %v14064_v2  ;;  %9919 = vmatpush3.bf16.msra.mxu1 %v12419_v49 }
0x22ab   :  { %9920 = vmatprep.subr.bf16.mxu1 %v14064_v2  ;;  %9922 = vmatprep.mubr.msk.bf16.mxu1 %vm11108_vm0, %v14064_v2 }
0x22ad   :  { %9909 = vmatpush3.bf16.msra.mxu0 %v12092_v34 }
0x22ae   :  { %9910 = vmatprep.subr.bf16.mxu0 %v14064_v2  ;;  %9921 = vmatpush3.bf16.msra.mxu1 %v12428_v38 }
0x22af   :  { %9926 = vmatprep.subr.bf16.mxu1 %v14064_v2 }
0x22b1   :  { %9911 = vmatpush3.bf16.msra.mxu0 %v14117_v45  ;;  %v14119_v45 = vld [vmem:[#allocation52_spill] sm:$0xff] }
0x22b2   :  { %9912 = vmatprep.subr.bf16.mxu0 %v14064_v2 }
0x22b5   :  { %9913 = vmatpush3.bf16.msra.mxu0 %v14118_v17 }
0x22b6   :  { %9934 = vmatprep.subr.bf16.mxu0 %v14064_v2 }
0x2368   :  { %v3819_v62 = vpop.f32.mrf.mxu0  ;;  %v3865_v48 = vpop.f32.mrf.mxu1 }
0x2369   :  { %v3866_v34 = vadd.f32 %v3865_v48, %v3819_v62 }
0x236a   :  { %v9896_v36 = vpop.f32.mrf.mxu0  ;;  %v9904_v7 = vpop.f32.mrf.mxu1 }
0x236b   :  { %v3871_v11 = vadd.f32 %v12437_v30, %v3866_v34 }
0x236c   :  { %v3822_v24 = vpop.f32.mrf.mxu0  ;;  %v3868_v15 = vpop.f32.mrf.mxu1 }
0x236d   :  { %vm3872_vm9 = vcmp.ge.f32.partialorder %v3871_v11, 0.0  ;;  %v3873_v61 = vmul.f32 0.1, %v3871_v11 }
0x236e   :  { %v9897_v20 = vpop.f32.mrf.mxu0  ;;  %v9905_v41 = vpop.f32.mrf.mxu1 }
0x236f   :  { %v3874_v51 = vsel %vm3872_vm9, %v3871_v11, %v3873_v61  ;;  %v14120_v11 = vld [vmem:[#allocation40_spill] sm:$0xff]  ;;  %v14121_v20 = vld [vmem:[#allocation47_spill] sm:$0xff]  ;;  %vm8501_vm9 = vcmask 258048  }
0x2370   :  { %v3875_v58 = vpack.c.bf16 %v3874_v51, %v3874_v51  ;;  %v14122_v51 = vld [vmem:[#allocation48_spill] sm:$0xff] }
0x2372   :  { %9915 = vmatmul.mubr.msk.bf16.vlgmr.msra.gmra.mxu0 %vm304_vm2, %v3875_v58 }
0x2373   :  { %9935 = vmatpush3.bf16.msra.mxu0 %v12442_v60  ;;  %9938 = vmatprep.mubr.msk.bf16.mxu0 %vm11108_vm0, %v14064_v2 }
0x2374   :  { %9936 = vmatprep.subr.bf16.mxu0 %v14064_v2 }
0x2377   :  { %9937 = vmatpush3.bf16.msra.mxu0 %v12449_v59 }
0x2378   :  { %9950 = vmatprep.subr.bf16.mxu0 %v14064_v2 }
0x2432   :  { %v3913_v28 = vpop.f32.mrf.mxu0 }
0x2433   :  { %v3914_v26 = vadd.f32 %v12454_v16, %v3913_v28 }
0x2434   :  { %v9916_v9 = vpop.f32.mrf.mxu0 }
0x2435   :  { %v3919_v63 = vpack.c.bf16 %v3914_v26, %v3914_v26 }
0x2436   :  { %v3916_v18 = vpop.f32.mrf.mxu0 }
0x2437   :  { %9923 = vmatmul.mubr.msk.bf16.vlgmr.msra.gmra.mxu1 %vm399_vm1, %v3919_v63  ;;  %v12479_v18 = vld [vmem:[%s14063_s22 + $0x8] sm:$0xff]  }
0x2438   :  { %v9917_v35 = vpop.f32.mrf.mxu0  ;;  %9927 = vmatpush3.bf16.msra.mxu1 %v12459_v8  ;;  %9930 = vmatprep.mubr.msk.bf16.mxu1 %vm11108_vm0, %v14064_v2  ;;  %14123 = vst [vmem:[#allocation51_spill] sm:$0xff] %v12479_v18 }
0x2439   :  { %9928 = vmatprep.subr.bf16.mxu1 %v14064_v2  ;;  %v12486_v35 = vld [vmem:[%s14063_s22] sm:$0xff]  }
0x243a   :  { %14124 = vst [vmem:[#allocation53_spill] sm:$0xff] %v12486_v35 }
0x243c   :  { %9929 = vmatpush3.bf16.msra.mxu1 %v12466_v32 }
0x243d   :  { %9942 = vmatprep.subr.bf16.mxu1 %v14064_v2 }
0x24f7   :  { %v3957_v13 = vpop.f32.mrf.mxu1 }
0x24f8   :  { %v3970_v17 = vrot.slane %v3957_v13, %v14119_v45  ;;  %v12490_v13 = vld [vmem:[%s11148_s21 + $0x1c] ss:$12 sps:$4 sm:$0xff]  }
0x24f9   :  { %v9924_v62 = vpop.f32.mrf.mxu1  ;;  %14125 = vst [vmem:[#allocation54_spill] sm:$0xff] %v12490_v13 }
0x24fa   :  { %v3971_v48 = vcombine.high %v3970_v17, %v3970_v17  ;;  %v3978_v34 = vrot.slane %v3970_v17, %v14119_v45  ;;  %v12495_v17 = vld [vmem:[%s11148_s21 + $0x18] ss:$12 sps:$4 sm:$0xff]  }
0x24fb   :  { %v3960_v36 = vpop.f32.mrf.mxu1  ;;  %14126 = vst [vmem:[#allocation55_spill] sm:$0xff] %v12495_v17  ;;  %v8967_v62 = vld [vmem:[%s11128_s5 + $0x6] sm:$0x3] }
0x24fc   :  { %v3985_v7 = vrot.slane %v3971_v48, %v14119_v45  ;;  %v3989_v24 = vrot.slane %v3978_v34, %v14120_v11  ;;  %v12501_v48 = vld [vmem:[%s11148_s21 + $0x4] ss:$12 sps:$4 sm:$0xff]   ;;  %v12504_v34 = vpack.c.bf16 %v8967_v62, %v8967_v62  ;;  %v12507_v36 = vld [vmem:[%s11148_s21] ss:$12 sps:$4 sm:$0xff]  }
0x24fd   :  { %v9925_v15 = vpop.f32.mrf.mxu1  ;;  %14127 = vst [vmem:[#allocation56_spill] sm:$0xff] %v12501_v48  ;;  %14128 = vst [vmem:[#allocation57_spill] sm:$0xff] %v12507_v36  ;;  %v14140_v62 = vld [vmem:[#allocation38_spill] sm:$0xff] }
0x24fe   :  { %v3993_v61 = vrot.slane %v3985_v7, %v14120_v11  ;;  %v3996_v41 = vadd.f32 %v3989_v24, %v14121_v20  ;;  %v14130_v7 = vld [vmem:[#allocation28_spill] sm:$0xff]  ;;  %v14131_v24 = vld [vmem:[#allocation29_spill] sm:$0xff]  ;;  %v14132_v15 = vld [vmem:[#allocation30_spill] sm:$0xff]  ;;  %v14146_v20 = vmov 1  }
0x2500   :  { %v3997_v58 = vadd.f32 %v3993_v61, %v14122_v51  ;;  %10746 = vtanh.f32 %v3996_v41  ;;  %v14133_v61 = vld [vmem:[#allocation31_spill] sm:$0xff]  ;;  %v14134_v41 = vld [vmem:[#allocation32_spill] sm:$0xff] }
0x2502   :  { %10748 = vtanh.f32 %v3997_v58  ;;  %v14135_v58 = vld [vmem:[#allocation33_spill] sm:$0xff] }
0x250d   :  { %v10747_v28 = vpop.eup %10746 }
0x250f   :  { %v10749_v26 = vpop.eup %10748 }
0x2510   :  { %v4000_v9 = vpack.c.bf16 %v10749_v26, %v10747_v28  ;;  %v14136_v28 = vld [vmem:[#allocation34_spill] sm:$0xff]  ;;  %v14137_v26 = vld [vmem:[#allocation35_spill] sm:$0xff] }
0x2512   :  { %9931 = vmatmul.mubr.msk.bf16.vlgmr.msra.gmra.mxu1 %vm399_vm1, %v4000_v9  ;;  %v14138_v9 = vld [vmem:[#allocation36_spill] sm:$0xff] }
0x2513   :  { %9943 = vmatpush3.bf16.msra.mxu1 %v12479_v18  ;;  %9946 = vmatprep.mubr.msk.bf16.mxu1 %vm11108_vm0, %v14064_v2 }
0x2514   :  { %9944 = vmatprep.subr.bf16.mxu1 %v14064_v2 }
0x2517   :  { %9945 = vmatpush3.bf16.msra.mxu1 %v12486_v35 }
0x2518   :  { %4399 = vmatprep.subr.bf16.mxu1 %v12490_v13  ;;  %v14143_v13 = vld [vmem:[#allocation60_spill] sm:$0xff] }
0x251a   :  { %9947 = vmatmul.mubr.msk.bf16.vlgmr.msra.gmra.mxu1 %vm399_vm1, %v3919_v63  ;;  %v14129_v63 = vld [vmem:[#allocation27_spill] sm:$0xff] }
0x251b   :  { %4400 = vmatpush1.bf16.msra.mxu1 %v12495_v17  ;;  %4419 = vmatprep.mubr.bf16.mxu1 %v14067_v46 }
0x251c   :  { %4401 = vmatprep.subr.bf16.mxu1 %v12501_v48 }
0x251f   :  { %4402 = vmatpush1.bf16.msra.mxu1 %v12507_v36 }
0x2520   :  { %9966 = vmatprep.subr.bf16.mxu1 %v14064_v2 }
0x2522   :  { %8968 = vmatmul.mubr.msk.bf16.vlgmr.msra.gmra.mxu1 %vm399_vm1, %v12504_v34 }
0x2523   :  { %9967 = vmatpush3.bf16.xpose.msra.mxu1 %v14129_v63  ;;  %9978 = vmatprep.mubr.msk.bf16.mxu1 %vm11108_vm0, %v14064_v2 }
0x2524   :  { %9968 = vmatprep.subr.bf16.mxu1 %v14064_v2 }
0x252b   :  { %9969 = vmatpush3.bf16.xpose.msra.mxu1 %v14130_v7 }
0x252c   :  { %9970 = vmatprep.subr.bf16.mxu1 %v14064_v2 }
0x2533   :  { %9971 = vmatpush3.bf16.xpose.msra.mxu1 %v14131_v24 }
0x2534   :  { %9972 = vmatprep.subr.bf16.mxu1 %v14064_v2 }
0x253b   :  { %9973 = vmatpush3.bf16.xpose.msra.mxu1 %v14132_v15 }
0x253c   :  { %9974 = vmatprep.subr.bf16.mxu1 %v14064_v2 }
0x2543   :  { %9975 = vmatpush3.bf16.xpose.msra.mxu1 %v14133_v61 }
0x2544   :  { %9976 = vmatprep.subr.bf16.mxu1 %v14064_v2 }
0x254b   :  { %9977 = vmatpush3.bf16.xpose.msra.mxu1 %v14134_v41 }
0x254c   :  { %9998 = vmatprep.subr.bf16.mxu1 %v14064_v2 }
0x2552   :  { %9979 = vmatmul.mubr.msk.bf16.vlgmr.msra.gmra.mxu1 %vm399_vm1, %v12409_v50  ;;  %v14139_v50 = vld [vmem:[#allocation37_spill] sm:$0xff] }
0x2553   :  { %9999 = vmatpush3.bf16.xpose.msra.mxu1 %v14135_v58  ;;  %10010 = vmatprep.mubr.msk.bf16.mxu1 %vm11108_vm0, %v14064_v2 }
0x2554   :  { %10000 = vmatprep.subr.bf16.mxu1 %v14064_v2 }
0x255b   :  { %10001 = vmatpush3.bf16.xpose.msra.mxu1 %v14136_v28 }
0x255c   :  { %10002 = vmatprep.subr.bf16.mxu1 %v14064_v2 }
0x2563   :  { %10003 = vmatpush3.bf16.xpose.msra.mxu1 %v14137_v26 }
0x2564   :  { %10004 = vmatprep.subr.bf16.mxu1 %v14064_v2 }
0x256b   :  { %10005 = vmatpush3.bf16.xpose.msra.mxu1 %v14138_v9 }
0x256c   :  { %10006 = vmatprep.subr.bf16.mxu1 %v14064_v2 }
0x2573   :  { %10007 = vmatpush3.bf16.xpose.msra.mxu1 %v14139_v50 }
0x2574   :  { %10008 = vmatprep.subr.bf16.mxu1 %v14064_v2 }
0x257b   :  { %10009 = vmatpush3.bf16.xpose.msra.mxu1 %v14140_v62 }
0x257c   :  { %10030 = vmatprep.subr.bf16.mxu1 %v14064_v2 }
0x2582   :  { %10011 = vmatmul.mubr.msk.bf16.vlgmr.msra.gmra.mxu1 %vm399_vm1, %v12352_v57  ;;  %v12552_v57 = vld [vmem:[%s14070_s26] ss:$0 sm:$0xff] }
0x2583   :  { %10031 = vmatpush3.bf16.xpose.msra.mxu1 %v14141_v44  ;;  %10032 = vmatprep.mubr.msk.bf16.mxu1 %vm11108_vm0, %v14064_v2  ;;  %14142 = vst [vmem:[#allocation46_spill] sm:$0xff] %v12552_v57 }
0x2584   :  { %10042 = vmatprep.subr.bf16.mxu1 %v14064_v2 }
0x25d2   :  { %v4038_v3 = vpop.f32.mrf.mxu1 }
0x25d3   :  { %10750 = vtanh.f32 %v4038_v3 }
0x25d4   :  { %v9932_v50 = vpop.f32.mrf.mxu1 }
0x25d6   :  { %v4041_v9 = vpop.f32.mrf.mxu1 }
0x25d7   :  { %10752 = vtanh.f32 %v4041_v9 }
0x25d8   :  { %v9933_v26 = vpop.f32.mrf.mxu1 }
0x25da   :  { %v12549_v62 = vpop.f32.mrf.mxu1 }
0x25dc   :  { %v9948_v28 = vpop.f32.mrf.mxu1 }
0x25de   :  { %v4239_v58 = vpop.f32.mrf.mxu1 }
0x25e0   :  { %v10751_v41 = vpop.eup %10750  ;;  %v9949_v61 = vpop.f32.mrf.mxu1 }
0x25e1   :  { %v4047_v44 = vmul.f32 %v12552_v57, %v10751_v41 }
0x25e2   :  { %v12555_v15 = vpop.f32.mrf.mxu1 }
0x25e3   :  { %v4049_v24 = vsel %vm399_vm1, %v4047_v44, 0.0 }
0x25e4   :  { %v10753_v7 = vpop.eup %10752  ;;  %4050 = vadd.xlane.f32.xlu1 %v4049_v24  ;;  %v12558_v3 = vpop.f32.mrf.mxu1 }
0x25e5   :  { %v4048_v26 = vmul.f32 %v12552_v57, %v10753_v7 }
0x25e6   :  { %v4425_v9 = vpop.f32.mrf.mxu1 }
0x25e7   :  { %v4052_v28 = vsel %vm399_vm1, %v4048_v26, 0.0  ;;  %v14144_v9 = vld [vmem:[#allocation59_spill] sm:$0xff] }
0x25e8   :  { %4053 = vadd.xlane.f32.xlu0 %v4052_v28  ;;  %v4426_v58 = vpop.f32.mrf.mxu1 }
0x2612   :  { %v12562_v61 = vpop.f32.mrf.mxu1 }
0x2614   :  { %v9980_v50 = vpop.f32.mrf.mxu1 }
0x2616   :  { %v4505_v63 = vpop.f32.mrf.mxu1 }
0x2618   :  { %v9981_v41 = vpop.f32.mrf.mxu1 }
0x2619   :  { %v14145_v41 = vld [vmem:[#allocation41_spill] sm:$0xff] }
0x2642   :  { %v12564_v36 = vpop.f32.mrf.mxu1 }
0x2644   :  { %v10012_v48 = vpop.f32.mrf.mxu1 }
0x2646   :  { %v4585_v44 = vpop.f32.mrf.mxu1 }
0x2648   :  { %v10013_v17 = vpop.f32.mrf.mxu1 }
0x266d   :  { %v4051_v24 = vpop.xlane.xlu1 %4050 }
0x266e   :  { %v4055_v35 = vadd.f32 %v4051_v24, %v14143_v13 }
0x2670   :  { %v4062_v26 = vrot.slane %v4055_v35, %v14144_v9 }
0x2671   :  { %v4054_v18 = vpop.xlane.xlu0 %4053 }
0x2672   :  { %v4056_v7 = vadd.f32 %v4054_v18, %v14143_v13 }
0x2674   :  { %v4066_v28 = vrot.slane %v4056_v7, %v14144_v9 }
0x2676   :  { %v4067_v58 = vsel %vm1649_vm5, %v4066_v28, %v4062_v26 }
0x2677   :  { %v4069_v63 = vsel %vm1652_vm6, %v4067_v58, -inf }
0x2678   :  { %4070 = vmax.xlane.f32.xlu0 %v4069_v63 }
0x2701   :  { %v4071_v50 = vpop.xlane.xlu0 %4070 }
0x2702   :  { %v4076_v48 = vrot.slane %v4071_v50, %v14120_v11  ;;  %v4080_v17 = vrot.slane %v4071_v50, %v14145_v41 }
0x2704   :  { %v4083_v44 = vsub.f32 %v4055_v35, %v4076_v48  ;;  %v4084_v57 = vsub.f32 %v4056_v7, %v4080_v17 }
0x2706   :  { %v4085_v24 = vmul.f32 1.442695, %v4083_v44  ;;  %v4087_v51 = vmul.f32 1.442695, %v4084_v57 }
0x2708   :  { %10754 = vpow2.f32 %v4085_v24 }
0x2709   :  { %10756 = vpow2.f32 %v4087_v51 }
0x2715   :  { %v10755_v18 = vpop.eup %10754 }
0x2716   :  { %v10757_v13 = vpop.eup %10756  ;;  %4092 = vperm.xlu1 %10531, %v10755_v18  }
0x2717   :  { %4095 = vperm.xlu0 %10530, %v10757_v13  }
0x271a   :  { %10532 = vset.pattern.permute.xlu1 %v14146_v20 }
0x2791   :  { %v4093_v26 = vpop.permute.xlu1 %4092 }
0x2792   :  { %v4096_v28 = vpop.permute.xlu0 %4095  ;;  %v4100_v58 = vrot.slane %v4093_v26, %v14144_v9  ;;  %v14147_v26 = vmov 2  }
0x2793   :  { %v4104_v63 = vrot.slane %v4096_v28, %v14144_v9 }
0x2795   :  { %v4105_v50 = vsel %vm1649_vm5, %v4104_v63, %v4100_v58  ;;  %v14148_v58 = vld [vmem:[#allocation45_spill] sm:$0xff] }
0x2796   :  { %v4107_v35 = vsel %vm1652_vm6, %v4105_v50, 0.0 }
0x2797   :  { %4108 = vadd.xlane.f32.xlu1 %v4107_v35 }
0x2820   :  { %v4109_v57 = vpop.xlane.xlu1 %4108 }
0x2821   :  { %v4114_v51 = vrot.slane %v4109_v57, %v14120_v11  ;;  %v4118_v7 = vrot.slane %v4109_v57, %v14145_v41 }
0x2823   :  { %10758 = vrcp.f32 %v4114_v51 }
0x2824   :  { %10760 = vrcp.f32 %v4118_v7 }
0x2830   :  { %v10759_v48 = vpop.eup %10758 }
0x2831   :  { %v4122_v17 = vmul.f32 %v10759_v48, %v10755_v18  ;;  %v10761_v44 = vpop.eup %10760 }
0x2832   :  { %v4124_v24 = vmul.f32 %v10761_v44, %v10757_v13 }
0x2833   :  { %4127 = vperm.xlu0 %10530, %v4122_v17  }
0x2837   :  { %4132 = vperm.xlu0 %10530, %v4124_v24  }
0x283b   :  { %10533 = vset.pattern.permute.xlu0 %v14147_v26 }
0x28ae   :  { %v4128_v28 = vpop.permute.xlu0 %4127 }
0x28af   :  { %v4135_v63 = vmul.f32 %v14148_v58, %v4128_v28 }
0x28b1   :  { %v4137_v50 = vsel %vm399_vm1, %v4135_v63, 0.0 }
0x28b2   :  { %v4138_v35 = vrot.slane %v4137_v50, 4  ;;  %v4133_v20 = vpop.permute.xlu0 %4132 }
0x28b3   :  { %v4136_v9 = vmul.f32 %v12221_v56, %v4133_v20 }
0x28b4   :  { %v4139_v57 = vadd.f32 %v4138_v35, %v4137_v50  ;;  %v12589_v50 = vld [vmem:[%s14079_s28 + $0x8] sm:$0xff]  }
0x28b5   :  { %v4144_v51 = vsel %vm399_vm1, %v4136_v9, 0.0 }
0x28b6   :  { %v4140_v7 = vrot.slane %v4139_v57, 2  ;;  %v4145_v18 = vrot.slane %v4144_v51, 4 }
0x28b8   :  { %v4141_v48 = vadd.f32 %v4140_v7, %v4139_v57  ;;  %v4146_v13 = vadd.f32 %v4145_v18, %v4144_v51  ;;  %v12602_v57 = vld [vmem:[%s14080_s2] ss:$0 sm:$0xff] }
0x28ba   :  { %v4142_v17 = vrot.slane %v4141_v48, 1  ;;  %v4147_v44 = vrot.slane %v4146_v13, 2 }
0x28bc   :  { %v4143_v24 = vadd.f32 %v4142_v17, %v4141_v48  ;;  %v4148_v26 = vadd.f32 %v4147_v44, %v4146_v13  ;;  %v12611_v17 = vld [vmem:[%s11148_s21 + $0x20] ss:$12 sps:$4 sm:$0xff]  }
0x28be   :  { %v4149_v28 = vrot.slane %v4148_v26, 1  ;;  %v4151_v58 = vpack.c.bf16 %v4143_v24, %v4143_v24 }
0x28c0   :  { %v4150_v63 = vadd.f32 %v4149_v28, %v4148_v26  ;;  %v4155_v11 = vunpack.c.l.b16 %v4151_v58  ;;  %v12596_v26 = vld [vmem:[%s14079_s28] sm:$0xff]  }
0x28c2   :  { %v4152_v41 = vpack.c.bf16 %v4150_v63, %v4150_v63 }
0x28c4   :  { %v4156_v56 = vunpack.c.l.b16 %v4152_v41 }
0x28c6   :  { %v4157_v20 = vsel %vm1649_vm5, %v4156_v56, %v4155_v11 }
0x28c7   :  { %v4158_v9 = vpack.c.b16 %v4157_v20, %v4157_v20  ;;  %v12662_v20 = vld [vmem:[%s11163_s3 + $0x1] ss:$0 sm:$0xff] }
0x28c9   :  { %9939 = vmatmul.mubr.msk.bf16.vlgmr.msra.gmra.mxu0 %vm399_vm1, %v4158_v9 }
0x28ca   :  { %9951 = vmatpush3.bf16.msra.mxu0 %v12589_v50  ;;  %9954 = vmatprep.mubr.msk.bf16.mxu0 %vm11108_vm0, %v14064_v2 }
0x28cb   :  { %9952 = vmatprep.subr.bf16.mxu0 %v14064_v2 }
0x28ce   :  { %9953 = vmatpush3.bf16.msra.mxu0 %v12596_v26 }
0x28cf   :  { %9958 = vmatprep.subr.bf16.mxu0 %v14064_v2 }
0x2989   :  { %v4196_v11 = vpop.f32.mrf.mxu0 }
0x298a   :  { %v4237_v41 = vadd.f32 %v12549_v62, %v4196_v11  ;;  %v12618_v62 = vld [vmem:[%s11148_s21 + $0x8] ss:$12 sps:$4 sm:$0xff]  }
0x298b   :  { %v9940_v35 = vpop.f32.mrf.mxu0 }
0x298c   :  { %v4242_v51 = vadd.f32 %v12602_v57, %v4237_v41  ;;  %v12667_v35 = vld [vmem:[%s11163_s3 + $0x2] ss:$0 sm:$0xff] }
0x298d   :  { %v4199_v7 = vpop.f32.mrf.mxu0 }
0x298e   :  { %10762 = vtanh.f32 %v4242_v51  ;;  %v4583_v51 = vadd.f32 %v12667_v35, %v12564_v36  ;;  %v4424_v36 = vadd.f32 %v12558_v3, %v11532_v22 }
0x298f   :  { %v9941_v18 = vpop.f32.mrf.mxu0 }
0x299b   :  { %v12605_v48 = vpop.eup %10762 }
0x299c   :  { %14149 = vst [vmem:[#allocation63_spill] sm:$0xff] %v12605_v48  ;;  %v4244_v13 = vpack.c.bf16 %v12605_v48, %v12605_v48 }
0x299e   :  { %9955 = vmatmul.mubr.msk.bf16.vlgmr.msra.gmra.mxu0 %vm399_vm1, %v4244_v13  ;;  %v12673_v13 = vld [vmem:[%s11163_s3 + $0x3] ss:$0 sm:$0xff] }
0x299f   :  { %9959 = vmatpush3.bf16.msra.mxu0 %v12611_v17  ;;  %9962 = vmatprep.mubr.msk.bf16.mxu0 %vm11108_vm0, %v14064_v2 }
0x29a0   :  { %9960 = vmatprep.subr.bf16.mxu0 %v14064_v2 }
0x29a3   :  { %9961 = vmatpush3.bf16.msra.mxu0 %v12618_v62 }
0x29a4   :  { %9982 = vmatprep.subr.bf16.mxu0 %v14064_v2 }
0x29a6   :  { %9963 = vmatmul.mubr.msk.bf16.vlgmr.msra.gmra.mxu0 %vm399_vm1, %v12504_v34 }
0x29a7   :  { %9983 = vmatpush3.bf16.xpose.msra.mxu0 %v11347_v27  ;;  %9994 = vmatprep.mubr.msk.bf16.mxu0 %vm11108_vm0, %v14064_v2 }
0x29a8   :  { %9984 = vmatprep.subr.bf16.mxu0 %v14064_v2 }
0x29af   :  { %9985 = vmatpush3.bf16.xpose.msra.mxu0 %v11353_v29 }
0x29b0   :  { %9986 = vmatprep.subr.bf16.mxu0 %v14064_v2 }
0x29b7   :  { %9987 = vmatpush3.bf16.xpose.msra.mxu0 %v11359_v31 }
0x29b8   :  { %9988 = vmatprep.subr.bf16.mxu0 %v14064_v2 }
0x29bf   :  { %9989 = vmatpush3.bf16.xpose.msra.mxu0 %v11366_v33 }
0x29c0   :  { %9990 = vmatprep.subr.bf16.mxu0 %v14064_v2 }
0x29c7   :  { %9991 = vmatpush3.bf16.xpose.msra.mxu0 %v11392_v37 }
0x29c8   :  { %9992 = vmatprep.subr.bf16.mxu0 %v14064_v2 }
0x29cf   :  { %9993 = vmatpush3.bf16.xpose.msra.mxu0 %v11403_v40 }
0x29d0   :  { %10014 = vmatprep.subr.bf16.mxu0 %v14064_v2 }
0x29d6   :  { %9995 = vmatmul.mubr.msk.bf16.vlgmr.msra.gmra.mxu0 %vm399_vm1, %v12344_v52 }
0x29d7   :  { %10015 = vmatpush3.bf16.xpose.msra.mxu0 %v11422_v55  ;;  %10026 = vmatprep.mubr.msk.bf16.mxu0 %vm11108_vm0, %v14064_v2 }
0x29d8   :  { %10016 = vmatprep.subr.bf16.mxu0 %v14064_v2 }
0x29df   :  { %10017 = vmatpush3.bf16.xpose.msra.mxu0 %v11442_v0 }
0x29e0   :  { %10018 = vmatprep.subr.bf16.mxu0 %v14064_v2 }
0x29e7   :  { %10019 = vmatpush3.bf16.xpose.msra.mxu0 %v11454_v6 }
0x29e8   :  { %10020 = vmatprep.subr.bf16.mxu0 %v14064_v2 }
0x29ef   :  { %10021 = vmatpush3.bf16.xpose.msra.mxu0 %v11466_v10 }
0x29f0   :  { %10022 = vmatprep.subr.bf16.mxu0 %v14064_v2 }
0x29f7   :  { %10023 = vmatpush3.bf16.xpose.msra.mxu0 %v11478_v14 }
0x29f8   :  { %10024 = vmatprep.subr.bf16.mxu0 %v14064_v2 }
0x29ff   :  { %10025 = vmatpush3.bf16.xpose.msra.mxu0 %v11490_v19 }
0x2a00   :  { %10036 = vmatprep.subr.bf16.mxu0 %v14064_v2 }
0x2a06   :  { %10027 = vmatmul.mubr.msk.bf16.vlgmr.msra.gmra.mxu0 %vm399_vm1, %v12368_v12 }
0x2a07   :  { %10037 = vmatpush3.bf16.xpose.msra.mxu0 %v11571_v25  ;;  %10038 = vmatprep.mubr.msk.bf16.mxu0 %vm11108_vm0, %v14064_v2 }
0x2a08   :  { %10048 = vmatprep.subr.bf16.mxu0 %v14064_v2 }
0x2a5e   :  { %v4282_v52 = vpop.f32.mrf.mxu0 }
0x2a5f   :  { %4289 = vst.msk [vmem:[#allocation3 + $0x4] sm:$0x3] %vm1914_vm7, %v4282_v52 }
0x2a60   :  { %v9956_v34 = vpop.f32.mrf.mxu0 }
0x2a62   :  { %v4285_v44 = vpop.f32.mrf.mxu0 }
0x2a64   :  { %v9957_v24 = vpop.f32.mrf.mxu0 }
0x2a66   :  { %v4462_v28 = vpop.f32.mrf.mxu0 }
0x2a68   :  { %v9964_v58 = vpop.f32.mrf.mxu0 }
0x2a6a   :  { %v4465_v63 = vpop.f32.mrf.mxu0 }
0x2a6c   :  { %v9965_v56 = vpop.f32.mrf.mxu0 }
0x2a96   :  { %v4542_v12 = vpop.f32.mrf.mxu0 }
0x2a97   :  { %v4543_v9 = vadd.f32 %v12662_v20, %v4542_v12 }
0x2a98   :  { %v9996_v11 = vpop.f32.mrf.mxu0 }
0x2a99   :  { %4655 = vrot.lane.b32.xlu0 %v4543_v9, %s11110_s0  ;;  %v12683_v11 = vadd.f32 %v12555_v15, %v11520_v1  ;;  %v4463_v15 = vadd.f32 %v4462_v28, %v11534_v23 }
0x2a9a   :  { %v4545_v41 = vpop.f32.mrf.mxu0 }
0x2a9c   :  { %v9997_v7 = vpop.f32.mrf.mxu0 }
0x2a9d   :  { %4694 = vrot.lane.b32.xlu0 %v4583_v51, %s11111_s9 }
0x2ac6   :  { %v4622_v18 = vpop.f32.mrf.mxu0 }
0x2ac7   :  { %v4623_v52 = vadd.f32 %v12673_v13, %v4622_v18 }
0x2ac8   :  { %v10028_v34 = vpop.f32.mrf.mxu0 }
0x2ac9   :  { %4723 = vrot.lane.b32.xlu0 %v4623_v52, %s11112_s13 }
0x2aca   :  { %v4625_v44 = vpop.f32.mrf.mxu0 }
0x2acc   :  { %v10029_v24 = vpop.f32.mrf.mxu0 }
0x2acd   :  { %4672 = vrot.lane.b32.xlu0 %v4543_v9, %s11112_s13 }
0x2ad1   :  { %4733 = vrot.lane.b32.xlu0 %v4623_v52, %s11110_s0 }
0x2b0b   :  { %v4656_v58 = vpop.permute.xlu0 %4655 }
0x2b0c   :  { %v4658_v41 = vadd.f32 %v4656_v58, %v12683_v11 }
0x2b0e   :  { %v8975_v7 = vmul.f32 -1.442695, %v4658_v41 }
0x2b0f   :  { %v4695_v63 = vpop.permute.xlu0 %4694 }
0x2b10   :  { %v4697_v56 = vadd.f32 %v4695_v63, %v4424_v36 }
0x2b12   :  { %v8977_v12 = vmul.f32 -1.442695, %v4697_v56 }
0x2b14   :  { %10764 = vpow2.f32 %v8977_v12 }
0x2b15   :  { %10766 = vpow2.f32 %v8975_v7 }
0x2b21   :  { %v10765_v18 = vpop.eup %10764 }
0x2b22   :  { %v4701_v9 = vadd.f32 1.0, %v10765_v18  ;;  %v10767_v52 = vpop.eup %10766 }
0x2b23   :  { %v4662_v34 = vadd.f32 1.0, %v10767_v52 }
0x2b24   :  { %10768 = vrcp.f32 %v4701_v9 }
0x2b25   :  { %10770 = vrcp.f32 %v4662_v34 }
0x2b31   :  { %v10769_v44 = vpop.eup %10768 }
0x2b32   :  { %v4704_v3 = vmul.f32 %v10769_v44, %v4583_v51  ;;  %v10771_v12 = vpop.eup %10770 }
0x2b34   :  { %4706 = vrot.lane.b32.xlu1 %v4704_v3, %s11111_s9 }
0x2b38   :  { %4717 = vrot.lane.b32.xlu1 %v12331_v5, %s11111_s9 }
0x2b3b   :  { %v4724_v24 = vpop.permute.xlu0 %4723 }
0x2b3c   :  { %v4726_v63 = vadd.f32 %v4724_v24, %v4463_v15  ;;  %4749 = vrot.lane.b32.xlu1 %v12336_v39, %s11112_s13 }
0x2b3e   :  { %v8978_v56 = vmul.f32 -1.442695, %v4726_v63 }
0x2b3f   :  { %v4673_v41 = vpop.permute.xlu0 %4672 }
0x2b40   :  { %10772 = vpow2.f32 %v8978_v56  ;;  %v4675_v7 = vmul.f32 %v10771_v12, %v4673_v41 }
0x2b42   :  { %4677 = vrot.lane.b32.xlu0 %v4675_v7, %s11111_s9  ;;  %v4665_v7 = vadd.f32 %v4656_v58, %v4424_v36 }
0x2b43   :  { %v4734_v52 = vpop.permute.xlu0 %4733 }
0x2b4d   :  { %v10773_v51 = vpop.eup %10772 }
0x2b4e   :  { %v4730_v18 = vadd.f32 1.0, %v10773_v51 }
0x2b50   :  { %10774 = vrcp.f32 %v4730_v18 }
0x2b5d   :  { %v10775_v9 = vpop.eup %10774 }
0x2b5e   :  { %v4736_v5 = vmul.f32 %v10775_v9, %v4734_v52 }
0x2b60   :  { %4738 = vrot.lane.b32.xlu0 %v4736_v5, %s11111_s9 }
0x2b64   :  { %4688 = vrot.lane.b32.xlu0 %v12326_v53, %s11110_s0  ;;  %v8976_v53 = vmul.f32 -1.442695, %v4665_v7 }
0x2ba6   :  { %v4707_v28 = vpop.permute.xlu1 %4706 }
0x2ba7   :  { %v4709_v3 = vadd.f32 %v4707_v28, %v4463_v15 }
0x2bb4   :  { %v4678_v39 = vpop.permute.xlu0 %4677 }
0x2bb5   :  { %v4680_v34 = vadd.f32 %v4678_v39, %v4424_v36 }
0x2bb7   :  { %10776 = vtanh.f32 %v4680_v34 }
0x2bb8   :  { %10778 = vtanh.f32 %v4709_v3 }
0x2bc4   :  { %v10777_v24 = vpop.eup %10776 }
0x2bc5   :  { %4684 = vrot.lane.b32.xlu0 %v10777_v24, %s11110_s0  ;;  %v10779_v63 = vpop.eup %10778  ;;  %v4718_v24 = vpop.permute.xlu1 %4717 }
0x2bc9   :  { %4713 = vrot.lane.b32.xlu0 %v10779_v63, %s11110_s0  ;;  %v4750_v36 = vpop.permute.xlu1 %4749 }
0x2bd2   :  { %v4739_v56 = vpop.permute.xlu0 %4738 }
0x2bd3   :  { %v4741_v12 = vadd.f32 %v4739_v56, %v4463_v15  ;;  %v4711_v15 = vsub.f32 1.0, %v10769_v44 }
0x2bd5   :  { %10780 = vtanh.f32 %v4741_v12  ;;  %v4720_v12 = vmul.f32 %v10769_v44, %v4718_v24 }
0x2bd6   :  { %10782 = vpow2.f32 %v8976_v53  ;;  %v4689_v5 = vpop.permute.xlu0 %4688  ;;  %v4752_v53 = vmul.f32 %v10775_v9, %v4750_v36 }
0x2be2   :  { %v10781_v41 = vpop.eup %10780 }
0x2be3   :  { %4745 = vrot.lane.b32.xlu0 %v10781_v41, %s11110_s0  ;;  %v10783_v51 = vpop.eup %10782  ;;  %v4743_v41 = vsub.f32 1.0, %v10775_v9 }
0x2be4   :  { %v4669_v18 = vadd.f32 1.0, %v10783_v51 }
0x2be6   :  { %10784 = vrcp.f32 %v4669_v18 }
0x2bf3   :  { %v10785_v52 = vpop.eup %10784 }
0x2bf4   :  { %v4682_v28 = vsub.f32 1.0, %v10785_v52  ;;  %v4691_v34 = vmul.f32 %v10785_v52, %v4689_v5 }
0x2c37   :  { %v4685_v39 = vpop.permute.xlu0 %4684 }
0x2c38   :  { %v4687_v3 = vmul.f32 %v4685_v39, %v4682_v28  ;;  %v12727_v39 = vld [vmem:[%s11163_s3] ss:$0 sm:$0xff] }
0x2c3a   :  { %v12699_v63 = vadd.f32 %v4691_v34, %v4687_v3  ;;  %v4503_v34 = vadd.f32 %v12727_v39, %v12562_v61 }
0x2c3b   :  { %v4714_v56 = vpop.permute.xlu0 %4713 }
0x2c3c   :  { %v4716_v48 = vmul.f32 %v4714_v56, %v4711_v15  ;;  %4755 = vrot.lane.b32.xlu0 %v12699_v63, %s11112_s13 }
0x2c3e   :  { %v12703_v58 = vadd.f32 %v4720_v12, %v4716_v48 }
0x2c40   :  { %4759 = vrot.lane.b32.xlu1 %v12703_v58, %s11111_s9 }
0x2c55   :  { %v4746_v7 = vpop.permute.xlu0 %4745 }
0x2c56   :  { %v4748_v51 = vmul.f32 %v4746_v7, %v4743_v41 }
0x2c58   :  { %v12707_v18 = vadd.f32 %v4752_v53, %v4748_v51 }
0x2c5a   :  { %4763 = vrot.lane.b32.xlu0 %v12707_v18, %s11110_s0 }
0x2cae   :  { %v12711_v44 = vpop.permute.xlu0 %4755 }
0x2caf   :  { %v4766_v48 = vpack.c.bf16 %v12711_v44, %v12711_v44 }
0x2cb1   :  { %4770 = vrot.lane.b32.xlu1 %v4766_v48, %s11110_s0 }
0x2cb2   :  { %v12716_v52 = vpop.permute.xlu1 %4759 }
0x2cb3   :  { %v4767_v5 = vpack.c.bf16 %v12716_v52, %v12716_v52 }
0x2cb5   :  { %4816 = vrot.lane.b32.xlu0 %v4767_v5, %s11110_s0 }
0x2ccc   :  { %v12721_v9 = vpop.permute.xlu0 %4763 }
0x2ccd   :  { %v4768_v28 = vpack.c.bf16 %v12721_v9, %v12721_v9 }
0x2ccf   :  { %4862 = vrot.lane.b32.xlu1 %v4768_v28, %s11110_s0 }
0x2cd3   :  { %4636 = vrot.lane.b32.xlu1 %v4503_v34, %s11111_s9 }
0x2d23   :  { %v12732_v3 = vpop.permute.xlu1 %4770 }
0x2d24   :  { %10033 = vmatmul.mubr.msk.bf16.vlgmr.msra.gmra.mxu1 %vm399_vm1, %v12732_v3 }
0x2d25   :  { %10043 = vmatpush3.bf16.xpose.msra.mxu1 %v14115_v47  ;;  %10044 = vmatprep.mubr.msk.bf16.mxu1 %vm11108_vm0, %v14064_v2  ;;  %v12765_v47 = vld [vmem:[%s11173_s14] ss:$0 sm:$0xff] }
0x2d26   :  { %10056 = vmatprep.subr.bf16.mxu1 %v14064_v2 }
0x2d27   :  { %v12740_v24 = vpop.permute.xlu0 %4816 }
0x2d28   :  { %10039 = vmatmul.mubr.msk.bf16.vlgmr.msra.gmra.mxu0 %vm399_vm1, %v12740_v24 }
0x2d29   :  { %10049 = vmatpush3.bf16.msra.mxu0 %v12357_v4  ;;  %10052 = vmatprep.mubr.msk.bf16.mxu0 %vm11108_vm0, %v14064_v2 }
0x2d2a   :  { %10050 = vmatprep.subr.bf16.mxu0 %v14064_v2 }
0x2d2d   :  { %10051 = vmatpush3.bf16.msra.mxu0 %v12364_v42 }
0x2d2e   :  { %10064 = vmatprep.subr.bf16.mxu0 %v14064_v2 }
0x2d41   :  { %v12750_v61 = vpop.permute.xlu1 %4862 }
0x2d42   :  { %10045 = vmatmul.mubr.msk.bf16.vlgmr.msra.gmra.mxu1 %vm399_vm1, %v12750_v61 }
0x2d43   :  { %10057 = vmatpush3.bf16.msra.mxu1 %v12373_v21  ;;  %10060 = vmatprep.mubr.msk.bf16.mxu1 %vm11108_vm0, %v14064_v2  ;;  %v4628_v21 = vadd.f32 %v4503_v34, %v12683_v11 }
0x2d44   :  { %10058 = vmatprep.subr.bf16.mxu1 %v14064_v2 }
0x2d45   :  { %v8974_v53 = vmul.f32 -1.442695, %v4628_v21 }
0x2d47   :  { %10059 = vmatpush3.bf16.msra.mxu1 %v12380_v43  ;;  %10786 = vpow2.f32 %v8974_v53 }
0x2d48   :  { %10076 = vmatprep.subr.bf16.mxu1 %v14064_v2 }
0x2de4   :  { %v4809_v4 = vpop.f32.mrf.mxu1 }
0x2de5   :  { %v4907_v43 = vsel %vm1153_vm3, %v4809_v4, 0.0  ;;  %v4637_v4 = vpop.permute.xlu1 %4636 }
0x2de6   :  { %v10034_v42 = vpop.f32.mrf.mxu1 }
0x2de8   :  { %v4812_v15 = vpop.f32.mrf.mxu1  ;;  %v4855_v56 = vpop.f32.mrf.mxu0 }
0x2de9   :  { %v4908_v51 = vsel %vm1153_vm3, %v4855_v56, 0.0 }
0x2dea   :  { %v10035_v12 = vpop.f32.mrf.mxu1  ;;  %v10040_v36 = vpop.f32.mrf.mxu0  ;;  %v4909_v48 = vadd.f32 %v4908_v51, %v4907_v43 }
0x2dec   :  { %v4858_v41 = vpop.f32.mrf.mxu0 }
0x2ded   :  { %v10787_v41 = vpop.eup %10786 }
0x2dee   :  { %v10041_v7 = vpop.f32.mrf.mxu0  ;;  %v4632_v56 = vadd.f32 1.0, %v10787_v41 }
0x2df0   :  { %10788 = vrcp.f32 %v4632_v56 }
0x2dfd   :  { %v10789_v21 = vpop.eup %10788 }
0x2dfe   :  { %v4639_v53 = vmul.f32 %v10789_v21, %v4637_v4 }
0x2e02   :  { %v4901_v5 = vpop.f32.mrf.mxu1 }
0x2e03   :  { %v4910_v28 = vsel %vm1153_vm3, %v4901_v5, 0.0 }
0x2e04   :  { %v4911_v42 = vadd.f32 %v4910_v28, %v4909_v48  ;;  %v10046_v15 = vpop.f32.mrf.mxu1 }
0x2e06   :  { %v4912_v12 = vadd.f32 %v12765_v47, %v4911_v42  ;;  %v4904_v36 = vpop.f32.mrf.mxu1 }
0x2e08   :  { %8982 = vst.msk [vmem:[%s11296_s4 + $0x6] sm:$0x3] %vm1153_vm3, %v4912_v12  ;;  %v10047_v34 = vpop.f32.mrf.mxu1  ;;  %v4913_v7 = vsel %vm1153_vm3, %v4912_v12, -inf }
0x2e09   :  { %4914 = vmax.xlane.f32.xlu0 %v4913_v7 }
0x2e1f   :  { %4641 = vrot.lane.b32.xlu0 %v4639_v53, %s11111_s9 }
0x2e92   :  { %v4915_v51 = vpop.xlane.xlu0 %4914 }
0x2e93   :  { %v4916_v43 = vsub.f32 %v4912_v12, %v4915_v51 }
0x2e95   :  { %v4917_v48 = vmul.f32 1.442695, %v4916_v43  ;;  %v4652_v43 = vmul.f32 %v10789_v21, %v12402_v54 }
0x2e96   :  { %v4642_v42 = vpop.permute.xlu0 %4641 }
0x2e97   :  { %10790 = vpow2.f32 %v4917_v48  ;;  %v4644_v36 = vadd.f32 %v4642_v42, %v12683_v11  ;;  %v4646_v11 = vsub.f32 1.0, %v10789_v21 }
0x2ea4   :  { %v10791_v5 = vpop.eup %10790 }
0x2ea5   :  { %v4919_v28 = vsel %vm1153_vm3, %v10791_v5, 0.0 }
0x2ea6   :  { %4920 = vadd.xlane.f32.xlu1 %v4919_v28 }
0x2f2f   :  { %v4921_v15 = vpop.xlane.xlu1 %4920 }
0x2f30   :  { %10792 = vrcp.f32 %v4921_v15 }
0x2f31   :  { %10794 = vtanh.f32 %v4644_v36 }
0x2f3d   :  { %v10793_v41 = vpop.eup %10792 }
0x2f3e   :  { %v4923_v34 = vmul.f32 %v10793_v41, %v10791_v5  ;;  %v10795_v7 = vpop.eup %10794 }
0x2f40   :  { %4941 = vperm.xlu0 %10533, %v4923_v34   ;;  %4931 = vperm.xlu1 %10532, %v4923_v34  }
0x2f44   :  { %10534 = vset.pattern.permute.xlu0 %v14067_v46  ;;  %4648 = vrot.lane.b32.xlu1 %v10795_v7, %s11110_s0  ;;  %v12794_v7 = vld [vmem:[%s11193_s6 + $0x18] sm:$0xff]  }
0x2f45   :  { %4926 = vperm.xlu0 %10534, %v4923_v34   ;;  %10535 = vset.pattern.permute.xlu1 %v14067_v46 }
0x2fbb   :  { %v4932_v12 = vpop.permute.xlu1 %4931  ;;  %v4942_v4 = vpop.permute.xlu0 %4941 }
0x2fbc   :  { %v4934_v56 = vmul.f32 %v4932_v12, %v12703_v58  ;;  %v4944_v51 = vmul.f32 %v4942_v4, %v12707_v18  ;;  %v12812_v12 = vld [vmem:[%s11193_s6 + $0x8] sm:$0xff]  }
0x2fbd   :  { %14151 = vst [vmem:[#allocation64_spill] sm:$0xff] %v12812_v12 }
0x2fbe   :  { %4936 = vrot.lane.b32.xlu1 %v4934_v56, %s11112_s13 }
0x2fbf   :  { %v4649_v53 = vpop.permute.xlu1 %4648 }
0x2fc0   :  { %v4651_v48 = vmul.f32 %v4649_v53, %v4646_v11  ;;  %v4927_v58 = vpop.permute.xlu0 %4926 }
0x2fc1   :  { %v4929_v15 = vmul.f32 %v4927_v58, %v12699_v63  ;;  %v12805_v63 = vld [vmem:[%s11193_s6 + $0x10] sm:$0xff]  }
0x2fc2   :  { %v12781_v5 = vadd.f32 %v4652_v43, %v4651_v48  ;;  %4946 = vrot.lane.b32.xlu1 %v4944_v51, %s11111_s9 }
0x2fc4   :  { %14150 = vst [vmem:[#allocation45_spill] sm:$0xff] %v12781_v5  ;;  %v4952_v28 = vpack.c.bf16 %v12781_v5, %v12781_v5 }
0x2fc6   :  { %4998 = vrot.lane.b32.xlu0 %v4952_v28, %s11110_s0 }
0x3030   :  { %v4937_v42 = vpop.permute.xlu1 %4936 }
0x3031   :  { %v4939_v36 = vadd.f32 %v4937_v42, %v4929_v15 }
0x3034   :  { %v4947_v18 = vpop.permute.xlu1 %4946 }
0x3035   :  { %v4949_v41 = vadd.f32 %v4947_v18, %v4939_v36 }
0x3037   :  { %v4953_v21 = vpack.c.bf16 %v4949_v41, %v4949_v41 }
0x3038   :  { %v12788_v34 = vpop.permute.xlu0 %4998 }
0x3039   :  { %10053 = vmatmul.mubr.msk.bf16.vlgmr.msra.gmra.mxu0 %vm399_vm1, %v4953_v21  ;;  %10061 = vmatmul.mubr.msk.bf16.vlgmr.msra.gmra.mxu1 %vm399_vm1, %v12788_v34 }
0x303a   :  { %10065 = vmatpush3.bf16.msra.mxu0 %v12794_v7  ;;  %10072 = vmatprep.mubr.msk.bf16.mxu0 %vm11108_vm0, %v14064_v2 }
0x303b   :  { %10066 = vmatprep.subr.bf16.mxu0 %v14064_v2  ;;  %10077 = vmatpush3.bf16.msra.mxu1 %v12419_v49  ;;  %v12817_v49 = vld [vmem:[%s11193_s6] sm:$0xff]  }
0x303c   :  { %10078 = vmatprep.subr.bf16.mxu1 %v14064_v2  ;;  %10080 = vmatprep.mubr.msk.bf16.mxu1 %vm11108_vm0, %v14064_v2  ;;  %14152 = vst [vmem:[#allocation65_spill] sm:$0xff] %v12817_v49 }
0x303e   :  { %10067 = vmatpush3.bf16.msra.mxu0 %v12805_v63 }
0x303f   :  { %10068 = vmatprep.subr.bf16.mxu0 %v14064_v2  ;;  %10079 = vmatpush3.bf16.msra.mxu1 %v12428_v38 }
0x3040   :  { %10084 = vmatprep.subr.bf16.mxu1 %v14064_v2 }
0x3042   :  { %10069 = vmatpush3.bf16.msra.mxu0 %v12812_v12 }
0x3043   :  { %10070 = vmatprep.subr.bf16.mxu0 %v14064_v2 }
0x3046   :  { %10071 = vmatpush3.bf16.msra.mxu0 %v12817_v49 }
0x3047   :  { %10092 = vmatprep.subr.bf16.mxu0 %v14064_v2 }
0x30f9   :  { %v4991_v56 = vpop.f32.mrf.mxu0  ;;  %v5037_v4 = vpop.f32.mrf.mxu1 }
0x30fa   :  { %v5038_v11 = vadd.f32 %v5037_v4, %v4991_v56 }
0x30fb   :  { %v10054_v53 = vpop.f32.mrf.mxu0  ;;  %v10062_v51 = vpop.f32.mrf.mxu1 }
0x30fc   :  { %v5043_v38 = vadd.f32 %v12437_v30, %v5038_v11 }
0x30fd   :  { %v4994_v43 = vpop.f32.mrf.mxu0  ;;  %v5040_v48 = vpop.f32.mrf.mxu1 }
0x30fe   :  { %vm5044_vm10 = vcmp.ge.f32.partialorder %v5043_v38, 0.0  ;;  %v5045_v28 = vmul.f32 0.1, %v5043_v38 }
0x30ff   :  { %v10055_v58 = vpop.f32.mrf.mxu0  ;;  %v10063_v42 = vpop.f32.mrf.mxu1 }
0x3100   :  { %v5046_v15 = vsel %vm5044_vm10, %v5043_v38, %v5045_v28  ;;  %v14154_v58 = vld [vmem:[#allocation47_spill] sm:$0xff]  ;;  %vm8634_vm10 = vcmask 257024  }
0x3101   :  { %v5047_v36 = vpack.c.bf16 %v5046_v15, %v5046_v15 }
0x3103   :  { %10073 = vmatmul.mubr.msk.bf16.vlgmr.msra.gmra.mxu0 %vm304_vm2, %v5047_v36 }
0x3104   :  { %10093 = vmatpush3.bf16.msra.mxu0 %v12442_v60  ;;  %10096 = vmatprep.mubr.msk.bf16.mxu0 %vm11108_vm0, %v14064_v2 }
0x3105   :  { %10094 = vmatprep.subr.bf16.mxu0 %v14064_v2 }
0x3108   :  { %10095 = vmatpush3.bf16.msra.mxu0 %v12449_v59 }
0x3109   :  { %10108 = vmatprep.subr.bf16.mxu0 %v14064_v2 }
0x31c3   :  { %v5085_v30 = vpop.f32.mrf.mxu0 }
0x31c4   :  { %v5086_v18 = vadd.f32 %v12454_v16, %v5085_v30 }
0x31c5   :  { %v10074_v41 = vpop.f32.mrf.mxu0 }
0x31c6   :  { %v5091_v21 = vpack.c.bf16 %v5086_v18, %v5086_v18  ;;  %v14156_v41 = vld [vmem:[#allocation51_spill] sm:$0xff] }
0x31c7   :  { %v5088_v56 = vpop.f32.mrf.mxu0 }
0x31c8   :  { %10081 = vmatmul.mubr.msk.bf16.vlgmr.msra.gmra.mxu1 %vm399_vm1, %v5091_v21  ;;  %v14157_v56 = vld [vmem:[#allocation53_spill] sm:$0xff] }
0x31c9   :  { %v10075_v4 = vpop.f32.mrf.mxu0  ;;  %10085 = vmatpush3.bf16.msra.mxu1 %v12459_v8  ;;  %10088 = vmatprep.mubr.msk.bf16.mxu1 %vm11108_vm0, %v14064_v2  ;;  %v14153_v8 = vld [vmem:[#allocation40_spill] sm:$0xff] }
0x31ca   :  { %10086 = vmatprep.subr.bf16.mxu1 %v14064_v2  ;;  %v14158_v4 = vld [vmem:[#allocation54_spill] sm:$0xff] }
0x31cd   :  { %10087 = vmatpush3.bf16.msra.mxu1 %v12466_v32  ;;  %v14155_v32 = vld [vmem:[#allocation48_spill] sm:$0xff] }
0x31ce   :  { %10100 = vmatprep.subr.bf16.mxu1 %v14064_v2 }
0x3288   :  { %v5129_v60 = vpop.f32.mrf.mxu1 }
0x3289   :  { %v5142_v59 = vrot.slane %v5129_v60, %v14119_v45  ;;  %v14159_v60 = vld [vmem:[#allocation55_spill] sm:$0xff] }
0x328a   :  { %v10082_v16 = vpop.f32.mrf.mxu1 }
0x328b   :  { %v5143_v11 = vcombine.high %v5142_v59, %v5142_v59  ;;  %v5150_v53 = vrot.slane %v5142_v59, %v14119_v45  ;;  %v8991_v59 = vld [vmem:[%s11128_s5 + $0x8] sm:$0x3] }
0x328c   :  { %v5132_v51 = vpop.f32.mrf.mxu1  ;;  %v14160_v16 = vld [vmem:[#allocation56_spill] sm:$0xff] }
0x328d   :  { %v5157_v38 = vrot.slane %v5143_v11, %v14119_v45  ;;  %v5161_v43 = vrot.slane %v5150_v53, %v14153_v8  ;;  %v12856_v11 = vpack.c.bf16 %v8991_v59, %v8991_v59  ;;  %v14161_v53 = vld [vmem:[#allocation57_spill] sm:$0xff]  ;;  %v14162_v51 = vld [vmem:[#allocation27_spill] sm:$0xff] }
0x328e   :  { %v10083_v48 = vpop.f32.mrf.mxu1 }
0x328f   :  { %v5165_v28 = vrot.slane %v5157_v38, %v14153_v8  ;;  %v5168_v42 = vadd.f32 %v5161_v43, %v14154_v58  ;;  %v14164_v38 = vld [vmem:[#allocation29_spill] sm:$0xff]  ;;  %v14165_v43 = vld [vmem:[#allocation30_spill] sm:$0xff]  ;;  %v14166_v48 = vld [vmem:[#allocation31_spill] sm:$0xff]  ;;  %v14179_v58 = vmov 2  }
0x3291   :  { %v5169_v15 = vadd.f32 %v5165_v28, %v14155_v32  ;;  %10796 = vtanh.f32 %v5168_v42  ;;  %v14167_v28 = vld [vmem:[#allocation32_spill] sm:$0xff]  ;;  %v14168_v42 = vld [vmem:[#allocation33_spill] sm:$0xff] }
0x3293   :  { %10798 = vtanh.f32 %v5169_v15  ;;  %v14169_v15 = vld [vmem:[#allocation34_spill] sm:$0xff] }
0x329e   :  { %v10797_v36 = vpop.eup %10796 }
0x32a0   :  { %v10799_v30 = vpop.eup %10798 }
0x32a1   :  { %v5172_v18 = vpack.c.bf16 %v10799_v30, %v10797_v36  ;;  %v14170_v36 = vld [vmem:[#allocation35_spill] sm:$0xff]  ;;  %v14171_v30 = vld [vmem:[#allocation36_spill] sm:$0xff] }
0x32a3   :  { %10089 = vmatmul.mubr.msk.bf16.vlgmr.msra.gmra.mxu1 %vm399_vm1, %v5172_v18  ;;  %v14173_v18 = vld [vmem:[#allocation38_spill] sm:$0xff] }
0x32a4   :  { %10101 = vmatpush3.bf16.msra.mxu1 %v14156_v41  ;;  %10104 = vmatprep.mubr.msk.bf16.mxu1 %vm11108_vm0, %v14064_v2  ;;  %v14174_v41 = vld [vmem:[#allocation42_spill] sm:$0xff] }
0x32a5   :  { %10102 = vmatprep.subr.bf16.mxu1 %v14064_v2 }
0x32a8   :  { %10103 = vmatpush3.bf16.msra.mxu1 %v14157_v56 }
0x32a9   :  { %5571 = vmatprep.subr.bf16.mxu1 %v14158_v4 }
0x32ab   :  { %10105 = vmatmul.mubr.msk.bf16.vlgmr.msra.gmra.mxu1 %vm399_vm1, %v5091_v21  ;;  %v14163_v21 = vld [vmem:[#allocation28_spill] sm:$0xff] }
0x32ac   :  { %5572 = vmatpush1.bf16.msra.mxu1 %v14159_v60  ;;  %5591 = vmatprep.mubr.bf16.mxu1 %v14067_v46 }
0x32ad   :  { %5573 = vmatprep.subr.bf16.mxu1 %v14160_v16 }
0x32b0   :  { %5574 = vmatpush1.bf16.msra.mxu1 %v14161_v53 }
0x32b1   :  { %10124 = vmatprep.subr.bf16.mxu1 %v14064_v2 }
0x32b3   :  { %8992 = vmatmul.mubr.msk.bf16.vlgmr.msra.gmra.mxu1 %vm399_vm1, %v12856_v11 }
0x32b4   :  { %10125 = vmatpush3.bf16.xpose.msra.mxu1 %v14162_v51  ;;  %10136 = vmatprep.mubr.msk.bf16.mxu1 %vm11108_vm0, %v14064_v2 }
0x32b5   :  { %10126 = vmatprep.subr.bf16.mxu1 %v14064_v2 }
0x32bc   :  { %10127 = vmatpush3.bf16.xpose.msra.mxu1 %v14163_v21 }
0x32bd   :  { %10128 = vmatprep.subr.bf16.mxu1 %v14064_v2 }
0x32c4   :  { %10129 = vmatpush3.bf16.xpose.msra.mxu1 %v14164_v38  ;;  %v14176_v38 = vld [vmem:[#allocation60_spill] sm:$0xff] }
0x32c5   :  { %10130 = vmatprep.subr.bf16.mxu1 %v14064_v2 }
0x32cc   :  { %10131 = vmatpush3.bf16.xpose.msra.mxu1 %v14165_v43 }
0x32cd   :  { %10132 = vmatprep.subr.bf16.mxu1 %v14064_v2 }
0x32d4   :  { %10133 = vmatpush3.bf16.xpose.msra.mxu1 %v14166_v48 }
0x32d5   :  { %10134 = vmatprep.subr.bf16.mxu1 %v14064_v2 }
0x32dc   :  { %10135 = vmatpush3.bf16.xpose.msra.mxu1 %v14167_v28 }
0x32dd   :  { %10156 = vmatprep.subr.bf16.mxu1 %v14064_v2 }
0x32e3   :  { %10137 = vmatmul.mubr.msk.bf16.vlgmr.msra.gmra.mxu1 %vm399_vm1, %v12788_v34  ;;  %v14172_v34 = vld [vmem:[#allocation37_spill] sm:$0xff] }
0x32e4   :  { %10157 = vmatpush3.bf16.xpose.msra.mxu1 %v14168_v42  ;;  %10168 = vmatprep.mubr.msk.bf16.mxu1 %vm11108_vm0, %v14064_v2 }
0x32e5   :  { %10158 = vmatprep.subr.bf16.mxu1 %v14064_v2 }
0x32ec   :  { %10159 = vmatpush3.bf16.xpose.msra.mxu1 %v14169_v15 }
0x32ed   :  { %10160 = vmatprep.subr.bf16.mxu1 %v14064_v2 }
0x32f4   :  { %10161 = vmatpush3.bf16.xpose.msra.mxu1 %v14170_v36 }
0x32f5   :  { %10162 = vmatprep.subr.bf16.mxu1 %v14064_v2 }
0x32fc   :  { %10163 = vmatpush3.bf16.xpose.msra.mxu1 %v14171_v30 }
0x32fd   :  { %10164 = vmatprep.subr.bf16.mxu1 %v14064_v2 }
0x3304   :  { %10165 = vmatpush3.bf16.xpose.msra.mxu1 %v14172_v34 }
0x3305   :  { %10166 = vmatprep.subr.bf16.mxu1 %v14064_v2 }
0x330c   :  { %10167 = vmatpush3.bf16.xpose.msra.mxu1 %v14173_v18 }
0x330d   :  { %10188 = vmatprep.subr.bf16.mxu1 %v14064_v2 }
0x3313   :  { %10169 = vmatmul.mubr.msk.bf16.vlgmr.msra.gmra.mxu1 %vm399_vm1, %v12740_v24  ;;  %v14175_v24 = vld [vmem:[#allocation46_spill] sm:$0xff] }
0x3314   :  { %10189 = vmatpush3.bf16.xpose.msra.mxu1 %v14174_v41  ;;  %10190 = vmatprep.mubr.msk.bf16.mxu1 %vm11108_vm0, %v14064_v2 }
0x3315   :  { %10200 = vmatprep.subr.bf16.mxu1 %v14064_v2 }
0x3363   :  { %v5210_v56 = vpop.f32.mrf.mxu1 }
0x3364   :  { %10800 = vtanh.f32 %v5210_v56 }
0x3365   :  { %v10090_v4 = vpop.f32.mrf.mxu1 }
0x3367   :  { %v5213_v60 = vpop.f32.mrf.mxu1 }
0x3368   :  { %10802 = vtanh.f32 %v5213_v60 }
0x3369   :  { %v10091_v59 = vpop.f32.mrf.mxu1 }
0x336b   :  { %v12898_v16 = vpop.f32.mrf.mxu1 }
0x336d   :  { %v10106_v53 = vpop.f32.mrf.mxu1 }
0x336f   :  { %v5411_v54 = vpop.f32.mrf.mxu1 }
0x3371   :  { %v10801_v18 = vpop.eup %10800  ;;  %v10107_v34 = vpop.f32.mrf.mxu1 }
0x3372   :  { %v5219_v30 = vmul.f32 %v14175_v24, %v10801_v18 }
0x3373   :  { %v12901_v41 = vpop.f32.mrf.mxu1 }
0x3374   :  { %v5221_v36 = vsel %vm399_vm1, %v5219_v30, 0.0 }
0x3375   :  { %v10803_v15 = vpop.eup %10802  ;;  %5222 = vadd.xlane.f32.xlu1 %v5221_v36  ;;  %v12904_v42 = vpop.f32.mrf.mxu1 }
0x3376   :  { %v5220_v56 = vmul.f32 %v14175_v24, %v10803_v15  ;;  %v14177_v24 = vld [vmem:[#allocation59_spill] sm:$0xff] }
0x3377   :  { %v5597_v4 = vpop.f32.mrf.mxu1 }
0x3378   :  { %v5224_v60 = vsel %vm399_vm1, %v5220_v56, 0.0 }
0x3379   :  { %5225 = vadd.xlane.f32.xlu0 %v5224_v60  ;;  %v5598_v59 = vpop.f32.mrf.mxu1 }
0x33a3   :  { %v12908_v54 = vpop.f32.mrf.mxu1 }
0x33a5   :  { %v10138_v34 = vpop.f32.mrf.mxu1 }
0x33a7   :  { %v5677_v53 = vpop.f32.mrf.mxu1 }
0x33a8   :  { %v14178_v53 = vld [vmem:[#allocation41_spill] sm:$0xff] }
0x33a9   :  { %v10139_v18 = vpop.f32.mrf.mxu1 }
0x33d3   :  { %v12910_v28 = vpop.f32.mrf.mxu1 }
0x33d5   :  { %v10170_v48 = vpop.f32.mrf.mxu1 }
0x33d7   :  { %v5757_v30 = vpop.f32.mrf.mxu1 }
0x33d9   :  { %v10171_v43 = vpop.f32.mrf.mxu1 }
0x33fe   :  { %v5223_v36 = vpop.xlane.xlu1 %5222 }
0x33ff   :  { %v5227_v21 = vadd.f32 %v5223_v36, %v14176_v38 }
0x3401   :  { %v5234_v56 = vrot.slane %v5227_v21, %v14177_v24 }
0x3402   :  { %v5226_v51 = vpop.xlane.xlu0 %5225 }
0x3403   :  { %v5228_v15 = vadd.f32 %v5226_v51, %v14176_v38 }
0x3405   :  { %v5238_v4 = vrot.slane %v5228_v15, %v14177_v24 }
0x3407   :  { %v5239_v60 = vsel %vm1649_vm5, %v5238_v4, %v5234_v56 }
0x3408   :  { %v5241_v59 = vsel %vm1652_vm6, %v5239_v60, -inf }
0x3409   :  { %5242 = vmax.xlane.f32.xlu0 %v5241_v59 }
0x3492   :  { %v5243_v34 = vpop.xlane.xlu0 %5242 }
0x3493   :  { %v5248_v48 = vrot.slane %v5243_v34, %v14153_v8  ;;  %v5252_v43 = vrot.slane %v5243_v34, %v14178_v53 }
0x3495   :  { %v5255_v18 = vsub.f32 %v5227_v21, %v5248_v48  ;;  %v5256_v30 = vsub.f32 %v5228_v15, %v5252_v43 }
0x3497   :  { %v5257_v36 = vmul.f32 1.442695, %v5255_v18  ;;  %v5259_v32 = vmul.f32 1.442695, %v5256_v30 }
0x3499   :  { %10804 = vpow2.f32 %v5257_v36 }
0x349a   :  { %10806 = vpow2.f32 %v5259_v32 }
0x34a6   :  { %v10805_v51 = vpop.eup %10804 }
0x34a7   :  { %v10807_v38 = vpop.eup %10806  ;;  %5264 = vperm.xlu0 %10534, %v10805_v51  }
0x34a8   :  { %5267 = vperm.xlu1 %10535, %v10807_v38  }
0x34ac   :  { %10537 = vset.pattern.permute.xlu1 %v14179_v58  ;;  %v12934_v58 = vld [vmem:[%s11246_s27 + $0x8] sm:$0xff] }
0x3522   :  { %v5265_v56 = vpop.permute.xlu0 %5264 }
0x3523   :  { %v5268_v4 = vpop.permute.xlu1 %5267  ;;  %v5272_v60 = vrot.slane %v5265_v56, %v14177_v24  ;;  %v14180_v56 = vmov 1  }
0x3524   :  { %v5276_v59 = vrot.slane %v5268_v4, %v14177_v24 }
0x3526   :  { %v5277_v34 = vsel %vm1649_vm5, %v5276_v59, %v5272_v60  ;;  %v12929_v60 = vld [vmem:[%s11246_s27] sm:$0xff] }
0x3527   :  { %v5279_v21 = vsel %vm1652_vm6, %v5277_v34, 0.0  ;;  %14181 = vst [vmem:[#allocation51_spill] sm:$0xff] %v12929_v60 }
0x3528   :  { %5280 = vadd.xlane.f32.xlu1 %v5279_v21 }
0x35b1   :  { %v5281_v15 = vpop.xlane.xlu1 %5280 }
0x35b2   :  { %v5286_v32 = vrot.slane %v5281_v15, %v14153_v8  ;;  %v5290_v48 = vrot.slane %v5281_v15, %v14178_v53 }
0x35b4   :  { %10808 = vrcp.f32 %v5286_v32 }
0x35b5   :  { %10810 = vrcp.f32 %v5290_v48 }
0x35c1   :  { %v10809_v43 = vpop.eup %10808 }
0x35c2   :  { %v5294_v18 = vmul.f32 %v10809_v43, %v10805_v51  ;;  %v10811_v30 = vpop.eup %10810 }
0x35c3   :  { %v5296_v36 = vmul.f32 %v10811_v30, %v10807_v38 }
0x35c4   :  { %5299 = vperm.xlu0 %10534, %v5294_v18  }
0x35c8   :  { %5304 = vperm.xlu0 %10534, %v5296_v36  }
0x35cc   :  { %10536 = vset.pattern.permute.xlu0 %v14180_v56 }
0x363f   :  { %v5300_v4 = vpop.permute.xlu0 %5299 }
0x3640   :  { %v5307_v59 = vmul.f32 %v12929_v60, %v5300_v4 }
0x3642   :  { %v5309_v34 = vsel %vm399_vm1, %v5307_v59, 0.0 }
0x3643   :  { %v5310_v21 = vrot.slane %v5309_v34, 4  ;;  %v5305_v15 = vpop.permute.xlu0 %5304 }
0x3644   :  { %v5308_v32 = vmul.f32 %v12934_v58, %v5305_v15 }
0x3645   :  { %v5311_v51 = vadd.f32 %v5310_v21, %v5309_v34 }
0x3646   :  { %v5316_v48 = vsel %vm399_vm1, %v5308_v32, 0.0 }
0x3647   :  { %v5312_v38 = vrot.slane %v5311_v51, 2  ;;  %v5317_v43 = vrot.slane %v5316_v48, 4 }
0x3649   :  { %v5313_v18 = vadd.f32 %v5312_v38, %v5311_v51  ;;  %v5318_v30 = vadd.f32 %v5317_v43, %v5316_v48  ;;  %v5755_v51 = vadd.f32 %v12667_v35, %v12910_v28 }
0x364b   :  { %v5314_v36 = vrot.slane %v5313_v18, 1  ;;  %v5319_v56 = vrot.slane %v5318_v30, 2 }
0x364d   :  { %v5315_v53 = vadd.f32 %v5314_v36, %v5313_v18  ;;  %v5320_v24 = vadd.f32 %v5319_v56, %v5318_v30 }
0x364f   :  { %v5321_v4 = vrot.slane %v5320_v24, 1  ;;  %v5323_v60 = vpack.c.bf16 %v5315_v53, %v5315_v53 }
0x3651   :  { %v5322_v59 = vadd.f32 %v5321_v4, %v5320_v24  ;;  %v5327_v45 = vunpack.c.l.b16 %v5323_v60  ;;  %v5596_v4 = vadd.f32 %v12904_v42, %v11532_v22 }
0x3653   :  { %v5324_v8 = vpack.c.bf16 %v5322_v59, %v5322_v59 }
0x3655   :  { %v5328_v49 = vunpack.c.l.b16 %v5324_v8 }
0x3657   :  { %v5329_v12 = vsel %vm1649_vm5, %v5328_v49, %v5327_v45 }
0x3658   :  { %v5330_v15 = vpack.c.b16 %v5329_v12, %v5329_v12 }
0x365a   :  { %10097 = vmatmul.mubr.msk.bf16.vlgmr.msra.gmra.mxu0 %vm399_vm1, %v5330_v15  ;;  %v13011_v15 = vadd.f32 %v12901_v41, %v11520_v1 }
0x365b   :  { %10109 = vmatpush3.bf16.msra.mxu0 %v12589_v50  ;;  %10112 = vmatprep.mubr.msk.bf16.mxu0 %vm11108_vm0, %v14064_v2 }
0x365c   :  { %10110 = vmatprep.subr.bf16.mxu0 %v14064_v2 }
0x365f   :  { %10111 = vmatpush3.bf16.msra.mxu0 %v12596_v26 }
0x3660   :  { %10116 = vmatprep.subr.bf16.mxu0 %v14064_v2 }
0x371a   :  { %v5368_v24 = vpop.f32.mrf.mxu0 }
0x371b   :  { %v5409_v53 = vadd.f32 %v12898_v16, %v5368_v24 }
0x371c   :  { %v10098_v8 = vpop.f32.mrf.mxu0 }
0x371d   :  { %v5414_v45 = vadd.f32 %v12602_v57, %v5409_v53 }
0x371e   :  { %v5371_v12 = vpop.f32.mrf.mxu0 }
0x371f   :  { %10812 = vtanh.f32 %v5414_v45 }
0x3720   :  { %v10099_v49 = vpop.f32.mrf.mxu0 }
0x372c   :  { %v12948_v56 = vpop.eup %10812 }
0x372d   :  { %14182 = vst [vmem:[#allocation53_spill] sm:$0xff] %v12948_v56  ;;  %v5416_v50 = vpack.c.bf16 %v12948_v56, %v12948_v56  ;;  %v14206_v56 = vld [vmem:[#allocation60_spill] sm:$0xff] }
0x372f   :  { %10113 = vmatmul.mubr.msk.bf16.vlgmr.msra.gmra.mxu0 %vm399_vm1, %v5416_v50 }
0x3730   :  { %10117 = vmatpush3.bf16.msra.mxu0 %v12611_v17  ;;  %10120 = vmatprep.mubr.msk.bf16.mxu0 %vm11108_vm0, %v14064_v2 }
0x3731   :  { %10118 = vmatprep.subr.bf16.mxu0 %v14064_v2 }
0x3734   :  { %10119 = vmatpush3.bf16.msra.mxu0 %v12618_v62 }
0x3735   :  { %10140 = vmatprep.subr.bf16.mxu0 %v14064_v2 }
0x3737   :  { %10121 = vmatmul.mubr.msk.bf16.vlgmr.msra.gmra.mxu0 %vm399_vm1, %v12856_v11 }
0x3738   :  { %10141 = vmatpush3.bf16.xpose.msra.mxu0 %v11347_v27  ;;  %10152 = vmatprep.mubr.msk.bf16.mxu0 %vm11108_vm0, %v14064_v2 }
0x3739   :  { %10142 = vmatprep.subr.bf16.mxu0 %v14064_v2 }
0x3740   :  { %10143 = vmatpush3.bf16.xpose.msra.mxu0 %v11353_v29 }
0x3741   :  { %10144 = vmatprep.subr.bf16.mxu0 %v14064_v2 }
0x3748   :  { %10145 = vmatpush3.bf16.xpose.msra.mxu0 %v11359_v31 }
0x3749   :  { %10146 = vmatprep.subr.bf16.mxu0 %v14064_v2 }
0x3750   :  { %10147 = vmatpush3.bf16.xpose.msra.mxu0 %v11366_v33 }
0x3751   :  { %10148 = vmatprep.subr.bf16.mxu0 %v14064_v2 }
0x3758   :  { %10149 = vmatpush3.bf16.xpose.msra.mxu0 %v11392_v37 }
0x3759   :  { %10150 = vmatprep.subr.bf16.mxu0 %v14064_v2 }
0x3760   :  { %10151 = vmatpush3.bf16.xpose.msra.mxu0 %v11403_v40 }
0x3761   :  { %10172 = vmatprep.subr.bf16.mxu0 %v14064_v2 }
0x3767   :  { %10153 = vmatmul.mubr.msk.bf16.vlgmr.msra.gmra.mxu0 %vm399_vm1, %v12732_v3 }
0x3768   :  { %10173 = vmatpush3.bf16.xpose.msra.mxu0 %v11422_v55  ;;  %10184 = vmatprep.mubr.msk.bf16.mxu0 %vm11108_vm0, %v14064_v2 }
0x3769   :  { %10174 = vmatprep.subr.bf16.mxu0 %v14064_v2 }
0x3770   :  { %10175 = vmatpush3.bf16.xpose.msra.mxu0 %v11442_v0 }
0x3771   :  { %10176 = vmatprep.subr.bf16.mxu0 %v14064_v2 }
0x3778   :  { %10177 = vmatpush3.bf16.xpose.msra.mxu0 %v11454_v6 }
0x3779   :  { %10178 = vmatprep.subr.bf16.mxu0 %v14064_v2 }
0x3780   :  { %10179 = vmatpush3.bf16.xpose.msra.mxu0 %v11466_v10 }
0x3781   :  { %10180 = vmatprep.subr.bf16.mxu0 %v14064_v2 }
0x3788   :  { %10181 = vmatpush3.bf16.xpose.msra.mxu0 %v11478_v14 }
0x3789   :  { %10182 = vmatprep.subr.bf16.mxu0 %v14064_v2 }
0x3790   :  { %10183 = vmatpush3.bf16.xpose.msra.mxu0 %v11490_v19 }
0x3791   :  { %10194 = vmatprep.subr.bf16.mxu0 %v14064_v2 }
0x3797   :  { %10185 = vmatmul.mubr.msk.bf16.vlgmr.msra.gmra.mxu0 %vm399_vm1, %v12750_v61 }
0x3798   :  { %10195 = vmatpush3.bf16.xpose.msra.mxu0 %v11571_v25  ;;  %10196 = vmatprep.mubr.msk.bf16.mxu0 %vm11108_vm0, %v14064_v2 }
0x3799   :  { %10206 = vmatprep.subr.bf16.mxu0 %v14064_v2 }
0x37ef   :  { %v5454_v26 = vpop.f32.mrf.mxu0 }
0x37f0   :  { %5461 = vst.msk [vmem:[#allocation3 + $0x6] sm:$0x3] %vm1914_vm7, %v5454_v26 }
0x37f1   :  { %v10114_v57 = vpop.f32.mrf.mxu0 }
0x37f3   :  { %v5457_v17 = vpop.f32.mrf.mxu0 }
0x37f5   :  { %v10115_v62 = vpop.f32.mrf.mxu0 }
0x37f7   :  { %v5634_v3 = vpop.f32.mrf.mxu0 }
0x37f8   :  { %v5635_v50 = vadd.f32 %v5634_v3, %v11534_v23 }
0x37f9   :  { %v10122_v11 = vpop.f32.mrf.mxu0 }
0x37fb   :  { %v5637_v16 = vpop.f32.mrf.mxu0 }
0x37fd   :  { %v10123_v60 = vpop.f32.mrf.mxu0 }
0x3827   :  { %v5714_v34 = vpop.f32.mrf.mxu0 }
0x3828   :  { %v5715_v61 = vadd.f32 %v12662_v20, %v5714_v34 }
0x3829   :  { %v10154_v21 = vpop.f32.mrf.mxu0 }
0x382a   :  { %5827 = vrot.lane.b32.xlu0 %v5715_v61, %s11110_s0 }
0x382b   :  { %v5717_v32 = vpop.f32.mrf.mxu0 }
0x382d   :  { %v10155_v48 = vpop.f32.mrf.mxu0 }
0x382e   :  { %5866 = vrot.lane.b32.xlu0 %v5755_v51, %s11111_s9 }
0x3857   :  { %v5794_v38 = vpop.f32.mrf.mxu0 }
0x3858   :  { %v5795_v43 = vadd.f32 %v12673_v13, %v5794_v38 }
0x3859   :  { %v10186_v18 = vpop.f32.mrf.mxu0 }
0x385a   :  { %5895 = vrot.lane.b32.xlu0 %v5795_v43, %s11112_s13 }
0x385b   :  { %v5797_v30 = vpop.f32.mrf.mxu0 }
0x385d   :  { %v10187_v36 = vpop.f32.mrf.mxu0 }
0x385e   :  { %5844 = vrot.lane.b32.xlu0 %v5715_v61, %s11112_s13 }
0x3862   :  { %5905 = vrot.lane.b32.xlu0 %v5795_v43, %s11110_s0 }
0x389c   :  { %v5828_v20 = vpop.permute.xlu0 %5827 }
0x389d   :  { %v5830_v13 = vadd.f32 %v5828_v20, %v13011_v15  ;;  %v5837_v36 = vadd.f32 %v5828_v20, %v5596_v4 }
0x389f   :  { %v8999_v24 = vmul.f32 -1.442695, %v5830_v13 }
0x38a0   :  { %v5867_v35 = vpop.permute.xlu0 %5866 }
0x38a1   :  { %v5869_v28 = vadd.f32 %v5867_v35, %v5596_v4  ;;  %v9000_v35 = vmul.f32 -1.442695, %v5837_v36 }
0x38a3   :  { %v9001_v59 = vmul.f32 -1.442695, %v5869_v28 }
0x38a5   :  { %10814 = vpow2.f32 %v9001_v59 }
0x38a6   :  { %10816 = vpow2.f32 %v8999_v24 }
0x38b2   :  { %v10815_v53 = vpop.eup %10814 }
0x38b3   :  { %v5873_v8 = vadd.f32 1.0, %v10815_v53  ;;  %v10817_v45 = vpop.eup %10816 }
0x38b4   :  { %v5834_v12 = vadd.f32 1.0, %v10817_v45 }
0x38b5   :  { %10818 = vrcp.f32 %v5873_v8 }
0x38b6   :  { %10820 = vrcp.f32 %v5834_v12 }
0x38c2   :  { %v10819_v49 = vpop.eup %10818 }
0x38c3   :  { %v5876_v42 = vmul.f32 %v10819_v49, %v5755_v51  ;;  %v10821_v17 = vpop.eup %10820 }
0x38c5   :  { %5878 = vrot.lane.b32.xlu1 %v5876_v42, %s11111_s9 }
0x38cc   :  { %v5896_v26 = vpop.permute.xlu0 %5895 }
0x38cd   :  { %v5898_v41 = vadd.f32 %v5896_v26, %v5635_v50 }
0x38cf   :  { %v9002_v57 = vmul.f32 -1.442695, %v5898_v41 }
0x38d0   :  { %v5845_v62 = vpop.permute.xlu0 %5844 }
0x38d1   :  { %10822 = vpow2.f32 %v9002_v57  ;;  %v5847_v11 = vmul.f32 %v10821_v17, %v5845_v62 }
0x38d3   :  { %5849 = vrot.lane.b32.xlu0 %v5847_v11, %s11111_s9 }
0x38d4   :  { %v5906_v61 = vpop.permute.xlu0 %5905 }
0x38de   :  { %v10823_v16 = vpop.eup %10822 }
0x38df   :  { %v5902_v60 = vadd.f32 1.0, %v10823_v16 }
0x38e1   :  { %10824 = vrcp.f32 %v5902_v60 }
0x38ee   :  { %v10825_v34 = vpop.eup %10824 }
0x38ef   :  { %v5908_v21 = vmul.f32 %v10825_v34, %v5906_v61  ;;  %v5915_v57 = vsub.f32 1.0, %v10825_v34 }
0x38f1   :  { %5910 = vrot.lane.b32.xlu0 %v5908_v21, %s11111_s9 }
0x38f5   :  { %5860 = vrot.lane.b32.xlu0 %v12711_v44, %s11110_s0 }
0x3937   :  { %v5879_v3 = vpop.permute.xlu1 %5878 }
0x3938   :  { %v5881_v32 = vadd.f32 %v5879_v3, %v5635_v50 }
0x393a   :  { %10826 = vtanh.f32 %v5881_v32  ;;  %v5675_v32 = vadd.f32 %v12727_v39, %v12908_v54  ;;  %v13070_v39 = vld [vmem:[%s11183_s24 + $0x8] sm:$0xff]   ;;  %v13077_v54 = vld [vmem:[%s11183_s24] sm:$0xff]   ;;  %s14234_s24 = sld [smem:[#allocation26_spill]] }
0x3945   :  { %v5850_v51 = vpop.permute.xlu0 %5849 }
0x3946   :  { %v5852_v48 = vadd.f32 %v5850_v51, %v5596_v4 }
0x3947   :  { %v10827_v38 = vpop.eup %10826 }
0x3948   :  { %10828 = vtanh.f32 %v5852_v48  ;;  %5885 = vrot.lane.b32.xlu0 %v10827_v38, %s11110_s0  ;;  %v14183_v48 = vld [vmem:[#allocation43_spill] sm:$0xff] }
0x3955   :  { %v10829_v43 = vpop.eup %10828 }
0x3956   :  { %5856 = vrot.lane.b32.xlu0 %v10829_v43, %s11110_s0 }
0x395a   :  { %5889 = vrot.lane.b32.xlu0 %v12716_v52, %s11111_s9 }
0x395e   :  { %5921 = vrot.lane.b32.xlu0 %v12721_v9, %s11112_s13  ;;  %v5883_v9 = vsub.f32 1.0, %v10819_v49 }
0x3963   :  { %v5911_v18 = vpop.permute.xlu0 %5910 }
0x3964   :  { %v5913_v44 = vadd.f32 %v5911_v18, %v5635_v50  ;;  %v13086_v18 = vld [vmem:[%s11178_s19 + $0x8] sm:$0xff]  }
0x3966   :  { %10830 = vtanh.f32 %v5913_v44  ;;  %v13093_v44 = vld [vmem:[%s11178_s19] sm:$0xff]   ;;  %s14233_s19 = sld [smem:[#allocation24_spill]] }
0x3967   :  { %10832 = vpow2.f32 %v9000_v35  ;;  %v5861_v13 = vpop.permute.xlu0 %5860 }
0x3973   :  { %v10831_v30 = vpop.eup %10830 }
0x3974   :  { %5917 = vrot.lane.b32.xlu1 %v10831_v30, %s11110_s0  ;;  %v10833_v28 = vpop.eup %10832 }
0x3975   :  { %v5841_v59 = vadd.f32 1.0, %v10833_v28 }
0x3977   :  { %10834 = vrcp.f32 %v5841_v59 }
0x3984   :  { %v10835_v24 = vpop.eup %10834 }
0x3985   :  { %v5854_v8 = vsub.f32 1.0, %v10835_v24  ;;  %v5863_v45 = vmul.f32 %v10835_v24, %v5861_v13 }
0x39ba   :  { %v5886_v53 = vpop.permute.xlu0 %5885 }
0x39bb   :  { %v5888_v26 = vmul.f32 %v5886_v53, %v5883_v9  ;;  %v5800_v53 = vadd.f32 %v5675_v32, %v13011_v15 }
0x39c8   :  { %v5857_v52 = vpop.permute.xlu0 %5856 }
0x39c9   :  { %v5859_v12 = vmul.f32 %v5857_v52, %v5854_v8  ;;  %v8998_v52 = vmul.f32 -1.442695, %v5800_v53 }
0x39cb   :  { %v13027_v42 = vadd.f32 %v5863_v45, %v5859_v12  ;;  %10836 = vpow2.f32 %v8998_v52 }
0x39cc   :  { %v5890_v50 = vpop.permute.xlu0 %5889 }
0x39cd   :  { %v5892_v41 = vmul.f32 %v10819_v49, %v5890_v50  ;;  %5927 = vrot.lane.b32.xlu1 %v13027_v42, %s11112_s13 }
0x39cf   :  { %v13031_v20 = vadd.f32 %v5892_v41, %v5888_v26 }
0x39d0   :  { %v5922_v4 = vpop.permute.xlu0 %5921 }
0x39d1   :  { %5931 = vrot.lane.b32.xlu0 %v13031_v20, %s11111_s9  ;;  %v5924_v62 = vmul.f32 %v10825_v34, %v5922_v4 }
0x39d8   :  { %v10837_v26 = vpop.eup %10836 }
0x39e6   :  { %v5918_v17 = vpop.permute.xlu1 %5917 }
0x39e7   :  { %v5920_v11 = vmul.f32 %v5918_v17, %v5915_v57  ;;  %v5804_v17 = vadd.f32 1.0, %v10837_v26 }
0x39e9   :  { %v13035_v16 = vadd.f32 %v5924_v62, %v5920_v11  ;;  %10838 = vrcp.f32 %v5804_v17 }
0x39eb   :  { %5935 = vrot.lane.b32.xlu1 %v13035_v16, %s11110_s0 }
0x3a3f   :  { %v13039_v60 = vpop.permute.xlu1 %5927 }
0x3a40   :  { %v5938_v49 = vpack.c.bf16 %v13039_v60, %v13039_v60 }
0x3a42   :  { %5942 = vrot.lane.b32.xlu0 %v5938_v49, %s11110_s0 }
0x3a43   :  { %v13044_v61 = vpop.permute.xlu0 %5931 }
0x3a44   :  { %v5939_v21 = vpack.c.bf16 %v13044_v61, %v13044_v61 }
0x3a46   :  { %5988 = vrot.lane.b32.xlu1 %v5939_v21, %s11110_s0 }
0x3a5d   :  { %v13049_v34 = vpop.permute.xlu1 %5935 }
0x3a5e   :  { %v5940_v3 = vpack.c.bf16 %v13049_v34, %v13049_v34 }
0x3a60   :  { %6034 = vrot.lane.b32.xlu0 %v5940_v3, %s11110_s0 }
0x3a64   :  { %5808 = vrot.lane.b32.xlu0 %v5675_v32, %s11111_s9  ;;  %v10839_v32 = vpop.eup %10838 }
0x3ab4   :  { %v13057_v51 = vpop.permute.xlu0 %5942 }
0x3ab5   :  { %10191 = vmatmul.mubr.msk.bf16.vlgmr.msra.gmra.mxu1 %vm399_vm1, %v13057_v51 }
0x3ab6   :  { %10201 = vmatpush3.bf16.xpose.msra.mxu1 %v14183_v48  ;;  %10202 = vmatprep.mubr.msk.bf16.mxu1 %vm11108_vm0, %v14064_v2 }
0x3ab7   :  { %10214 = vmatprep.subr.bf16.mxu1 %v14064_v2 }
0x3ab8   :  { %v13065_v38 = vpop.permute.xlu1 %5988 }
0x3ab9   :  { %10197 = vmatmul.mubr.msk.bf16.vlgmr.msra.gmra.mxu0 %vm399_vm1, %v13065_v38 }
0x3aba   :  { %10207 = vmatpush3.bf16.msra.mxu0 %v13070_v39  ;;  %10210 = vmatprep.mubr.msk.bf16.mxu0 %vm11108_vm0, %v14064_v2 }
0x3abb   :  { %10208 = vmatprep.subr.bf16.mxu0 %v14064_v2 }
0x3abe   :  { %10209 = vmatpush3.bf16.msra.mxu0 %v13077_v54 }
0x3abf   :  { %10222 = vmatprep.subr.bf16.mxu0 %v14064_v2 }
0x3ad2   :  { %v13081_v43 = vpop.permute.xlu0 %6034 }
0x3ad3   :  { %10203 = vmatmul.mubr.msk.bf16.vlgmr.msra.gmra.mxu1 %vm399_vm1, %v13081_v43 }
0x3ad4   :  { %10215 = vmatpush3.bf16.msra.mxu1 %v13086_v18  ;;  %10218 = vmatprep.mubr.msk.bf16.mxu1 %vm11108_vm0, %v14064_v2 }
0x3ad5   :  { %10216 = vmatprep.subr.bf16.mxu1 %v14064_v2 }
0x3ad6   :  { %v5809_v3 = vpop.permute.xlu0 %5808 }
0x3ad8   :  { %10217 = vmatpush3.bf16.msra.mxu1 %v13093_v44 }
0x3ad9   :  { %10234 = vmatprep.subr.bf16.mxu1 %v14064_v2 }
0x3b75   :  { %v5981_v30 = vpop.f32.mrf.mxu1 }
0x3b76   :  { %v6079_v12 = vsel %vm1153_vm3, %v5981_v30, 0.0  ;;  %v5811_v30 = vmul.f32 %v10839_v32, %v5809_v3 }
0x3b77   :  { %v10192_v36 = vpop.f32.mrf.mxu1 }
0x3b79   :  { %v5984_v35 = vpop.f32.mrf.mxu1  ;;  %v6027_v28 = vpop.f32.mrf.mxu0 }
0x3b7a   :  { %v6080_v45 = vsel %vm1153_vm3, %v6027_v28, 0.0 }
0x3b7b   :  { %v10193_v59 = vpop.f32.mrf.mxu1  ;;  %v10198_v13 = vpop.f32.mrf.mxu0  ;;  %v6081_v9 = vadd.f32 %v6080_v45, %v6079_v12 }
0x3b7d   :  { %v6030_v24 = vpop.f32.mrf.mxu0 }
0x3b7f   :  { %v10199_v8 = vpop.f32.mrf.mxu0 }
0x3b93   :  { %v6073_v50 = vpop.f32.mrf.mxu1 }
0x3b94   :  { %v6082_v41 = vsel %vm1153_vm3, %v6073_v50, 0.0 }
0x3b95   :  { %v6083_v4 = vadd.f32 %v6082_v41, %v6081_v9  ;;  %v10204_v57 = vpop.f32.mrf.mxu1 }
0x3b97   :  { %v6084_v62 = vadd.f32 %v12765_v47, %v6083_v4  ;;  %v6076_v11 = vpop.f32.mrf.mxu1  ;;  %v5824_v4 = vmul.f32 %v10839_v32, %v12781_v5 }
0x3b99   :  { %9006 = vst.msk [vmem:[%s11296_s4 + $0x8] sm:$0x3] %vm1153_vm3, %v6084_v62  ;;  %v10205_v49 = vpop.f32.mrf.mxu1  ;;  %v6085_v21 = vsel %vm1153_vm3, %v6084_v62, -inf }
0x3b9a   :  { %6086 = vmax.xlane.f32.xlu1 %v6085_v21 }
0x3bab   :  { %5813 = vrot.lane.b32.xlu1 %v5811_v30, %s11111_s9 }
0x3c23   :  { %v6087_v36 = vpop.xlane.xlu1 %6086 }
0x3c24   :  { %v6088_v35 = vsub.f32 %v6084_v62, %v6087_v36  ;;  %v14184_v36 = vld [vmem:[#allocation64_spill] sm:$0xff] }
0x3c26   :  { %v6089_v28 = vmul.f32 1.442695, %v6088_v35  ;;  %v14185_v35 = vld [vmem:[#allocation65_spill] sm:$0xff] }
0x3c27   :  { %v5814_v13 = vpop.permute.xlu1 %5813 }
0x3c28   :  { %10840 = vpow2.f32 %v6089_v28  ;;  %v5816_v53 = vadd.f32 %v5814_v13, %v13011_v15  ;;  %v5818_v15 = vsub.f32 1.0, %v10839_v32 }
0x3c35   :  { %v10841_v59 = vpop.eup %10840 }
0x3c36   :  { %v6091_v47 = vsel %vm1153_vm3, %v10841_v59, 0.0 }
0x3c37   :  { %6092 = vadd.xlane.f32.xlu0 %v6091_v47 }
0x3cc0   :  { %v6093_v24 = vpop.xlane.xlu0 %6092 }
0x3cc1   :  { %10842 = vrcp.f32 %v6093_v24  ;;  %v13150_v24 = vld [vmem:[%s14052_s29] ss:$0 sm:$0xff] }
0x3cc2   :  { %10844 = vtanh.f32 %v5816_v53 }
0x3cce   :  { %v10843_v8 = vpop.eup %10842 }
0x3ccf   :  { %v6095_v52 = vmul.f32 %v10843_v8, %v10841_v59  ;;  %v10845_v45 = vpop.eup %10844 }
0x3cd1   :  { %6113 = vperm.xlu1 %10537, %v6095_v52   ;;  %6103 = vperm.xlu0 %10536, %v6095_v52  }
0x3cd5   :  { %5820 = vrot.lane.b32.xlu1 %v10845_v45, %s11110_s0  ;;  %10539 = vset.pattern.permute.xlu0 %v14067_v46 }
0x3cd6   :  { %10538 = vset.pattern.permute.xlu1 %v14067_v46 }
0x3cd9   :  { %6098 = vperm.xlu1 %10538, %v6095_v52  }
0x3d4c   :  { %v6104_v12 = vpop.permute.xlu0 %6103  ;;  %v6114_v9 = vpop.permute.xlu1 %6113 }
0x3d4d   :  { %v6106_v50 = vmul.f32 %v6104_v12, %v13031_v20  ;;  %v6116_v41 = vmul.f32 %v6114_v9, %v13035_v16 }
0x3d4f   :  { %6108 = vrot.lane.b32.xlu1 %v6106_v50, %s11112_s13 }
0x3d50   :  { %v5821_v26 = vpop.permute.xlu1 %5820 }
0x3d51   :  { %v5823_v57 = vmul.f32 %v5821_v26, %v5818_v15  ;;  %v13155_v26 = vld [vmem:[%s14077_s30 + $0x8] sm:$0xff]  }
0x3d53   :  { %v13115_v17 = vadd.f32 %v5824_v4, %v5823_v57  ;;  %6118 = vrot.lane.b32.xlu1 %v6116_v41, %s11111_s9  ;;  %v13162_v41 = vld [vmem:[%s14077_s30] sm:$0xff]  }
0x3d54   :  { %v6099_v20 = vpop.permute.xlu1 %6098  ;;  %v13167_v57 = vld [vmem:[%s14054_s8] ss:$0 sm:$0xff] }
0x3d55   :  { %v6124_v62 = vpack.c.bf16 %v13115_v17, %v13115_v17  ;;  %v6101_v49 = vmul.f32 %v6099_v20, %v13027_v42  ;;  %v13132_v42 = vld [vmem:[%s14051_s25 + $0x8] sm:$0xff]  }
0x3d57   :  { %6170 = vrot.lane.b32.xlu1 %v6124_v62, %s11110_s0 }
0x3dc1   :  { %v6109_v11 = vpop.permute.xlu1 %6108 }
0x3dc2   :  { %v6111_v21 = vadd.f32 %v6109_v11, %v6101_v49 }
0x3dc5   :  { %v6119_v16 = vpop.permute.xlu1 %6118 }
0x3dc6   :  { %v6121_v3 = vadd.f32 %v6119_v16, %v6111_v21  ;;  %v13172_v16 = vld [vmem:[%s14056_s20 + $0x8] sm:$0xff]  }
0x3dc8   :  { %v6125_v32 = vpack.c.bf16 %v6121_v3, %v6121_v3  ;;  %v13179_v3 = vld [vmem:[%s14056_s20] sm:$0xff]  }
0x3dc9   :  { %v13122_v30 = vpop.permute.xlu1 %6170 }
0x3dca   :  { %10211 = vmatmul.mubr.msk.bf16.vlgmr.msra.gmra.mxu0 %vm399_vm1, %v6125_v32  ;;  %10219 = vmatmul.mubr.msk.bf16.vlgmr.msra.gmra.mxu1 %vm399_vm1, %v13122_v30 }
0x3dcb   :  { %10223 = vmatpush3.bf16.msra.mxu0 %v12794_v7  ;;  %10230 = vmatprep.mubr.msk.bf16.mxu0 %vm11108_vm0, %v14064_v2  ;;  %v13141_v7 = vld [vmem:[%s14051_s25] sm:$0xff]  }
0x3dcc   :  { %10224 = vmatprep.subr.bf16.mxu0 %v14064_v2  ;;  %10235 = vmatpush3.bf16.msra.mxu1 %v13132_v42 }
0x3dcd   :  { %10236 = vmatprep.subr.bf16.mxu1 %v14064_v2  ;;  %10238 = vmatprep.mubr.msk.bf16.mxu1 %vm11108_vm0, %v14064_v2 }
0x3dcf   :  { %10225 = vmatpush3.bf16.msra.mxu0 %v12805_v63 }
0x3dd0   :  { %10226 = vmatprep.subr.bf16.mxu0 %v14064_v2  ;;  %10237 = vmatpush3.bf16.msra.mxu1 %v13141_v7 }
0x3dd1   :  { %10242 = vmatprep.subr.bf16.mxu1 %v14064_v2 }
0x3dd3   :  { %10227 = vmatpush3.bf16.msra.mxu0 %v14184_v36  ;;  %v14186_v36 = vld [vmem:[#allocation52_spill] sm:$0xff] }
0x3dd4   :  { %10228 = vmatprep.subr.bf16.mxu0 %v14064_v2 }
0x3dd7   :  { %10229 = vmatpush3.bf16.msra.mxu0 %v14185_v35 }
0x3dd8   :  { %10250 = vmatprep.subr.bf16.mxu0 %v14064_v2 }
0x3e8a   :  { %v6163_v28 = vpop.f32.mrf.mxu0  ;;  %v6209_v59 = vpop.f32.mrf.mxu1 }
0x3e8b   :  { %v6210_v63 = vadd.f32 %v6209_v59, %v6163_v28 }
0x3e8c   :  { %v10212_v47 = vpop.f32.mrf.mxu0  ;;  %v10220_v13 = vpop.f32.mrf.mxu1 }
0x3e8d   :  { %v6215_v53 = vadd.f32 %v13150_v24, %v6210_v63 }
0x3e8e   :  { %v6166_v8 = vpop.f32.mrf.mxu0  ;;  %v6212_v52 = vpop.f32.mrf.mxu1 }
0x3e8f   :  { %vm6216_vm11 = vcmp.ge.f32.partialorder %v6215_v53, 0.0  ;;  %v6217_v45 = vmul.f32 0.1, %v6215_v53 }
0x3e90   :  { %v10213_v12 = vpop.f32.mrf.mxu0  ;;  %v10221_v9 = vpop.f32.mrf.mxu1 }
0x3e91   :  { %v6218_v50 = vsel %vm6216_vm11, %v6215_v53, %v6217_v45  ;;  %v14187_v53 = vld [vmem:[#allocation40_spill] sm:$0xff]  ;;  %v14188_v12 = vld [vmem:[#allocation47_spill] sm:$0xff] }
0x3e92   :  { %v6219_v15 = vpack.c.bf16 %v6218_v50, %v6218_v50  ;;  %v14189_v50 = vld [vmem:[#allocation48_spill] sm:$0xff] }
0x3e94   :  { %10231 = vmatmul.mubr.msk.bf16.vlgmr.msra.gmra.mxu0 %vm304_vm2, %v6219_v15 }
0x3e95   :  { %10251 = vmatpush3.bf16.msra.mxu0 %v13155_v26  ;;  %10254 = vmatprep.mubr.msk.bf16.mxu0 %vm11108_vm0, %v14064_v2 }
0x3e96   :  { %10252 = vmatprep.subr.bf16.mxu0 %v14064_v2 }
0x3e99   :  { %10253 = vmatpush3.bf16.msra.mxu0 %v13162_v41 }
0x3e9a   :  { %10266 = vmatprep.subr.bf16.mxu0 %v14064_v2 }
0x3f54   :  { %v6257_v4 = vpop.f32.mrf.mxu0 }
0x3f55   :  { %v6258_v62 = vadd.f32 %v13167_v57, %v6257_v4 }
0x3f56   :  { %v10232_v20 = vpop.f32.mrf.mxu0 }
0x3f57   :  { %v6263_v11 = vpack.c.bf16 %v6258_v62, %v6258_v62 }
0x3f58   :  { %v6260_v49 = vpop.f32.mrf.mxu0 }
0x3f59   :  { %10239 = vmatmul.mubr.msk.bf16.vlgmr.msra.gmra.mxu1 %vm399_vm1, %v6263_v11  ;;  %v13192_v49 = vld [vmem:[%s14063_s22 + $0x8] sm:$0xff]  }
0x3f5a   :  { %v10233_v21 = vpop.f32.mrf.mxu0  ;;  %10243 = vmatpush3.bf16.msra.mxu1 %v13172_v16  ;;  %10246 = vmatprep.mubr.msk.bf16.mxu1 %vm11108_vm0, %v14064_v2  ;;  %14190 = vst [vmem:[#allocation54_spill] sm:$0xff] %v13192_v49 }
0x3f5b   :  { %10244 = vmatprep.subr.bf16.mxu1 %v14064_v2  ;;  %v13199_v21 = vld [vmem:[%s14063_s22] sm:$0xff]  }
0x3f5c   :  { %14191 = vst [vmem:[#allocation55_spill] sm:$0xff] %v13199_v21 }
0x3f5e   :  { %10245 = vmatpush3.bf16.msra.mxu1 %v13179_v3 }
0x3f5f   :  { %10258 = vmatprep.subr.bf16.mxu1 %v14064_v2 }
0x4019   :  { %v6301_v32 = vpop.f32.mrf.mxu1 }
0x401a   :  { %v6314_v35 = vrot.slane %v6301_v32, %v14186_v36  ;;  %v10984_v32 = vld [vmem:[%s11148_s21 + $0x1c] ss:$12 sps:$4 sm:$0xff]  }
0x401b   :  { %v10240_v28 = vpop.f32.mrf.mxu1 }
0x401c   :  { %v6315_v59 = vcombine.high %v6314_v35, %v6314_v35  ;;  %v6322_v63 = vrot.slane %v6314_v35, %v14186_v36  ;;  %v10985_v35 = vld [vmem:[%s11148_s21 + $0x18] ss:$12 sps:$4 sm:$0xff]   ;;  %v9015_v28 = vld [vmem:[%s11128_s5 + $0xa] sm:$0x3]  ;;  %s14221_s5 = sld [smem:[#allocation20_spill]] }
0x401d   :  { %v6304_v47 = vpop.f32.mrf.mxu1 }
0x401e   :  { %v6329_v13 = vrot.slane %v6315_v59, %v14186_v36  ;;  %v6333_v8 = vrot.slane %v6322_v63, %v14187_v53  ;;  %v10986_v59 = vld [vmem:[%s11148_s21 + $0x4] ss:$12 sps:$4 sm:$0xff]   ;;  %v13208_v63 = vpack.c.bf16 %v9015_v28, %v9015_v28  ;;  %v10987_v47 = vld [vmem:[%s11148_s21] ss:$12 sps:$4 sm:$0xff]  }
0x401f   :  { %v10241_v52 = vpop.f32.mrf.mxu1 }
0x4020   :  { %v6337_v45 = vrot.slane %v6329_v13, %v14187_v53  ;;  %v6340_v9 = vadd.f32 %v6333_v8, %v14188_v12  ;;  %v14192_v13 = vld [vmem:[#allocation27_spill] sm:$0xff]  ;;  %v14194_v8 = vld [vmem:[#allocation29_spill] sm:$0xff]  ;;  %v14195_v52 = vld [vmem:[#allocation30_spill] sm:$0xff]  ;;  %v14209_v12 = vmov 1  }
0x4022   :  { %v6341_v15 = vadd.f32 %v6337_v45, %v14189_v50  ;;  %10846 = vtanh.f32 %v6340_v9  ;;  %v14196_v45 = vld [vmem:[#allocation31_spill] sm:$0xff]  ;;  %v14197_v9 = vld [vmem:[#allocation32_spill] sm:$0xff] }
0x4024   :  { %10848 = vtanh.f32 %v6341_v15  ;;  %v14198_v15 = vld [vmem:[#allocation33_spill] sm:$0xff] }
0x402f   :  { %v10847_v4 = vpop.eup %10846 }
0x4031   :  { %v10849_v62 = vpop.eup %10848 }
0x4032   :  { %v6344_v20 = vpack.c.bf16 %v10849_v62, %v10847_v4  ;;  %v14199_v4 = vld [vmem:[#allocation34_spill] sm:$0xff]  ;;  %v14200_v62 = vld [vmem:[#allocation35_spill] sm:$0xff] }
0x4034   :  { %10247 = vmatmul.mubr.msk.bf16.vlgmr.msra.gmra.mxu1 %vm399_vm1, %v6344_v20  ;;  %v14201_v20 = vld [vmem:[#allocation36_spill] sm:$0xff] }
0x4035   :  { %10259 = vmatpush3.bf16.msra.mxu1 %v13192_v49  ;;  %10262 = vmatprep.mubr.msk.bf16.mxu1 %vm11108_vm0, %v14064_v2 }
0x4036   :  { %10260 = vmatprep.subr.bf16.mxu1 %v14064_v2 }
0x4039   :  { %10261 = vmatpush3.bf16.msra.mxu1 %v13199_v21 }
0x403a   :  { %6743 = vmatprep.subr.bf16.mxu1 %v10984_v32  ;;  %v14203_v32 = vld [vmem:[#allocation38_spill] sm:$0xff] }
0x403c   :  { %10263 = vmatmul.mubr.msk.bf16.vlgmr.msra.gmra.mxu1 %vm399_vm1, %v6263_v11  ;;  %v14193_v11 = vld [vmem:[#allocation28_spill] sm:$0xff] }
0x403d   :  { %6744 = vmatpush1.bf16.msra.mxu1 %v10985_v35  ;;  %6763 = vmatprep.mubr.bf16.mxu1 %v14067_v46  ;;  %v14204_v35 = vld [vmem:[#allocation42_spill] sm:$0xff] }
0x403e   :  { %6745 = vmatprep.subr.bf16.mxu1 %v10986_v59 }
0x4041   :  { %6746 = vmatpush1.bf16.msra.mxu1 %v10987_v47 }
0x4042   :  { %10282 = vmatprep.subr.bf16.mxu1 %v14064_v2 }
0x4044   :  { %9016 = vmatmul.mubr.msk.bf16.vlgmr.msra.gmra.mxu1 %vm399_vm1, %v13208_v63 }
0x4045   :  { %10283 = vmatpush3.bf16.xpose.msra.mxu1 %v14192_v13  ;;  %10294 = vmatprep.mubr.msk.bf16.mxu1 %vm11108_vm0, %v14064_v2 }
0x4046   :  { %10284 = vmatprep.subr.bf16.mxu1 %v14064_v2 }
0x404d   :  { %10285 = vmatpush3.bf16.xpose.msra.mxu1 %v14193_v11 }
0x404e   :  { %10286 = vmatprep.subr.bf16.mxu1 %v14064_v2 }
0x4055   :  { %10287 = vmatpush3.bf16.xpose.msra.mxu1 %v14194_v8 }
0x4056   :  { %10288 = vmatprep.subr.bf16.mxu1 %v14064_v2 }
0x405d   :  { %10289 = vmatpush3.bf16.xpose.msra.mxu1 %v14195_v52 }
0x405e   :  { %10290 = vmatprep.subr.bf16.mxu1 %v14064_v2 }
0x4065   :  { %10291 = vmatpush3.bf16.xpose.msra.mxu1 %v14196_v45 }
0x4066   :  { %10292 = vmatprep.subr.bf16.mxu1 %v14064_v2 }
0x406d   :  { %10293 = vmatpush3.bf16.xpose.msra.mxu1 %v14197_v9 }
0x406e   :  { %10314 = vmatprep.subr.bf16.mxu1 %v14064_v2 }
0x4074   :  { %10295 = vmatmul.mubr.msk.bf16.vlgmr.msra.gmra.mxu1 %vm399_vm1, %v13122_v30  ;;  %v14202_v30 = vld [vmem:[#allocation37_spill] sm:$0xff] }
0x4075   :  { %10315 = vmatpush3.bf16.xpose.msra.mxu1 %v14198_v15  ;;  %10326 = vmatprep.mubr.msk.bf16.mxu1 %vm11108_vm0, %v14064_v2 }
0x4076   :  { %10316 = vmatprep.subr.bf16.mxu1 %v14064_v2 }
0x407d   :  { %10317 = vmatpush3.bf16.xpose.msra.mxu1 %v14199_v4 }
0x407e   :  { %10318 = vmatprep.subr.bf16.mxu1 %v14064_v2 }
0x4085   :  { %10319 = vmatpush3.bf16.xpose.msra.mxu1 %v14200_v62 }
0x4086   :  { %10320 = vmatprep.subr.bf16.mxu1 %v14064_v2 }
0x408d   :  { %10321 = vmatpush3.bf16.xpose.msra.mxu1 %v14201_v20 }
0x408e   :  { %10322 = vmatprep.subr.bf16.mxu1 %v14064_v2 }
0x4095   :  { %10323 = vmatpush3.bf16.xpose.msra.mxu1 %v14202_v30 }
0x4096   :  { %10324 = vmatprep.subr.bf16.mxu1 %v14064_v2 }
0x409d   :  { %10325 = vmatpush3.bf16.xpose.msra.mxu1 %v14203_v32 }
0x409e   :  { %10346 = vmatprep.subr.bf16.mxu1 %v14064_v2 }
0x40a4   :  { %10327 = vmatmul.mubr.msk.bf16.vlgmr.msra.gmra.mxu1 %vm399_vm1, %v13065_v38  ;;  %v13253_v38 = vld [vmem:[%s14070_s26] ss:$0 sm:$0xff] }
0x40a5   :  { %10347 = vmatpush3.bf16.xpose.msra.mxu1 %v14204_v35  ;;  %10348 = vmatprep.mubr.msk.bf16.mxu1 %vm11108_vm0, %v14064_v2  ;;  %14205 = vst [vmem:[#allocation56_spill] sm:$0xff] %v13253_v38 }
0x40a6   :  { %10358 = vmatprep.subr.bf16.mxu1 %v14064_v2 }
0x40f4   :  { %v6382_v28 = vpop.f32.mrf.mxu1 }
0x40f5   :  { %10850 = vtanh.f32 %v6382_v28 }
0x40f6   :  { %v10248_v59 = vpop.f32.mrf.mxu1 }
0x40f8   :  { %v6385_v47 = vpop.f32.mrf.mxu1 }
0x40f9   :  { %10852 = vtanh.f32 %v6385_v47 }
0x40fa   :  { %v10249_v13 = vpop.f32.mrf.mxu1 }
0x40fc   :  { %v13250_v11 = vpop.f32.mrf.mxu1 }
0x40fe   :  { %v10264_v8 = vpop.f32.mrf.mxu1 }
0x4100   :  { %v6583_v52 = vpop.f32.mrf.mxu1 }
0x4102   :  { %v10851_v45 = vpop.eup %10850  ;;  %v10265_v9 = vpop.f32.mrf.mxu1 }
0x4103   :  { %v6391_v15 = vmul.f32 %v13253_v38, %v10851_v45 }
0x4104   :  { %v13256_v4 = vpop.f32.mrf.mxu1 }
0x4105   :  { %v6393_v62 = vsel %vm399_vm1, %v6391_v15, 0.0 }
0x4106   :  { %v10853_v20 = vpop.eup %10852  ;;  %6394 = vadd.xlane.f32.xlu1 %v6393_v62  ;;  %v13259_v30 = vpop.f32.mrf.mxu1 }
0x4107   :  { %v6392_v32 = vmul.f32 %v13253_v38, %v10853_v20 }
0x4108   :  { %v6769_v35 = vpop.f32.mrf.mxu1 }
0x4109   :  { %v6396_v28 = vsel %vm399_vm1, %v6392_v32, 0.0  ;;  %v14207_v35 = vld [vmem:[#allocation59_spill] sm:$0xff] }
0x410a   :  { %6397 = vadd.xlane.f32.xlu0 %v6396_v28  ;;  %v6770_v59 = vpop.f32.mrf.mxu1 }
0x4134   :  { %v13263_v47 = vpop.f32.mrf.mxu1 }
0x4136   :  { %v10296_v13 = vpop.f32.mrf.mxu1 }
0x4138   :  { %v6849_v8 = vpop.f32.mrf.mxu1 }
0x413a   :  { %v10297_v52 = vpop.f32.mrf.mxu1 }
0x4164   :  { %v13265_v45 = vpop.f32.mrf.mxu1 }
0x4166   :  { %v10328_v9 = vpop.f32.mrf.mxu1 }
0x4167   :  { %v14208_v9 = vld [vmem:[#allocation41_spill] sm:$0xff] }
0x4168   :  { %v6929_v15 = vpop.f32.mrf.mxu1 }
0x416a   :  { %v10329_v5 = vpop.f32.mrf.mxu1 }
0x418f   :  { %v6395_v62 = vpop.xlane.xlu1 %6394 }
0x4190   :  { %v6399_v21 = vadd.f32 %v6395_v62, %v14206_v56 }
0x4192   :  { %v6406_v32 = vrot.slane %v6399_v21, %v14207_v35 }
0x4193   :  { %v6398_v49 = vpop.xlane.xlu0 %6397 }
0x4194   :  { %v6400_v20 = vadd.f32 %v6398_v49, %v14206_v56 }
0x4196   :  { %v6410_v28 = vrot.slane %v6400_v20, %v14207_v35 }
0x4198   :  { %v6411_v59 = vsel %vm1649_vm5, %v6410_v28, %v6406_v32 }
0x4199   :  { %v6413_v13 = vsel %vm1652_vm6, %v6411_v59, -inf }
0x419a   :  { %6414 = vmax.xlane.f32.xlu1 %v6413_v13 }
0x4223   :  { %v6415_v8 = vpop.xlane.xlu1 %6414 }
0x4224   :  { %v6420_v52 = vrot.slane %v6415_v8, %v14187_v53  ;;  %v6424_v5 = vrot.slane %v6415_v8, %v14208_v9 }
0x4226   :  { %v6427_v15 = vsub.f32 %v6399_v21, %v6420_v52  ;;  %v6428_v38 = vsub.f32 %v6400_v20, %v6424_v5 }
0x4228   :  { %v6429_v62 = vmul.f32 1.442695, %v6427_v15  ;;  %v6431_v50 = vmul.f32 1.442695, %v6428_v38 }
0x422a   :  { %10854 = vpow2.f32 %v6429_v62  ;;  %v14210_v62 = vmov 2  }
0x422b   :  { %10856 = vpow2.f32 %v6431_v50 }
0x4237   :  { %v10855_v49 = vpop.eup %10854 }
0x4238   :  { %v10857_v56 = vpop.eup %10856  ;;  %6436 = vperm.xlu0 %10539, %v10855_v49  }
0x4239   :  { %6439 = vperm.xlu1 %10538, %v10857_v56  }
0x423d   :  { %10540 = vset.pattern.permute.xlu1 %v14209_v12 }
0x42b3   :  { %v6437_v32 = vpop.permute.xlu0 %6436 }
0x42b4   :  { %v6440_v28 = vpop.permute.xlu1 %6439  ;;  %v6444_v59 = vrot.slane %v6437_v32, %v14207_v35 }
0x42b5   :  { %v6448_v13 = vrot.slane %v6440_v28, %v14207_v35  ;;  %v14211_v28 = vld [vmem:[#allocation51_spill] sm:$0xff] }
0x42b7   :  { %v6449_v8 = vsel %vm1649_vm5, %v6448_v13, %v6444_v59 }
0x42b8   :  { %v6451_v21 = vsel %vm1652_vm6, %v6449_v8, 0.0 }
0x42b9   :  { %6452 = vadd.xlane.f32.xlu1 %v6451_v21 }
0x4342   :  { %v6453_v38 = vpop.xlane.xlu1 %6452 }
0x4343   :  { %v6458_v50 = vrot.slane %v6453_v38, %v14187_v53  ;;  %v6462_v20 = vrot.slane %v6453_v38, %v14208_v9 }
0x4345   :  { %10858 = vrcp.f32 %v6458_v50 }
0x4346   :  { %10860 = vrcp.f32 %v6462_v20 }
0x4352   :  { %v10859_v52 = vpop.eup %10858 }
0x4353   :  { %v6466_v12 = vmul.f32 %v10859_v52, %v10855_v49  ;;  %v10861_v5 = vpop.eup %10860 }
0x4354   :  { %v6468_v15 = vmul.f32 %v10861_v5, %v10857_v56 }
0x4355   :  { %6471 = vperm.xlu0 %10539, %v6466_v12  }
0x4359   :  { %6476 = vperm.xlu0 %10539, %v6468_v15  }
0x435d   :  { %10541 = vset.pattern.permute.xlu0 %v14210_v62 }
0x43d0   :  { %v6472_v32 = vpop.permute.xlu0 %6471 }
0x43d1   :  { %v6479_v59 = vmul.f32 %v14211_v28, %v6472_v32 }
0x43d3   :  { %v6481_v13 = vsel %vm399_vm1, %v6479_v59, 0.0 }
0x43d4   :  { %v6482_v8 = vrot.slane %v6481_v13, 4  ;;  %v6477_v21 = vpop.permute.xlu0 %6476 }
0x43d5   :  { %v6480_v35 = vmul.f32 %v12934_v58, %v6477_v21  ;;  %v10990_v21 = vld [vmem:[%s14079_s28] sm:$0xff]  }
0x43d6   :  { %v6483_v38 = vadd.f32 %v6482_v8, %v6481_v13  ;;  %v10989_v8 = vld [vmem:[%s14079_s28 + $0x8] sm:$0xff]  }
0x43d7   :  { %v6488_v50 = vsel %vm399_vm1, %v6480_v35, 0.0 }
0x43d8   :  { %v6484_v20 = vrot.slane %v6483_v38, 2  ;;  %v6489_v49 = vrot.slane %v6488_v50, 4 }
0x43da   :  { %v6485_v52 = vadd.f32 %v6484_v20, %v6483_v38  ;;  %v6490_v56 = vadd.f32 %v6489_v49, %v6488_v50  ;;  %v10991_v50 = vld [vmem:[%s14080_s2] ss:$0 sm:$0xff] }
0x43dc   :  { %v6486_v12 = vrot.slane %v6485_v52, 1  ;;  %v6491_v5 = vrot.slane %v6490_v56, 2 }
0x43de   :  { %v6487_v15 = vadd.f32 %v6486_v12, %v6485_v52  ;;  %v6492_v62 = vadd.f32 %v6491_v5, %v6490_v56  ;;  %v10992_v5 = vld [vmem:[%s11148_s21 + $0x20] ss:$12 sps:$4 sm:$0xff]  }
0x43e0   :  { %v6493_v32 = vrot.slane %v6492_v62, 1  ;;  %v6495_v28 = vpack.c.bf16 %v6487_v15, %v6487_v15 }
0x43e2   :  { %v6494_v59 = vadd.f32 %v6493_v32, %v6492_v62  ;;  %v6499_v53 = vunpack.c.l.b16 %v6495_v28  ;;  %v10996_v62 = vld [vmem:[%s11163_s3 + $0x3] ss:$0 sm:$0xff] }
0x43e4   :  { %v6496_v9 = vpack.c.bf16 %v6494_v59, %v6494_v59 }
0x43e6   :  { %v6500_v58 = vunpack.c.l.b16 %v6496_v9 }
0x43e8   :  { %v6501_v13 = vsel %vm1649_vm5, %v6500_v58, %v6499_v53 }
0x43e9   :  { %v6502_v35 = vpack.c.b16 %v6501_v13, %v6501_v13  ;;  %v13358_v13 = vadd.f32 %v13256_v4, %v11520_v1 }
0x43eb   :  { %10255 = vmatmul.mubr.msk.bf16.vlgmr.msra.gmra.mxu0 %vm399_vm1, %v6502_v35 }
0x43ec   :  { %10267 = vmatpush3.bf16.msra.mxu0 %v10989_v8  ;;  %10270 = vmatprep.mubr.msk.bf16.mxu0 %vm11108_vm0, %v14064_v2  ;;  %v6768_v8 = vadd.f32 %v13259_v30, %v11532_v22 }
0x43ed   :  { %10268 = vmatprep.subr.bf16.mxu0 %v14064_v2 }
0x43f0   :  { %10269 = vmatpush3.bf16.msra.mxu0 %v10990_v21 }
0x43f1   :  { %10274 = vmatprep.subr.bf16.mxu0 %v14064_v2 }
0x44ab   :  { %v6540_v38 = vpop.f32.mrf.mxu0 }
0x44ac   :  { %v6581_v9 = vadd.f32 %v13250_v11, %v6540_v38  ;;  %v10993_v11 = vld [vmem:[%s11148_s21 + $0x8] ss:$12 sps:$4 sm:$0xff]   ;;  %s14223_s21 = sld [smem:[#allocation21_spill]] }
0x44ad   :  { %v10256_v53 = vpop.f32.mrf.mxu0 }
0x44ae   :  { %v6586_v20 = vadd.f32 %v10991_v50, %v6581_v9 }
0x44af   :  { %v6543_v49 = vpop.f32.mrf.mxu0 }
0x44b0   :  { %10862 = vtanh.f32 %v6586_v20 }
0x44b1   :  { %v10257_v52 = vpop.f32.mrf.mxu0 }
0x44bd   :  { %v13297_v56 = vpop.eup %10862 }
0x44be   :  { %v6588_v12 = vpack.c.bf16 %v13297_v56, %v13297_v56 }
0x44c0   :  { %10271 = vmatmul.mubr.msk.bf16.vlgmr.msra.gmra.mxu0 %vm399_vm1, %v6588_v12 }
0x44c1   :  { %10275 = vmatpush3.bf16.msra.mxu0 %v10992_v5  ;;  %10278 = vmatprep.mubr.msk.bf16.mxu0 %vm11108_vm0, %v14064_v2 }
0x44c2   :  { %10276 = vmatprep.subr.bf16.mxu0 %v14064_v2 }
0x44c5   :  { %10277 = vmatpush3.bf16.msra.mxu0 %v10993_v11 }
0x44c6   :  { %10298 = vmatprep.subr.bf16.mxu0 %v14064_v2 }
0x44c8   :  { %10279 = vmatmul.mubr.msk.bf16.vlgmr.msra.gmra.mxu0 %vm399_vm1, %v13208_v63 }
0x44c9   :  { %10299 = vmatpush3.bf16.xpose.msra.mxu0 %v11347_v27  ;;  %10310 = vmatprep.mubr.msk.bf16.mxu0 %vm11108_vm0, %v14064_v2 }
0x44ca   :  { %10300 = vmatprep.subr.bf16.mxu0 %v14064_v2 }
0x44d1   :  { %10301 = vmatpush3.bf16.xpose.msra.mxu0 %v11353_v29 }
0x44d2   :  { %10302 = vmatprep.subr.bf16.mxu0 %v14064_v2 }
0x44d9   :  { %10303 = vmatpush3.bf16.xpose.msra.mxu0 %v11359_v31 }
0x44da   :  { %10304 = vmatprep.subr.bf16.mxu0 %v14064_v2 }
0x44e1   :  { %10305 = vmatpush3.bf16.xpose.msra.mxu0 %v11366_v33 }
0x44e2   :  { %10306 = vmatprep.subr.bf16.mxu0 %v14064_v2 }
0x44e9   :  { %10307 = vmatpush3.bf16.xpose.msra.mxu0 %v11392_v37 }
0x44ea   :  { %10308 = vmatprep.subr.bf16.mxu0 %v14064_v2 }
0x44f1   :  { %10309 = vmatpush3.bf16.xpose.msra.mxu0 %v11403_v40 }
0x44f2   :  { %10330 = vmatprep.subr.bf16.mxu0 %v14064_v2 }
0x44f8   :  { %10311 = vmatmul.mubr.msk.bf16.vlgmr.msra.gmra.mxu0 %vm399_vm1, %v13057_v51  ;;  %v10995_v51 = vld [vmem:[%s11163_s3 + $0x2] ss:$0 sm:$0xff] }
0x44f9   :  { %10331 = vmatpush3.bf16.xpose.msra.mxu0 %v11422_v55  ;;  %10342 = vmatprep.mubr.msk.bf16.mxu0 %vm11108_vm0, %v14064_v2 }
0x44fa   :  { %10332 = vmatprep.subr.bf16.mxu0 %v14064_v2 }
0x4501   :  { %10333 = vmatpush3.bf16.xpose.msra.mxu0 %v11442_v0 }
0x4502   :  { %10334 = vmatprep.subr.bf16.mxu0 %v14064_v2 }
0x4509   :  { %10335 = vmatpush3.bf16.xpose.msra.mxu0 %v11454_v6 }
0x450a   :  { %10336 = vmatprep.subr.bf16.mxu0 %v14064_v2 }
0x4511   :  { %10337 = vmatpush3.bf16.xpose.msra.mxu0 %v11466_v10  ;;  %v10994_v10 = vld [vmem:[%s11163_s3 + $0x1] ss:$0 sm:$0xff] }
0x4512   :  { %10338 = vmatprep.subr.bf16.mxu0 %v14064_v2 }
0x4519   :  { %10339 = vmatpush3.bf16.xpose.msra.mxu0 %v11478_v14 }
0x451a   :  { %10340 = vmatprep.subr.bf16.mxu0 %v14064_v2 }
0x4521   :  { %10341 = vmatpush3.bf16.xpose.msra.mxu0 %v11490_v19 }
0x4522   :  { %10352 = vmatprep.subr.bf16.mxu0 %v14064_v2 }
0x4528   :  { %10343 = vmatmul.mubr.msk.bf16.vlgmr.msra.gmra.mxu0 %vm399_vm1, %v13081_v43  ;;  %v6927_v43 = vadd.f32 %v10995_v51, %v13265_v45 }
0x4529   :  { %10353 = vmatpush3.bf16.xpose.msra.mxu0 %v11571_v25  ;;  %10354 = vmatprep.mubr.msk.bf16.mxu0 %vm11108_vm0, %v14064_v2 }
0x452a   :  { %10364 = vmatprep.subr.bf16.mxu0 %v14064_v2 }
0x4580   :  { %v6626_v27 = vpop.f32.mrf.mxu0 }
0x4581   :  { %6633 = vst.msk [vmem:[#allocation3 + $0x8] sm:$0x3] %vm1914_vm7, %v6626_v27 }
0x4582   :  { %v10272_v29 = vpop.f32.mrf.mxu0 }
0x4584   :  { %v6629_v31 = vpop.f32.mrf.mxu0 }
0x4586   :  { %v10273_v33 = vpop.f32.mrf.mxu0 }
0x4588   :  { %v6806_v37 = vpop.f32.mrf.mxu0 }
0x4589   :  { %v6807_v22 = vadd.f32 %v6806_v37, %v11534_v23 }
0x458a   :  { %v10280_v40 = vpop.f32.mrf.mxu0 }
0x458c   :  { %v6809_v55 = vpop.f32.mrf.mxu0 }
0x458e   :  { %v10281_v0 = vpop.f32.mrf.mxu0 }
0x45b8   :  { %v6886_v6 = vpop.f32.mrf.mxu0 }
0x45b9   :  { %v6887_v14 = vadd.f32 %v10994_v10, %v6886_v6 }
0x45ba   :  { %v10312_v19 = vpop.f32.mrf.mxu0 }
0x45bb   :  { %6999 = vrot.lane.b32.xlu0 %v6887_v14, %s11110_s0 }
0x45bc   :  { %v6889_v25 = vpop.f32.mrf.mxu0 }
0x45be   :  { %v10313_v63 = vpop.f32.mrf.mxu0 }
0x45bf   :  { %7038 = vrot.lane.b32.xlu0 %v6927_v43, %s11111_s9 }
0x45c3   :  { %7016 = vrot.lane.b32.xlu0 %v6887_v14, %s11112_s13 }
0x45e8   :  { %v6966_v15 = vpop.f32.mrf.mxu0 }
0x45e9   :  { %v6967_v32 = vadd.f32 %v10996_v62, %v6966_v15 }
0x45ea   :  { %v10344_v28 = vpop.f32.mrf.mxu0 }
0x45eb   :  { %7077 = vrot.lane.b32.xlu0 %v6967_v32, %s11110_s0  ;;  %7067 = vrot.lane.b32.xlu1 %v6967_v32, %s11112_s13 }
0x45ec   :  { %v6969_v59 = vpop.f32.mrf.mxu0 }
0x45ee   :  { %v10345_v58 = vpop.f32.mrf.mxu0 }
0x462d   :  { %v7000_v45 = vpop.permute.xlu0 %6999 }
0x462e   :  { %v7002_v35 = vadd.f32 %v7000_v45, %v13358_v13 }
0x4630   :  { %v9023_v21 = vmul.f32 -1.442695, %v7002_v35 }
0x4631   :  { %v7039_v38 = vpop.permute.xlu0 %7038 }
0x4632   :  { %10864 = vpow2.f32 %v9023_v21  ;;  %v7041_v9 = vadd.f32 %v7039_v38, %v6768_v8 }
0x4634   :  { %v9025_v53 = vmul.f32 -1.442695, %v7041_v9 }
0x4635   :  { %v7017_v4 = vpop.permute.xlu0 %7016 }
0x4636   :  { %10866 = vpow2.f32 %v9025_v53 }
0x463f   :  { %v10865_v50 = vpop.eup %10864 }
0x4640   :  { %v7006_v20 = vadd.f32 1.0, %v10865_v50 }
0x4642   :  { %10868 = vrcp.f32 %v7006_v20 }
0x4643   :  { %v10867_v49 = vpop.eup %10866 }
0x4644   :  { %v7045_v52 = vadd.f32 1.0, %v10867_v49 }
0x4646   :  { %10870 = vrcp.f32 %v7045_v52 }
0x464f   :  { %v10869_v1 = vpop.eup %10868 }
0x4650   :  { %v7019_v12 = vmul.f32 %v10869_v1, %v7017_v4 }
0x4652   :  { %7021 = vrot.lane.b32.xlu0 %v7019_v12, %s11111_s9 }
0x4653   :  { %v10871_v5 = vpop.eup %10870 }
0x4654   :  { %v7048_v11 = vmul.f32 %v10871_v5, %v6927_v43  ;;  %v7055_v38 = vsub.f32 1.0, %v10871_v5 }
0x4656   :  { %7050 = vrot.lane.b32.xlu0 %v7048_v11, %s11111_s9 }
0x465d   :  { %v7068_v30 = vpop.permute.xlu1 %7067  ;;  %v7078_v55 = vpop.permute.xlu0 %7077 }
0x465e   :  { %v7070_v27 = vadd.f32 %v7068_v30, %v6807_v22 }
0x4660   :  { %v9026_v29 = vmul.f32 -1.442695, %v7070_v27 }
0x4662   :  { %10872 = vpow2.f32 %v9026_v29  ;;  %v10997_v29 = vld [vmem:[%s11163_s3] ss:$0 sm:$0xff]  ;;  %s14231_s3 = sld [smem:[#allocation22_spill]] }
0x466f   :  { %v10873_v31 = vpop.eup %10872 }
0x4670   :  { %v7074_v33 = vadd.f32 1.0, %v10873_v31  ;;  %v6847_v31 = vadd.f32 %v10997_v29, %v13263_v47 }
0x4672   :  { %10874 = vrcp.f32 %v7074_v33 }
0x467f   :  { %v10875_v40 = vpop.eup %10874 }
0x4680   :  { %v7080_v0 = vmul.f32 %v10875_v40, %v7078_v55  ;;  %v7087_v20 = vsub.f32 1.0, %v10875_v40 }
0x4682   :  { %7082 = vrot.lane.b32.xlu1 %v7080_v0, %s11111_s9 }
0x4686   :  { %7032 = vrot.lane.b32.xlu1 %v13039_v60, %s11110_s0 }
0x468a   :  { %7061 = vrot.lane.b32.xlu1 %v13044_v61, %s11111_s9  ;;  %v7009_v61 = vadd.f32 %v7000_v45, %v6768_v8 }
0x468e   :  { %7093 = vrot.lane.b32.xlu1 %v13049_v34, %s11112_s13  ;;  %v9024_v34 = vmul.f32 -1.442695, %v7009_v61 }
0x46c4   :  { %v7022_v23 = vpop.permute.xlu0 %7021 }
0x46c5   :  { %v7024_v37 = vadd.f32 %v7022_v23, %v6768_v8 }
0x46c7   :  { %10876 = vtanh.f32 %v7024_v37 }
0x46c8   :  { %v7051_v6 = vpop.permute.xlu0 %7050 }
0x46c9   :  { %v7053_v10 = vadd.f32 %v7051_v6, %v6807_v22 }
0x46cb   :  { %10878 = vtanh.f32 %v7053_v10 }
0x46d4   :  { %v10877_v14 = vpop.eup %10876 }
0x46d5   :  { %7028 = vrot.lane.b32.xlu0 %v10877_v14, %s11110_s0 }
0x46d8   :  { %v10879_v19 = vpop.eup %10878 }
0x46d9   :  { %7057 = vrot.lane.b32.xlu0 %v10879_v19, %s11110_s0 }
0x46f4   :  { %v7083_v25 = vpop.permute.xlu1 %7082 }
0x46f5   :  { %v7085_v60 = vadd.f32 %v7083_v25, %v6807_v22 }
0x46f7   :  { %10880 = vtanh.f32 %v7085_v60 }
0x46f8   :  { %10882 = vpow2.f32 %v9024_v34  ;;  %v7033_v62 = vpop.permute.xlu1 %7032  ;;  %v10998_v34 = vld [vmem:[%s11173_s14] ss:$0 sm:$0xff]  ;;  %s14232_s14 = sld [smem:[#allocation23_spill]] }
0x46fc   :  { %v7062_v35 = vpop.permute.xlu1 %7061 }
0x46fd   :  { %v7064_v53 = vmul.f32 %v10871_v5, %v7062_v35 }
0x4700   :  { %v7094_v8 = vpop.permute.xlu1 %7093 }
0x4701   :  { %v7096_v52 = vmul.f32 %v10875_v40, %v7094_v8 }
0x4704   :  { %v10881_v51 = vpop.eup %10880 }
0x4705   :  { %7089 = vrot.lane.b32.xlu0 %v10881_v51, %s11110_s0  ;;  %v10883_v43 = vpop.eup %10882 }
0x4706   :  { %v7013_v63 = vadd.f32 1.0, %v10883_v43 }
0x4708   :  { %10884 = vrcp.f32 %v7013_v63 }
0x4715   :  { %v10885_v15 = vpop.eup %10884 }
0x4716   :  { %v7026_v32 = vsub.f32 1.0, %v10885_v15  ;;  %v7035_v59 = vmul.f32 %v10885_v15, %v7033_v62 }
0x4747   :  { %v7029_v28 = vpop.permute.xlu0 %7028 }
0x4748   :  { %v7031_v58 = vmul.f32 %v7029_v28, %v7026_v32 }
0x474a   :  { %v13376_v21 = vadd.f32 %v7035_v59, %v7031_v58 }
0x474b   :  { %v7058_v9 = vpop.permute.xlu0 %7057 }
0x474c   :  { %v7060_v50 = vmul.f32 %v7058_v9, %v7055_v38  ;;  %7099 = vrot.lane.b32.xlu0 %v13376_v21, %s11112_s13 }
0x474e   :  { %v13380_v45 = vadd.f32 %v7064_v53, %v7060_v50 }
0x4750   :  { %7103 = vrot.lane.b32.xlu1 %v13380_v45, %s11111_s9 }
0x4777   :  { %v7090_v49 = vpop.permute.xlu0 %7089 }
0x4778   :  { %v7092_v1 = vmul.f32 %v7090_v49, %v7087_v20 }
0x477a   :  { %v13384_v4 = vadd.f32 %v7096_v52, %v7092_v1 }
0x477c   :  { %7107 = vrot.lane.b32.xlu0 %v13384_v4, %s11110_s0 }
0x47be   :  { %v7100_v12 = vpop.permute.xlu0 %7099 }
0x47bf   :  { %v7110_v5 = vpack.c.bf16 %v7100_v12, %v7100_v12 }
0x47c1   :  { %7114 = vrot.lane.b32.xlu1 %v7110_v5, %s11110_s0 }
0x47c2   :  { %v7104_v11 = vpop.permute.xlu1 %7103 }
0x47c3   :  { %v7111_v22 = vpack.c.bf16 %v7104_v11, %v7104_v11 }
0x47c5   :  { %7160 = vrot.lane.b32.xlu0 %v7111_v22, %s11110_s0 }
0x47ee   :  { %v7108_v30 = vpop.permute.xlu0 %7107 }
0x47ef   :  { %v7112_v27 = vpack.c.bf16 %v7108_v30, %v7108_v30 }
0x47f1   :  { %7206 = vrot.lane.b32.xlu1 %v7112_v27, %s11110_s0 }
0x47f5   :  { %6980 = vrot.lane.b32.xlu1 %v6847_v31, %s11111_s9 }
0x4833   :  { %v7115_v33 = vpop.permute.xlu1 %7114 }
0x4834   :  { %10349 = vmatmul.mubr.msk.bf16.vlgmr.msra.gmra.mxu1 %vm399_vm1, %v7115_v33 }
0x4835   :  { %10359 = vmatpush3.bf16.xpose.msra.mxu1 %v14183_v48  ;;  %10360 = vmatprep.mubr.msk.bf16.mxu1 %vm11108_vm0, %v14064_v2 }
0x4836   :  { %10372 = vmatprep.subr.bf16.mxu1 %v14064_v2 }
0x4837   :  { %v7161_v40 = vpop.permute.xlu0 %7160 }
0x4838   :  { %10355 = vmatmul.mubr.msk.bf16.vlgmr.msra.gmra.mxu0 %vm399_vm1, %v7161_v40 }
0x4839   :  { %10365 = vmatpush3.bf16.msra.mxu0 %v13070_v39  ;;  %10368 = vmatprep.mubr.msk.bf16.mxu0 %vm11108_vm0, %v14064_v2 }
0x483a   :  { %10366 = vmatprep.subr.bf16.mxu0 %v14064_v2 }
0x483d   :  { %10367 = vmatpush3.bf16.msra.mxu0 %v13077_v54 }
0x483e   :  { %10380 = vmatprep.subr.bf16.mxu0 %v14064_v2 }
0x4863   :  { %v7207_v48 = vpop.permute.xlu1 %7206 }
0x4864   :  { %10361 = vmatmul.mubr.msk.bf16.vlgmr.msra.gmra.mxu1 %vm399_vm1, %v7207_v48 }
0x4865   :  { %10373 = vmatpush3.bf16.msra.mxu1 %v13086_v18  ;;  %10376 = vmatprep.mubr.msk.bf16.mxu1 %vm11108_vm0, %v14064_v2  ;;  %v6972_v18 = vadd.f32 %v6847_v31, %v13358_v13 }
0x4866   :  { %10374 = vmatprep.subr.bf16.mxu1 %v14064_v2 }
0x4867   :  { %v9022_v10 = vmul.f32 -1.442695, %v6972_v18  ;;  %v6981_v59 = vpop.permute.xlu1 %6980 }
0x4869   :  { %10375 = vmatpush3.bf16.msra.mxu1 %v13093_v44  ;;  %10886 = vpow2.f32 %v9022_v10 }
0x486a   :  { %10392 = vmatprep.subr.bf16.mxu1 %v14064_v2 }
0x4876   :  { %v10887_v15 = vpop.eup %10886 }
0x4877   :  { %v6976_v28 = vadd.f32 1.0, %v10887_v15 }
0x4879   :  { %10888 = vrcp.f32 %v6976_v28 }
0x4886   :  { %v10889_v58 = vpop.eup %10888 }
0x4887   :  { %v6983_v35 = vmul.f32 %v10889_v58, %v6981_v59  ;;  %v6996_v31 = vmul.f32 %v10889_v58, %v13115_v17 }
0x48f4   :  { %v7153_v39 = vpop.f32.mrf.mxu1 }
0x48f5   :  { %v7251_v44 = vsel %vm1153_vm3, %v7153_v39, 0.0 }
0x48f6   :  { %v10350_v47 = vpop.f32.mrf.mxu1 }
0x48f8   :  { %v7156_v55 = vpop.f32.mrf.mxu1  ;;  %v7199_v54 = vpop.f32.mrf.mxu0 }
0x48f9   :  { %v7252_v14 = vsel %vm1153_vm3, %v7199_v54, 0.0 }
0x48fa   :  { %v10351_v0 = vpop.f32.mrf.mxu1  ;;  %v10356_v23 = vpop.f32.mrf.mxu0  ;;  %v7253_v19 = vadd.f32 %v7252_v14, %v7251_v44 }
0x48fb   :  { %v10999_v23 = vld [vmem:[%s11193_s6 + $0x18] sm:$0xff]  }
0x48fc   :  { %v7202_v37 = vpop.f32.mrf.mxu0 }
0x48fd   :  { %v11001_v37 = vld [vmem:[%s11193_s6 + $0x8] sm:$0xff]  }
0x48fe   :  { %v10357_v6 = vpop.f32.mrf.mxu0 }
0x48ff   :  { %v11002_v6 = vld [vmem:[%s11193_s6] sm:$0xff]  }
0x4924   :  { %v7245_v25 = vpop.f32.mrf.mxu1 }
0x4925   :  { %v7254_v60 = vsel %vm1153_vm3, %v7245_v25, 0.0 }
0x4926   :  { %v7255_v51 = vadd.f32 %v7254_v60, %v7253_v19  ;;  %v10362_v61 = vpop.f32.mrf.mxu1 }
0x4928   :  { %v7256_v43 = vadd.f32 %v10998_v34, %v7255_v51  ;;  %v7248_v63 = vpop.f32.mrf.mxu1 }
0x492a   :  { %9030 = vst.msk [vmem:[%s11296_s4 + $0xa] sm:$0x3] %vm1153_vm3, %v7256_v43  ;;  %v10363_v62 = vpop.f32.mrf.mxu1  ;;  %v7257_v32 = vsel %vm1153_vm3, %v7256_v43, -inf }
0x492b   :  { %7258 = vmax.xlane.f32.xlu0 %v7257_v32 }
0x4941   :  { %6985 = vrot.lane.b32.xlu0 %v6983_v35, %s11111_s9 }
0x49b4   :  { %v7259_v38 = vpop.xlane.xlu0 %7258 }
0x49b5   :  { %v7260_v9 = vsub.f32 %v7256_v43, %v7259_v38 }
0x49b7   :  { %v7261_v53 = vmul.f32 1.442695, %v7260_v9 }
0x49b8   :  { %v6986_v20 = vpop.permute.xlu0 %6985 }
0x49b9   :  { %10890 = vpow2.f32 %v7261_v53  ;;  %v6988_v52 = vadd.f32 %v6986_v20, %v13358_v13  ;;  %v6990_v13 = vsub.f32 1.0, %v10889_v58 }
0x49c6   :  { %v10891_v50 = vpop.eup %10890 }
0x49c7   :  { %v7263_v8 = vsel %vm1153_vm3, %v10891_v50, 0.0 }
0x49c8   :  { %7264 = vadd.xlane.f32.xlu1 %v7263_v8  ;;  %v14213_v8 = vld [vmem:[#allocation47_spill] sm:$0xff] }
0x4a51   :  { %v7265_v49 = vpop.xlane.xlu1 %7264 }
0x4a52   :  { %10892 = vrcp.f32 %v7265_v49 }
0x4a53   :  { %10894 = vtanh.f32 %v6988_v52 }
0x4a5f   :  { %v10893_v1 = vpop.eup %10892 }
0x4a60   :  { %v7267_v12 = vmul.f32 %v10893_v1, %v10891_v50  ;;  %v10895_v5 = vpop.eup %10894 }
0x4a62   :  { %7285 = vperm.xlu0 %10541, %v7267_v12   ;;  %7275 = vperm.xlu1 %10540, %v7267_v12  }
0x4a66   :  { %10542 = vset.pattern.permute.xlu0 %v14067_v46  ;;  %6992 = vrot.lane.b32.xlu1 %v10895_v5, %s11110_s0  ;;  %v14215_v5 = vld [vmem:[#allocation54_spill] sm:$0xff] }
0x4a67   :  { %7270 = vperm.xlu0 %10542, %v7267_v12   ;;  %10543 = vset.pattern.permute.xlu1 %v14067_v46 }
0x4add   :  { %v7276_v11 = vpop.permute.xlu1 %7275  ;;  %v7286_v30 = vpop.permute.xlu0 %7285 }
0x4ade   :  { %v7278_v22 = vmul.f32 %v7276_v11, %v13380_v45  ;;  %v7288_v29 = vmul.f32 %v7286_v30, %v13384_v4  ;;  %v14216_v11 = vld [vmem:[#allocation55_spill] sm:$0xff] }
0x4ae0   :  { %7280 = vrot.lane.b32.xlu1 %v7278_v22, %s11112_s13 }
0x4ae1   :  { %v6993_v27 = vpop.permute.xlu1 %6992 }
0x4ae2   :  { %v6995_v33 = vmul.f32 %v6993_v27, %v6990_v13  ;;  %v7271_v45 = vpop.permute.xlu0 %7270 }
0x4ae3   :  { %v7273_v39 = vmul.f32 %v7271_v45, %v13376_v21  ;;  %v11000_v21 = vld [vmem:[%s11193_s6 + $0x10] sm:$0xff]   ;;  %s14235_s6 = sld [smem:[#allocation25_spill]] }
0x4ae4   :  { %v13431_v40 = vadd.f32 %v6996_v31, %v6995_v33  ;;  %7290 = vrot.lane.b32.xlu1 %v7288_v29, %s11111_s9 }
0x4ae6   :  { %v7296_v46 = vpack.c.bf16 %v13431_v40, %v13431_v40 }
0x4ae8   :  { %7342 = vrot.lane.b32.xlu0 %v7296_v46, %s11110_s0 }
0x4b52   :  { %v7281_v48 = vpop.permute.xlu1 %7280 }
0x4b53   :  { %v7283_v47 = vadd.f32 %v7281_v48, %v7273_v39  ;;  %v14217_v48 = vld [vmem:[#allocation56_spill] sm:$0xff] }
0x4b56   :  { %v7291_v4 = vpop.permute.xlu1 %7290 }
0x4b57   :  { %v7293_v55 = vadd.f32 %v7291_v4, %v7283_v47 }
0x4b59   :  { %v7297_v54 = vpack.c.bf16 %v7293_v55, %v7293_v55 }
0x4b5a   :  { %v7343_v0 = vpop.permute.xlu0 %7342 }
0x4b5b   :  { %10369 = vmatmul.mubr.msk.bf16.vlgmr.msra.gmra.mxu0 %vm399_vm1, %v7297_v54  ;;  %10377 = vmatmul.mubr.msk.bf16.vlgmr.msra.gmra.mxu1 %vm399_vm1, %v7343_v0 }
0x4b5c   :  { %10381 = vmatpush3.bf16.msra.mxu0 %v10999_v23  ;;  %10388 = vmatprep.mubr.msk.bf16.mxu0 %vm11108_vm0, %v14064_v2  ;;  %v14218_v23 = vld [vmem:[#allocation60_spill] sm:$0xff] }
0x4b5d   :  { %10382 = vmatprep.subr.bf16.mxu0 %v14064_v2  ;;  %10393 = vmatpush3.bf16.msra.mxu1 %v13132_v42 }
0x4b5e   :  { %10394 = vmatprep.subr.bf16.mxu1 %v14064_v2  ;;  %10396 = vmatprep.mubr.msk.bf16.mxu1 %vm11108_vm0, %v14064_v2 }
0x4b60   :  { %10383 = vmatpush3.bf16.msra.mxu0 %v11000_v21 }
0x4b61   :  { %10384 = vmatprep.subr.bf16.mxu0 %v14064_v2  ;;  %10395 = vmatpush3.bf16.msra.mxu1 %v13141_v7 }
0x4b62   :  { %10400 = vmatprep.subr.bf16.mxu1 %v14064_v2 }
0x4b64   :  { %10385 = vmatpush3.bf16.msra.mxu0 %v11001_v37 }
0x4b65   :  { %10386 = vmatprep.subr.bf16.mxu0 %v14064_v2 }
0x4b68   :  { %10387 = vmatpush3.bf16.msra.mxu0 %v11002_v6 }
0x4b69   :  { %10408 = vmatprep.subr.bf16.mxu0 %v14064_v2 }
0x4c1b   :  { %v7335_v42 = vpop.f32.mrf.mxu0  ;;  %v7381_v18 = vpop.f32.mrf.mxu1 }
0x4c1c   :  { %v7382_v10 = vadd.f32 %v7381_v18, %v7335_v42  ;;  %v14219_v42 = vld [vmem:[#allocation59_spill] sm:$0xff] }
0x4c1d   :  { %v10370_v14 = vpop.f32.mrf.mxu0  ;;  %v10378_v44 = vpop.f32.mrf.mxu1 }
0x4c1e   :  { %v7387_v19 = vadd.f32 %v13150_v24, %v7382_v10 }
0x4c1f   :  { %v7338_v25 = vpop.f32.mrf.mxu0  ;;  %v7384_v60 = vpop.f32.mrf.mxu1 }
0x4c20   :  { %vm7388_vm12 = vcmp.ge.f32.partialorder %v7387_v19, 0.0  ;;  %v7389_v7 = vmul.f32 0.1, %v7387_v19  ;;  %v14220_v60 = vld [vmem:[#allocation41_spill] sm:$0xff] }
0x4c21   :  { %v10371_v51 = vpop.f32.mrf.mxu0  ;;  %v10379_v61 = vpop.f32.mrf.mxu1 }
0x4c22   :  { %v7390_v34 = vsel %vm7388_vm12, %v7387_v19, %v7389_v7 }
0x4c23   :  { %v7391_v43 = vpack.c.bf16 %v7390_v34, %v7390_v34 }
0x4c25   :  { %10389 = vmatmul.mubr.msk.bf16.vlgmr.msra.gmra.mxu0 %vm304_vm2, %v7391_v43 }
0x4c26   :  { %10409 = vmatpush3.bf16.msra.mxu0 %v13155_v26  ;;  %10412 = vmatprep.mubr.msk.bf16.mxu0 %vm11108_vm0, %v14064_v2 }
0x4c27   :  { %10410 = vmatprep.subr.bf16.mxu0 %v14064_v2 }
0x4c2a   :  { %10411 = vmatpush3.bf16.msra.mxu0 %v13162_v41 }
0x4c2b   :  { %10424 = vmatprep.subr.bf16.mxu0 %v14064_v2 }
0x4ce5   :  { %v7429_v24 = vpop.f32.mrf.mxu0 }
0x4ce6   :  { %v7430_v63 = vadd.f32 %v13167_v57, %v7429_v24 }
0x4ce7   :  { %v10390_v15 = vpop.f32.mrf.mxu0 }
0x4ce8   :  { %v7435_v62 = vpack.c.bf16 %v7430_v63, %v7430_v63  ;;  %v14222_v15 = vld [vmem:[#allocation61_spill] sm:$0xff] }
0x4ce9   :  { %v7432_v32 = vpop.f32.mrf.mxu0 }
0x4cea   :  { %10397 = vmatmul.mubr.msk.bf16.vlgmr.msra.gmra.mxu1 %vm399_vm1, %v7435_v62 }
0x4ceb   :  { %v10391_v28 = vpop.f32.mrf.mxu0  ;;  %10401 = vmatpush3.bf16.msra.mxu1 %v13172_v16  ;;  %10404 = vmatprep.mubr.msk.bf16.mxu1 %vm11108_vm0, %v14064_v2  ;;  %v14212_v16 = vld [vmem:[#allocation40_spill] sm:$0xff] }
0x4cec   :  { %10402 = vmatprep.subr.bf16.mxu1 %v14064_v2 }
0x4cef   :  { %10403 = vmatpush3.bf16.msra.mxu1 %v13179_v3  ;;  %v14214_v3 = vld [vmem:[#allocation48_spill] sm:$0xff] }
0x4cf0   :  { %10416 = vmatprep.subr.bf16.mxu1 %v14064_v2 }
0x4daa   :  { %v7473_v26 = vpop.f32.mrf.mxu1 }
0x4dab   :  { %v7486_v41 = vrot.slane %v7473_v26, %v14186_v36 }
0x4dac   :  { %v10398_v57 = vpop.f32.mrf.mxu1 }
0x4dad   :  { %v7487_v59 = vcombine.high %v7486_v41, %v7486_v41  ;;  %v7494_v58 = vrot.slane %v7486_v41, %v14186_v36 }
0x4dae   :  { %v7476_v35 = vpop.f32.mrf.mxu1 }
0x4daf   :  { %v7501_v38 = vrot.slane %v7487_v59, %v14186_v36  ;;  %v7505_v9 = vrot.slane %v7494_v58, %v14212_v16 }
0x4db0   :  { %v10399_v53 = vpop.f32.mrf.mxu1 }
0x4db1   :  { %v7509_v50 = vrot.slane %v7501_v38, %v14212_v16  ;;  %v7512_v20 = vadd.f32 %v7505_v9, %v14213_v8  ;;  %v13519_v38 = vld [vmem:[%s14221_s5 + $0x8] sm:$0x3] }
0x4db3   :  { %v7513_v49 = vadd.f32 %v7509_v50, %v14214_v3  ;;  %10896 = vtanh.f32 %v7512_v20  ;;  %v13527_v20 = vld [vmem:[%s14221_s5 + $0x10] sm:$0xff] }
0x4db5   :  { %10898 = vtanh.f32 %v7513_v49 }
0x4dc0   :  { %v10897_v52 = vpop.eup %10896 }
0x4dc2   :  { %v10899_v1 = vpop.eup %10898 }
0x4dc3   :  { %v7516_v12 = vpack.c.bf16 %v10899_v1, %v10897_v52  ;;  %v13532_v52 = vld [vmem:[%s14221_s5 + $0x18] sm:$0x3] }
0x4dc5   :  { %10405 = vmatmul.mubr.msk.bf16.vlgmr.msra.gmra.mxu1 %vm399_vm1, %v7516_v12 }
0x4dc6   :  { %10417 = vmatpush3.bf16.msra.mxu1 %v14215_v5  ;;  %10420 = vmatprep.mubr.msk.bf16.mxu1 %vm11108_vm0, %v14064_v2 }
0x4dc7   :  { %10418 = vmatprep.subr.bf16.mxu1 %v14064_v2 }
0x4dca   :  { %10419 = vmatpush3.bf16.msra.mxu1 %v14216_v11  ;;  %v262_v11 = vld [vmem:[%s14223_s21] sm:$0x3] }
0x4dcb   :  { %10432 = vmatprep.subr.bf16.mxu1 %v14064_v2 }
0x4dcd   :  { %10421 = vmatmul.mubr.msk.bf16.vlgmr.msra.gmra.mxu1 %vm399_vm1, %v7435_v62  ;;  %v1923_v62 = vrot.slane %v14222_v15, %v14186_v36 }
0x4dce   :  { %10440 = vmatprep.mubr.msk.bf16.mxu1 %vm11108_vm0, %v14064_v2 }
0x4dcf   :  { %v1931_v32 = vrot.slane %v1923_v62, %v14186_v36  ;;  %v1924_v28 = vcombine.high %v1923_v62, %v1923_v62 }
0x4dd1   :  { %v13514_v59 = vrot.slane %v1931_v32, %v14212_v16  ;;  %v1938_v58 = vrot.slane %v1924_v28, %v14186_v36 }
0x4dd3   :  { %v1950_v50 = vmul.f32 %v13514_v59, %v13519_v38  ;;  %v1946_v8 = vrot.slane %v1938_v58, %v14212_v16 }
0x4dd5   :  { %v1957_v3 = vsel %vm1956_vm13, %v1950_v50, 0.0  ;;  %v1951_v49 = vmul.f32 %v1946_v8, %v13527_v20  ;;  %v1952_v12 = vmul.f32 %v1946_v8, %v13532_v52 }
0x4dd7   :  { %v1960_v1 = vsel %vm399_vm1, %v1951_v49, 0.0  ;;  %v1963_v5 = vsel %vm1956_vm13, %v1952_v12, 0.0  ;;  %v14230_v12 = vld [vmem:[#allocation44_spill] sm:$0xff] }
0x4e85   :  { %v7554_v22 = vpop.f32.mrf.mxu1 }
0x4e86   :  { %10900 = vtanh.f32 %v7554_v22  ;;  %v1970_v22 = vrot.slane %v262_v11, %v14212_v16 }
0x4e87   :  { %v10406_v30 = vpop.f32.mrf.mxu1 }
0x4e88   :  { %v13540_v30 = vrot.slane %v262_v11, %v14220_v60  ;;  %v8021_v11 = vrot.slane %v13431_v40, %v14186_v36 }
0x4e89   :  { %v7557_v13 = vpop.f32.mrf.mxu1 }
0x4e8a   :  { %10902 = vtanh.f32 %v7557_v13  ;;  %v14224_v13 = vld [vmem:[#allocation49_spill] sm:$0xff]  ;;  %v8029_v40 = vrot.slane %v8021_v11, %v14186_v36 }
0x4e8b   :  { %v10407_v27 = vpop.f32.mrf.mxu1 }
0x4e8c   :  { %v13545_v27 = vrot.slane %v14224_v13, %v14186_v36 }
0x4e8d   :  { %v13489_v29 = vpop.f32.mrf.mxu1 }
0x4e8f   :  { %v10422_v31 = vpop.f32.mrf.mxu1 }
0x4e90   :  { %v14225_v31 = vld [vmem:[#allocation63_spill] sm:$0xff] }
0x4e91   :  { %v7755_v33 = vpop.f32.mrf.mxu1 }
0x4e92   :  { %v13549_v33 = vrot.slane %v14225_v31, %v14186_v36 }
0x4e93   :  { %v10901_v46 = vpop.eup %10900  ;;  %v10423_v45 = vpop.f32.mrf.mxu1 }
0x4e94   :  { %v7563_v39 = vmul.f32 %v14217_v48, %v10901_v46  ;;  %v3133_v46 = vrot.slane %v13545_v27, %v14186_v36  ;;  %v4305_v45 = vrot.slane %v13549_v33, %v14186_v36 }
0x4e96   :  { %v7565_v47 = vsel %vm399_vm1, %v7563_v39, 0.0  ;;  %v14226_v39 = vld [vmem:[#allocation53_spill] sm:$0xff] }
0x4e97   :  { %v10903_v4 = vpop.eup %10902  ;;  %7566 = vadd.xlane.f32.xlu1 %v7565_v47  ;;  %v5469_v47 = vrot.slane %v14226_v39, %v14186_v36 }
0x4e98   :  { %v7564_v55 = vmul.f32 %v14217_v48, %v10903_v4  ;;  %v13556_v48 = vrot.slane %v3133_v46, %v14212_v16  ;;  %v13561_v4 = vrot.slane %v4305_v45, %v14212_v16 }
0x4e9a   :  { %v7568_v54 = vsel %vm399_vm1, %v7564_v55, 0.0  ;;  %v3152_v55 = vmul.f32 %v13556_v48, %v13519_v38 }
0x4e9b   :  { %7569 = vadd.xlane.f32.xlu0 %v7568_v54  ;;  %v5477_v54 = vrot.slane %v5469_v47, %v14186_v36 }
0x4f20   :  { %v7567_v0 = vpop.xlane.xlu1 %7566 }
0x4f21   :  { %v7571_v21 = vadd.f32 %v7567_v0, %v14218_v23  ;;  %v5470_v0 = vcombine.high %v5469_v47, %v5469_v47 }
0x4f23   :  { %v7578_v18 = vrot.slane %v7571_v21, %v14219_v42 }
0x4f24   :  { %v7570_v37 = vpop.xlane.xlu0 %7569 }
0x4f25   :  { %v7572_v6 = vadd.f32 %v7570_v37, %v14218_v23  ;;  %v4324_v23 = vmul.f32 %v13561_v4, %v13519_v38  ;;  %v13570_v37 = vrot.slane %v5477_v54, %v14212_v16 }
0x4f27   :  { %v7582_v10 = vrot.slane %v7572_v6, %v14219_v42 }
0x4f29   :  { %v7583_v14 = vsel %vm1649_vm5, %v7582_v10, %v7578_v18  ;;  %v6641_v18 = vrot.slane %v13297_v56, %v14186_v36  ;;  %v4330_v10 = vsel %vm1956_vm13, %v4324_v23, 0.0 }
0x4f2a   :  { %v7585_v44 = vsel %vm1652_vm6, %v7583_v14, -inf  ;;  %v13577_v14 = vld [vmem:[%s14221_s5] sm:$0xff] }
0x4f2b   :  { %7586 = vmax.xlane.f32.xlu0 %v7585_v44  ;;  %v5495_v44 = vmul.f32 %v13570_v37, %v13577_v14 }
0x4fb4   :  { %v7587_v19 = vpop.xlane.xlu0 %7586 }
0x4fb5   :  { %v7592_v25 = vrot.slane %v7587_v19, %v14212_v16  ;;  %v7596_v7 = vrot.slane %v7587_v19, %v14220_v60 }
0x4fb7   :  { %v7599_v51 = vsub.f32 %v7571_v21, %v7592_v25  ;;  %v7600_v61 = vsub.f32 %v7572_v6, %v7596_v7  ;;  %v3158_v21 = vsel %vm1956_vm13, %v3152_v55, 0.0  ;;  %v5484_v6 = vrot.slane %v5470_v0, %v14186_v36 }
0x4fb8   :  { %v6649_v25 = vrot.slane %v6641_v18, %v14186_v36  ;;  %v6642_v7 = vcombine.high %v6641_v18, %v6641_v18 }
0x4fb9   :  { %v7601_v34 = vmul.f32 1.442695, %v7599_v51  ;;  %v7603_v43 = vmul.f32 1.442695, %v7600_v61  ;;  %v13582_v19 = vrot.slane %v5484_v6, %v14212_v16  ;;  %v5499_v51 = vsel %vm399_vm1, %v5495_v44, 0.0 }
0x4fba   :  { %v13589_v61 = vrot.slane %v6649_v25, %v14212_v16 }
0x4fbb   :  { %10904 = vpow2.f32 %v7601_v34  ;;  %v5497_v56 = vmul.f32 %v13582_v19, %v13527_v20  ;;  %v6656_v34 = vrot.slane %v6642_v7, %v14186_v36 }
0x4fbc   :  { %10906 = vpow2.f32 %v7603_v43  ;;  %v6667_v15 = vmul.f32 %v13589_v61, %v13577_v14 }
0x4fbd   :  { %v5505_v43 = vsel %vm399_vm1, %v5497_v56, 0.0  ;;  %v13596_v62 = vrot.slane %v6656_v34, %v14212_v16 }
0x4fbe   :  { %v6671_v32 = vsel %vm399_vm1, %v6667_v15, 0.0 }
0x4fbf   :  { %v6669_v28 = vmul.f32 %v13596_v62, %v13527_v20 }
0x4fc8   :  { %v13503_v24 = vpop.eup %10904 }
0x4fc9   :  { %v13505_v63 = vpop.eup %10906  ;;  %7608 = vperm.xlu1 %10543, %v13503_v24  }
0x4fca   :  { %7611 = vperm.xlu0 %10542, %v13505_v63  }
0x5044   :  { %v7609_v26 = vpop.permute.xlu1 %7608 }
0x5045   :  { %v7612_v41 = vpop.permute.xlu0 %7611  ;;  %v7616_v57 = vrot.slane %v7609_v26, %v14219_v42  ;;  %v6677_v26 = vsel %vm399_vm1, %v6669_v28, 0.0 }
0x5046   :  { %v7620_v35 = vrot.slane %v7612_v41, %v14219_v42 }
0x5048   :  { %v7621_v9 = vsel %vm1649_vm5, %v7620_v35, %v7616_v57  ;;  %v14227_v35 = vld [vmem:[#allocation62_spill] sm:$0xff] }
0x5049   :  { %v7623_v53 = vsel %vm1652_vm6, %v7621_v9, 0.0  ;;  %v7929_v9 = vrot.slane %v14227_v35, %v14186_v36  ;;  %vm8096_vm6 = vcmask 1043456  }
0x504a   :  { %7624 = vadd.xlane.f32.xlu1 %v7623_v53  ;;  %v14228_v53 = vld [vmem:[#allocation50_spill] sm:$0xff] }
0x504b   :  { %v7952_v50 = vrot.slane %v14228_v53, %v14186_v36  ;;  %v7930_v8 = vcombine.high %v7929_v9, %v7929_v9 }
0x504d   :  { %v7960_v13 = vrot.slane %v7952_v50, %v14186_v36  ;;  %v7944_v46 = vrot.slane %v7930_v8, %v14186_v36 }
0x504e   :  { %1958 = vadd.xlane.f32.xlu1 %v1957_v3  ;;  %v14229_v3 = vld [vmem:[#allocation45_spill] sm:$0xff] }
0x504f   :  { %v7975_v49 = vrot.slane %v14229_v3, %v14186_v36  ;;  %v8044_v44 = vrot.slane %v7944_v46, %v14212_v16 }
0x5051   :  { %v7976_v45 = vcombine.high %v7975_v49, %v7975_v49  ;;  %v7983_v39 = vrot.slane %v7975_v49, %v14186_v36 }
0x5052   :  { %1961 = vadd.xlane.f32.xlu1 %v1960_v1  ;;  %v7998_v1 = vrot.slane %v13115_v17, %v14186_v36 }
0x5053   :  { %v7990_v25 = vrot.slane %v7976_v45, %v14186_v36 }
0x5054   :  { %v7999_v47 = vcombine.high %v7998_v1, %v7998_v1  ;;  %v8006_v17 = vrot.slane %v7998_v1, %v14186_v36  ;;  %v10600_v1 = vld [vmem:[%s14231_s3 + $0x18] sm:$0xff]  }
0x5055   :  { %10433 = vmatpush3.bf16.msra.mxu1 %v10600_v1 }
0x5056   :  { %1964 = vadd.xlane.f32.xlu1 %v1963_v5  ;;  %v7904_v5 = vrot.slane %v14230_v12, %v14186_v36  ;;  %v8013_v56 = vrot.slane %v7999_v47, %v14186_v36  ;;  %10434 = vmatprep.subr.bf16.mxu1 %v14064_v2 }
0x5058   :  { %v7905_v0 = vcombine.high %v7904_v5, %v7904_v5  ;;  %v7912_v6 = vrot.slane %v7904_v5, %v14186_v36  ;;  %v10601_v5 = vld [vmem:[%s14231_s3 + $0x10] sm:$0xff]  }
0x5059   :  { %10435 = vmatpush3.bf16.msra.mxu1 %v10601_v5 }
0x505a   :  { %10436 = vmatprep.subr.bf16.mxu1 %v14064_v2 }
0x5067   :  { %1972 = vbcast.lane.b32.xlu1 %v1970_v22, 256 }
0x506b   :  { %1976 = vbcast.lane.b32.xlu1 %v1970_v22, 264  ;;  %v7953_v22 = vcombine.high %v7952_v50, %v7952_v50 }
0x506d   :  { %v7967_v18 = vrot.slane %v7953_v22, %v14186_v36  ;;  %v10603_v22 = vld [vmem:[%s14231_s3] sm:$0xff]  }
0x506f   :  { %1987 = vbcast.lane.b32.xlu1 %v13540_v30, 264 }
0x5093   :  { %3159 = vadd.xlane.f32.xlu1 %v3158_v21  ;;  %v8022_v21 = vcombine.high %v8021_v11, %v8021_v11  ;;  %v10602_v11 = vld [vmem:[%s14231_s3 + $0x8] sm:$0xff]  }
0x5094   :  { %10437 = vmatpush3.bf16.msra.mxu1 %v10602_v11 }
0x5095   :  { %v8036_v34 = vrot.slane %v8022_v21, %v14186_v36  ;;  %10438 = vmatprep.subr.bf16.mxu1 %v14064_v2 }
0x5097   :  { %4331 = vadd.xlane.f32.xlu1 %v4330_v10  ;;  %v8050_v10 = vrot.slane %v7960_v13, %v14212_v16 }
0x5098   :  { %10439 = vmatpush3.bf16.msra.mxu1 %v10603_v22 }
0x5099   :  { %10460 = vmatprep.subr.bf16.mxu1 %v14064_v2 }
0x509b   :  { %5500 = vadd.xlane.f32.xlu1 %v5499_v51  ;;  %v8070_v51 = vrot.slane %v8006_v17, %v14212_v16  ;;  %v11004_v17 = vld [vmem:[%s11246_s27 + $0x8] sm:$0xff] }
0x509f   :  { %5506 = vadd.xlane.f32.xlu1 %v5505_v43  ;;  %v8080_v43 = vrot.slane %v8029_v40, %v14212_v16 }
0x50a3   :  { %6672 = vadd.xlane.f32.xlu1 %v6671_v32  ;;  %v8054_v32 = vrot.slane %v7967_v18, %v14212_v16 }
0x50a7   :  { %6678 = vadd.xlane.f32.xlu1 %v6677_v26 }
0x50d3   :  { %v7625_v41 = vpop.xlane.xlu1 %7624 }
0x50d4   :  { %v7630_v57 = vrot.slane %v7625_v41, %v14212_v16  ;;  %v7634_v58 = vrot.slane %v7625_v41, %v14220_v60  ;;  %v7937_v60 = vrot.slane %v7929_v9, %v14186_v36  ;;  %v8064_v41 = vrot.slane %v7990_v25, %v14212_v16 }
0x50d5   :  { %v8084_v9 = vrot.slane %v8036_v34, %v14212_v16 }
0x50d6   :  { %10908 = vrcp.f32 %v7630_v57  ;;  %v8040_v23 = vrot.slane %v7937_v60, %v14212_v16 }
0x50d7   :  { %10910 = vrcp.f32 %v7634_v58  ;;  %v8074_v58 = vrot.slane %v8013_v56, %v14212_v16 }
0x50d8   :  { %v8088_v15 = vsel %vm8087_vm14, %v7912_v6, %v8040_v23 }
0x50d9   :  { %v8091_v28 = vsel %vm8090_vm15, %v8088_v15, %v8050_v10 }
0x50e3   :  { %v10909_v31 = vpop.eup %10908 }
0x50e4   :  { %v7638_v55 = vmul.f32 %v10909_v31, %v13503_v24  ;;  %v10911_v54 = vpop.eup %10910  ;;  %v8060_v24 = vrot.slane %v7983_v39, %v14212_v16  ;;  %v11003_v31 = vld [vmem:[%s11246_s27] sm:$0xff]  ;;  %s11116_s27 = smov [#allocation3]  }
0x50e5   :  { %v7640_v7 = vmul.f32 %v10911_v54, %v13505_v63  ;;  %v7919_v63 = vrot.slane %v7905_v0, %v14186_v36  ;;  %s8751_s4 = sshll.u32 %s11116_s27, 4  ;;  %s8752_s4 = int_to_ptr.vmem [resolvable:$true] %s8751_s4 }
0x50e6   :  { %7643 = vperm.xlu0 %10542, %v7638_v55   ;;  %v8094_v26 = vsel %vm8093_vm4, %v8091_v28, %v8060_v24  ;;  %s11008_s15 = scalar_lea.vmem %s8752_s4, 192  ;;  %p11013_p1 = scmp.lt.s32.totalorder %s8752_s4, %s8752_s4 }
0x50e7   :  { %v8097_v57 = vsel %vm8096_vm6, %v8094_v26, %v8070_v51  ;;  %v8089_v53 = vsel %vm8087_vm14, %v7919_v63, %v8044_v44  ;;  %p11009_p0 = scmp.ne.s32.totalorder %s8752_s4, %s11008_s15  ;;  %p11014_p2 = scmp.lt.s32.totalorder %s11008_s15, %s11008_s15 }
0x50e8   :  { %v8100_v35 = vsel %vm8099_vm8, %v8097_v57, %v8080_v43  ;;  %v8092_v50 = vsel %vm8090_vm15, %v8089_v53, %v8054_v32 }
0x50e9   :  { %v8095_v8 = vsel %vm8093_vm4, %v8092_v50, %v8064_v41  ;;  %v8516_v12 = vrot.slane %v8100_v35, 2  ;;  %v8110_v0 = vrot.slane %v8100_v35, 1  ;;  %p11015_p3 = por %p11014_p2, %p11013_p1 }
0x50ea   :  { %7648 = vperm.xlu0 %10542, %v7640_v7   ;;  %v8098_v3 = vsel %vm8096_vm6, %v8095_v8, %v8074_v58 }
0x50eb   :  { %v8101_v49 = vsel %vm8099_vm8, %v8098_v3, %v8084_v9  ;;  %p11016_p4 = pnand %p11015_p3, %p11009_p0 }
0x50ec   :  { %v8517_v60 = vrot.slane %v8101_v49, 2  ;;  %v8111_v7 = vrot.slane %v8101_v49, 1 }
0x50ee   :  { %8104 = vrot.lane.b32.xlu0 %v8100_v35, %s11110_s0 }
0x50f2   :  { %8106 = vrot.lane.b32.xlu0 %v8101_v49, %s11110_s0 }
0x50f6   :  { %8518 = vrot.lane.b32.xlu0 %v8516_v12, %s11112_s13 }
0x50fa   :  { %8520 = vrot.lane.b32.xlu0 %v8517_v60, %s11112_s13 }
0x5161   :  { %v7644_v13 = vpop.permute.xlu0 %7643 }
0x5162   :  { %v7651_v46 = vmul.f32 %v11003_v31, %v7644_v13 }
0x5164   :  { %v7653_v45 = vsel %vm399_vm1, %v7651_v46, 0.0 }
0x5165   :  { %v7654_v39 = vrot.slane %v7653_v45, 4  ;;  %v7649_v47 = vpop.permute.xlu0 %7648 }
0x5166   :  { %v7652_v55 = vmul.f32 %v11004_v17, %v7649_v47 }
0x5167   :  { %v7655_v54 = vadd.f32 %v7654_v39, %v7653_v45 }
0x5168   :  { %v7660_v23 = vsel %vm399_vm1, %v7652_v55, 0.0 }
0x5169   :  { %v7656_v21 = vrot.slane %v7655_v54, 2  ;;  %v7661_v40 = vrot.slane %v7660_v23, 4  ;;  %v8105_v6 = vpop.permute.xlu0 %8104 }
0x516a   :  { %v8114_v18 = vsel %vm399_vm1, %v8105_v6, %v8110_v0 }
0x516b   :  { %v7657_v10 = vadd.f32 %v7656_v21, %v7655_v54  ;;  %v7662_v44 = vadd.f32 %v7661_v40, %v7660_v23  ;;  %v8118_v25 = vcombine.high %v8114_v18, %v8114_v18  ;;  %v8125_v24 = vrot.slane %v8114_v18, %v14186_v36 }
0x516d   :  { %v7658_v51 = vrot.slane %v7657_v10, 1  ;;  %v7663_v56 = vrot.slane %v7662_v44, 2  ;;  %v8133_v34 = vcombine.high %v8125_v24, %v8125_v24  ;;  %v8107_v43 = vpop.permute.xlu0 %8106  ;;  %v8132_v15 = vrot.slane %v8118_v25, %v14186_v36 }
0x516e   :  { %v8115_v32 = vsel %vm399_vm1, %v8107_v43, %v8111_v7  ;;  %v8140_v26 = vrot.slane %v8125_v24, %v14186_v36 }
0x516f   :  { %v7659_v28 = vadd.f32 %v7658_v51, %v7657_v10  ;;  %v7664_v63 = vadd.f32 %v7663_v56, %v7662_v44  ;;  %v8154_v41 = vrot.slane %v8133_v34, %v14186_v36  ;;  %v8157_v57 = vcombine.high %v8115_v32, %v8115_v32  ;;  %v11005_v34 = vld [vmem:[%s14079_s28 + $0x8] sm:$0xff]  }
0x5170   :  { %v8164_v58 = vrot.slane %v8115_v32, %v14186_v36  ;;  %v8147_v8 = vrot.slane %v8132_v15, %v14186_v36 }
0x5171   :  { %v7665_v35 = vrot.slane %v7664_v63, 1  ;;  %v8204_v9 = vcombine.low %v8140_v26, %v8154_v41  ;;  %v9039_v53 = vcombine.high %v8140_v26, %v8154_v41  ;;  %v8519_v50 = vpop.permute.xlu0 %8518  ;;  %v8171_v3 = vrot.slane %v8157_v57, %v14186_v36  ;;  %v11007_v57 = vld [vmem:[%s14080_s2] ss:$0 sm:$0xff] }
0x5172   :  { %v8172_v49 = vcombine.high %v8164_v58, %v8164_v58  ;;  %v8179_v1 = vrot.slane %v8164_v58, %v14186_v36  ;;  %v7667_v12 = vpack.c.bf16 %v7659_v28, %v7659_v28  ;;  %v8524_v45 = vsel %vm304_vm2, %v8114_v18, %v8519_v50  ;;  %v11006_v28 = vld [vmem:[%s14079_s28] sm:$0xff]  }
0x5173   :  { %v7666_v5 = vadd.f32 %v7665_v35, %v7664_v63  ;;  %v8214_v60 = vrot.slane %v8204_v9, %v14186_v36  ;;  %v8221_v11 = vrot.slane %v9039_v53, %v14186_v36  ;;  %v8186_v47 = vrot.slane %v8171_v3, %v14186_v36  ;;  %v9040_v9 = vld [vmem:[%s14232_s14] ss:$0 sm:$0xff] }
0x5174   :  { %v8193_v22 = vrot.slane %v8172_v49, %v14186_v36  ;;  %v8194_v13 = vcombine.high %v8179_v1, %v8179_v1  ;;  %v8206_v31 = vcombine.low %v8147_v8, %v8179_v1  ;;  %v7671_v0 = vunpack.c.l.b16 %v7667_v12 }
0x5175   :  { %v7668_v46 = vpack.c.bf16 %v7666_v5, %v7666_v5  ;;  %v8521_v39 = vpop.permute.xlu0 %8520  ;;  %v8236_v40 = vcombine.low %v8214_v60, %v8221_v11 }
0x5176   :  { %v8195_v17 = vcombine.high %v8193_v22, %v8193_v22  ;;  %v8207_v55 = vcombine.low %v8193_v22, %v8194_v13  ;;  %v8525_v54 = vsel %vm304_vm2, %v8115_v32, %v8521_v39  ;;  %v8228_v6 = vrot.slane %v8206_v31, %v14186_v36 }
0x5177   :  { %v7672_v23 = vunpack.c.l.b16 %v7668_v46  ;;  %v13680_v21 = vcombine.low %v8524_v45, %v8525_v54  ;;  %v8244_v51 = vrot.slane %v8236_v40, %v14186_v36 }
0x5178   :  { %v8235_v10 = vrot.slane %v8207_v55, %v14186_v36  ;;  %v8253_v44 = vcombine.low %v8195_v17, %v8186_v47 }
0x5179   :  { %v7673_v18 = vsel %vm1649_vm5, %v7672_v23, %v7671_v0 }
0x517a   :  { %v7674_v25 = vpack.c.b16 %v7673_v18, %v7673_v18  ;;  %v8237_v24 = vcombine.low %v8228_v6, %v8235_v10  ;;  %v8260_v7 = vrot.slane %v8253_v44, %v14186_v36  ;;  %v10604_v10 = vld [vmem:[%s14233_s19 + $0x28] sm:$0xff]  }
0x517c   :  { %v8251_v56 = vrot.slane %v8237_v24, %v14186_v36  ;;  %10413 = vmatmul.mubr.msk.bf16.vlgmr.msra.gmra.mxu0 %vm399_vm1, %v7674_v25  ;;  %v8267_v15 = vrot.slane %v8260_v7, %v14186_v36 }
0x517d   :  { %10425 = vmatpush3.bf16.msra.mxu0 %v11005_v34  ;;  %10428 = vmatprep.mubr.msk.bf16.mxu0 %vm11108_vm0, %v14064_v2 }
0x517e   :  { %v8252_v43 = vcombine.low %v8244_v51, %v8251_v56  ;;  %10426 = vmatprep.subr.bf16.mxu0 %v14064_v2 }
0x5180   :  { %v8270_v32 = vpack.c.bf16 %v8267_v15, %v8252_v43 }
0x5181   :  { %10427 = vmatpush3.bf16.msra.mxu0 %v11006_v28 }
0x5182   :  { %10441 = vmatmul.mubr.msk.bf16.vlgmr.msra.gmra.mxu1 %vm304_vm2, %v8270_v32  ;;  %10444 = vmatprep.subr.bf16.mxu0 %v14064_v2  ;;  %v10605_v32 = vld [vmem:[%s14233_s19 + $0x20] sm:$0xff]  }
0x5183   :  { %10468 = vmatprep.mubr.msk.bf16.mxu1 %vm11108_vm0, %v14064_v2 }
0x523c   :  { %v7712_v63 = vpop.f32.mrf.mxu0 }
0x523d   :  { %v7753_v26 = vadd.f32 %v13489_v29, %v7712_v63 }
0x523e   :  { %v10414_v41 = vpop.f32.mrf.mxu0 }
0x523f   :  { %v7758_v58 = vadd.f32 %v11007_v57, %v7753_v26 }
0x5240   :  { %v7715_v35 = vpop.f32.mrf.mxu0 }
0x5241   :  { %10912 = vtanh.f32 %v7758_v58 }
0x5242   :  { %v8339_v53 = vpop.f32.mrf.mxu1  ;;  %v10415_v50 = vpop.f32.mrf.mxu0 }
0x5243   :  { %v8340_v8 = vadd.f32 %v9040_v9, %v8339_v53 }
0x5244   :  { %v10442_v3 = vpop.f32.mrf.mxu1 }
0x5245   :  { %v8346_v49 = vmax.f32 %v8340_v8, 0.0 }
0x5246   :  { %v8342_v1 = vpop.f32.mrf.mxu1 }
0x5247   :  { %v8350_v12 = vcombine.high %v8346_v49, %v8346_v49  ;;  %v8357_v5 = vrot.slane %v8346_v49, %v14186_v36  ;;  %v8343_v60 = vadd.f32 %v9040_v9, %v8342_v1  ;;  %v10606_v49 = vld [vmem:[%s14233_s19 + $0x18] sm:$0xff]  }
0x5248   :  { %v10443_v11 = vpop.f32.mrf.mxu1 }
0x5249   :  { %v8364_v29 = vrot.slane %v8350_v12, %v14186_v36  ;;  %v8365_v22 = vcombine.high %v8357_v5, %v8357_v5  ;;  %v8347_v13 = vmax.f32 %v8343_v60, 0.0  ;;  %v8373_v31 = vrot.slane %v8357_v5, %v14186_v36 }
0x524b   :  { %v8366_v46 = vcombine.high %v8364_v29, %v8364_v29  ;;  %v8380_v45 = vrot.slane %v8364_v29, %v14186_v36  ;;  %v8387_v39 = vrot.slane %v8365_v22, %v14186_v36  ;;  %v8405_v47 = vrot.slane %v8347_v13, %v14186_v36 }
0x524d   :  { %v8394_v17 = vrot.slane %v8366_v46, %v14186_v36  ;;  %v8396_v55 = vcombine.high %v8380_v45, %v8380_v45  ;;  %v8421_v54 = vcombine.low %v8373_v31, %v8387_v39  ;;  %v9046_v0 = vcombine.high %v8373_v31, %v8387_v39  ;;  %v10607_v31 = vld [vmem:[%s14233_s19 + $0x10] sm:$0xff]  }
0x524e   :  { %v10913_v23 = vpop.eup %10912  ;;  %v8443_v40 = vrot.slane %v8380_v45, %v14186_v36  ;;  %v8406_v6 = vcombine.high %v8405_v47, %v8405_v47  ;;  %v8413_v24 = vrot.slane %v8405_v47, %v14186_v36 }
0x524f   :  { %v7760_v44 = vpack.c.bf16 %v10913_v23, %v10913_v23  ;;  %v8429_v18 = vrot.slane %v8421_v54, %v14186_v36  ;;  %v8436_v25 = vrot.slane %v9046_v0, %v14186_v36  ;;  %v8460_v7 = vcombine.low %v8394_v17, %v8396_v55  ;;  %v10608_v55 = vld [vmem:[%s14233_s19 + $0x8] sm:$0xff]  }
0x5250   :  { %v8398_v51 = vcombine.high %v8394_v17, %v8394_v17  ;;  %v8420_v56 = vrot.slane %v8406_v6, %v14186_v36  ;;  %v7813_v34 = vrot.slane %v10913_v23, %v14186_v36  ;;  %v8458_v41 = vrot.slane %v8443_v40, %v14186_v36  ;;  %v10609_v40 = vld [vmem:[%s14233_s19] sm:$0xff]  }
0x5251   :  { %v8444_v43 = vcombine.low %v8429_v18, %v8436_v25  ;;  %10429 = vmatmul.mubr.msk.bf16.vlgmr.msra.gmra.mxu0 %vm399_vm1, %v7760_v44  ;;  %v8468_v58 = vrot.slane %v8460_v7, %v14186_v36  ;;  %v8542_v18 = vpack.c.bf16 %v13680_v21, %v13680_v21 }
0x5252   :  { %v8461_v15 = vcombine.low %v8398_v51, %v8413_v24  ;;  %10445 = vmatpush3.bf16.msra.mxu0 %v10604_v10  ;;  %v7821_v28 = vrot.slane %v7813_v34, %v14186_v36  ;;  %v7814_v63 = vcombine.high %v7813_v34, %v7813_v34  ;;  %v8482_v57 = vrot.slane %v8420_v56, %v14186_v36 }
0x5253   :  { %v8451_v26 = vrot.slane %v8444_v43, %v14186_v36  ;;  %10446 = vmatprep.subr.bf16.mxu0 %v14064_v2  ;;  %10456 = vmatprep.mubr.msk.bf16.mxu0 %vm11108_vm0, %v14064_v2  ;;  %vm8586_vm0 = vcmask 785408  }
0x5254   :  { %v8475_v35 = vrot.slane %v8461_v15, %v14186_v36  ;;  %v13728_v9 = vrot.slane %v7821_v28, %v14212_v16  ;;  %v7828_v53 = vrot.slane %v7814_v63, %v14186_v36  ;;  %v8497_v12 = vrot.slane %v8482_v57, %v14186_v36  ;;  %v10610_v15 = vld [vmem:[%s14234_s24 + $0x18] sm:$0xff]   ;;  %v9047_v28 = vld [vmem:[%s14235_s6] ss:$0 sm:$0xff] }
0x5255   :  { %v8459_v50 = vcombine.low %v8451_v26, %v8458_v41  ;;  %10461 = vmatpush3.bf16.msra.mxu1 %v10610_v15  ;;  %v10612_v26 = vld [vmem:[%s14234_s24 + $0x8] sm:$0xff]  }
0x5256   :  { %v8483_v8 = vcombine.low %v8468_v58, %v8475_v35  ;;  %10447 = vmatpush3.bf16.msra.mxu0 %v10605_v32  ;;  %v7839_v3 = vmul.f32 %v13728_v9, %v13577_v14  ;;  %v13735_v1 = vrot.slane %v7828_v53, %v14212_v16  ;;  %10462 = vmatprep.subr.bf16.mxu1 %v14064_v2  ;;  %v10611_v32 = vld [vmem:[%s14234_s24 + $0x10] sm:$0xff]  }
0x5257   :  { %10448 = vmatprep.subr.bf16.mxu0 %v14064_v2  ;;  %v8502_v5 = vsel %vm8501_vm9, %v8459_v50, -inf }
0x5258   :  { %v8490_v60 = vrot.slane %v8483_v8, %v14186_v36  ;;  %v7843_v11 = vsel %vm399_vm1, %v7839_v3, 0.0  ;;  %v7841_v29 = vmul.f32 %v13735_v1, %v13527_v20  ;;  %v8503_v22 = vrot.slane %v8502_v5, 4 }
0x5259   :  { %7844 = vadd.xlane.f32.xlu1 %v7843_v11  ;;  %10463 = vmatpush3.bf16.msra.mxu1 %v10611_v32 }
0x525a   :  { %v8498_v13 = vcombine.low %v8490_v60, %v8497_v12  ;;  %10449 = vmatpush3.bf16.msra.mxu0 %v10606_v49  ;;  %v8504_v46 = vmax.f32 %v8502_v5, %v8503_v22  ;;  %v7849_v45 = vsel %vm399_vm1, %v7841_v29, 0.0  ;;  %10464 = vmatprep.subr.bf16.mxu1 %v14064_v2  ;;  %v10613_v49 = vld [vmem:[%s14234_s24] sm:$0xff]  }
0x525b   :  { %10450 = vmatprep.subr.bf16.mxu0 %v14064_v2 }
0x525c   :  { %v8505_v39 = vrot.slane %v8504_v46, 2  ;;  %v8509_v47 = vsel %vm8501_vm9, %v8498_v13, -inf }
0x525d   :  { %7850 = vadd.xlane.f32.xlu1 %v7849_v45  ;;  %v8510_v17 = vrot.slane %v8509_v47, 4  ;;  %10465 = vmatpush3.bf16.msra.mxu1 %v10612_v26 }
0x525e   :  { %10451 = vmatpush3.bf16.msra.mxu0 %v10607_v31  ;;  %v8506_v54 = vmax.f32 %v8504_v46, %v8505_v39  ;;  %10466 = vmatprep.subr.bf16.mxu1 %v14064_v2 }
0x525f   :  { %10452 = vmatprep.subr.bf16.mxu0 %v14064_v2  ;;  %v8511_v0 = vmax.f32 %v8509_v47, %v8510_v17  ;;  %v1949_v47 = vmul.f32 %v13514_v59, %v13577_v14  ;;  %v4298_v59 = vcombine.high %v13549_v33, %v13549_v33 }
0x5260   :  { %v8507_v6 = vrot.slane %v8506_v54, 1 }
0x5261   :  { %v8512_v23 = vrot.slane %v8511_v0, 2  ;;  %10467 = vmatpush3.bf16.msra.mxu1 %v10613_v49  ;;  %v1953_v17 = vsel %vm399_vm1, %v1949_v47, 0.0 }
0x5262   :  { %10453 = vmatpush3.bf16.msra.mxu0 %v10608_v55  ;;  %v8508_v25 = vmax.f32 %v8506_v54, %v8507_v6  ;;  %v3126_v55 = vcombine.high %v13545_v27, %v13545_v27  ;;  %v4312_v27 = vrot.slane %v4298_v59, %v14186_v36 }
0x5263   :  { %10454 = vmatprep.subr.bf16.mxu0 %v14064_v2  ;;  %v8513_v10 = vmax.f32 %v8511_v0, %v8512_v23  ;;  %v3151_v0 = vmul.f32 %v13556_v48, %v13577_v14  ;;  %v4323_v48 = vmul.f32 %v13561_v4, %v13577_v14  ;;  %v1959_v4 = vpop.xlane.xlu1 %1958  ;;  %v5498_v14 = vmul.f32 %v13582_v19, %v13532_v52 }
0x5264   :  { %v3140_v54 = vrot.slane %v3126_v55, %v14186_v36 }
0x5265   :  { %v8514_v44 = vrot.slane %v8513_v10, 1 }
0x5266   :  { %10455 = vmatpush3.bf16.msra.mxu0 %v10609_v40  ;;  %v3148_v23 = vrot.slane %v3140_v54, %v14212_v16  ;;  %v3155_v40 = vsel %vm399_vm1, %v3151_v0, 0.0 }
0x5267   :  { %v8515_v24 = vmax.f32 %v8513_v10, %v8514_v44 }
0x5268   :  { %v3153_v6 = vmul.f32 %v3148_v23, %v13527_v20  ;;  %v3154_v10 = vmul.f32 %v3148_v23, %v13532_v52 }
0x5269   :  { %10457 = vmatmul.mubr.msk.bf16.vlgmr.msra.gmra.mxu0 %vm8586_vm0, %v8542_v18  ;;  %v13755_v7 = vsel %vm1649_vm5, %v8515_v24, %v8508_v25  ;;  %v4320_v18 = vrot.slane %v4312_v27, %v14212_v16  ;;  %v4327_v25 = vsel %vm399_vm1, %v4323_v48, 0.0 }
0x526a   :  { %v3164_v44 = vsel %vm1956_vm13, %v3154_v10, 0.0 }
0x526b   :  { %v4325_v33 = vmul.f32 %v4320_v18, %v13527_v20  ;;  %v5508_v20 = vsel %vm1956_vm13, %v5498_v14, 0.0 }
0x526d   :  { %v4333_v24 = vsel %vm399_vm1, %v4325_v33, 0.0 }
0x5311   :  { %v7798_v51 = vpop.f32.mrf.mxu0 }
0x5312   :  { %7805 = vst.msk [vmem:[#allocation3 + $0xa] sm:$0x3] %vm1914_vm7, %v7798_v51  ;;  %v4326_v51 = vmul.f32 %v4320_v18, %v13532_v52 }
0x5313   :  { %v10430_v56 = vpop.f32.mrf.mxu0 }
0x5314   :  { %v4336_v36 = vsel %vm1956_vm13, %v4326_v51, 0.0  ;;  %v5496_v56 = vmul.f32 %v13570_v37, %v13519_v38 }
0x5315   :  { %v7801_v34 = vpop.f32.mrf.mxu0 }
0x5316   :  { %v5502_v16 = vsel %vm1956_vm13, %v5496_v56, 0.0  ;;  %v6668_v34 = vmul.f32 %v13589_v61, %v13519_v38  ;;  %v7840_v61 = vmul.f32 %v13728_v9, %v13519_v38 }
0x5317   :  { %v10431_v43 = vpop.f32.mrf.mxu0 }
0x5318   :  { %v1962_v43 = vpop.xlane.xlu1 %1961  ;;  %v6674_v37 = vsel %vm1956_vm13, %v6668_v34, 0.0  ;;  %v7846_v26 = vsel %vm1956_vm13, %v7840_v61, 0.0 }
0x531c   :  { %v1965_v19 = vpop.xlane.xlu1 %1964 }
0x5329   :  { %v8624_v21 = vpop.f32.mrf.mxu0 }
0x532a   :  { %v8625_v63 = vadd.f32 %v9047_v28, %v8624_v21  ;;  %v6670_v28 = vmul.f32 %v13596_v62, %v13532_v52 }
0x532b   :  { %v10458_v41 = vpop.f32.mrf.mxu0 }
0x532c   :  { %v8630_v57 = vmax.f32 %v8625_v63, 0.0  ;;  %v6680_v63 = vsel %vm1956_vm13, %v6670_v28, 0.0  ;;  %v1973_v41 = vpop.permute.xlu1 %1972 }
0x532d   :  { %v8627_v58 = vpop.f32.mrf.mxu0 }
0x532e   :  { %v8632_v35 = vcombine.high %v8630_v57, %v8630_v57  ;;  %v8635_v53 = vsel %vm8634_vm10, %v8630_v57, -inf }
0x532f   :  { %v8636_v50 = vrot.slane %v8635_v53, 4  ;;  %v10459_v8 = vpop.f32.mrf.mxu0 }
0x5330   :  { %v8642_v3 = vsel %vm8634_vm10, %v8632_v35, -inf  ;;  %v13815_v57 = vpop.permute.xlu1 %1976 }
0x5331   :  { %v8637_v12 = vmax.f32 %v8635_v53, %v8636_v50  ;;  %v8643_v5 = vrot.slane %v8642_v3, 4 }
0x5333   :  { %v8638_v60 = vrot.slane %v8637_v12, 2  ;;  %v8644_v11 = vmax.f32 %v8642_v3, %v8643_v5  ;;  %v1994_v5 = vmul.f32 %v13815_v57, %v1959_v4 }
0x5334   :  { %v13817_v58 = vpop.permute.xlu1 %1987 }
0x5335   :  { %v8639_v29 = vmax.f32 %v8637_v12, %v8638_v60  ;;  %v8645_v22 = vrot.slane %v8644_v11, 2 }
0x5337   :  { %v8640_v13 = vrot.slane %v8639_v29, 1  ;;  %v8646_v31 = vmax.f32 %v8644_v11, %v8645_v22 }
0x5338   :  { %v3160_v35 = vpop.xlane.xlu1 %3159 }
0x5339   :  { %v8647_v46 = vrot.slane %v8646_v31, 1  ;;  %v8641_v45 = vmax.f32 %v8639_v29, %v8640_v13  ;;  %v3168_v50 = vmul.f32 %v3160_v35, %v13815_v57  ;;  %v1996_v13 = vmul.f32 %v13817_v58, %v1965_v19 }
0x533b   :  { %v8648_v39 = vmax.f32 %v8646_v31, %v8647_v46 }
0x533c   :  { %v4332_v53 = vpop.xlane.xlu1 %4331 }
0x533d   :  { %v8655_v2 = vsel %vm1649_vm5, %v8648_v39, %v8641_v45  ;;  %v4340_v38 = vmul.f32 %v4332_v53, %v13815_v57 }
0x533e   :  { %8656 = vrot.lane.b32.xlu0 %v8655_v2, %s11112_s13 }
0x5340   :  { %v5501_v9 = vpop.xlane.xlu1 %5500 }
0x5341   :  { %v5511_v8 = vmul.f32 %v5501_v9, %v1973_v41 }
0x535d   :  { %1954 = vadd.xlane.f32.xlu0 %v1953_v17 }
0x5373   :  { %1983 = vbcast.lane.b32.xlu0 %v13540_v30, 256  ;;  %v3161_v30 = vsel %vm399_vm1, %v3153_v6, 0.0 }
0x5392   :  { %3156 = vadd.xlane.f32.xlu0 %v3155_v40 }
0x5396   :  { %3162 = vadd.xlane.f32.xlu0 %v3161_v30 }
0x539a   :  { %3165 = vadd.xlane.f32.xlu0 %v3164_v44 }
0x539e   :  { %4328 = vadd.xlane.f32.xlu0 %v4327_v25 }
0x53a2   :  { %4334 = vadd.xlane.f32.xlu0 %v4333_v24 }
0x53a6   :  { %4337 = vadd.xlane.f32.xlu0 %v4336_v36 }
0x53aa   :  { %5503 = vadd.xlane.f32.xlu0 %v5502_v16 }
0x53ae   :  { %5509 = vadd.xlane.f32.xlu0 %v5508_v20 }
0x53b0   :  { %v8657_v15 = vpop.permute.xlu0 %8656 }
0x53b1   :  { %v8659_v32 = vsel %vm399_vm1, %v13755_v7, %v8657_v15  ;;  %v7842_v7 = vmul.f32 %v13735_v1, %v13532_v52  ;;  %v5507_v52 = vpop.xlane.xlu1 %5506 }
0x53b2   :  { %v8668_v21 = vpack.c.bf16 %v8659_v32, %v8659_v32  ;;  %6675 = vadd.xlane.f32.xlu0 %v6674_v37 }
0x53b3   :  { %v7852_v62 = vsel %vm1956_vm13, %v7842_v7, 0.0 }
0x53b4   :  { %10469 = vmatmul.mubr.msk.bf16.vlgmr.msra.gmra.mxu1 %vm304_vm2, %v8668_v21 }
0x53b5   :  { %v6673_v49 = vpop.xlane.xlu1 %6672 }
0x53b6   :  { %6681 = vadd.xlane.f32.xlu0 %v6680_v63  ;;  %v6683_v11 = vmul.f32 %v6673_v49, %v1973_v41 }
0x53b9   :  { %v6679_v22 = vpop.xlane.xlu1 %6678 }
0x53ba   :  { %7847 = vadd.xlane.f32.xlu0 %v7846_v26 }
0x53bd   :  { %v7845_v46 = vpop.xlane.xlu1 %7844 }
0x53be   :  { %7853 = vadd.xlane.f32.xlu0 %v7852_v62  ;;  %v7855_v45 = vmul.f32 %v7845_v46, %v1973_v41 }
0x53c1   :  { %v7851_v39 = vpop.xlane.xlu1 %7850 }
0x53d4   :  { %3179 = vperm.xlu0 %10542, %v3168_v50  }
0x53d8   :  { %4351 = vperm.xlu0 %10542, %v4340_v38  }
0x53dc   :  { %5520 = vperm.xlu0 %10542, %v5511_v8  }
0x53e6   :  { %v1955_v1 = vpop.xlane.xlu0 %1954 }
0x53e7   :  { %v1993_v3 = vmul.f32 %v1973_v41, %v1955_v1 }
0x53e9   :  { %2002 = vperm.xlu1 %10543, %v1993_v3  }
0x53ea   :  { %v1984_v12 = vpop.permute.xlu0 %1983 }
0x53eb   :  { %v5513_v60 = vmul.f32 %v5507_v52, %v1984_v12  ;;  %v1995_v29 = vmul.f32 %v1984_v12, %v1962_v43  ;;  %v6685_v31 = vmul.f32 %v6679_v22, %v1984_v12  ;;  %v7857_v2 = vmul.f32 %v7851_v39, %v1984_v12 }
0x53ed   :  { %2005 = vperm.xlu1 %10543, %v1994_v5   ;;  %5526 = vperm.xlu0 %10542, %v5513_v60  }
0x53f1   :  { %2008 = vperm.xlu1 %10543, %v1995_v29   ;;  %6692 = vperm.xlu0 %10542, %v6683_v11  }
0x53f5   :  { %2011 = vperm.xlu1 %10543, %v1996_v13   ;;  %6698 = vperm.xlu0 %10542, %v6685_v31  }
0x53f9   :  { %7864 = vperm.xlu0 %10542, %v7855_v45  }
0x53fd   :  { %7870 = vperm.xlu0 %10542, %v7857_v2  }
0x541b   :  { %v3157_v47 = vpop.xlane.xlu0 %3156 }
0x541c   :  { %v3167_v17 = vmul.f32 %v3157_v47, %v1973_v41 }
0x541e   :  { %3176 = vperm.xlu1 %10543, %v3167_v17  }
0x541f   :  { %v3163_v55 = vpop.xlane.xlu0 %3162 }
0x5420   :  { %v3169_v54 = vmul.f32 %v3163_v55, %v1984_v12 }
0x5422   :  { %3182 = vperm.xlu1 %10543, %v3169_v54  }
0x5423   :  { %v3166_v0 = vpop.xlane.xlu0 %3165 }
0x5424   :  { %v3170_v23 = vmul.f32 %v3166_v0, %v13817_v58 }
0x5426   :  { %3185 = vperm.xlu1 %10543, %v3170_v23  }
0x5427   :  { %v4329_v40 = vpop.xlane.xlu0 %4328 }
0x5428   :  { %v4339_v6 = vmul.f32 %v4329_v40, %v1973_v41 }
0x542a   :  { %4348 = vperm.xlu1 %10543, %v4339_v6  }
0x542b   :  { %v4335_v59 = vpop.xlane.xlu0 %4334 }
0x542c   :  { %v4341_v30 = vmul.f32 %v4335_v59, %v1984_v12 }
0x542e   :  { %4354 = vperm.xlu1 %10543, %v4341_v30  }
0x542f   :  { %v4338_v10 = vpop.xlane.xlu0 %4337 }
0x5430   :  { %v4342_v27 = vmul.f32 %v4338_v10, %v13817_v58 }
0x5432   :  { %4357 = vperm.xlu1 %10543, %v4342_v27  }
0x5433   :  { %v5504_v44 = vpop.xlane.xlu0 %5503 }
0x5434   :  { %v5512_v48 = vmul.f32 %v5504_v44, %v13815_v57 }
0x5436   :  { %5523 = vperm.xlu1 %10543, %v5512_v48  }
0x5437   :  { %v5510_v18 = vpop.xlane.xlu0 %5509 }
0x5438   :  { %v5514_v25 = vmul.f32 %v5510_v18, %v13817_v58 }
0x543a   :  { %5529 = vperm.xlu1 %10543, %v5514_v25  }
0x543b   :  { %v6676_v33 = vpop.xlane.xlu0 %6675 }
0x543c   :  { %v6684_v24 = vmul.f32 %v6676_v33, %v13815_v57 }
0x543e   :  { %6695 = vperm.xlu1 %10543, %v6684_v24  }
0x543f   :  { %v6682_v51 = vpop.xlane.xlu0 %6681 }
0x5440   :  { %v6686_v36 = vmul.f32 %v6682_v51, %v13817_v58 }
0x5442   :  { %6701 = vperm.xlu1 %10543, %v6686_v36  }
0x5443   :  { %v7848_v56 = vpop.xlane.xlu0 %7847 }
0x5444   :  { %v7856_v4 = vmul.f32 %v7848_v56, %v13815_v57 }
0x5446   :  { %7867 = vperm.xlu1 %10543, %v7856_v4  }
0x5447   :  { %v7854_v16 = vpop.xlane.xlu0 %7853 }
0x5448   :  { %v7858_v14 = vmul.f32 %v7854_v16, %v13817_v58 }
0x544a   :  { %7873 = vperm.xlu1 %10543, %v7858_v14  }
0x544b   :  { %11019 = shalt.err (!%p11016_p4)
}
0x544c   :  { %s11117_s10 = smov 2   ;;  %v14236_v43 = vld [vmem:[#allocation58_spill] sm:$0xff]  ;;  %v14237_v37 = vld [vmem:[#allocation39_spill] sm:$0xff]  ;;  %vm2022_vm1 = vcmask 130112   ;;  %vm2035_vm2 = vcmask 74752   ;;  %s11119_s12 = smov [#allocation7]  }
0x544d   :  { %8757 = dma.vmem_to_hbm [thread:$0]  %s8752_s4, 192, %s11286_s1, [#allocation4], %s11112_s13, %s11112_s13, %s11117_s10   ;;  %v2017_v15 = vadd.s32 4294967288, %v14236_v43 }
0x544e   :  { %s11118_s1 = smov [#allocation5]   ;;  %s8778_s16 = sshll.u32 %s11119_s12, 4  ;;  %s8779_s16 = int_to_ptr.vmem [resolvable:$true] %s8778_s16 }
0x544f   :  { %v13837_v28 = vsub.s32 %v2017_v15, %v14237_v37  ;;  %v3180_v49 = vpop.permute.xlu0 %3179  ;;  %s8763_s11 = sshll.u32 %s11118_s1, 4  ;;  %s8764_s11 = int_to_ptr.vmem [resolvable:$true] %s8763_s11 }
0x5450   :  { %s11028_s18 = scalar_lea.vmem %s8764_s11, 192  ;;  %p11033_p6 = scmp.lt.s32.totalorder %s8764_s11, %s8764_s11 }
0x5451   :  { %v3194_v29 = vrot.slane %v3180_v49, %v13837_v28  ;;  %p11029_p5 = scmp.ne.s32.totalorder %s8764_s11, %s11028_s18  ;;  %p11034_p7 = scmp.lt.s32.totalorder %s11028_s18, %s11028_s18 }
0x5453   :  { %v4352_v60 = vpop.permute.xlu0 %4351  ;;  %p11035_p8 = por %p11034_p7, %p11033_p6 }
0x5454   :  { %v4366_v0 = vrot.slane %v4352_v60, %v13837_v28 }
0x5455   :  { %p11036_p9 = pnand %p11035_p8, %p11029_p5 }
0x5457   :  { %v5521_v2 = vpop.permute.xlu0 %5520 }
0x5458   :  { %v5534_v18 = vrot.slane %v5521_v2, %v14219_v42 }
0x5464   :  { %v2003_v20 = vpop.permute.xlu1 %2002 }
0x5465   :  { %v2016_v63 = vrot.slane %v2003_v20, %v14219_v42 }
0x5468   :  { %v2006_v34 = vpop.permute.xlu1 %2005  ;;  %v5527_v17 = vpop.permute.xlu0 %5526 }
0x5469   :  { %v2021_v21 = vrot.slane %v2006_v34, %v13837_v28  ;;  %v5543_v25 = vrot.slane %v5527_v17, %v14219_v42 }
0x546b   :  { %v2023_v7 = vsel %vm2022_vm1, %v2021_v21, %v2016_v63 }
0x546c   :  { %v2009_v32 = vpop.permute.xlu1 %2008  ;;  %v6693_v30 = vpop.permute.xlu0 %6692 }
0x546d   :  { %v2027_v61 = vrot.slane %v2009_v32, %v14219_v42  ;;  %v6706_v34 = vrot.slane %v6693_v30, %v14219_v42 }
0x5470   :  { %v2012_v19 = vpop.permute.xlu1 %2011  ;;  %v6699_v24 = vpop.permute.xlu0 %6698 }
0x5471   :  { %v2031_v26 = vrot.slane %v2012_v19, %v13837_v28  ;;  %v6715_v43 = vrot.slane %v6699_v24, %v14219_v42 }
0x5473   :  { %v2032_v41 = vsel %vm2022_vm1, %v2031_v26, %v2027_v61 }
0x5474   :  { %v2033_v62 = vsel %vm1649_vm5, %v2032_v41, %v2023_v7  ;;  %v8730_v57 = vpop.f32.mrf.mxu1  ;;  %v7865_v14 = vpop.permute.xlu0 %7864 }
0x5475   :  { %2036 = vst.msk [vmem:[#allocation5] sm:$0x3] %vm2035_vm2, %v2033_v62  ;;  %vm8736_vm7 = vcmp.ge.f32.partialorder %v8730_v57, 0.0  ;;  %v8737_v58 = vmul.f32 0.1, %v8730_v57  ;;  %v7878_v7 = vrot.slane %v7865_v14, %v14219_v42 }
0x5476   :  { %v10470_v35 = vpop.f32.mrf.mxu1 }
0x5477   :  { %v8738_v53 = vsel %vm8736_vm7, %v8730_v57, %v8737_v58 }
0x5478   :  { %v9060_v50 = vmul.f32 -1.442695, %v8738_v53  ;;  %v8733_v38 = vpop.f32.mrf.mxu1  ;;  %v7871_v63 = vpop.permute.xlu0 %7870 }
0x5479   :  { %v7887_v41 = vrot.slane %v7871_v63, %v14219_v42 }
0x547a   :  { %10914 = vpow2.f32 %v9060_v50  ;;  %v10471_v9 = vpop.f32.mrf.mxu1 }
0x5487   :  { %v10915_v8 = vpop.eup %10914 }
0x5488   :  { %v8742_v52 = vadd.f32 1.0, %v10915_v8 }
0x548a   :  { %10916 = vrcp.f32 %v8742_v52 }
0x5497   :  { %v10917_v1 = vpop.eup %10916 }
0x5498   :  { %8745 = vst.msk [vmem:[#allocation7] sm:$0x3] %vm1153_vm3, %v10917_v1 }
0x5499   :  { %v3177_v3 = vpop.permute.xlu1 %3176 }
0x549a   :  { %v3190_v5 = vrot.slane %v3177_v3, %v14219_v42 }
0x549c   :  { %v3195_v31 = vsel %vm2022_vm1, %v3194_v29, %v3190_v5 }
0x549d   :  { %v3183_v12 = vpop.permute.xlu1 %3182 }
0x549e   :  { %v3199_v22 = vrot.slane %v3183_v12, %v14219_v42 }
0x54a1   :  { %v3186_v11 = vpop.permute.xlu1 %3185 }
0x54a2   :  { %v3203_v13 = vrot.slane %v3186_v11, %v13837_v28 }
0x54a4   :  { %v3204_v46 = vsel %vm2022_vm1, %v3203_v13, %v3199_v22 }
0x54a5   :  { %v3205_v45 = vsel %vm1649_vm5, %v3204_v46, %v3195_v31  ;;  %v4349_v39 = vpop.permute.xlu1 %4348 }
0x54a6   :  { %3208 = vst.msk [vmem:[#allocation5 + $0x2] sm:$0x3] %vm2035_vm2, %v3205_v45  ;;  %v4362_v55 = vrot.slane %v4349_v39, %v14219_v42 }
0x54a8   :  { %v4367_v6 = vsel %vm2022_vm1, %v4366_v0, %v4362_v55 }
0x54a9   :  { %v4355_v47 = vpop.permute.xlu1 %4354 }
0x54aa   :  { %v4371_v23 = vrot.slane %v4355_v47, %v14219_v42 }
0x54ad   :  { %v4358_v54 = vpop.permute.xlu1 %4357 }
0x54ae   :  { %v4375_v40 = vrot.slane %v4358_v54, %v13837_v28 }
0x54b0   :  { %v4376_v59 = vsel %vm2022_vm1, %v4375_v40, %v4371_v23 }
0x54b1   :  { %v4377_v10 = vsel %vm1649_vm5, %v4376_v59, %v4367_v6  ;;  %v5524_v27 = vpop.permute.xlu1 %5523 }
0x54b2   :  { %4380 = vst.msk [vmem:[#allocation5 + $0x4] sm:$0x3] %vm2035_vm2, %v4377_v10  ;;  %v5538_v44 = vrot.slane %v5524_v27, %v13837_v28 }
0x54b4   :  { %v5539_v51 = vsel %vm2022_vm1, %v5538_v44, %v5534_v18 }
0x54b5   :  { %v5530_v48 = vpop.permute.xlu1 %5529 }
0x54b6   :  { %v5547_v33 = vrot.slane %v5530_v48, %v13837_v28 }
0x54b8   :  { %v5548_v36 = vsel %vm2022_vm1, %v5547_v33, %v5543_v25 }
0x54b9   :  { %v5549_v56 = vsel %vm1649_vm5, %v5548_v36, %v5539_v51  ;;  %v6696_v4 = vpop.permute.xlu1 %6695 }
0x54ba   :  { %5552 = vst.msk [vmem:[#allocation5 + $0x6] sm:$0x3] %vm2035_vm2, %v5549_v56  ;;  %v6710_v16 = vrot.slane %v6696_v4, %v13837_v28 }
0x54bc   :  { %v6711_v32 = vsel %vm2022_vm1, %v6710_v16, %v6706_v34 }
0x54bd   :  { %v6702_v20 = vpop.permute.xlu1 %6701 }
0x54be   :  { %v6719_v15 = vrot.slane %v6702_v20, %v13837_v28 }
0x54c0   :  { %v6720_v37 = vsel %vm2022_vm1, %v6719_v15, %v6715_v43 }
0x54c1   :  { %v6721_v21 = vsel %vm1649_vm5, %v6720_v37, %v6711_v32  ;;  %v7868_v19 = vpop.permute.xlu1 %7867 }
0x54c2   :  { %6724 = vst.msk [vmem:[#allocation5 + $0x8] sm:$0x3] %vm2035_vm2, %v6721_v21  ;;  %v7882_v61 = vrot.slane %v7868_v19, %v13837_v28 }
0x54c4   :  { %v7883_v57 = vsel %vm2022_vm1, %v7882_v61, %v7878_v7 }
0x54c5   :  { %v7874_v26 = vpop.permute.xlu1 %7873 }
0x54c6   :  { %v7891_v62 = vrot.slane %v7874_v26, %v13837_v28 }
0x54c8   :  { %v7892_v58 = vsel %vm2022_vm1, %v7891_v62, %v7887_v41 }
0x54c9   :  { %v7893_v35 = vsel %vm1649_vm5, %v7892_v58, %v7883_v57 }
0x54ca   :  { %7896 = vst.msk [vmem:[#allocation5 + $0xa] sm:$0x3] %vm2035_vm2, %v7893_v35 }
0x54cb   :  { %11039 = shalt.err (!%p11036_p9)
}
0x54cc   :  { %8769 = dma.vmem_to_hbm [thread:$0]  %s8764_s11, 192, %s11291_s7, [#allocation6], %s11112_s13, %s11112_s13, %s11117_s10  }
0x54cd   :  { %s11048_s0 = scalar_lea.vmem %s8779_s16, 32  ;;  %p11053_p11 = scmp.lt.s32.totalorder %s8779_s16, %s8779_s16 }
0x54ce   :  { %p11049_p10 = scmp.ne.s32.totalorder %s8779_s16, %s11048_s0  ;;  %p11054_p12 = scmp.lt.s32.totalorder %s11048_s0, %s11048_s0 }
0x54d0   :  { %p11055_p13 = por %p11054_p12, %p11053_p11 }
0x54d2   :  { %p11056_p0 = pnand %p11055_p13, %p11049_p10 }
0x54d4   :  { %11059 = shalt.err (!%p11056_p0)
}
0x54d5   :  { %8781 = dma.vmem_to_hbm [thread:$0]  %s8779_s16, 32, %s11301_s23, [#allocation6]  }
0x54d6   :  { %11068 = dma.done.wait [#allocation4], 192  }
0x54d7   :  { %11069 = vsyncadd [#allocation4], 4294967104 }
0x54d8   :  { %11070 = dma.done.wait [#allocation6], 224  }
0x54d9   :  { %11071 = vsyncadd [#allocation6], 4294967072 }
0x54da   :  { %8793 = vsyncpa [#allocation4], 1 }
0x54db   :  { %8794 = vsyncpa [#allocation6], 1 }

</bundles_post_ra>
